<compile_context>
chip_gen: v7x
topology: tpu7x:2x2x1
jax: 0.10.0
libtpu: 0.0.40
codegen_flags: <defaults>
</compile_context>

<pallas_src>
import math
from functools import partial
from typing import NamedTuple

import numpy as np
import jax
import jax.numpy as jnp
from jax import lax
from jax.experimental import pallas as pl
from jax.experimental.pallas import tpu as pltpu


_NEG = -1e30            # f32-safe additive "-inf" for non-edges
_APPROX_RECIP = True    # EUP approx reciprocal in softmax (~1e-3 rel err vs exact)


# ------------------------------ fused kernel --------------------------------

def _mm(a, b):
    # (M, K) @ (K, O) on the MXU, f32 accumulation.
    return lax.dot_general(a, b, (((1,), (0,)), ((), ())),
                           preferred_element_type=jnp.float32)


def _model_kernel(x_ref, bias_ref, rowm_ref, in_w_ref, in_b_ref,
                  w_qkvs_ref, b_qkvs_ref, w_ba_ref, w_bs_ref,
                  ln_w_ref, ln_b_ref, proj_w_ref, proj_b_ref,
                  out_w_ref, out_b_ref, o_ref, agg_ref,
                  *, layers, heads, hid_dim, n_valid, eps):
    D = hid_dim
    HD = heads * D
    scale = 1.0 / math.sqrt(D)          # TransformerConv divides scores by sqrt(out_channels)

    bias = bias_ref[...]                # (Np, Np): 0 for edge j->i at [i, j], -1e30 otherwise
    rowm = rowm_ref[...]                # (Np, 1): 1 for real nodes, 0 for padding rows

    # input_lin (+ dropout = identity)
    h = _mm(x_ref[...], in_w_ref[...]) + in_b_ref[...]           # (Np, hid)

    for l in range(layers):             # small static unroll over layers
        # ---- TransformerConv(hid, hid, heads, beta=True, concat=True), eval ----
        qkvs = _mm(h, w_qkvs_ref[l]) + b_qkvs_ref[l]             # (Np, 4*HD), one wide matmul
        q    = qkvs[:, 0 * HD:1 * HD]
        k    = qkvs[:, 1 * HD:2 * HD]
        v    = qkvs[:, 2 * HD:3 * HD]
        skip = qkvs[:, 3 * HD:4 * HD]                            # lin_skip (root weight)

        for hh in range(heads):
            sl = slice(hh * D, (hh + 1) * D)
            s = lax.dot_general(q[:, sl], k[:, sl],
                                (((1,), (1,)), ((), ())),
                                preferred_element_type=jnp.float32) * scale + bias
            # Clamp the row max to >= 0 so fully-masked rows (isolated / padding
            # nodes) underflow to exactly 0 -> agg = 0, matching PyG.
            m = jnp.maximum(jnp.max(s, axis=-1, keepdims=True), 0.0)
            p = jnp.exp(s - m)                                   # masked entries -> 0.0
            denom = jnp.sum(p, axis=-1, keepdims=True)
            denom = jnp.where(denom > 0.0, denom, 1.0)
            alpha = p * pl.reciprocal(denom, approx=_APPROX_RECIP)
            agg_ref[:, sl] = _mm(alpha, v[:, sl])                # per-head write, no concat
        agg = agg_ref[...]                                       # (Np, HD)

        # lin_beta([agg, skip, agg - skip]) folded into two per-feature weight rows
        logit = jnp.sum(agg * w_ba_ref[l] + skip * w_bs_ref[l],
                        axis=-1, keepdims=True)                  # (Np, 1)
        beta = jax.nn.sigmoid(logit)
        conv = beta * skip + (1.0 - beta) * agg                  # (Np, HD)

        # ---- PyG LayerNorm(mode='graph', batch=None); padded rows excluded ----
        inv_n = 1.0 / float(n_valid * HD)
        cm = conv * rowm
        s1 = jnp.sum(cm)
        s2 = jnp.sum(cm * cm)
        mean = s1 * inv_n
        var = jnp.maximum(s2 * inv_n - mean * mean, 0.0)
        std = jnp.sqrt(var)                                      # unbiased=False
        normed = (conv - mean) / (std + eps) * ln_w_ref[l] + ln_b_ref[l]

        # ---- proj + dropout(identity) + residual + ReLU ----
        proj = _mm(normed, proj_w_ref[l]) + proj_b_ref[l]        # (Np, hid)
        h = jnp.maximum(proj + h, 0.0)

    # out_lin, written as a lane-dense 128-wide slab (sliced to out_dim in wrapper)
    o_ref[...] = _mm(h, out_w_ref[...]) + out_b_ref[...]


# --------------------------- one-time preparation -----------------------------

class ModelConfig(NamedTuple):
    n_nodes: int
    n_pad: int
    in_dim: int
    in_pad: int
    hid: int
    heads: int
    hd: int
    layers: int
    out_dim: int
    out_pad: int


def prepare_model(params, heads, n_nodes, edge_index):
    """Pack/transpose/stack weights, lane-pad I/O dims and build the additive
    attention bias ONCE. Call this a single time and reuse the result for every
    forward call -- nothing here re-runs per call."""
    f32 = jnp.float32
    hid = params["in_w"].shape[0]
    in_dim = params["in_w"].shape[1]
    out_dim = params["out_w"].shape[0]
    layers = len(params["layers"])
    HD = heads * hid

    rnd = lambda v: int(pl.cdiv(v, 128) * 128)
    in_pad, out_pad, n_pad = rnd(in_dim), rnd(out_dim), rnd(n_nodes)

    # pre-transpose to [in, out]; zero-pad feature dims to 128 lanes
    in_w = jnp.zeros((in_pad, hid), f32).at[:in_dim, :].set(params["in_w"].T)
    in_b = params["in_b"].reshape(1, hid).astype(f32)
    out_w = jnp.zeros((hid, out_pad), f32).at[:, :out_dim].set(params["out_w"].T)
    out_b = jnp.zeros((1, out_pad), f32).at[:, :out_dim].set(
        params["out_b"].reshape(1, out_dim))

    w_qkvs, b_qkvs, w_ba, w_bs, ln_w, ln_b, proj_w, proj_b = ([] for _ in range(8))
    for lp in params["layers"]:
        c = lp["conv"]
        w_qkvs.append(jnp.concatenate(
            [c["wq"].T, c["wk"].T, c["wv"].T, c["wskip"].T], axis=1))       # (hid, 4*HD)
        b_qkvs.append(jnp.concatenate(
            [c["bq"], c["bk"], c["bv"], c["bskip"]]).reshape(1, 4 * HD))
        wb = c["wbeta"].reshape(3 * HD)
        w1, w2, w3 = wb[:HD], wb[HD:2 * HD], wb[2 * HD:]
        w_ba.append((w1 + w3).reshape(1, HD))     # multiplies agg
        w_bs.append((w2 - w3).reshape(1, HD))     # multiplies skip
        ln_w.append(lp["ln_w"].reshape(1, HD))
        ln_b.append(lp["ln_b"].reshape(1, HD))
        proj_w.append(lp["proj_w"].T)             # (HD, hid)
        proj_b.append(lp["proj_b"].reshape(1, hid))
    st = lambda xs: jnp.stack(xs, axis=0).astype(f32)

    # additive attention bias: bias[i, j] = 0 iff edge j -> i, else -1e30
    # (softmax grouped by target node; padded rows/cols stay fully masked)
    ei = np.asarray(edge_index)
    if np.unique(ei, axis=1).shape[1] != ei.shape[1]:
        raise ValueError("duplicate edges in edge_index: dense-bias attention "
                         "collapses them; exact only for simple graphs")
    src, dst = edge_index[0], edge_index[1]
    bias = jnp.full((n_pad, n_pad), _NEG, f32).at[dst, src].set(0.0)

    # validity mask for graph-LayerNorm statistics (excludes padding rows)
    row_mask = jnp.zeros((n_pad, 1), f32).at[:n_nodes, :].set(1.0)

    packed = dict(bias=bias, row_mask=row_mask,
                  in_w=in_w, in_b=in_b, out_w=out_w, out_b=out_b,
                  w_qkvs=st(w_qkvs), b_qkvs=st(b_qkvs),
                  w_ba=st(w_ba), w_bs=st(w_bs),
                  ln_w=st(ln_w), ln_b=st(ln_b),
                  proj_w=st(proj_w), proj_b=st(proj_b))
    cfg = ModelConfig(n_nodes=n_nodes, n_pad=n_pad, in_dim=in_dim, in_pad=in_pad,
                      hid=hid, heads=heads, hd=HD, layers=layers,
                      out_dim=out_dim, out_pad=out_pad)
    return packed, cfg


# ------------------------------ model wrapper --------------------------------

@partial(jax.jit, static_argnames=("cfg",))
def fine_tune_model_forward(x, packed, *, cfg):
    assert x.shape == (cfg.n_nodes, cfg.in_dim)
    Np, HD, hid, L, H = cfg.n_pad, cfg.hd, cfg.hid, cfg.layers, cfg.heads

    x_pad = jnp.zeros((Np, cfg.in_pad), jnp.float32).at[:cfg.n_nodes, :cfg.in_dim].set(x)

    kernel = partial(_model_kernel, layers=L, heads=H, hid_dim=hid,
                     n_valid=cfg.n_nodes, eps=1e-5)

    mm = lambda m, k, n: 2 * m * k * n
    attn_flops = H * (mm(Np, hid, Np) + mm(Np, Np, hid))
    flops = (mm(Np, cfg.in_pad, hid)
             + L * (mm(Np, hid, 4 * HD) + attn_flops + mm(Np, HD, hid))
             + mm(Np, hid, cfg.out_pad))
    transcendentals = L * (H * Np * Np + 2 * Np)
    bytes_accessed = 4 * (x_pad.size + sum(int(a.size) for a in packed.values())
                          + Np * cfg.out_pad)

    full2 = lambda shape: pl.BlockSpec(shape, lambda i: (0, 0))
    full3 = lambda shape: pl.BlockSpec(shape, lambda i: (0, 0, 0))

    out = pl.pallas_call(
        kernel,
        out_shape=jax.ShapeDtypeStruct((Np, cfg.out_pad), jnp.float32),
        grid=(1,),
        in_specs=[
            full2((Np, cfg.in_pad)),            # x (lane/row padded)
            full2((Np, Np)),                    # additive attention bias
            full2((Np, 1)),                     # row validity mask for graph-LN
            full2((cfg.in_pad, hid)),           # input_lin W^T (padded)
            full2((1, hid)),                    # input_lin b
            full3((L, hid, 4 * HD)),            # packed q/k/v/skip weights
            full3((L, 1, 4 * HD)),              # packed q/k/v/skip biases
            full3((L, 1, HD)),                  # lin_beta folded (agg part)
            full3((L, 1, HD)),                  # lin_beta folded (skip part)
            full3((L, 1, HD)),                  # LayerNorm weight
            full3((L, 1, HD)),                  # LayerNorm bias
            full3((L, HD, hid)),                # proj W^T
            full3((L, 1, hid)),                 # proj b
            full2((hid, cfg.out_pad)),          # out_lin W^T (lane-padded)
            full2((1, cfg.out_pad)),            # out_lin b (lane-padded)
        ],
        out_specs=full2((Np, cfg.out_pad)),
        scratch_shapes=[pltpu.VMEM((Np, HD), jnp.float32)],     # per-head agg buffer
        compiler_params=pltpu.CompilerParams(
            dimension_semantics=("arbitrary",)),
        cost_estimate=pl.CostEstimate(flops=int(flops),
                                      transcendentals=int(transcendentals),
                                      bytes_accessed=int(bytes_accessed)),
    )(x_pad, packed["bias"], packed["row_mask"],
      packed["in_w"], packed["in_b"],
      packed["w_qkvs"], packed["b_qkvs"], packed["w_ba"], packed["w_bs"],
      packed["ln_w"], packed["ln_b"], packed["proj_w"], packed["proj_b"],
      packed["out_w"], packed["out_b"])

    return out[:cfg.n_nodes, :cfg.out_dim]


# ----------------------------- parameter init --------------------------------

def init_linear(key, out_dim, in_dim, bias=True):
    kw, kb = jax.random.split(key)
    bound = 1.0 / math.sqrt(in_dim)
    w = jax.random.uniform(kw, (out_dim, in_dim), jnp.float32, -bound, bound)
    if bias:
        b = jax.random.uniform(kb, (out_dim,), jnp.float32, -bound, bound)
    else:
        b = jnp.zeros((out_dim,), jnp.float32)
    return w, b


def init_params(key, in_dim, hid_dim, out_dim, layers, heads):
    keys = jax.random.split(key, 2 + layers)
    in_w, in_b = init_linear(keys[0], hid_dim, in_dim)
    out_w, out_b = init_linear(keys[1], out_dim, hid_dim)
    HD = heads * hid_dim
    layer_params = []
    for l in range(layers):
        lk = jax.random.split(keys[2 + l], 6)
        wq, bq = init_linear(lk[0], HD, hid_dim)
        wk, bk = init_linear(lk[1], HD, hid_dim)
        wv, bv = init_linear(lk[2], HD, hid_dim)
        wskip, bskip = init_linear(lk[3], HD, hid_dim)
        wbeta, _ = init_linear(lk[4], 1, 3 * HD, bias=False)   # lin_beta has no bias in PyG
        proj_w, proj_b = init_linear(lk[5], hid_dim, HD)
        layer_params.append(dict(
            conv=dict(wq=wq, bq=bq, wk=wk, bk=bk, wv=wv, bv=bv,
                      wskip=wskip, bskip=bskip, wbeta=wbeta),
            ln_w=jnp.ones((HD,), jnp.float32),
            ln_b=jnp.zeros((HD,), jnp.float32),
            proj_w=proj_w, proj_b=proj_b,
        ))
    return dict(in_w=in_w, in_b=in_b, out_w=out_w, out_b=out_b,
                layers=layer_params)


# --------------------------------- main ---------------------------------------

if __name__ == "__main__":
    # Small config consistent with FineTuneModel(in_dim=15, hid_dim, out_dim=5, layers, heads=4)
    N = 16          # number of graph nodes
    IN_DIM = 15
    HID_DIM = 32
    OUT_DIM = 5
    LAYERS = 2
    HEADS = 4

    key = jax.random.PRNGKey(0)
    kx, kp = jax.random.split(key)

    x = jax.random.normal(kx, (N, IN_DIM), jnp.float32)

    # bidirectional ring graph -> every node has incoming edges
    src = jnp.concatenate([jnp.arange(N), (jnp.arange(N) + 1) % N])
    dst = jnp.concatenate([(jnp.arange(N) + 1) % N, jnp.arange(N)])
    edge_index = jnp.stack([src, dst]).astype(jnp.int32)   # [2, 2N]

    params = init_params(kp, IN_DIM, HID_DIM, OUT_DIM, LAYERS, HEADS)

    # One-time packing (weights + attention bias); reused for every forward call.
    packed, cfg = prepare_model(params, HEADS, N, edge_index)

    out = fine_tune_model_forward(x, packed, cfg=cfg)
    out = jax.block_until_ready(out)
    # Second call: hits the jit cache and the prepacked weights (no re-packing work).
    out2 = jax.block_until_ready(fine_tune_model_forward(x, packed, cfg=cfg))

    assert out.shape == (N, OUT_DIM) and out.dtype == jnp.float32
    assert bool(jnp.all(jnp.isfinite(out)))
    assert bool(jnp.allclose(out, out2))
    print("KERNEL_OK")
</pallas_src>

<mosaic_0001>
module attributes {stable_mosaic.version = 11 : i64} {
  func.func @_model_kernel(%arg0: i32, %arg1: memref<128x128xf32, #tpu.memory_space<vmem>>, %arg2: memref<128x128xf32, #tpu.memory_space<vmem>>, %arg3: memref<128x1xf32, #tpu.memory_space<vmem>>, %arg4: memref<128x32xf32, #tpu.memory_space<vmem>>, %arg5: memref<1x32xf32, #tpu.memory_space<vmem>>, %arg6: memref<2x32x512xf32, #tpu.memory_space<vmem>>, %arg7: memref<2x1x512xf32, #tpu.memory_space<vmem>>, %arg8: memref<2x1x128xf32, #tpu.memory_space<vmem>>, %arg9: memref<2x1x128xf32, #tpu.memory_space<vmem>>, %arg10: memref<2x1x128xf32, #tpu.memory_space<vmem>>, %arg11: memref<2x1x128xf32, #tpu.memory_space<vmem>>, %arg12: memref<2x128x32xf32, #tpu.memory_space<vmem>>, %arg13: memref<2x1x32xf32, #tpu.memory_space<vmem>>, %arg14: memref<32x128xf32, #tpu.memory_space<vmem>>, %arg15: memref<1x128xf32, #tpu.memory_space<vmem>>, %arg16: memref<128x128xf32, #tpu.memory_space<vmem>>, %arg17: memref<128x128xf32, #tpu.memory_space<vmem>>) attributes {dimension_semantics = [#tpu.dimension_semantics<arbitrary>], iteration_bounds = array<i64: 1>, scalar_prefetch = 0 : i64, scratch_operands = 1 : i64, tpu.core_type = #tpu.core_type<tc>, window_params = [{pipeline_mode = #tpu.pipeline_mode<synchronous>, transform_indices = @transform_0, window_bounds = array<i64: 128, 128>}, {pipeline_mode = #tpu.pipeline_mode<synchronous>, transform_indices = @transform_1, window_bounds = array<i64: 128, 128>}, {pipeline_mode = #tpu.pipeline_mode<synchronous>, transform_indices = @transform_2, window_bounds = array<i64: 128, 1>}, {pipeline_mode = #tpu.pipeline_mode<synchronous>, transform_indices = @transform_3, window_bounds = array<i64: 128, 32>}, {pipeline_mode = #tpu.pipeline_mode<synchronous>, transform_indices = @transform_4, window_bounds = array<i64: 1, 32>}, {pipeline_mode = #tpu.pipeline_mode<synchronous>, transform_indices = @transform_5, window_bounds = array<i64: 2, 32, 512>}, {pipeline_mode = #tpu.pipeline_mode<synchronous>, transform_indices = @transform_6, window_bounds = array<i64: 2, 1, 512>}, {pipeline_mode = #tpu.pipeline_mode<synchronous>, transform_indices = @transform_7, window_bounds = array<i64: 2, 1, 128>}, {pipeline_mode = #tpu.pipeline_mode<synchronous>, transform_indices = @transform_8, window_bounds = array<i64: 2, 1, 128>}, {pipeline_mode = #tpu.pipeline_mode<synchronous>, transform_indices = @transform_9, window_bounds = array<i64: 2, 1, 128>}, {pipeline_mode = #tpu.pipeline_mode<synchronous>, transform_indices = @transform_10, window_bounds = array<i64: 2, 1, 128>}, {pipeline_mode = #tpu.pipeline_mode<synchronous>, transform_indices = @transform_11, window_bounds = array<i64: 2, 128, 32>}, {pipeline_mode = #tpu.pipeline_mode<synchronous>, transform_indices = @transform_12, window_bounds = array<i64: 2, 1, 32>}, {pipeline_mode = #tpu.pipeline_mode<synchronous>, transform_indices = @transform_13, window_bounds = array<i64: 32, 128>}, {pipeline_mode = #tpu.pipeline_mode<synchronous>, transform_indices = @transform_14, window_bounds = array<i64: 1, 128>}, {pipeline_mode = #tpu.pipeline_mode<synchronous>, transform_indices = @transform_15, window_bounds = array<i64: 128, 128>}]} {
    %c0 = arith.constant 0 : index
    %c0_0 = arith.constant 0 : index
    %0 = vector.load %arg2[%c0, %c0_0] : memref<128x128xf32, #tpu.memory_space<vmem>>, vector<128x128xf32>
    %c0_1 = arith.constant 0 : index
    %c0_2 = arith.constant 0 : index
    %1 = vector.load %arg3[%c0_1, %c0_2] : memref<128x1xf32, #tpu.memory_space<vmem>>, vector<128x1xf32>
    %c0_3 = arith.constant 0 : index
    %c0_4 = arith.constant 0 : index
    %2 = vector.load %arg1[%c0_3, %c0_4] : memref<128x128xf32, #tpu.memory_space<vmem>>, vector<128x128xf32>
    %c0_5 = arith.constant 0 : index
    %c0_6 = arith.constant 0 : index
    %3 = vector.load %arg4[%c0_5, %c0_6] : memref<128x32xf32, #tpu.memory_space<vmem>>, vector<128x32xf32>
    %cst = arith.constant dense<0.000000e+00> : vector<128x32xf32>
    %4 = tpu.matmul %2, %3, %cst {dimension_numbers = #tpu.dot_dimension_numbers<[1], [0], [0], [1], [0, 0, 1, 1], [], []>} : vector<128x128xf32>, vector<128x32xf32>, vector<128x32xf32> -> vector<128x32xf32>
    %c0_7 = arith.constant 0 : index
    %c0_8 = arith.constant 0 : index
    %5 = vector.load %arg5[%c0_7, %c0_8] : memref<1x32xf32, #tpu.memory_space<vmem>>, vector<1x32xf32>
    %6 = vector.broadcast %5 : vector<1x32xf32> to vector<128x32xf32>
    %7 = arith.addf %4, %6 : vector<128x32xf32>
    %c0_9 = arith.constant 0 : index
    %c0_10 = arith.constant 0 : index
    %c0_11 = arith.constant 0 : index
    %8 = vector.load %arg6[%c0_9, %c0_10, %c0_11] : memref<2x32x512xf32, #tpu.memory_space<vmem>>, vector<1x32x512xf32>
    %9 = vector.shape_cast %8 : vector<1x32x512xf32> to vector<32x512xf32>
    %cst_12 = arith.constant dense<0.000000e+00> : vector<128x512xf32>
    %10 = tpu.matmul %7, %9, %cst_12 {dimension_numbers = #tpu.dot_dimension_numbers<[1], [0], [0], [1], [0, 0, 1, 1], [], []>} : vector<128x32xf32>, vector<32x512xf32>, vector<128x512xf32> -> vector<128x512xf32>
    %c0_13 = arith.constant 0 : index
    %c0_14 = arith.constant 0 : index
    %c0_15 = arith.constant 0 : index
    %11 = vector.load %arg7[%c0_13, %c0_14, %c0_15] : memref<2x1x512xf32, #tpu.memory_space<vmem>>, vector<1x1x512xf32>
    %12 = vector.shape_cast %11 : vector<1x1x512xf32> to vector<1x512xf32>
    %13 = vector.broadcast %12 : vector<1x512xf32> to vector<128x512xf32>
    %14 = arith.addf %10, %13 : vector<128x512xf32>
    %15 = vector.extract_strided_slice %14 {offsets = [0, 0], sizes = [128, 128], strides = [1, 1]} : vector<128x512xf32> to vector<128x128xf32>
    %16 = vector.extract_strided_slice %14 {offsets = [0, 128], sizes = [128, 128], strides = [1, 1]} : vector<128x512xf32> to vector<128x128xf32>
    %17 = vector.extract_strided_slice %14 {offsets = [0, 256], sizes = [128, 128], strides = [1, 1]} : vector<128x512xf32> to vector<128x128xf32>
    %18 = vector.extract_strided_slice %14 {offsets = [0, 384], sizes = [128, 128], strides = [1, 1]} : vector<128x512xf32> to vector<128x128xf32>
    %19 = vector.extract_strided_slice %15 {offsets = [0, 0], sizes = [128, 32], strides = [1, 1]} : vector<128x128xf32> to vector<128x32xf32>
    %20 = vector.extract_strided_slice %16 {offsets = [0, 0], sizes = [128, 32], strides = [1, 1]} : vector<128x128xf32> to vector<128x32xf32>
    %cst_16 = arith.constant dense<0.000000e+00> : vector<128x128xf32>
    %21 = tpu.matmul %19, %20, %cst_16 {dimension_numbers = #tpu.dot_dimension_numbers<[1], [1], [0], [0], [0, 0, 1, 0], [], []>} : vector<128x32xf32>, vector<128x32xf32>, vector<128x128xf32> -> vector<128x128xf32>
    %cst_17 = arith.constant 0.176776692 : f32
    %22 = vector.broadcast %cst_17 : f32 to vector<128x128xf32>
    %23 = arith.mulf %21, %22 : vector<128x128xf32>
    %24 = arith.addf %23, %0 : vector<128x128xf32>
    %cst_18 = arith.constant dense<0xFF800000> : vector<128xf32>
    %25 = vector.multi_reduction <maximumf>, %24, %cst_18 [1] : vector<128x128xf32> to vector<128xf32>
    %26 = vector.shape_cast %25 : vector<128xf32> to vector<128x1xf32>
    %cst_19 = arith.constant 0.000000e+00 : f32
    %27 = vector.broadcast %cst_19 : f32 to vector<128x1xf32>
    %28 = arith.maximumf %26, %27 : vector<128x1xf32>
    %29 = vector.broadcast %28 : vector<128x1xf32> to vector<128x128xf32>
    %30 = arith.subf %24, %29 : vector<128x128xf32>
    %31 = math.exp %30 : vector<128x128xf32>
    %cst_20 = arith.constant dense<0.000000e+00> : vector<128xf32>
    %32 = vector.multi_reduction <add>, %31, %cst_20 [1] : vector<128x128xf32> to vector<128xf32>
    %33 = vector.shape_cast %32 : vector<128xf32> to vector<128x1xf32>
    %cst_21 = arith.constant 0.000000e+00 : f32
    %34 = vector.broadcast %cst_21 : f32 to vector<128x1xf32>
    %35 = arith.cmpf ogt, %33, %34 : vector<128x1xf32>
    %cst_22 = arith.constant 1.000000e+00 : f32
    %36 = vector.broadcast %cst_22 : f32 to vector<128x1xf32>
    %37 = arith.select %35, %33, %36 : vector<128x1xi1>, vector<128x1xf32>
    %38 = tpu.reciprocal %37 {approx = true} : vector<128x1xf32> -> vector<128x1xf32>
    %39 = vector.broadcast %38 : vector<128x1xf32> to vector<128x128xf32>
    %40 = arith.mulf %31, %39 : vector<128x128xf32>
    %41 = vector.extract_strided_slice %17 {offsets = [0, 0], sizes = [128, 32], strides = [1, 1]} : vector<128x128xf32> to vector<128x32xf32>
    %cst_23 = arith.constant dense<0.000000e+00> : vector<128x32xf32>
    %42 = tpu.matmul %40, %41, %cst_23 {dimension_numbers = #tpu.dot_dimension_numbers<[1], [0], [0], [1], [0, 0, 1, 1], [], []>} : vector<128x128xf32>, vector<128x32xf32>, vector<128x32xf32> -> vector<128x32xf32>
    %c0_24 = arith.constant 0 : index
    %c0_25 = arith.constant 0 : index
    %43 = vector.load %arg17[%c0_24, %c0_25] : memref<128x128xf32, #tpu.memory_space<vmem>>, vector<128x32xf32>
    tpu.vector_store %arg17[%c0_24, %c0_25], %42 {strides = array<i32>} : memref<128x128xf32, #tpu.memory_space<vmem>>, vector<128x32xf32>,
    %44 = vector.extract_strided_slice %15 {offsets = [0, 32], sizes = [128, 32], strides = [1, 1]} : vector<128x128xf32> to vector<128x32xf32>
    %45 = vector.extract_strided_slice %16 {offsets = [0, 32], sizes = [128, 32], strides = [1, 1]} : vector<128x128xf32> to vector<128x32xf32>
    %cst_26 = arith.constant dense<0.000000e+00> : vector<128x128xf32>
    %46 = tpu.matmul %44, %45, %cst_26 {dimension_numbers = #tpu.dot_dimension_numbers<[1], [1], [0], [0], [0, 0, 1, 0], [], []>} : vector<128x32xf32>, vector<128x32xf32>, vector<128x128xf32> -> vector<128x128xf32>
    %cst_27 = arith.constant 0.176776692 : f32
    %47 = vector.broadcast %cst_27 : f32 to vector<128x128xf32>
    %48 = arith.mulf %46, %47 : vector<128x128xf32>
    %49 = arith.addf %48, %0 : vector<128x128xf32>
    %cst_28 = arith.constant dense<0xFF800000> : vector<128xf32>
    %50 = vector.multi_reduction <maximumf>, %49, %cst_28 [1] : vector<128x128xf32> to vector<128xf32>
    %51 = vector.shape_cast %50 : vector<128xf32> to vector<128x1xf32>
    %cst_29 = arith.constant 0.000000e+00 : f32
    %52 = vector.broadcast %cst_29 : f32 to vector<128x1xf32>
    %53 = arith.maximumf %51, %52 : vector<128x1xf32>
    %54 = vector.broadcast %53 : vector<128x1xf32> to vector<128x128xf32>
    %55 = arith.subf %49, %54 : vector<128x128xf32>
    %56 = math.exp %55 : vector<128x128xf32>
    %cst_30 = arith.constant dense<0.000000e+00> : vector<128xf32>
    %57 = vector.multi_reduction <add>, %56, %cst_30 [1] : vector<128x128xf32> to vector<128xf32>
    %58 = vector.shape_cast %57 : vector<128xf32> to vector<128x1xf32>
    %cst_31 = arith.constant 0.000000e+00 : f32
    %59 = vector.broadcast %cst_31 : f32 to vector<128x1xf32>
    %60 = arith.cmpf ogt, %58, %59 : vector<128x1xf32>
    %cst_32 = arith.constant 1.000000e+00 : f32
    %61 = vector.broadcast %cst_32 : f32 to vector<128x1xf32>
    %62 = arith.select %60, %58, %61 : vector<128x1xi1>, vector<128x1xf32>
    %63 = tpu.reciprocal %62 {approx = true} : vector<128x1xf32> -> vector<128x1xf32>
    %64 = vector.broadcast %63 : vector<128x1xf32> to vector<128x128xf32>
    %65 = arith.mulf %56, %64 : vector<128x128xf32>
    %66 = vector.extract_strided_slice %17 {offsets = [0, 32], sizes = [128, 32], strides = [1, 1]} : vector<128x128xf32> to vector<128x32xf32>
    %cst_33 = arith.constant dense<0.000000e+00> : vector<128x32xf32>
    %67 = tpu.matmul %65, %66, %cst_33 {dimension_numbers = #tpu.dot_dimension_numbers<[1], [0], [0], [1], [0, 0, 1, 1], [], []>} : vector<128x128xf32>, vector<128x32xf32>, vector<128x32xf32> -> vector<128x32xf32>
    %c0_34 = arith.constant 0 : index
    %c32 = arith.constant 32 : index
    %68 = vector.load %arg17[%c0_34, %c32] : memref<128x128xf32, #tpu.memory_space<vmem>>, vector<128x32xf32>
    tpu.vector_store %arg17[%c0_34, %c32], %67 {strides = array<i32>} : memref<128x128xf32, #tpu.memory_space<vmem>>, vector<128x32xf32>,
    %69 = vector.extract_strided_slice %15 {offsets = [0, 64], sizes = [128, 32], strides = [1, 1]} : vector<128x128xf32> to vector<128x32xf32>
    %70 = vector.extract_strided_slice %16 {offsets = [0, 64], sizes = [128, 32], strides = [1, 1]} : vector<128x128xf32> to vector<128x32xf32>
    %cst_35 = arith.constant dense<0.000000e+00> : vector<128x128xf32>
    %71 = tpu.matmul %69, %70, %cst_35 {dimension_numbers = #tpu.dot_dimension_numbers<[1], [1], [0], [0], [0, 0, 1, 0], [], []>} : vector<128x32xf32>, vector<128x32xf32>, vector<128x128xf32> -> vector<128x128xf32>
    %cst_36 = arith.constant 0.176776692 : f32
    %72 = vector.broadcast %cst_36 : f32 to vector<128x128xf32>
    %73 = arith.mulf %71, %72 : vector<128x128xf32>
    %74 = arith.addf %73, %0 : vector<128x128xf32>
    %cst_37 = arith.constant dense<0xFF800000> : vector<128xf32>
    %75 = vector.multi_reduction <maximumf>, %74, %cst_37 [1] : vector<128x128xf32> to vector<128xf32>
    %76 = vector.shape_cast %75 : vector<128xf32> to vector<128x1xf32>
    %cst_38 = arith.constant 0.000000e+00 : f32
    %77 = vector.broadcast %cst_38 : f32 to vector<128x1xf32>
    %78 = arith.maximumf %76, %77 : vector<128x1xf32>
    %79 = vector.broadcast %78 : vector<128x1xf32> to vector<128x128xf32>
    %80 = arith.subf %74, %79 : vector<128x128xf32>
    %81 = math.exp %80 : vector<128x128xf32>
    %cst_39 = arith.constant dense<0.000000e+00> : vector<128xf32>
    %82 = vector.multi_reduction <add>, %81, %cst_39 [1] : vector<128x128xf32> to vector<128xf32>
    %83 = vector.shape_cast %82 : vector<128xf32> to vector<128x1xf32>
    %cst_40 = arith.constant 0.000000e+00 : f32
    %84 = vector.broadcast %cst_40 : f32 to vector<128x1xf32>
    %85 = arith.cmpf ogt, %83, %84 : vector<128x1xf32>
    %cst_41 = arith.constant 1.000000e+00 : f32
    %86 = vector.broadcast %cst_41 : f32 to vector<128x1xf32>
    %87 = arith.select %85, %83, %86 : vector<128x1xi1>, vector<128x1xf32>
    %88 = tpu.reciprocal %87 {approx = true} : vector<128x1xf32> -> vector<128x1xf32>
    %89 = vector.broadcast %88 : vector<128x1xf32> to vector<128x128xf32>
    %90 = arith.mulf %81, %89 : vector<128x128xf32>
    %91 = vector.extract_strided_slice %17 {offsets = [0, 64], sizes = [128, 32], strides = [1, 1]} : vector<128x128xf32> to vector<128x32xf32>
    %cst_42 = arith.constant dense<0.000000e+00> : vector<128x32xf32>
    %92 = tpu.matmul %90, %91, %cst_42 {dimension_numbers = #tpu.dot_dimension_numbers<[1], [0], [0], [1], [0, 0, 1, 1], [], []>} : vector<128x128xf32>, vector<128x32xf32>, vector<128x32xf32> -> vector<128x32xf32>
    %c0_43 = arith.constant 0 : index
    %c64 = arith.constant 64 : index
    %93 = vector.load %arg17[%c0_43, %c64] : memref<128x128xf32, #tpu.memory_space<vmem>>, vector<128x32xf32>
    tpu.vector_store %arg17[%c0_43, %c64], %92 {strides = array<i32>} : memref<128x128xf32, #tpu.memory_space<vmem>>, vector<128x32xf32>,
    %94 = vector.extract_strided_slice %15 {offsets = [0, 96], sizes = [128, 32], strides = [1, 1]} : vector<128x128xf32> to vector<128x32xf32>
    %95 = vector.extract_strided_slice %16 {offsets = [0, 96], sizes = [128, 32], strides = [1, 1]} : vector<128x128xf32> to vector<128x32xf32>
    %cst_44 = arith.constant dense<0.000000e+00> : vector<128x128xf32>
    %96 = tpu.matmul %94, %95, %cst_44 {dimension_numbers = #tpu.dot_dimension_numbers<[1], [1], [0], [0], [0, 0, 1, 0], [], []>} : vector<128x32xf32>, vector<128x32xf32>, vector<128x128xf32> -> vector<128x128xf32>
    %cst_45 = arith.constant 0.176776692 : f32
    %97 = vector.broadcast %cst_45 : f32 to vector<128x128xf32>
    %98 = arith.mulf %96, %97 : vector<128x128xf32>
    %99 = arith.addf %98, %0 : vector<128x128xf32>
    %cst_46 = arith.constant dense<0xFF800000> : vector<128xf32>
    %100 = vector.multi_reduction <maximumf>, %99, %cst_46 [1] : vector<128x128xf32> to vector<128xf32>
    %101 = vector.shape_cast %100 : vector<128xf32> to vector<128x1xf32>
    %cst_47 = arith.constant 0.000000e+00 : f32
    %102 = vector.broadcast %cst_47 : f32 to vector<128x1xf32>
    %103 = arith.maximumf %101, %102 : vector<128x1xf32>
    %104 = vector.broadcast %103 : vector<128x1xf32> to vector<128x128xf32>
    %105 = arith.subf %99, %104 : vector<128x128xf32>
    %106 = math.exp %105 : vector<128x128xf32>
    %cst_48 = arith.constant dense<0.000000e+00> : vector<128xf32>
    %107 = vector.multi_reduction <add>, %106, %cst_48 [1] : vector<128x128xf32> to vector<128xf32>
    %108 = vector.shape_cast %107 : vector<128xf32> to vector<128x1xf32>
    %cst_49 = arith.constant 0.000000e+00 : f32
    %109 = vector.broadcast %cst_49 : f32 to vector<128x1xf32>
    %110 = arith.cmpf ogt, %108, %109 : vector<128x1xf32>
    %cst_50 = arith.constant 1.000000e+00 : f32
    %111 = vector.broadcast %cst_50 : f32 to vector<128x1xf32>
    %112 = arith.select %110, %108, %111 : vector<128x1xi1>, vector<128x1xf32>
    %113 = tpu.reciprocal %112 {approx = true} : vector<128x1xf32> -> vector<128x1xf32>
    %114 = vector.broadcast %113 : vector<128x1xf32> to vector<128x128xf32>
    %115 = arith.mulf %106, %114 : vector<128x128xf32>
    %116 = vector.extract_strided_slice %17 {offsets = [0, 96], sizes = [128, 32], strides = [1, 1]} : vector<128x128xf32> to vector<128x32xf32>
    %cst_51 = arith.constant dense<0.000000e+00> : vector<128x32xf32>
    %117 = tpu.matmul %115, %116, %cst_51 {dimension_numbers = #tpu.dot_dimension_numbers<[1], [0], [0], [1], [0, 0, 1, 1], [], []>} : vector<128x128xf32>, vector<128x32xf32>, vector<128x32xf32> -> vector<128x32xf32>
    %c0_52 = arith.constant 0 : index
    %c96 = arith.constant 96 : index
    %118 = vector.load %arg17[%c0_52, %c96] : memref<128x128xf32, #tpu.memory_space<vmem>>, vector<128x32xf32>
    tpu.vector_store %arg17[%c0_52, %c96], %117 {strides = array<i32>} : memref<128x128xf32, #tpu.memory_space<vmem>>, vector<128x32xf32>,
    %c0_53 = arith.constant 0 : index
    %c0_54 = arith.constant 0 : index
    %119 = vector.load %arg17[%c0_53, %c0_54] : memref<128x128xf32, #tpu.memory_space<vmem>>, vector<128x128xf32>
    %c0_55 = arith.constant 0 : index
    %c0_56 = arith.constant 0 : index
    %c0_57 = arith.constant 0 : index
    %120 = vector.load %arg8[%c0_55, %c0_56, %c0_57] : memref<2x1x128xf32, #tpu.memory_space<vmem>>, vector<1x1x128xf32>
    %121 = vector.shape_cast %120 : vector<1x1x128xf32> to vector<1x128xf32>
    %122 = vector.broadcast %121 : vector<1x128xf32> to vector<128x128xf32>
    %123 = arith.mulf %119, %122 : vector<128x128xf32>
    %c0_58 = arith.constant 0 : index
    %c0_59 = arith.constant 0 : index
    %c0_60 = arith.constant 0 : index
    %124 = vector.load %arg9[%c0_58, %c0_59, %c0_60] : memref<2x1x128xf32, #tpu.memory_space<vmem>>, vector<1x1x128xf32>
    %125 = vector.shape_cast %124 : vector<1x1x128xf32> to vector<1x128xf32>
    %126 = vector.broadcast %125 : vector<1x128xf32> to vector<128x128xf32>
    %127 = arith.mulf %18, %126 : vector<128x128xf32>
    %128 = arith.addf %123, %127 : vector<128x128xf32>
    %cst_61 = arith.constant dense<0.000000e+00> : vector<128xf32>
    %129 = vector.multi_reduction <add>, %128, %cst_61 [1] : vector<128x128xf32> to vector<128xf32>
    %130 = vector.shape_cast %129 : vector<128xf32> to vector<128x1xf32>
    %131 = arith.negf %130 : vector<128x1xf32>
    %132 = math.exp %131 : vector<128x1xf32>
    %cst_62 = arith.constant 1.000000e+00 : f32
    %133 = vector.broadcast %cst_62 : f32 to vector<128x1xf32>
    %134 = arith.addf %133, %132 : vector<128x1xf32>
    %135 = arith.divf %133, %134 : vector<128x1xf32>
    %136 = vector.broadcast %135 : vector<128x1xf32> to vector<128x128xf32>
    %137 = arith.mulf %136, %18 : vector<128x128xf32>
    %cst_63 = arith.constant 1.000000e+00 : f32
    %138 = vector.broadcast %cst_63 : f32 to vector<128x1xf32>
    %139 = arith.subf %138, %135 : vector<128x1xf32>
    %140 = vector.broadcast %139 : vector<128x1xf32> to vector<128x128xf32>
    %141 = arith.mulf %140, %119 : vector<128x128xf32>
    %142 = arith.addf %137, %141 : vector<128x128xf32>
    %143 = vector.broadcast %1 : vector<128x1xf32> to vector<128x128xf32>
    %144 = arith.mulf %142, %143 : vector<128x128xf32>
    %145 = vector.shape_cast %144 : vector<128x128xf32> to vector<1x128x128xf32>
    %cst_64 = arith.constant dense<0.000000e+00> : vector<1xf32>
    %146 = vector.multi_reduction <add>, %145, %cst_64 [1, 2] : vector<1x128x128xf32> to vector<1xf32>
    %147 = vector.shape_cast %146 : vector<1xf32> to vector<1x1x1xf32>
    %148 = vector.extract %147[0, 0, 0] : f32 from vector<1x1x1xf32>
    %149 = arith.mulf %144, %144 : vector<128x128xf32>
    %150 = vector.shape_cast %149 : vector<128x128xf32> to vector<1x128x128xf32>
    %cst_65 = arith.constant dense<0.000000e+00> : vector<1xf32>
    %151 = vector.multi_reduction <add>, %150, %cst_65 [1, 2] : vector<1x128x128xf32> to vector<1xf32>
    %152 = vector.shape_cast %151 : vector<1xf32> to vector<1x1x1xf32>
    %153 = vector.extract %152[0, 0, 0] : f32 from vector<1x1x1xf32>
    %cst_66 = arith.constant 4.8828125E-4 : f32
    %154 = arith.mulf %148, %cst_66 : f32
    %cst_67 = arith.constant 4.8828125E-4 : f32
    %155 = arith.mulf %153, %cst_67 : f32
    %156 = arith.mulf %154, %154 : f32
    %157 = arith.subf %155, %156 : f32
    %cst_68 = arith.constant 0.000000e+00 : f32
    %158 = arith.maximumf %157, %cst_68 : f32
    %159 = math.sqrt %158 : f32
    %160 = vector.broadcast %154 : f32 to vector<128x128xf32>
    %161 = arith.subf %142, %160 : vector<128x128xf32>
    %cst_69 = arith.constant 9.99999974E-6 : f32
    %162 = arith.addf %159, %cst_69 : f32
    %163 = vector.broadcast %162 : f32 to vector<128x128xf32>
    %164 = arith.divf %161, %163 : vector<128x128xf32>
    %c0_70 = arith.constant 0 : index
    %c0_71 = arith.constant 0 : index
    %c0_72 = arith.constant 0 : index
    %165 = vector.load %arg10[%c0_70, %c0_71, %c0_72] : memref<2x1x128xf32, #tpu.memory_space<vmem>>, vector<1x1x128xf32>
    %166 = vector.shape_cast %165 : vector<1x1x128xf32> to vector<1x128xf32>
    %167 = vector.broadcast %166 : vector<1x128xf32> to vector<128x128xf32>
    %168 = arith.mulf %164, %167 : vector<128x128xf32>
    %c0_73 = arith.constant 0 : index
    %c0_74 = arith.constant 0 : index
    %c0_75 = arith.constant 0 : index
    %169 = vector.load %arg11[%c0_73, %c0_74, %c0_75] : memref<2x1x128xf32, #tpu.memory_space<vmem>>, vector<1x1x128xf32>
    %170 = vector.shape_cast %169 : vector<1x1x128xf32> to vector<1x128xf32>
    %171 = vector.broadcast %170 : vector<1x128xf32> to vector<128x128xf32>
    %172 = arith.addf %168, %171 : vector<128x128xf32>
    %c0_76 = arith.constant 0 : index
    %c0_77 = arith.constant 0 : index
    %c0_78 = arith.constant 0 : index
    %173 = vector.load %arg12[%c0_76, %c0_77, %c0_78] : memref<2x128x32xf32, #tpu.memory_space<vmem>>, vector<1x128x32xf32>
    %174 = vector.shape_cast %173 : vector<1x128x32xf32> to vector<128x32xf32>
    %cst_79 = arith.constant dense<0.000000e+00> : vector<128x32xf32>
    %175 = tpu.matmul %172, %174, %cst_79 {dimension_numbers = #tpu.dot_dimension_numbers<[1], [0], [0], [1], [0, 0, 1, 1], [], []>} : vector<128x128xf32>, vector<128x32xf32>, vector<128x32xf32> -> vector<128x32xf32>
    %c0_80 = arith.constant 0 : index
    %c0_81 = arith.constant 0 : index
    %c0_82 = arith.constant 0 : index
    %176 = vector.load %arg13[%c0_80, %c0_81, %c0_82] : memref<2x1x32xf32, #tpu.memory_space<vmem>>, vector<1x1x32xf32>
    %177 = vector.shape_cast %176 : vector<1x1x32xf32> to vector<1x32xf32>
    %178 = vector.broadcast %177 : vector<1x32xf32> to vector<128x32xf32>
    %179 = arith.addf %175, %178 : vector<128x32xf32>
    %180 = arith.addf %179, %7 : vector<128x32xf32>
    %cst_83 = arith.constant 0.000000e+00 : f32
    %181 = vector.broadcast %cst_83 : f32 to vector<128x32xf32>
    %182 = arith.maximumf %180, %181 : vector<128x32xf32>
    %c1 = arith.constant 1 : index
    %c0_84 = arith.constant 0 : index
    %c0_85 = arith.constant 0 : index
    %183 = vector.load %arg6[%c1, %c0_84, %c0_85] : memref<2x32x512xf32, #tpu.memory_space<vmem>>, vector<1x32x512xf32>
    %184 = vector.shape_cast %183 : vector<1x32x512xf32> to vector<32x512xf32>
    %cst_86 = arith.constant dense<0.000000e+00> : vector<128x512xf32>
    %185 = tpu.matmul %182, %184, %cst_86 {dimension_numbers = #tpu.dot_dimension_numbers<[1], [0], [0], [1], [0, 0, 1, 1], [], []>} : vector<128x32xf32>, vector<32x512xf32>, vector<128x512xf32> -> vector<128x512xf32>
    %c1_87 = arith.constant 1 : index
    %c0_88 = arith.constant 0 : index
    %c0_89 = arith.constant 0 : index
    %186 = vector.load %arg7[%c1_87, %c0_88, %c0_89] : memref<2x1x512xf32, #tpu.memory_space<vmem>>, vector<1x1x512xf32>
    %187 = vector.shape_cast %186 : vector<1x1x512xf32> to vector<1x512xf32>
    %188 = vector.broadcast %187 : vector<1x512xf32> to vector<128x512xf32>
    %189 = arith.addf %185, %188 : vector<128x512xf32>
    %190 = vector.extract_strided_slice %189 {offsets = [0, 0], sizes = [128, 128], strides = [1, 1]} : vector<128x512xf32> to vector<128x128xf32>
    %191 = vector.extract_strided_slice %189 {offsets = [0, 128], sizes = [128, 128], strides = [1, 1]} : vector<128x512xf32> to vector<128x128xf32>
    %192 = vector.extract_strided_slice %189 {offsets = [0, 256], sizes = [128, 128], strides = [1, 1]} : vector<128x512xf32> to vector<128x128xf32>
    %193 = vector.extract_strided_slice %189 {offsets = [0, 384], sizes = [128, 128], strides = [1, 1]} : vector<128x512xf32> to vector<128x128xf32>
    %194 = vector.extract_strided_slice %190 {offsets = [0, 0], sizes = [128, 32], strides = [1, 1]} : vector<128x128xf32> to vector<128x32xf32>
    %195 = vector.extract_strided_slice %191 {offsets = [0, 0], sizes = [128, 32], strides = [1, 1]} : vector<128x128xf32> to vector<128x32xf32>
    %cst_90 = arith.constant dense<0.000000e+00> : vector<128x128xf32>
    %196 = tpu.matmul %194, %195, %cst_90 {dimension_numbers = #tpu.dot_dimension_numbers<[1], [1], [0], [0], [0, 0, 1, 0], [], []>} : vector<128x32xf32>, vector<128x32xf32>, vector<128x128xf32> -> vector<128x128xf32>
    %cst_91 = arith.constant 0.176776692 : f32
    %197 = vector.broadcast %cst_91 : f32 to vector<128x128xf32>
    %198 = arith.mulf %196, %197 : vector<128x128xf32>
    %199 = arith.addf %198, %0 : vector<128x128xf32>
    %cst_92 = arith.constant dense<0xFF800000> : vector<128xf32>
    %200 = vector.multi_reduction <maximumf>, %199, %cst_92 [1] : vector<128x128xf32> to vector<128xf32>
    %201 = vector.shape_cast %200 : vector<128xf32> to vector<128x1xf32>
    %cst_93 = arith.constant 0.000000e+00 : f32
    %202 = vector.broadcast %cst_93 : f32 to vector<128x1xf32>
    %203 = arith.maximumf %201, %202 : vector<128x1xf32>
    %204 = vector.broadcast %203 : vector<128x1xf32> to vector<128x128xf32>
    %205 = arith.subf %199, %204 : vector<128x128xf32>
    %206 = math.exp %205 : vector<128x128xf32>
    %cst_94 = arith.constant dense<0.000000e+00> : vector<128xf32>
    %207 = vector.multi_reduction <add>, %206, %cst_94 [1] : vector<128x128xf32> to vector<128xf32>
    %208 = vector.shape_cast %207 : vector<128xf32> to vector<128x1xf32>
    %cst_95 = arith.constant 0.000000e+00 : f32
    %209 = vector.broadcast %cst_95 : f32 to vector<128x1xf32>
    %210 = arith.cmpf ogt, %208, %209 : vector<128x1xf32>
    %cst_96 = arith.constant 1.000000e+00 : f32
    %211 = vector.broadcast %cst_96 : f32 to vector<128x1xf32>
    %212 = arith.select %210, %208, %211 : vector<128x1xi1>, vector<128x1xf32>
    %213 = tpu.reciprocal %212 {approx = true} : vector<128x1xf32> -> vector<128x1xf32>
    %214 = vector.broadcast %213 : vector<128x1xf32> to vector<128x128xf32>
    %215 = arith.mulf %206, %214 : vector<128x128xf32>
    %216 = vector.extract_strided_slice %192 {offsets = [0, 0], sizes = [128, 32], strides = [1, 1]} : vector<128x128xf32> to vector<128x32xf32>
    %cst_97 = arith.constant dense<0.000000e+00> : vector<128x32xf32>
    %217 = tpu.matmul %215, %216, %cst_97 {dimension_numbers = #tpu.dot_dimension_numbers<[1], [0], [0], [1], [0, 0, 1, 1], [], []>} : vector<128x128xf32>, vector<128x32xf32>, vector<128x32xf32> -> vector<128x32xf32>
    %c0_98 = arith.constant 0 : index
    %c0_99 = arith.constant 0 : index
    %218 = vector.load %arg17[%c0_98, %c0_99] : memref<128x128xf32, #tpu.memory_space<vmem>>, vector<128x32xf32>
    tpu.vector_store %arg17[%c0_98, %c0_99], %217 {strides = array<i32>} : memref<128x128xf32, #tpu.memory_space<vmem>>, vector<128x32xf32>,
    %219 = vector.extract_strided_slice %190 {offsets = [0, 32], sizes = [128, 32], strides = [1, 1]} : vector<128x128xf32> to vector<128x32xf32>
    %220 = vector.extract_strided_slice %191 {offsets = [0, 32], sizes = [128, 32], strides = [1, 1]} : vector<128x128xf32> to vector<128x32xf32>
    %cst_100 = arith.constant dense<0.000000e+00> : vector<128x128xf32>
    %221 = tpu.matmul %219, %220, %cst_100 {dimension_numbers = #tpu.dot_dimension_numbers<[1], [1], [0], [0], [0, 0, 1, 0], [], []>} : vector<128x32xf32>, vector<128x32xf32>, vector<128x128xf32> -> vector<128x128xf32>
    %cst_101 = arith.constant 0.176776692 : f32
    %222 = vector.broadcast %cst_101 : f32 to vector<128x128xf32>
    %223 = arith.mulf %221, %222 : vector<128x128xf32>
    %224 = arith.addf %223, %0 : vector<128x128xf32>
    %cst_102 = arith.constant dense<0xFF800000> : vector<128xf32>
    %225 = vector.multi_reduction <maximumf>, %224, %cst_102 [1] : vector<128x128xf32> to vector<128xf32>
    %226 = vector.shape_cast %225 : vector<128xf32> to vector<128x1xf32>
    %cst_103 = arith.constant 0.000000e+00 : f32
    %227 = vector.broadcast %cst_103 : f32 to vector<128x1xf32>
    %228 = arith.maximumf %226, %227 : vector<128x1xf32>
    %229 = vector.broadcast %228 : vector<128x1xf32> to vector<128x128xf32>
    %230 = arith.subf %224, %229 : vector<128x128xf32>
    %231 = math.exp %230 : vector<128x128xf32>
    %cst_104 = arith.constant dense<0.000000e+00> : vector<128xf32>
    %232 = vector.multi_reduction <add>, %231, %cst_104 [1] : vector<128x128xf32> to vector<128xf32>
    %233 = vector.shape_cast %232 : vector<128xf32> to vector<128x1xf32>
    %cst_105 = arith.constant 0.000000e+00 : f32
    %234 = vector.broadcast %cst_105 : f32 to vector<128x1xf32>
    %235 = arith.cmpf ogt, %233, %234 : vector<128x1xf32>
    %cst_106 = arith.constant 1.000000e+00 : f32
    %236 = vector.broadcast %cst_106 : f32 to vector<128x1xf32>
    %237 = arith.select %235, %233, %236 : vector<128x1xi1>, vector<128x1xf32>
    %238 = tpu.reciprocal %237 {approx = true} : vector<128x1xf32> -> vector<128x1xf32>
    %239 = vector.broadcast %238 : vector<128x1xf32> to vector<128x128xf32>
    %240 = arith.mulf %231, %239 : vector<128x128xf32>
    %241 = vector.extract_strided_slice %192 {offsets = [0, 32], sizes = [128, 32], strides = [1, 1]} : vector<128x128xf32> to vector<128x32xf32>
    %cst_107 = arith.constant dense<0.000000e+00> : vector<128x32xf32>
    %242 = tpu.matmul %240, %241, %cst_107 {dimension_numbers = #tpu.dot_dimension_numbers<[1], [0], [0], [1], [0, 0, 1, 1], [], []>} : vector<128x128xf32>, vector<128x32xf32>, vector<128x32xf32> -> vector<128x32xf32>
    %c0_108 = arith.constant 0 : index
    %c32_109 = arith.constant 32 : index
    %243 = vector.load %arg17[%c0_108, %c32_109] : memref<128x128xf32, #tpu.memory_space<vmem>>, vector<128x32xf32>
    tpu.vector_store %arg17[%c0_108, %c32_109], %242 {strides = array<i32>} : memref<128x128xf32, #tpu.memory_space<vmem>>, vector<128x32xf32>,
    %244 = vector.extract_strided_slice %190 {offsets = [0, 64], sizes = [128, 32], strides = [1, 1]} : vector<128x128xf32> to vector<128x32xf32>
    %245 = vector.extract_strided_slice %191 {offsets = [0, 64], sizes = [128, 32], strides = [1, 1]} : vector<128x128xf32> to vector<128x32xf32>
    %cst_110 = arith.constant dense<0.000000e+00> : vector<128x128xf32>
    %246 = tpu.matmul %244, %245, %cst_110 {dimension_numbers = #tpu.dot_dimension_numbers<[1], [1], [0], [0], [0, 0, 1, 0], [], []>} : vector<128x32xf32>, vector<128x32xf32>, vector<128x128xf32> -> vector<128x128xf32>
    %cst_111 = arith.constant 0.176776692 : f32
    %247 = vector.broadcast %cst_111 : f32 to vector<128x128xf32>
    %248 = arith.mulf %246, %247 : vector<128x128xf32>
    %249 = arith.addf %248, %0 : vector<128x128xf32>
    %cst_112 = arith.constant dense<0xFF800000> : vector<128xf32>
    %250 = vector.multi_reduction <maximumf>, %249, %cst_112 [1] : vector<128x128xf32> to vector<128xf32>
    %251 = vector.shape_cast %250 : vector<128xf32> to vector<128x1xf32>
    %cst_113 = arith.constant 0.000000e+00 : f32
    %252 = vector.broadcast %cst_113 : f32 to vector<128x1xf32>
    %253 = arith.maximumf %251, %252 : vector<128x1xf32>
    %254 = vector.broadcast %253 : vector<128x1xf32> to vector<128x128xf32>
    %255 = arith.subf %249, %254 : vector<128x128xf32>
    %256 = math.exp %255 : vector<128x128xf32>
    %cst_114 = arith.constant dense<0.000000e+00> : vector<128xf32>
    %257 = vector.multi_reduction <add>, %256, %cst_114 [1] : vector<128x128xf32> to vector<128xf32>
    %258 = vector.shape_cast %257 : vector<128xf32> to vector<128x1xf32>
    %cst_115 = arith.constant 0.000000e+00 : f32
    %259 = vector.broadcast %cst_115 : f32 to vector<128x1xf32>
    %260 = arith.cmpf ogt, %258, %259 : vector<128x1xf32>
    %cst_116 = arith.constant 1.000000e+00 : f32
    %261 = vector.broadcast %cst_116 : f32 to vector<128x1xf32>
    %262 = arith.select %260, %258, %261 : vector<128x1xi1>, vector<128x1xf32>
    %263 = tpu.reciprocal %262 {approx = true} : vector<128x1xf32> -> vector<128x1xf32>
    %264 = vector.broadcast %263 : vector<128x1xf32> to vector<128x128xf32>
    %265 = arith.mulf %256, %264 : vector<128x128xf32>
    %266 = vector.extract_strided_slice %192 {offsets = [0, 64], sizes = [128, 32], strides = [1, 1]} : vector<128x128xf32> to vector<128x32xf32>
    %cst_117 = arith.constant dense<0.000000e+00> : vector<128x32xf32>
    %267 = tpu.matmul %265, %266, %cst_117 {dimension_numbers = #tpu.dot_dimension_numbers<[1], [0], [0], [1], [0, 0, 1, 1], [], []>} : vector<128x128xf32>, vector<128x32xf32>, vector<128x32xf32> -> vector<128x32xf32>
    %c0_118 = arith.constant 0 : index
    %c64_119 = arith.constant 64 : index
    %268 = vector.load %arg17[%c0_118, %c64_119] : memref<128x128xf32, #tpu.memory_space<vmem>>, vector<128x32xf32>
    tpu.vector_store %arg17[%c0_118, %c64_119], %267 {strides = array<i32>} : memref<128x128xf32, #tpu.memory_space<vmem>>, vector<128x32xf32>,
    %269 = vector.extract_strided_slice %190 {offsets = [0, 96], sizes = [128, 32], strides = [1, 1]} : vector<128x128xf32> to vector<128x32xf32>
    %270 = vector.extract_strided_slice %191 {offsets = [0, 96], sizes = [128, 32], strides = [1, 1]} : vector<128x128xf32> to vector<128x32xf32>
    %cst_120 = arith.constant dense<0.000000e+00> : vector<128x128xf32>
    %271 = tpu.matmul %269, %270, %cst_120 {dimension_numbers = #tpu.dot_dimension_numbers<[1], [1], [0], [0], [0, 0, 1, 0], [], []>} : vector<128x32xf32>, vector<128x32xf32>, vector<128x128xf32> -> vector<128x128xf32>
    %cst_121 = arith.constant 0.176776692 : f32
    %272 = vector.broadcast %cst_121 : f32 to vector<128x128xf32>
    %273 = arith.mulf %271, %272 : vector<128x128xf32>
    %274 = arith.addf %273, %0 : vector<128x128xf32>
    %cst_122 = arith.constant dense<0xFF800000> : vector<128xf32>
    %275 = vector.multi_reduction <maximumf>, %274, %cst_122 [1] : vector<128x128xf32> to vector<128xf32>
    %276 = vector.shape_cast %275 : vector<128xf32> to vector<128x1xf32>
    %cst_123 = arith.constant 0.000000e+00 : f32
    %277 = vector.broadcast %cst_123 : f32 to vector<128x1xf32>
    %278 = arith.maximumf %276, %277 : vector<128x1xf32>
    %279 = vector.broadcast %278 : vector<128x1xf32> to vector<128x128xf32>
    %280 = arith.subf %274, %279 : vector<128x128xf32>
    %281 = math.exp %280 : vector<128x128xf32>
    %cst_124 = arith.constant dense<0.000000e+00> : vector<128xf32>
    %282 = vector.multi_reduction <add>, %281, %cst_124 [1] : vector<128x128xf32> to vector<128xf32>
    %283 = vector.shape_cast %282 : vector<128xf32> to vector<128x1xf32>
    %cst_125 = arith.constant 0.000000e+00 : f32
    %284 = vector.broadcast %cst_125 : f32 to vector<128x1xf32>
    %285 = arith.cmpf ogt, %283, %284 : vector<128x1xf32>
    %cst_126 = arith.constant 1.000000e+00 : f32
    %286 = vector.broadcast %cst_126 : f32 to vector<128x1xf32>
    %287 = arith.select %285, %283, %286 : vector<128x1xi1>, vector<128x1xf32>
    %288 = tpu.reciprocal %287 {approx = true} : vector<128x1xf32> -> vector<128x1xf32>
    %289 = vector.broadcast %288 : vector<128x1xf32> to vector<128x128xf32>
    %290 = arith.mulf %281, %289 : vector<128x128xf32>
    %291 = vector.extract_strided_slice %192 {offsets = [0, 96], sizes = [128, 32], strides = [1, 1]} : vector<128x128xf32> to vector<128x32xf32>
    %cst_127 = arith.constant dense<0.000000e+00> : vector<128x32xf32>
    %292 = tpu.matmul %290, %291, %cst_127 {dimension_numbers = #tpu.dot_dimension_numbers<[1], [0], [0], [1], [0, 0, 1, 1], [], []>} : vector<128x128xf32>, vector<128x32xf32>, vector<128x32xf32> -> vector<128x32xf32>
    %c0_128 = arith.constant 0 : index
    %c96_129 = arith.constant 96 : index
    %293 = vector.load %arg17[%c0_128, %c96_129] : memref<128x128xf32, #tpu.memory_space<vmem>>, vector<128x32xf32>
    tpu.vector_store %arg17[%c0_128, %c96_129], %292 {strides = array<i32>} : memref<128x128xf32, #tpu.memory_space<vmem>>, vector<128x32xf32>,
    %c0_130 = arith.constant 0 : index
    %c0_131 = arith.constant 0 : index
    %294 = vector.load %arg17[%c0_130, %c0_131] : memref<128x128xf32, #tpu.memory_space<vmem>>, vector<128x128xf32>
    %c1_132 = arith.constant 1 : index
    %c0_133 = arith.constant 0 : index
    %c0_134 = arith.constant 0 : index
    %295 = vector.load %arg8[%c1_132, %c0_133, %c0_134] : memref<2x1x128xf32, #tpu.memory_space<vmem>>, vector<1x1x128xf32>
    %296 = vector.shape_cast %295 : vector<1x1x128xf32> to vector<1x128xf32>
    %297 = vector.broadcast %296 : vector<1x128xf32> to vector<128x128xf32>
    %298 = arith.mulf %294, %297 : vector<128x128xf32>
    %c1_135 = arith.constant 1 : index
    %c0_136 = arith.constant 0 : index
    %c0_137 = arith.constant 0 : index
    %299 = vector.load %arg9[%c1_135, %c0_136, %c0_137] : memref<2x1x128xf32, #tpu.memory_space<vmem>>, vector<1x1x128xf32>
    %300 = vector.shape_cast %299 : vector<1x1x128xf32> to vector<1x128xf32>
    %301 = vector.broadcast %300 : vector<1x128xf32> to vector<128x128xf32>
    %302 = arith.mulf %193, %301 : vector<128x128xf32>
    %303 = arith.addf %298, %302 : vector<128x128xf32>
    %cst_138 = arith.constant dense<0.000000e+00> : vector<128xf32>
    %304 = vector.multi_reduction <add>, %303, %cst_138 [1] : vector<128x128xf32> to vector<128xf32>
    %305 = vector.shape_cast %304 : vector<128xf32> to vector<128x1xf32>
    %306 = arith.negf %305 : vector<128x1xf32>
    %307 = math.exp %306 : vector<128x1xf32>
    %cst_139 = arith.constant 1.000000e+00 : f32
    %308 = vector.broadcast %cst_139 : f32 to vector<128x1xf32>
    %309 = arith.addf %308, %307 : vector<128x1xf32>
    %310 = arith.divf %308, %309 : vector<128x1xf32>
    %311 = vector.broadcast %310 : vector<128x1xf32> to vector<128x128xf32>
    %312 = arith.mulf %311, %193 : vector<128x128xf32>
    %cst_140 = arith.constant 1.000000e+00 : f32
    %313 = vector.broadcast %cst_140 : f32 to vector<128x1xf32>
    %314 = arith.subf %313, %310 : vector<128x1xf32>
    %315 = vector.broadcast %314 : vector<128x1xf32> to vector<128x128xf32>
    %316 = arith.mulf %315, %294 : vector<128x128xf32>
    %317 = arith.addf %312, %316 : vector<128x128xf32>
    %318 = vector.broadcast %1 : vector<128x1xf32> to vector<128x128xf32>
    %319 = arith.mulf %317, %318 : vector<128x128xf32>
    %320 = vector.shape_cast %319 : vector<128x128xf32> to vector<1x128x128xf32>
    %cst_141 = arith.constant dense<0.000000e+00> : vector<1xf32>
    %321 = vector.multi_reduction <add>, %320, %cst_141 [1, 2] : vector<1x128x128xf32> to vector<1xf32>
    %322 = vector.shape_cast %321 : vector<1xf32> to vector<1x1x1xf32>
    %323 = vector.extract %322[0, 0, 0] : f32 from vector<1x1x1xf32>
    %324 = arith.mulf %319, %319 : vector<128x128xf32>
    %325 = vector.shape_cast %324 : vector<128x128xf32> to vector<1x128x128xf32>
    %cst_142 = arith.constant dense<0.000000e+00> : vector<1xf32>
    %326 = vector.multi_reduction <add>, %325, %cst_142 [1, 2] : vector<1x128x128xf32> to vector<1xf32>
    %327 = vector.shape_cast %326 : vector<1xf32> to vector<1x1x1xf32>
    %328 = vector.extract %327[0, 0, 0] : f32 from vector<1x1x1xf32>
    %cst_143 = arith.constant 4.8828125E-4 : f32
    %329 = arith.mulf %323, %cst_143 : f32
    %cst_144 = arith.constant 4.8828125E-4 : f32
    %330 = arith.mulf %328, %cst_144 : f32
    %331 = arith.mulf %329, %329 : f32
    %332 = arith.subf %330, %331 : f32
    %cst_145 = arith.constant 0.000000e+00 : f32
    %333 = arith.maximumf %332, %cst_145 : f32
    %334 = math.sqrt %333 : f32
    %335 = vector.broadcast %329 : f32 to vector<128x128xf32>
    %336 = arith.subf %317, %335 : vector<128x128xf32>
    %cst_146 = arith.constant 9.99999974E-6 : f32
    %337 = arith.addf %334, %cst_146 : f32
    %338 = vector.broadcast %337 : f32 to vector<128x128xf32>
    %339 = arith.divf %336, %338 : vector<128x128xf32>
    %c1_147 = arith.constant 1 : index
    %c0_148 = arith.constant 0 : index
    %c0_149 = arith.constant 0 : index
    %340 = vector.load %arg10[%c1_147, %c0_148, %c0_149] : memref<2x1x128xf32, #tpu.memory_space<vmem>>, vector<1x1x128xf32>
    %341 = vector.shape_cast %340 : vector<1x1x128xf32> to vector<1x128xf32>
    %342 = vector.broadcast %341 : vector<1x128xf32> to vector<128x128xf32>
    %343 = arith.mulf %339, %342 : vector<128x128xf32>
    %c1_150 = arith.constant 1 : index
    %c0_151 = arith.constant 0 : index
    %c0_152 = arith.constant 0 : index
    %344 = vector.load %arg11[%c1_150, %c0_151, %c0_152] : memref<2x1x128xf32, #tpu.memory_space<vmem>>, vector<1x1x128xf32>
    %345 = vector.shape_cast %344 : vector<1x1x128xf32> to vector<1x128xf32>
    %346 = vector.broadcast %345 : vector<1x128xf32> to vector<128x128xf32>
    %347 = arith.addf %343, %346 : vector<128x128xf32>
    %c1_153 = arith.constant 1 : index
    %c0_154 = arith.constant 0 : index
    %c0_155 = arith.constant 0 : index
    %348 = vector.load %arg12[%c1_153, %c0_154, %c0_155] : memref<2x128x32xf32, #tpu.memory_space<vmem>>, vector<1x128x32xf32>
    %349 = vector.shape_cast %348 : vector<1x128x32xf32> to vector<128x32xf32>
    %cst_156 = arith.constant dense<0.000000e+00> : vector<128x32xf32>
    %350 = tpu.matmul %347, %349, %cst_156 {dimension_numbers = #tpu.dot_dimension_numbers<[1], [0], [0], [1], [0, 0, 1, 1], [], []>} : vector<128x128xf32>, vector<128x32xf32>, vector<128x32xf32> -> vector<128x32xf32>
    %c1_157 = arith.constant 1 : index
    %c0_158 = arith.constant 0 : index
    %c0_159 = arith.constant 0 : index
    %351 = vector.load %arg13[%c1_157, %c0_158, %c0_159] : memref<2x1x32xf32, #tpu.memory_space<vmem>>, vector<1x1x32xf32>
    %352 = vector.shape_cast %351 : vector<1x1x32xf32> to vector<1x32xf32>
    %353 = vector.broadcast %352 : vector<1x32xf32> to vector<128x32xf32>
    %354 = arith.addf %350, %353 : vector<128x32xf32>
    %355 = arith.addf %354, %182 : vector<128x32xf32>
    %cst_160 = arith.constant 0.000000e+00 : f32
    %356 = vector.broadcast %cst_160 : f32 to vector<128x32xf32>
    %357 = arith.maximumf %355, %356 : vector<128x32xf32>
    %c0_161 = arith.constant 0 : index
    %c0_162 = arith.constant 0 : index
    %358 = vector.load %arg14[%c0_161, %c0_162] : memref<32x128xf32, #tpu.memory_space<vmem>>, vector<32x128xf32>
    %cst_163 = arith.constant dense<0.000000e+00> : vector<128x128xf32>
    %359 = tpu.matmul %357, %358, %cst_163 {dimension_numbers = #tpu.dot_dimension_numbers<[1], [0], [0], [1], [0, 0, 1, 1], [], []>} : vector<128x32xf32>, vector<32x128xf32>, vector<128x128xf32> -> vector<128x128xf32>
    %c0_164 = arith.constant 0 : index
    %c0_165 = arith.constant 0 : index
    %360 = vector.load %arg15[%c0_164, %c0_165] : memref<1x128xf32, #tpu.memory_space<vmem>>, vector<1x128xf32>
    %361 = vector.broadcast %360 : vector<1x128xf32> to vector<128x128xf32>
    %362 = arith.addf %359, %361 : vector<128x128xf32>
    %c0_166 = arith.constant 0 : index
    %c0_167 = arith.constant 0 : index
    %363 = vector.load %arg16[%c0_166, %c0_167] : memref<128x128xf32, #tpu.memory_space<vmem>>, vector<128x128xf32>
    tpu.vector_store %arg16[%c0_166, %c0_167], %362 {strides = array<i32>} : memref<128x128xf32, #tpu.memory_space<vmem>>, vector<128x128xf32>,
    return
  }
  func.func @transform_0(%arg0: i32) -> (i32, i32) {
    %c0_i32 = arith.constant 0 : i32
    %c0_i32_0 = arith.constant 0 : i32
    %c0_i32_1 = arith.constant 0 : i32
    return %c0_i32, %c0_i32_0 : i32, i32
  }
  func.func @transform_1(%arg0: i32) -> (i32, i32) {
    %c0_i32 = arith.constant 0 : i32
    %c0_i32_0 = arith.constant 0 : i32
    %c0_i32_1 = arith.constant 0 : i32
    return %c0_i32, %c0_i32_0 : i32, i32
  }
  func.func @transform_2(%arg0: i32) -> (i32, i32) {
    %c0_i32 = arith.constant 0 : i32
    %c0_i32_0 = arith.constant 0 : i32
    %c0_i32_1 = arith.constant 0 : i32
    return %c0_i32, %c0_i32_0 : i32, i32
  }
  func.func @transform_3(%arg0: i32) -> (i32, i32) {
    %c0_i32 = arith.constant 0 : i32
    %c0_i32_0 = arith.constant 0 : i32
    %c0_i32_1 = arith.constant 0 : i32
    return %c0_i32, %c0_i32_0 : i32, i32
  }
  func.func @transform_4(%arg0: i32) -> (i32, i32) {
    %c0_i32 = arith.constant 0 : i32
    %c0_i32_0 = arith.constant 0 : i32
    %c0_i32_1 = arith.constant 0 : i32
    return %c0_i32, %c0_i32_0 : i32, i32
  }
  func.func @transform_5(%arg0: i32) -> (i32, i32, i32) {
    %c0_i32 = arith.constant 0 : i32
    %c0_i32_0 = arith.constant 0 : i32
    %c0_i32_1 = arith.constant 0 : i32
    %c0_i32_2 = arith.constant 0 : i32
    return %c0_i32, %c0_i32_0, %c0_i32_1 : i32, i32, i32
  }
  func.func @transform_6(%arg0: i32) -> (i32, i32, i32) {
    %c0_i32 = arith.constant 0 : i32
    %c0_i32_0 = arith.constant 0 : i32
    %c0_i32_1 = arith.constant 0 : i32
    %c0_i32_2 = arith.constant 0 : i32
    return %c0_i32, %c0_i32_0, %c0_i32_1 : i32, i32, i32
  }
  func.func @transform_7(%arg0: i32) -> (i32, i32, i32) {
    %c0_i32 = arith.constant 0 : i32
    %c0_i32_0 = arith.constant 0 : i32
    %c0_i32_1 = arith.constant 0 : i32
    %c0_i32_2 = arith.constant 0 : i32
    return %c0_i32, %c0_i32_0, %c0_i32_1 : i32, i32, i32
  }
  func.func @transform_8(%arg0: i32) -> (i32, i32, i32) {
    %c0_i32 = arith.constant 0 : i32
    %c0_i32_0 = arith.constant 0 : i32
    %c0_i32_1 = arith.constant 0 : i32
    %c0_i32_2 = arith.constant 0 : i32
    return %c0_i32, %c0_i32_0, %c0_i32_1 : i32, i32, i32
  }
  func.func @transform_9(%arg0: i32) -> (i32, i32, i32) {
    %c0_i32 = arith.constant 0 : i32
    %c0_i32_0 = arith.constant 0 : i32
    %c0_i32_1 = arith.constant 0 : i32
    %c0_i32_2 = arith.constant 0 : i32
    return %c0_i32, %c0_i32_0, %c0_i32_1 : i32, i32, i32
  }
  func.func @transform_10(%arg0: i32) -> (i32, i32, i32) {
    %c0_i32 = arith.constant 0 : i32
    %c0_i32_0 = arith.constant 0 : i32
    %c0_i32_1 = arith.constant 0 : i32
    %c0_i32_2 = arith.constant 0 : i32
    return %c0_i32, %c0_i32_0, %c0_i32_1 : i32, i32, i32
  }
  func.func @transform_11(%arg0: i32) -> (i32, i32, i32) {
    %c0_i32 = arith.constant 0 : i32
    %c0_i32_0 = arith.constant 0 : i32
    %c0_i32_1 = arith.constant 0 : i32
    %c0_i32_2 = arith.constant 0 : i32
    return %c0_i32, %c0_i32_0, %c0_i32_1 : i32, i32, i32
  }
  func.func @transform_12(%arg0: i32) -> (i32, i32, i32) {
    %c0_i32 = arith.constant 0 : i32
    %c0_i32_0 = arith.constant 0 : i32
    %c0_i32_1 = arith.constant 0 : i32
    %c0_i32_2 = arith.constant 0 : i32
    return %c0_i32, %c0_i32_0, %c0_i32_1 : i32, i32, i32
  }
  func.func @transform_13(%arg0: i32) -> (i32, i32) {
    %c0_i32 = arith.constant 0 : i32
    %c0_i32_0 = arith.constant 0 : i32
    %c0_i32_1 = arith.constant 0 : i32
    return %c0_i32, %c0_i32_0 : i32, i32
  }
  func.func @transform_14(%arg0: i32) -> (i32, i32) {
    %c0_i32 = arith.constant 0 : i32
    %c0_i32_0 = arith.constant 0 : i32
    %c0_i32_1 = arith.constant 0 : i32
    return %c0_i32, %c0_i32_0 : i32, i32
  }
  func.func @transform_15(%arg0: i32) -> (i32, i32) {
    %c0_i32 = arith.constant 0 : i32
    %c0_i32_0 = arith.constant 0 : i32
    %c0_i32_1 = arith.constant 0 : i32
    return %c0_i32, %c0_i32_0 : i32, i32
  }
}

</mosaic_0001>

<bundles_post_ra>
// kernel: fine_tune_model_forward.1
= control target key start
LH: loop header
LB: loop body
LE: loop exit
PB: predicated region body
PF: predicated region fallthrough
CT: control target
= control target key end

     0   :  { %vm304_vm0 = vcmask 261120   ;;  %s12713_s22 = smov 96   ;;  %s12714_s23 = smov 64   ;;  %s17502_s3 = inlined_call_operand.vmem [shape: f32[128,32], index: 3, kind: input, shape index: {}]   ;;  %s17503_s0 = inlined_call_operand.vmem [shape: f32[128,128], index: 0, kind: input, shape index: {}]   ;;  %s17504_s5 = inlined_call_operand.vmem [shape: f32[2,32,512], index: 5, kind: input, shape index: {}]   ;;  %s17505_s4 = inlined_call_operand.vmem [shape: f32[1,32], index: 4, kind: input, shape index: {}]   ;;  %s17506_s6 = inlined_call_operand.vmem [shape: f32[2,1,512], index: 6, kind: input, shape index: {}]   ;;  %s17507_s1 = inlined_call_operand.vmem [shape: f32[128,128], index: 1, kind: input, shape index: {}]   ;;  %s17508_s2 = inlined_call_operand.vmem [shape: f32[128,1], index: 2, kind: input, shape index: {}]   ;;  %s17509_s8 = inlined_call_operand.vmem [shape: f32[2,1,128], index: 8, kind: input, shape index: {}]   ;;  %s17510_s7 = inlined_call_operand.vmem [shape: f32[2,1,128], index: 7, kind: input, shape index: {}]   ;;  %s17511_s11 = inlined_call_operand.vmem [shape: f32[2,128,32], index: 11, kind: input, shape index: {}]   ;;  %s17512_s9 = inlined_call_operand.vmem [shape: f32[2,1,128], index: 9, kind: input, shape index: {}]   ;;  %s17513_s10 = inlined_call_operand.vmem [shape: f32[2,1,128], index: 10, kind: input, shape index: {}]   ;;  %s17514_s12 = inlined_call_operand.vmem [shape: f32[2,1,32], index: 12, kind: input, shape index: {}]   ;;  %s17515_s13 = inlined_call_operand.vmem [shape: f32[32,128], index: 13, kind: input, shape index: {}]   ;;  %s17516_s14 = inlined_call_operand.vmem [shape: f32[1,128], index: 14, kind: input, shape index: {}]   ;;  %s17517_s15 = inlined_call_operand.vmem [shape: f32[128,128], index: 15, kind: output, shape index: {}]  }
   0x1   :  { %v98_v0 = vld [vmem:[%s17502_s3] sm:$0xff]  ;;  %v99_v1 = vld [vmem:[%s17502_s3 + $0x8] sm:$0xff]  ;;  %v100_v2 = vld [vmem:[%s17502_s3 + $0x10] sm:$0xff]  ;;  %s12715_s24 = smov 32   ;;  %s12717_s25 = smov 0.0  }
   0x2   :  { %v10736_v3 = vpack.c.bf16 %v99_v1, %v98_v0  ;;  %v101_v4 = vld [vmem:[%s17502_s3 + $0x18] sm:$0xff]  ;;  %v102_v6 = vld [vmem:[%s17502_s3 + $0x20] sm:$0xff]  ;;  %v103_v7 = vld [vmem:[%s17502_s3 + $0x28] sm:$0xff]  ;;  %v17521_v0 = vmov 0.0  }
   0x3   :  { %v10740_v5 = vpack.c.bf16 %v101_v4, %v100_v2  ;;  %v10744_v8 = vpack.c.bf16 %v103_v7, %v102_v6  ;;  %v82_v9 = vld [vmem:[%s17503_s0] sm:$0xff]  ;;  %v104_v10 = vld [vmem:[%s17502_s3 + $0x30] sm:$0xff]  ;;  %v105_v11 = vld [vmem:[%s17502_s3 + $0x38] sm:$0xff]  ;;  %417 = vmatprep.mubr.f32.mxu1 %v17521_v0 }
   0x4   :  { %10737 = vmatprep.subr.bf16.mxu0 %v10736_v3  ;;  %9672 = vmatprep.mubr.f32.mxu0 %v82_v9  ;;  %v10748_v12 = vpack.c.bf16 %v105_v11, %v104_v10  ;;  %v106_v13 = vld [vmem:[%s17502_s3 + $0x40] sm:$0xff]  ;;  %v107_v14 = vld [vmem:[%s17502_s3 + $0x48] sm:$0xff]  ;;  %v108_v22 = vld [vmem:[%s17502_s3 + $0x50] sm:$0xff] }
   0x5   :  { %10739 = vmatpush3.bf16.msra.mxu0 %v10736_v3  ;;  %v267_v15 = vld [vmem:[%s17504_s5 + $0x8] sm:$0xff]  ;;  %v266_v18 = vld [vmem:[%s17504_s5] sm:$0xff]  ;;  %v10752_v20 = vpack.c.bf16 %v107_v14, %v106_v13  ;;  %v109_v23 = vld [vmem:[%s17502_s3 + $0x58] sm:$0xff] }
   0x6   :  { %10741 = vmatprep.subr.bf16.mxu0 %v10740_v5  ;;  %v271_v16 = vld [vmem:[%s17504_s5 + $0x28] sm:$0xff]  ;;  %v270_v19 = vld [vmem:[%s17504_s5 + $0x20] sm:$0xff]  ;;  %v10756_v24 = vpack.c.bf16 %v109_v23, %v108_v22  ;;  %v112_v28 = vld [vmem:[%s17502_s3 + $0x70] sm:$0xff] }
   0x7   :  { %v10768_v17 = vpack.c.bf16 %v271_v16, %v267_v15  ;;  %v10770_v21 = vpack.c.bf16 %v270_v19, %v266_v18  ;;  %v110_v25 = vld [vmem:[%s17502_s3 + $0x60] sm:$0xff]  ;;  %v111_v26 = vld [vmem:[%s17502_s3 + $0x68] sm:$0xff]  ;;  %v113_v29 = vld [vmem:[%s17502_s3 + $0x78] sm:$0xff] }
   0x8   :  { %v10760_v27 = vpack.c.bf16 %v111_v26, %v110_v25  ;;  %v10764_v30 = vpack.c.bf16 %v113_v29, %v112_v28  ;;  %v269_v31 = vld [vmem:[%s17504_s5 + $0x18] sm:$0xff]  ;;  %v268_v34 = vld [vmem:[%s17504_s5 + $0x10] sm:$0xff]  ;;  %v83_v36 = vld [vmem:[%s17503_s0 + $0x8] sm:$0xff] }
   0x9   :  { %10743 = vmatpush3.bf16.msra.mxu0 %v10740_v5  ;;  %10769 = vmatprep.subr.bf16.mxu1 %v10768_v17  ;;  %v273_v32 = vld [vmem:[%s17504_s5 + $0x38] sm:$0xff]  ;;  %v272_v35 = vld [vmem:[%s17504_s5 + $0x30] sm:$0xff]  ;;  %v86_v40 = vld [vmem:[%s17503_s0 + $0x20] sm:$0xff] }
   0xa   :  { %10745 = vmatprep.subr.bf16.mxu0 %v10744_v8  ;;  %10771 = vmatpush1.bf16.msra.mxu1 %v10770_v21  ;;  %v10776_v33 = vpack.c.bf16 %v273_v32, %v269_v31  ;;  %v10778_v37 = vpack.c.bf16 %v272_v35, %v268_v34  ;;  %v84_v38 = vld [vmem:[%s17503_s0 + $0x10] sm:$0xff]  ;;  %v85_v39 = vld [vmem:[%s17503_s0 + $0x18] sm:$0xff]  ;;  %v87_v41 = vld [vmem:[%s17503_s0 + $0x28] sm:$0xff]  ;;  %v284_v34 = vlaneseq }
   0xb   :  { %v88_v42 = vld [vmem:[%s17503_s0 + $0x30] sm:$0xff]  ;;  %v89_v43 = vld [vmem:[%s17503_s0 + $0x38] sm:$0xff]  ;;  %v90_v44 = vld [vmem:[%s17503_s0 + $0x40] sm:$0xff] }
   0xc   :  { %v91_v45 = vld [vmem:[%s17503_s0 + $0x48] sm:$0xff]  ;;  %v92_v46 = vld [vmem:[%s17503_s0 + $0x50] sm:$0xff]  ;;  %v93_v47 = vld [vmem:[%s17503_s0 + $0x58] sm:$0xff]  ;;  %v13091_v35 = vshrl.u32 %v284_v34, 7 }
   0xd   :  { %10747 = vmatpush3.bf16.msra.mxu0 %v10744_v8  ;;  %v94_v48 = vld [vmem:[%s17503_s0 + $0x60] sm:$0xff]  ;;  %v95_v49 = vld [vmem:[%s17503_s0 + $0x68] sm:$0xff]  ;;  %v96_v50 = vld [vmem:[%s17503_s0 + $0x70] sm:$0xff] }
   0xe   :  { %10749 = vmatprep.subr.bf16.mxu0 %v10748_v12  ;;  %v97_v51 = vld [vmem:[%s17503_s0 + $0x78] sm:$0xff]  ;;  %v275_v52 = vld [vmem:[%s17504_s5 + $0x48] sm:$0xff]  ;;  %v274_v57 = vld [vmem:[%s17504_s5 + $0x40] sm:$0xff]  ;;  %17738 = vst [vmem:[#allocation19_spill] sm:$0xff] %v13091_v35 }
   0xf   :  { %v279_v53 = vld [vmem:[%s17504_s5 + $0x68] sm:$0xff]  ;;  %v277_v54 = vld [vmem:[%s17504_s5 + $0x58] sm:$0xff]  ;;  %v278_v58 = vld [vmem:[%s17504_s5 + $0x60] sm:$0xff] }
  0x10   :  { %v10772_v55 = vpack.c.bf16 %v279_v53, %v275_v52  ;;  %v281_v56 = vld [vmem:[%s17504_s5 + $0x78] sm:$0xff]  ;;  %v10774_v60 = vpack.c.bf16 %v278_v58, %v274_v57  ;;  %v276_v61 = vld [vmem:[%s17504_s5 + $0x50] sm:$0xff]  ;;  %v12947_v1 = vld [vmem:[%s17505_s4] ss:$0 sm:$0xff]  ;;  %v17743_v57 = vmov 0 }
  0x11   :  { %10751 = vmatpush3.bf16.msra.mxu0 %v10748_v12  ;;  %v10780_v59 = vpack.c.bf16 %v281_v56, %v277_v54  ;;  %v280_v62 = vld [vmem:[%s17504_s5 + $0x70] sm:$0xff]  ;;  %vm13134_vm1 = vmpackc.low %vm304_vm0, %vm304_vm0 }
  0x12   :  { %10753 = vmatprep.subr.bf16.mxu0 %v10752_v20  ;;  %10773 = vmatprep.subr.bf16.mxu1 %v10772_v55  ;;  %v10782_v63 = vpack.c.bf16 %v280_v62, %v276_v61  ;;  %v17744_v57 = vsel %vm13134_vm1, 4294967295, %v17743_v57 }
  0x13   :  { %10775 = vmatpush1.bf16.msra.mxu1 %v10774_v60  ;;  %17745 = vst [vmem:[#allocation24_spill] sm:$0xff] %v17744_v57 }
  0x15   :  { %10755 = vmatpush3.bf16.msra.mxu0 %v10752_v20 }
  0x16   :  { %10757 = vmatprep.subr.bf16.mxu0 %v10756_v24 }
  0x19   :  { %10759 = vmatpush3.bf16.msra.mxu0 %v10756_v24 }
  0x1a   :  { %10761 = vmatprep.subr.bf16.mxu0 %v10760_v27 }
  0x1d   :  { %10763 = vmatpush3.bf16.msra.mxu0 %v10760_v27 }
  0x1e   :  { %10765 = vmatprep.subr.bf16.mxu0 %v10764_v30 }
  0x21   :  { %10767 = vmatpush3.bf16.msra.mxu0 %v10764_v30 }
  0x22   :  { %10777 = vmatprep.subr.bf16.mxu0 %v10776_v33 }
  0x24   :  { %9673 = vmatmul.mubr.f32.vlgmr.msra.gmra.mrb[0].mxu0 %v83_v36  ;;  %v17520_v36 = vsub.s32 0, %v13091_v35 }
  0x25   :  { %9675 = vmatprep.mubr.f32.mxu0 %v84_v38  ;;  %10779 = vmatpush1.bf16.msra.mxu0 %v10778_v37  ;;  %v13097_v37 = vld [vmem:[%s17506_s6] sm:$0xf] }
  0x26   :  { %10781 = vmatprep.subr.bf16.mxu0 %v10780_v59  ;;  %v13102_v38 = vrot.slane %v13097_v37, %v17520_v36 }
  0x28   :  { %9676 = vmatmul.mubr.f32.gmra.mrb[2].mxu0 %v85_v39  ;;  %v17519_v39 = vsub.s32 2, %v13091_v35 }
  0x29   :  { %9678 = vmatprep.mubr.f32.mxu0 %v86_v40  ;;  %10783 = vmatpush1.bf16.msra.mxu0 %v10782_v63  ;;  %v17518_v40 = vsub.s32 1, %v13091_v35 }
  0x2c   :  { %9679 = vmatmul.mubr.f32.gmra.mrb[4].mxu0 %v87_v41 }
  0x2d   :  { %9681 = vmatprep.mubr.f32.mxu0 %v88_v42 }
  0x30   :  { %9682 = vmatmul.mubr.f32.gmra.mrb[6].mxu0 %v89_v43 }
  0x31   :  { %9684 = vmatprep.mubr.f32.mxu0 %v90_v44  ;;  %v13112_v44 = vrot.slane %v13097_v37, %v17519_v39 }
  0x34   :  { %9685 = vmatmul.mubr.f32.gmra.mrb[8].mxu0 %v91_v45 }
  0x35   :  { %9687 = vmatprep.mubr.f32.mxu0 %v92_v46 }
  0x38   :  { %9688 = vmatmul.mubr.f32.gmra.mrb[10].mxu0 %v93_v47  ;;  %v13119_v47 = vrot.slane %v13097_v37, %v17518_v40 }
  0x39   :  { %9690 = vmatprep.mubr.f32.mxu0 %v94_v48 }
  0x3c   :  { %9691 = vmatmul.mubr.f32.gmra.mrb[12].mxu0 %v95_v49 }
  0x3d   :  { %9693 = vmatprep.mubr.f32.mxu0 %v96_v50 }
  0x40   :  { %9694 = vmatmul.mubr.f32.gmra.mrb[14].mxu0 %v97_v51 }
  0x41   :  { %578 = vmatprep.mubr.f32.mxu0 %v17521_v0 }
  0xf7   :  { %v9674_v2 = vpop.f32.mrb[0].mxu0 }
  0xf8   :  { %v187_v3 = vpop.f32.mrb[1].mxu0  ;;  %v12959_v7 = vadd.f32 %v9674_v2, %v12947_v1 }
  0xf9   :  { %v12950_v4 = vadd.f32 %v12947_v1, %v187_v3 }
  0xfa   :  { %17723 = vst [vmem:[#allocation4_spill] sm:$0xff] %v12959_v7 }
  0xfb   :  { %17722 = vst [vmem:[#allocation3_spill] sm:$0xff] %v12950_v4  ;;  %8595 = vmatmul.mubr.msk.f32.vlgmr.msra.gmra.mrb[0].mxu1 %vm304_vm0, %v12950_v4  ;;  %8611 = vmatmul.mubr.msk.f32.vlgmr.msra.gmra.mrb[16].mxu0 %vm304_vm0, %v12950_v4  ;;  %v9677_v5 = vpop.f32.mrb[2].mxu0 }
  0xfc   :  { %423 = vmatprep.mubr.f32.mxu1 %v17521_v0  ;;  %584 = vmatprep.mubr.f32.mxu0 %v17521_v0  ;;  %v197_v6 = vpop.f32.mrb[3].mxu0  ;;  %v12977_v13 = vadd.f32 %v9677_v5, %v12947_v1 }
  0xfd   :  { %v12962_v8 = vadd.f32 %v12947_v1, %v197_v6 }
  0xfe   :  { %17725 = vst [vmem:[#allocation6_spill] sm:$0xff] %v12977_v13 }
  0xff   :  { %17724 = vst [vmem:[#allocation5_spill] sm:$0xff] %v12962_v8  ;;  %8596 = vmatmul.mubr.msk.f32.gmra.mrb[2].mxu1 %vm304_vm0, %v12959_v7  ;;  %8612 = vmatmul.mubr.msk.f32.gmra.mrb[18].mxu0 %vm304_vm0, %v12959_v7  ;;  %v9680_v9 = vpop.f32.mrb[4].mxu0 }
 0x100   :  { %429 = vmatprep.mubr.f32.mxu1 %v17521_v0  ;;  %590 = vmatprep.mubr.f32.mxu0 %v17521_v0  ;;  %v207_v10 = vpop.f32.mrb[5].mxu0  ;;  %v12995_v19 = vadd.f32 %v9680_v9, %v12947_v1 }
 0x101   :  { %v12980_v14 = vadd.f32 %v12947_v1, %v207_v10 }
 0x102   :  { %17727 = vst [vmem:[#allocation8_spill] sm:$0xff] %v12995_v19 }
 0x103   :  { %8597 = vmatmul.mubr.msk.f32.gmra.mrb[4].mxu1 %vm304_vm0, %v12962_v8  ;;  %8613 = vmatmul.mubr.msk.f32.gmra.mrb[20].mxu0 %vm304_vm0, %v12962_v8  ;;  %v9683_v11 = vpop.f32.mrb[6].mxu0  ;;  %17726 = vst [vmem:[#allocation7_spill] sm:$0xff] %v12980_v14 }
 0x104   :  { %435 = vmatprep.mubr.f32.mxu1 %v17521_v0  ;;  %596 = vmatprep.mubr.f32.mxu0 %v17521_v0  ;;  %v217_v12 = vpop.f32.mrb[7].mxu0  ;;  %v13013_v25 = vadd.f32 %v9683_v11, %v12947_v1 }
 0x105   :  { %v12998_v20 = vadd.f32 %v12947_v1, %v217_v12 }
 0x106   :  { %17729 = vst [vmem:[#allocation10_spill] sm:$0xff] %v13013_v25 }
 0x107   :  { %8598 = vmatmul.mubr.msk.f32.gmra.mrb[6].mxu1 %vm304_vm0, %v12977_v13  ;;  %8614 = vmatmul.mubr.msk.f32.gmra.mrb[22].mxu0 %vm304_vm0, %v12977_v13  ;;  %v9686_v15 = vpop.f32.mrb[8].mxu0  ;;  %17728 = vst [vmem:[#allocation9_spill] sm:$0xff] %v12998_v20 }
 0x108   :  { %441 = vmatprep.mubr.f32.mxu1 %v17521_v0  ;;  %602 = vmatprep.mubr.f32.mxu0 %v17521_v0  ;;  %v227_v16 = vpop.f32.mrb[9].mxu0  ;;  %v13031_v27 = vadd.f32 %v9686_v15, %v12947_v1 }
 0x109   :  { %v13016_v26 = vadd.f32 %v12947_v1, %v227_v16 }
 0x10a   :  { %17731 = vst [vmem:[#allocation12_spill] sm:$0xff] %v13031_v27 }
 0x10b   :  { %8599 = vmatmul.mubr.msk.f32.gmra.mrb[8].mxu1 %vm304_vm0, %v12980_v14  ;;  %8615 = vmatmul.mubr.msk.f32.gmra.mrb[24].mxu0 %vm304_vm0, %v12980_v14  ;;  %v9689_v17 = vpop.f32.mrb[10].mxu0  ;;  %17730 = vst [vmem:[#allocation11_spill] sm:$0xff] %v13016_v26 }
 0x10c   :  { %447 = vmatprep.mubr.f32.mxu1 %v17521_v0  ;;  %608 = vmatprep.mubr.f32.mxu0 %v17521_v0  ;;  %v237_v18 = vpop.f32.mrb[11].mxu0  ;;  %v13049_v29 = vadd.f32 %v9689_v17, %v12947_v1 }
 0x10d   :  { %v13034_v28 = vadd.f32 %v12947_v1, %v237_v18 }
 0x10e   :  { %17733 = vst [vmem:[#allocation14_spill] sm:$0xff] %v13049_v29 }
 0x10f   :  { %8600 = vmatmul.mubr.msk.f32.gmra.mrb[10].mxu1 %vm304_vm0, %v12995_v19  ;;  %8616 = vmatmul.mubr.msk.f32.gmra.mrb[26].mxu0 %vm304_vm0, %v12995_v19  ;;  %v9692_v21 = vpop.f32.mrb[12].mxu0  ;;  %17732 = vst [vmem:[#allocation13_spill] sm:$0xff] %v13034_v28 }
 0x110   :  { %453 = vmatprep.mubr.f32.mxu1 %v17521_v0  ;;  %614 = vmatprep.mubr.f32.mxu0 %v17521_v0  ;;  %v247_v22 = vpop.f32.mrb[13].mxu0  ;;  %v13067_v31 = vadd.f32 %v9692_v21, %v12947_v1 }
 0x111   :  { %v13052_v30 = vadd.f32 %v12947_v1, %v247_v22 }
 0x112   :  { %17735 = vst [vmem:[#allocation16_spill] sm:$0xff] %v13067_v31 }
 0x113   :  { %8601 = vmatmul.mubr.msk.f32.gmra.mrb[12].mxu1 %vm304_vm0, %v12998_v20  ;;  %8617 = vmatmul.mubr.msk.f32.gmra.mrb[28].mxu0 %vm304_vm0, %v12998_v20  ;;  %v9695_v23 = vpop.f32.mrb[14].mxu0  ;;  %17734 = vst [vmem:[#allocation15_spill] sm:$0xff] %v13052_v30 }
 0x114   :  { %459 = vmatprep.mubr.f32.mxu1 %v17521_v0  ;;  %620 = vmatprep.mubr.f32.mxu0 %v17521_v0  ;;  %v257_v24 = vpop.f32.mrb[15].mxu0  ;;  %v13085_v33 = vadd.f32 %v9695_v23, %v12947_v1 }
 0x115   :  { %v13070_v32 = vadd.f32 %v12947_v1, %v257_v24 }
 0x116   :  { %17737 = vst [vmem:[#allocation18_spill] sm:$0xff] %v13085_v33 }
 0x117   :  { %8602 = vmatmul.mubr.msk.f32.gmra.mrb[14].mxu1 %vm304_vm0, %v13013_v25  ;;  %8618 = vmatmul.mubr.msk.f32.gmra.mrb[30].mxu0 %vm304_vm0, %v13013_v25  ;;  %17736 = vst [vmem:[#allocation17_spill] sm:$0xff] %v13070_v32 }
 0x118   :  { %465 = vmatprep.mubr.f32.mxu1 %v17521_v0  ;;  %626 = vmatprep.mubr.f32.mxu0 %v17521_v0 }
 0x11b   :  { %8603 = vmatmul.mubr.msk.f32.gmra.mrb[16].mxu1 %vm304_vm0, %v13016_v26  ;;  %8619 = vmatmul.mubr.msk.f32.gmra.mrb[32].mxu0 %vm304_vm0, %v13016_v26 }
 0x11c   :  { %471 = vmatprep.mubr.f32.mxu1 %v17521_v0  ;;  %632 = vmatprep.mubr.f32.mxu0 %v17521_v0 }
 0x11f   :  { %8604 = vmatmul.mubr.msk.f32.gmra.mrb[18].mxu1 %vm304_vm0, %v13031_v27  ;;  %8620 = vmatmul.mubr.msk.f32.gmra.mrb[34].mxu0 %vm304_vm0, %v13031_v27 }
 0x120   :  { %477 = vmatprep.mubr.f32.mxu1 %v17521_v0  ;;  %638 = vmatprep.mubr.f32.mxu0 %v17521_v0 }
 0x123   :  { %8605 = vmatmul.mubr.msk.f32.gmra.mrb[20].mxu1 %vm304_vm0, %v13034_v28  ;;  %8621 = vmatmul.mubr.msk.f32.gmra.mrb[36].mxu0 %vm304_vm0, %v13034_v28 }
 0x124   :  { %483 = vmatprep.mubr.f32.mxu1 %v17521_v0  ;;  %644 = vmatprep.mubr.f32.mxu0 %v17521_v0 }
 0x127   :  { %8606 = vmatmul.mubr.msk.f32.gmra.mrb[22].mxu1 %vm304_vm0, %v13049_v29  ;;  %8622 = vmatmul.mubr.msk.f32.gmra.mrb[38].mxu0 %vm304_vm0, %v13049_v29 }
 0x128   :  { %489 = vmatprep.mubr.f32.mxu1 %v17521_v0  ;;  %650 = vmatprep.mubr.f32.mxu0 %v17521_v0 }
 0x12b   :  { %8607 = vmatmul.mubr.msk.f32.gmra.mrb[24].mxu1 %vm304_vm0, %v13052_v30  ;;  %8623 = vmatmul.mubr.msk.f32.gmra.mrb[40].mxu0 %vm304_vm0, %v13052_v30 }
 0x12c   :  { %495 = vmatprep.mubr.f32.mxu1 %v17521_v0  ;;  %656 = vmatprep.mubr.f32.mxu0 %v17521_v0 }
 0x12f   :  { %8608 = vmatmul.mubr.msk.f32.gmra.mrb[26].mxu1 %vm304_vm0, %v13067_v31  ;;  %8624 = vmatmul.mubr.msk.f32.gmra.mrb[42].mxu0 %vm304_vm0, %v13067_v31 }
 0x130   :  { %501 = vmatprep.mubr.f32.mxu1 %v17521_v0  ;;  %662 = vmatprep.mubr.f32.mxu0 %v17521_v0 }
 0x133   :  { %8609 = vmatmul.mubr.msk.f32.gmra.mrb[28].mxu1 %vm304_vm0, %v13070_v32  ;;  %8625 = vmatmul.mubr.msk.f32.gmra.mrb[44].mxu0 %vm304_vm0, %v13070_v32 }
 0x134   :  { %507 = vmatprep.mubr.f32.mxu1 %v17521_v0  ;;  %668 = vmatprep.mubr.f32.mxu0 %v17521_v0 }
 0x137   :  { %8610 = vmatmul.mubr.msk.f32.gmra.mrb[30].mxu1 %vm304_vm0, %v13085_v33  ;;  %8626 = vmatmul.mubr.msk.f32.gmra.mrb[46].mxu0 %vm304_vm0, %v13085_v33 }
 0x1ce   :  { %v419_v41 = vpop.f32.mrb[0].mxu1  ;;  %v580_v42 = vpop.f32.mrb[16].mxu0 }
 0x1cf   :  { %v13107_v43 = vadd.f32 %v419_v41, %v13102_v38  ;;  %v421_v45 = vpop.f32.mrb[1].mxu1  ;;  %v13114_v46 = vpop.f32.mrb[17].mxu0  ;;  %v581_v50 = vadd.f32 %v580_v42, %v13112_v44 }
 0x1d0   :  { %17740 = vst [vmem:[#allocation21_spill] sm:$0xff] %v13114_v46  ;;  %v422_v55 = vadd.f32 %v421_v45, %v13119_v47 }
 0x1d1   :  { %17739 = vst [vmem:[#allocation20_spill] sm:$0xff] %v13107_v43  ;;  %9728 = vmatprep.mubr.msk.f32.mxu1 %vm304_vm0, %v13107_v43 }
 0x1d2   :  { %v425_v48 = vpop.f32.mrb[2].mxu1  ;;  %v586_v49 = vpop.f32.mrb[18].mxu0 }
 0x1d3   :  { %v13125_v51 = vadd.f32 %v425_v48, %v13102_v38  ;;  %v587_v52 = vadd.f32 %v586_v49, %v13112_v44  ;;  %v427_v53 = vpop.f32.mrb[3].mxu1  ;;  %v13128_v54 = vpop.f32.mrb[19].mxu0 }
 0x1d4   :  { %17742 = vst [vmem:[#allocation23_spill] sm:$0xff] %v13128_v54  ;;  %v428_v56 = vadd.f32 %v427_v53, %v13119_v47 }
 0x1d5   :  { %17741 = vst [vmem:[#allocation22_spill] sm:$0xff] %v13125_v51  ;;  %v13138_v58 = vpack.c.bf16 %v587_v52, %v581_v50  ;;  %v13140_v59 = vpack.i.bf16 %v587_v52, %v581_v50 }
 0x1d6   :  { %v431_v60 = vpop.f32.mrb[4].mxu1  ;;  %v592_v61 = vpop.f32.mrb[20].mxu0  ;;  %v13142_v62 = vpack.i.bf16 %v428_v56, %v422_v55  ;;  %v10784_v63 = vpack.c.bf16 %v428_v56, %v422_v55 }
 0x1d7   :  { %17746 = vst [vmem:[#allocation25_spill] sm:$0xff] %v13140_v59  ;;  %v13145_v1 = vadd.f32 %v431_v60, %v13102_v38  ;;  %v433_v2 = vpop.f32.mrb[5].mxu1  ;;  %v13147_v3 = vpop.f32.mrb[21].mxu0  ;;  %v593_v9 = vadd.f32 %v592_v61, %v13112_v44 }
 0x1d8   :  { %17748 = vst [vmem:[#allocation27_spill] sm:$0xff] %v13147_v3  ;;  %11535 = vrot.lane.b32.xlu0 %v13142_v62, %s12713_s22  ;;  %10786 = vmatprep.subr.msk.bf16.mxu1 %vm13134_vm1, %v10784_v63  ;;  %v434_v16 = vadd.f32 %v433_v2, %v13119_v47  ;;  %v13701_v3 = vld [vmem:[%s17507_s1 + $0x58] sm:$0xff] }
 0x1d9   :  { %17747 = vst [vmem:[#allocation26_spill] sm:$0xff] %v13145_v1  ;;  %10789 = vmatpush3.bf16.xpose.msk.msra.mxu1 %vm13134_vm1, %v10784_v63 }
 0x1da   :  { %v437_v5 = vpop.f32.mrb[6].mxu1  ;;  %v598_v6 = vpop.f32.mrb[22].mxu0 }
 0x1db   :  { %v13157_v10 = vadd.f32 %v437_v5, %v13102_v38  ;;  %v599_v11 = vadd.f32 %v598_v6, %v13112_v44  ;;  %v439_v12 = vpop.f32.mrb[7].mxu1  ;;  %v13160_v15 = vpop.f32.mrb[23].mxu0 }
 0x1dc   :  { %17750 = vst [vmem:[#allocation29_spill] sm:$0xff] %v13160_v15  ;;  %v440_v17 = vadd.f32 %v439_v12, %v13119_v47 }
 0x1dd   :  { %17749 = vst [vmem:[#allocation28_spill] sm:$0xff] %v13157_v10  ;;  %v13164_v18 = vpack.c.bf16 %v599_v11, %v593_v9  ;;  %v13166_v21 = vpack.i.bf16 %v599_v11, %v593_v9 }
 0x1de   :  { %v443_v22 = vpop.f32.mrb[8].mxu1  ;;  %v604_v23 = vpop.f32.mrb[24].mxu0  ;;  %v13168_v24 = vpack.i.bf16 %v440_v17, %v434_v16  ;;  %v10790_v34 = vpack.c.bf16 %v440_v17, %v434_v16 }
 0x1df   :  { %17751 = vst [vmem:[#allocation30_spill] sm:$0xff] %v13166_v21  ;;  %v13171_v41 = vadd.f32 %v443_v22, %v13102_v38  ;;  %v445_v42 = vpop.f32.mrb[9].mxu1  ;;  %v13173_v45 = vpop.f32.mrb[25].mxu0  ;;  %v605_v50 = vadd.f32 %v604_v23, %v13112_v44 }
 0x1e0   :  { %17753 = vst [vmem:[#allocation32_spill] sm:$0xff] %v13173_v45  ;;  %11540 = vrot.lane.b32.xlu0 %v13168_v24, %s12713_s22  ;;  %10792 = vmatprep.subr.msk.bf16.mxu1 %vm13134_vm1, %v10790_v34  ;;  %v446_v60 = vadd.f32 %v445_v42, %v13119_v47 }
 0x1e1   :  { %17752 = vst [vmem:[#allocation31_spill] sm:$0xff] %v13171_v41  ;;  %10795 = vmatpush3.bf16.xpose.msk.msra.mxu1 %vm13134_vm1, %v10790_v34 }
 0x1e2   :  { %v449_v48 = vpop.f32.mrb[10].mxu1  ;;  %v610_v49 = vpop.f32.mrb[26].mxu0 }
 0x1e3   :  { %v13183_v52 = vadd.f32 %v449_v48, %v13102_v38  ;;  %v611_v53 = vadd.f32 %v610_v49, %v13112_v44  ;;  %v451_v55 = vpop.f32.mrb[11].mxu1  ;;  %v13186_v56 = vpop.f32.mrb[27].mxu0 }
 0x1e4   :  { %17755 = vst [vmem:[#allocation34_spill] sm:$0xff] %v13186_v56  ;;  %v452_v61 = vadd.f32 %v451_v55, %v13119_v47 }
 0x1e5   :  { %17754 = vst [vmem:[#allocation33_spill] sm:$0xff] %v13183_v52  ;;  %v13190_v63 = vpack.c.bf16 %v611_v53, %v605_v50  ;;  %v13192_v2 = vpack.i.bf16 %v611_v53, %v605_v50 }
 0x1e6   :  { %v455_v5 = vpop.f32.mrb[12].mxu1  ;;  %v616_v6 = vpop.f32.mrb[28].mxu0  ;;  %v13194_v9 = vpack.i.bf16 %v452_v61, %v446_v60  ;;  %v10796_v11 = vpack.c.bf16 %v452_v61, %v446_v60 }
 0x1e7   :  { %17756 = vst [vmem:[#allocation35_spill] sm:$0xff] %v13192_v2  ;;  %v13197_v12 = vadd.f32 %v455_v5, %v13102_v38  ;;  %v457_v16 = vpop.f32.mrb[13].mxu1  ;;  %v13199_v17 = vpop.f32.mrb[29].mxu0  ;;  %v617_v34 = vadd.f32 %v616_v6, %v13112_v44 }
 0x1e8   :  { %17758 = vst [vmem:[#allocation37_spill] sm:$0xff] %v13199_v17  ;;  %11545 = vrot.lane.b32.xlu1 %v13194_v9, %s12713_s22  ;;  %10798 = vmatprep.subr.msk.bf16.mxu1 %vm13134_vm1, %v10796_v11  ;;  %v458_v53 = vadd.f32 %v457_v16, %v13119_v47 }
 0x1e9   :  { %17757 = vst [vmem:[#allocation36_spill] sm:$0xff] %v13197_v12  ;;  %10801 = vmatpush3.bf16.xpose.msk.msra.mxu1 %vm13134_vm1, %v10796_v11 }
 0x1ea   :  { %v461_v22 = vpop.f32.mrb[14].mxu1  ;;  %v622_v23 = vpop.f32.mrb[30].mxu0 }
 0x1eb   :  { %v13209_v42 = vadd.f32 %v461_v22, %v13102_v38  ;;  %v623_v48 = vadd.f32 %v622_v23, %v13112_v44  ;;  %v463_v49 = vpop.f32.mrb[15].mxu1  ;;  %v13212_v50 = vpop.f32.mrb[31].mxu0 }
 0x1ec   :  { %17760 = vst [vmem:[#allocation39_spill] sm:$0xff] %v13212_v50  ;;  %v464_v55 = vadd.f32 %v463_v49, %v13119_v47  ;;  %v13683_v50 = vld [vmem:[%s17507_s1 + $0x48] sm:$0xff] }
 0x1ed   :  { %17759 = vst [vmem:[#allocation38_spill] sm:$0xff] %v13209_v42  ;;  %v13216_v60 = vpack.c.bf16 %v623_v48, %v617_v34  ;;  %v13218_v61 = vpack.i.bf16 %v623_v48, %v617_v34 }
 0x1ee   :  { %v467_v5 = vpop.f32.mrb[16].mxu1  ;;  %v628_v11 = vpop.f32.mrb[32].mxu0  ;;  %v13220_v40 = vpack.i.bf16 %v464_v55, %v458_v53  ;;  %v10802_v6 = vpack.c.bf16 %v464_v55, %v458_v53 }
 0x1ef   :  { %17761 = vst [vmem:[#allocation40_spill] sm:$0xff] %v13218_v61  ;;  %v13223_v22 = vadd.f32 %v467_v5, %v13102_v38  ;;  %v469_v23 = vpop.f32.mrb[17].mxu1  ;;  %v13225_v39 = vpop.f32.mrb[33].mxu0  ;;  %v629_v48 = vadd.f32 %v628_v11, %v13112_v44 }
 0x1f0   :  { %17762 = vst [vmem:[#allocation41_spill] sm:$0xff] %v13220_v40  ;;  %17764 = vst [vmem:[#allocation43_spill] sm:$0xff] %v13225_v39  ;;  %11550 = vrot.lane.b32.xlu1 %v13220_v40, %s12713_s22  ;;  %10804 = vmatprep.subr.msk.bf16.mxu1 %vm13134_vm1, %v10802_v6  ;;  %v470_v36 = vadd.f32 %v469_v23, %v13119_v47  ;;  %v17536_v23 = vsub.s32 3, %v13091_v35 }
 0x1f1   :  { %17763 = vst [vmem:[#allocation42_spill] sm:$0xff] %v13223_v22  ;;  %10807 = vmatpush3.bf16.xpose.msk.msra.mxu1 %vm13134_vm1, %v10802_v6 }
 0x1f2   :  { %v473_v16 = vpop.f32.mrb[18].mxu1  ;;  %v634_v34 = vpop.f32.mrb[34].mxu0 }
 0x1f3   :  { %v13235_v49 = vadd.f32 %v473_v16, %v13102_v38  ;;  %v635_v53 = vadd.f32 %v634_v34, %v13112_v44  ;;  %v475_v55 = vpop.f32.mrb[19].mxu1  ;;  %v13238_v5 = vpop.f32.mrb[35].mxu0 }
 0x1f4   :  { %17766 = vst [vmem:[#allocation45_spill] sm:$0xff] %v13238_v5  ;;  %v476_v0 = vadd.f32 %v475_v55, %v13119_v47 }
 0x1f5   :  { %17765 = vst [vmem:[#allocation44_spill] sm:$0xff] %v13235_v49  ;;  %v13242_v33 = vpack.c.bf16 %v635_v53, %v629_v48  ;;  %v13244_v32 = vpack.i.bf16 %v635_v53, %v629_v48 }
 0x1f6   :  { %v479_v6 = vpop.f32.mrb[20].mxu1  ;;  %v640_v31 = vpop.f32.mrb[36].mxu0  ;;  %v13246_v30 = vpack.i.bf16 %v476_v0, %v470_v36  ;;  %v10808_v11 = vpack.c.bf16 %v476_v0, %v470_v36 }
 0x1f7   :  { %17767 = vst [vmem:[#allocation46_spill] sm:$0xff] %v13244_v32  ;;  %v13249_v16 = vadd.f32 %v479_v6, %v13102_v38  ;;  %v481_v34 = vpop.f32.mrb[21].mxu1  ;;  %v13251_v29 = vpop.f32.mrb[37].mxu0  ;;  %v641_v0 = vadd.f32 %v640_v31, %v13112_v44  ;;  %v13276_v31 = vrot.slane %v13097_v37, %v17536_v23 }
 0x1f8   :  { %17768 = vst [vmem:[#allocation47_spill] sm:$0xff] %v13246_v30  ;;  %17770 = vst [vmem:[#allocation49_spill] sm:$0xff] %v13251_v29  ;;  %11555 = vrot.lane.b32.xlu0 %v13246_v30, %s12713_s22  ;;  %10810 = vmatprep.subr.msk.bf16.mxu1 %vm13134_vm1, %v10808_v11  ;;  %v482_v27 = vadd.f32 %v481_v34, %v13119_v47 }
 0x1f9   :  { %17769 = vst [vmem:[#allocation48_spill] sm:$0xff] %v13249_v16  ;;  %10813 = vmatpush3.bf16.xpose.msk.msra.mxu1 %vm13134_vm1, %v10808_v11  ;;  %17774 = vst [vmem:[#allocation53_spill] sm:$0xff] %v13276_v31 }
 0x1fa   :  { %v485_v48 = vpop.f32.mrb[22].mxu1  ;;  %v646_v53 = vpop.f32.mrb[38].mxu0 }
 0x1fb   :  { %v13262_v36 = vadd.f32 %v485_v48, %v13102_v38  ;;  %v647_v55 = vadd.f32 %v646_v53, %v13112_v44  ;;  %v487_v6 = vpop.f32.mrb[23].mxu1  ;;  %v13265_v28 = vpop.f32.mrb[39].mxu0 }
 0x1fc   :  { %17772 = vst [vmem:[#allocation51_spill] sm:$0xff] %v13265_v28  ;;  %v488_v26 = vadd.f32 %v487_v6, %v13119_v47 }
 0x1fd   :  { %17771 = vst [vmem:[#allocation50_spill] sm:$0xff] %v13262_v36  ;;  %v13269_v25 = vpack.c.bf16 %v647_v55, %v641_v0  ;;  %v13271_v11 = vpack.i.bf16 %v647_v55, %v641_v0 }
 0x1fe   :  { %v491_v48 = vpop.f32.mrb[24].mxu1  ;;  %v652_v20 = vpop.f32.mrb[40].mxu0  ;;  %v13278_v19 = vpack.i.bf16 %v488_v26, %v482_v27  ;;  %v10814_v53 = vpack.c.bf16 %v488_v26, %v482_v27 }
 0x1ff   :  { %17773 = vst [vmem:[#allocation52_spill] sm:$0xff] %v13271_v11  ;;  %v13281_v14 = vadd.f32 %v491_v48, %v13102_v38  ;;  %v493_v34 = vpop.f32.mrb[25].mxu1  ;;  %v654_v13 = vpop.f32.mrb[41].mxu0  ;;  %v653_v26 = vadd.f32 %v652_v20, %v13112_v44 }
 0x200   :  { %17775 = vst [vmem:[#allocation54_spill] sm:$0xff] %v13278_v19  ;;  %v13284_v6 = vadd.f32 %v654_v13, %v13276_v31  ;;  %11560 = vrot.lane.b32.xlu1 %v13278_v19, %s12713_s22  ;;  %10816 = vmatprep.subr.msk.bf16.mxu1 %vm13134_vm1, %v10814_v53  ;;  %v494_v23 = vadd.f32 %v493_v34, %v13119_v47 }
 0x201   :  { %17776 = vst [vmem:[#allocation55_spill] sm:$0xff] %v13281_v14  ;;  %10819 = vmatpush3.bf16.xpose.msk.msra.mxu1 %vm13134_vm1, %v10814_v53 }
 0x202   :  { %17777 = vst [vmem:[#allocation56_spill] sm:$0xff] %v13284_v6  ;;  %v497_v37 = vpop.f32.mrb[26].mxu1  ;;  %v658_v0 = vpop.f32.mrb[42].mxu0 }
 0x203   :  { %v13294_v27 = vadd.f32 %v497_v37, %v13102_v38  ;;  %v659_v55 = vadd.f32 %v658_v0, %v13112_v44  ;;  %v499_v13 = vpop.f32.mrb[27].mxu1  ;;  %v660_v48 = vpop.f32.mrb[43].mxu0 }
 0x204   :  { %v500_v35 = vadd.f32 %v499_v13, %v13119_v47  ;;  %v13300_v8 = vadd.f32 %v660_v48, %v13276_v31 }
 0x205   :  { %17778 = vst [vmem:[#allocation57_spill] sm:$0xff] %v13294_v27  ;;  %v13302_v7 = vpack.c.bf16 %v659_v55, %v653_v26  ;;  %v13304_v53 = vpack.i.bf16 %v659_v55, %v653_v26 }
 0x206   :  { %17779 = vst [vmem:[#allocation58_spill] sm:$0xff] %v13300_v8  ;;  %v503_v4 = vpop.f32.mrb[28].mxu1  ;;  %v664_v20 = vpop.f32.mrb[44].mxu0  ;;  %v13306_v6 = vpack.i.bf16 %v500_v35, %v494_v23  ;;  %v10820_v37 = vpack.c.bf16 %v500_v35, %v494_v23 }
 0x207   :  { %17780 = vst [vmem:[#allocation59_spill] sm:$0xff] %v13304_v53  ;;  %v13309_v0 = vadd.f32 %v503_v4, %v13102_v38  ;;  %v505_v29 = vpop.f32.mrb[29].mxu1  ;;  %v666_v28 = vpop.f32.mrb[45].mxu0  ;;  %v665_v35 = vadd.f32 %v664_v20, %v13112_v44 }
 0x208   :  { %17781 = vst [vmem:[#allocation60_spill] sm:$0xff] %v13306_v6  ;;  %v13312_v34 = vadd.f32 %v666_v28, %v13276_v31  ;;  %11565 = vrot.lane.b32.xlu0 %v13306_v6, %s12713_s22  ;;  %10822 = vmatprep.subr.msk.bf16.mxu1 %vm13134_vm1, %v10820_v37  ;;  %v506_v48 = vadd.f32 %v505_v29, %v13119_v47 }
 0x209   :  { %17782 = vst [vmem:[#allocation61_spill] sm:$0xff] %v13309_v0  ;;  %10825 = vmatpush3.bf16.xpose.msk.msra.mxu1 %vm13134_vm1, %v10820_v37 }
 0x20a   :  { %17783 = vst [vmem:[#allocation62_spill] sm:$0xff] %v13312_v34  ;;  %v509_v26 = vpop.f32.mrb[30].mxu1  ;;  %v670_v55 = vpop.f32.mrb[46].mxu0 }
 0x20b   :  { %v13322_v4 = vadd.f32 %v509_v26, %v13102_v38  ;;  %v671_v23 = vadd.f32 %v670_v55, %v13112_v44  ;;  %v511_v28 = vpop.f32.mrb[31].mxu1  ;;  %v672_v13 = vpop.f32.mrb[47].mxu0 }
 0x20c   :  { %v512_v34 = vadd.f32 %v511_v28, %v13119_v47  ;;  %v13328_v8 = vadd.f32 %v672_v13, %v13276_v31  ;;  %11575 = vrot.lane.b32.xlu0 %v13142_v62, %s12714_s23 }
 0x20d   :  { %17784 = vst [vmem:[#allocation63_spill] sm:$0xff] %v13322_v4  ;;  %v10860_v37 = vpack.c.bf16 %v671_v23, %v665_v35  ;;  %v13332_v20 = vpack.i.bf16 %v671_v23, %v665_v35 }
 0x20e   :  { %17785 = vst [vmem:[#allocation64_spill] sm:$0xff] %v13328_v8  ;;  %v13334_v38 = vpack.i.bf16 %v512_v34, %v506_v48  ;;  %v10826_v26 = vpack.c.bf16 %v512_v34, %v506_v48  ;;  %v13665_v8 = vld [vmem:[%s17507_s1 + $0x38] sm:$0xff] }
 0x20f   :  { %17786 = vst [vmem:[#allocation65_spill] sm:$0xff] %v13332_v20 }
 0x210   :  { %17787 = vst [vmem:[#allocation66_spill] sm:$0xff] %v13334_v38  ;;  %11570 = vrot.lane.b32.xlu1 %v13334_v38, %s12713_s22  ;;  %1303 = vrot.lane.b32.xlu0 %v13125_v51, %s12713_s22 }
 0x211   :  { %10828 = vmatprep.subr.msk.bf16.mxu1 %vm13134_vm1, %v10826_v26 }
 0x212   :  { %10831 = vmatpush3.bf16.xpose.msk.msra.mxu1 %vm13134_vm1, %v10826_v26 }
 0x213   :  { %10833 = vmatprep.subr.bf16.mxu1 %v13138_v58 }
 0x214   :  { %11585 = vrot.lane.b32.xlu0 %v13194_v9, %s12714_s23  ;;  %1301 = vrot.lane.b32.xlu1 %v13107_v43, %s12713_s22 }
 0x218   :  { %11595 = vrot.lane.b32.xlu0 %v13246_v30, %s12714_s23  ;;  %11580 = vrot.lane.b32.xlu1 %v13168_v24, %s12714_s23 }
 0x219   :  { %9729 = vmatmul.mubr.msk.f32.vlgmr.msra.gmra.mrb[32].mxu1 %vm304_vm0, %v13125_v51 }
 0x21a   :  { %9731 = vmatprep.mubr.msk.f32.mxu1 %vm304_vm0, %v13145_v1  ;;  %10835 = vmatpush3.bf16.msra.mxu1 %v13138_v58 }
 0x21b   :  { %10837 = vmatprep.subr.bf16.mxu1 %v13164_v18 }
 0x21c   :  { %1307 = vrot.lane.b32.xlu0 %v13157_v10, %s12713_s22  ;;  %11590 = vrot.lane.b32.xlu1 %v13220_v40, %s12714_s23 }
 0x21d   :  { %9732 = vmatmul.mubr.msk.f32.gmra.mrb[34].mxu1 %vm304_vm0, %v13157_v10 }
 0x21e   :  { %9734 = vmatprep.mubr.msk.f32.mxu1 %vm304_vm0, %v13171_v41  ;;  %10839 = vmatpush3.bf16.msra.mxu1 %v13164_v18 }
 0x21f   :  { %10841 = vmatprep.subr.bf16.mxu1 %v13190_v63 }
 0x220   :  { %1309 = vrot.lane.b32.xlu0 %v13171_v41, %s12713_s22  ;;  %1305 = vrot.lane.b32.xlu1 %v13145_v1, %s12713_s22 }
 0x221   :  { %9735 = vmatmul.mubr.msk.f32.gmra.mrb[36].mxu1 %vm304_vm0, %v13183_v52 }
 0x222   :  { %9737 = vmatprep.mubr.msk.f32.mxu1 %vm304_vm0, %v13197_v12  ;;  %10843 = vmatpush3.bf16.msra.mxu1 %v13190_v63 }
 0x223   :  { %10845 = vmatprep.subr.bf16.mxu1 %v13216_v60 }
 0x224   :  { %1313 = vrot.lane.b32.xlu0 %v13197_v12, %s12713_s22  ;;  %11600 = vrot.lane.b32.xlu1 %v13278_v19, %s12714_s23 }
 0x225   :  { %9738 = vmatmul.mubr.msk.f32.gmra.mrb[38].mxu1 %vm304_vm0, %v13209_v42 }
 0x226   :  { %9740 = vmatprep.mubr.msk.f32.mxu1 %vm304_vm0, %v13223_v22  ;;  %10847 = vmatpush3.bf16.msra.mxu1 %v13216_v60 }
 0x227   :  { %10849 = vmatprep.subr.bf16.mxu1 %v13242_v33 }
 0x228   :  { %11605 = vrot.lane.b32.xlu0 %v13306_v6, %s12714_s23  ;;  %1311 = vrot.lane.b32.xlu1 %v13183_v52, %s12713_s22 }
 0x229   :  { %9741 = vmatmul.mubr.msk.f32.gmra.mrb[40].mxu1 %vm304_vm0, %v13235_v49 }
 0x22a   :  { %9743 = vmatprep.mubr.msk.f32.mxu1 %vm304_vm0, %v13249_v16  ;;  %10851 = vmatpush3.bf16.msra.mxu1 %v13242_v33 }
 0x22b   :  { %10853 = vmatprep.subr.bf16.mxu1 %v13269_v25 }
 0x22c   :  { %1319 = vrot.lane.b32.xlu0 %v13235_v49, %s12713_s22  ;;  %1315 = vrot.lane.b32.xlu1 %v13209_v42, %s12713_s22 }
 0x22d   :  { %9744 = vmatmul.mubr.msk.f32.gmra.mrb[42].mxu1 %vm304_vm0, %v13262_v36 }
 0x22e   :  { %9746 = vmatprep.mubr.msk.f32.mxu1 %vm304_vm0, %v13281_v14  ;;  %10855 = vmatpush3.bf16.msra.mxu1 %v13269_v25 }
 0x22f   :  { %10857 = vmatprep.subr.bf16.mxu1 %v13302_v7 }
 0x230   :  { %1323 = vrot.lane.b32.xlu0 %v13262_v36, %s12713_s22  ;;  %1317 = vrot.lane.b32.xlu1 %v13223_v22, %s12713_s22 }
 0x231   :  { %9747 = vmatmul.mubr.msk.f32.gmra.mrb[44].mxu1 %vm304_vm0, %v13294_v27 }
 0x232   :  { %9749 = vmatprep.mubr.msk.f32.mxu1 %vm304_vm0, %v13309_v0  ;;  %10859 = vmatpush3.bf16.msra.mxu1 %v13302_v7 }
 0x233   :  { %10861 = vmatprep.subr.bf16.mxu1 %v10860_v37 }
 0x234   :  { %1325 = vrot.lane.b32.xlu0 %v13281_v14, %s12713_s22  ;;  %1321 = vrot.lane.b32.xlu1 %v13249_v16, %s12713_s22 }
 0x235   :  { %9750 = vmatmul.mubr.msk.f32.gmra.mrb[46].mxu1 %vm304_vm0, %v13322_v4 }
 0x236   :  { %10863 = vmatpush3.bf16.msra.mxu1 %v10860_v37 }
 0x238   :  { %1329 = vrot.lane.b32.xlu0 %v13309_v0, %s12713_s22  ;;  %11610 = vrot.lane.b32.xlu1 %v13334_v38, %s12714_s23 }
 0x23c   :  { %2088 = vrot.lane.b32.xlu0 %v13107_v43, %s12714_s23  ;;  %1327 = vrot.lane.b32.xlu1 %v13294_v27, %s12713_s22 }
 0x240   :  { %2092 = vrot.lane.b32.xlu0 %v13145_v1, %s12714_s23  ;;  %1331 = vrot.lane.b32.xlu1 %v13322_v4, %s12713_s22 }
 0x244   :  { %2096 = vrot.lane.b32.xlu0 %v13171_v41, %s12714_s23  ;;  %2090 = vrot.lane.b32.xlu1 %v13125_v51, %s12714_s23 }
 0x248   :  { %2100 = vrot.lane.b32.xlu0 %v13197_v12, %s12714_s23  ;;  %2094 = vrot.lane.b32.xlu1 %v13157_v10, %s12714_s23 }
 0x24a   :  { %v11536_v7 = vpop.permute.xlu0 %11535 }
 0x24b   :  { %v11538_v25 = vunpack.i.h.bf16 %v11536_v7  ;;  %v11537_v29 = vunpack.i.l.bf16 %v11536_v7 }
 0x24c   :  { %2104 = vrot.lane.b32.xlu0 %v13223_v22, %s12714_s23  ;;  %2098 = vrot.lane.b32.xlu1 %v13183_v52, %s12714_s23 }
 0x24d   :  { %v10864_v33 = vpack.c.bf16 %v11538_v25, %v11537_v29 }
 0x24f   :  { %10866 = vmatprep.subr.msk.bf16.mxu0 %vm13134_vm1, %v10864_v33 }
 0x250   :  { %10869 = vmatpush3.bf16.xpose.msk.msra.mxu0 %vm13134_vm1, %v10864_v33  ;;  %2108 = vrot.lane.b32.xlu0 %v13249_v16, %s12714_s23 }
 0x251   :  { %2102 = vrot.lane.b32.xlu1 %v13209_v42, %s12714_s23 }
 0x252   :  { %v11541_v44 = vpop.permute.xlu0 %11540 }
 0x253   :  { %v11543_v47 = vunpack.i.h.bf16 %v11541_v44  ;;  %v11542_v58 = vunpack.i.l.bf16 %v11541_v44 }
 0x254   :  { %2112 = vrot.lane.b32.xlu0 %v13281_v14, %s12714_s23 }
 0x255   :  { %v10870_v18 = vpack.c.bf16 %v11543_v47, %v11542_v58  ;;  %2106 = vrot.lane.b32.xlu1 %v13235_v49, %s12714_s23 }
 0x257   :  { %10872 = vmatprep.subr.msk.bf16.mxu0 %vm13134_vm1, %v10870_v18 }
 0x258   :  { %10875 = vmatpush3.bf16.xpose.msk.msra.mxu0 %vm13134_vm1, %v10870_v18  ;;  %2116 = vrot.lane.b32.xlu0 %v13309_v0, %s12714_s23 }
 0x259   :  { %2110 = vrot.lane.b32.xlu1 %v13262_v36, %s12714_s23 }
 0x25a   :  { %v11546_v63 = vpop.permute.xlu1 %11545 }
 0x25b   :  { %v11548_v60 = vunpack.i.h.bf16 %v11546_v63  ;;  %v11547_v34 = vunpack.i.l.bf16 %v11546_v63 }
 0x25c   :  { %11625 = vrot.lane.b32.xlu0 %v13192_v2, %s12713_s22 }
 0x25d   :  { %v10876_v55 = vpack.c.bf16 %v11548_v60, %v11547_v34  ;;  %2114 = vrot.lane.b32.xlu1 %v13294_v27, %s12714_s23 }
 0x25f   :  { %10878 = vmatprep.subr.msk.bf16.mxu0 %vm13134_vm1, %v10876_v55 }
 0x260   :  { %10881 = vmatpush3.bf16.xpose.msk.msra.mxu0 %vm13134_vm1, %v10876_v55  ;;  %11635 = vrot.lane.b32.xlu0 %v13244_v32, %s12713_s22 }
 0x261   :  { %2118 = vrot.lane.b32.xlu1 %v13322_v4, %s12714_s23 }
 0x262   :  { %v11551_v35 = vpop.permute.xlu1 %11550 }
 0x263   :  { %v11553_v23 = vunpack.i.h.bf16 %v11551_v35  ;;  %v11552_v28 = vunpack.i.l.bf16 %v11551_v35 }
 0x264   :  { %11645 = vrot.lane.b32.xlu0 %v13304_v53, %s12713_s22 }
 0x265   :  { %v10882_v13 = vpack.c.bf16 %v11553_v23, %v11552_v28  ;;  %11615 = vrot.lane.b32.xlu1 %v13140_v59, %s12713_s22 }
 0x267   :  { %10884 = vmatprep.subr.msk.bf16.mxu0 %vm13134_vm1, %v10882_v13 }
 0x268   :  { %10887 = vmatpush3.bf16.xpose.msk.msra.mxu0 %vm13134_vm1, %v10882_v13  ;;  %11655 = vrot.lane.b32.xlu0 %v13140_v59, %s12714_s23 }
 0x269   :  { %11620 = vrot.lane.b32.xlu1 %v13166_v21, %s12713_s22 }
 0x26a   :  { %v11556_v48 = vpop.permute.xlu0 %11555 }
 0x26b   :  { %v11558_v37 = vunpack.i.h.bf16 %v11556_v48  ;;  %v11557_v26 = vunpack.i.l.bf16 %v11556_v48 }
 0x26c   :  { %11665 = vrot.lane.b32.xlu0 %v13192_v2, %s12714_s23 }
 0x26d   :  { %v10888_v7 = vpack.c.bf16 %v11558_v37, %v11557_v26  ;;  %11630 = vrot.lane.b32.xlu1 %v13218_v61, %s12713_s22 }
 0x26f   :  { %10890 = vmatprep.subr.msk.bf16.mxu0 %vm13134_vm1, %v10888_v7 }
 0x270   :  { %10893 = vmatpush3.bf16.xpose.msk.msra.mxu0 %vm13134_vm1, %v10888_v7  ;;  %11695 = vrot.lane.b32.xlu0 %v13142_v62, %s12715_s24 }
 0x271   :  { %11640 = vrot.lane.b32.xlu1 %v13271_v11, %s12713_s22 }
 0x272   :  { %v11561_v25 = vpop.permute.xlu1 %11560 }
 0x273   :  { %v11563_v29 = vunpack.i.h.bf16 %v11561_v25  ;;  %v11562_v33 = vunpack.i.l.bf16 %v11561_v25 }
 0x274   :  { %11700 = vrot.lane.b32.xlu0 %v13168_v24, %s12715_s24 }
 0x275   :  { %v10894_v44 = vpack.c.bf16 %v11563_v29, %v11562_v33  ;;  %11650 = vrot.lane.b32.xlu1 %v13332_v20, %s12713_s22 }
 0x277   :  { %10896 = vmatprep.subr.msk.bf16.mxu0 %vm13134_vm1, %v10894_v44 }
 0x278   :  { %10899 = vmatpush3.bf16.xpose.msk.msra.mxu0 %vm13134_vm1, %v10894_v44 }
 0x279   :  { %11660 = vrot.lane.b32.xlu1 %v13166_v21, %s12714_s23 }
 0x27a   :  { %v11566_v62 = vpop.permute.xlu0 %11565 }
 0x27b   :  { %v11568_v47 = vunpack.i.h.bf16 %v11566_v62  ;;  %v11567_v58 = vunpack.i.l.bf16 %v11566_v62 }
 0x27d   :  { %v10900_v18 = vpack.c.bf16 %v11568_v47, %v11567_v58  ;;  %11670 = vrot.lane.b32.xlu1 %v13218_v61, %s12714_s23 }
 0x27e   :  { %v11576_v24 = vpop.permute.xlu0 %11575 }
 0x27f   :  { %10902 = vmatprep.subr.msk.bf16.mxu0 %vm13134_vm1, %v10900_v18  ;;  %v11578_v34 = vunpack.i.h.bf16 %v11576_v24  ;;  %v11577_v55 = vunpack.i.l.bf16 %v11576_v24 }
 0x280   :  { %10905 = vmatpush3.bf16.xpose.msk.msra.mxu0 %vm13134_vm1, %v10900_v18 }
 0x281   :  { %11675 = vrot.lane.b32.xlu1 %v13244_v32, %s12714_s23  ;;  %v10944_v37 = vpack.c.bf16 %v11578_v34, %v11577_v55 }
 0x282   :  { %v11571_v63 = vpop.permute.xlu1 %11570  ;;  %v1304_v60 = vpop.permute.xlu0 %1303 }
 0x283   :  { %v11573_v35 = vunpack.i.h.bf16 %v11571_v63  ;;  %v11572_v23 = vunpack.i.l.bf16 %v11571_v63 }
 0x285   :  { %v10906_v28 = vpack.c.bf16 %v11573_v35, %v11572_v23  ;;  %11680 = vrot.lane.b32.xlu1 %v13271_v11, %s12714_s23  ;;  %v13737_v11 = vld [vmem:[%s17507_s1 + $0x78] sm:$0xff] }
 0x286   :  { %v11586_v13 = vpop.permute.xlu0 %11585  ;;  %v1302_v48 = vpop.permute.xlu1 %1301 }
 0x287   :  { %10908 = vmatprep.subr.msk.bf16.mxu0 %vm13134_vm1, %v10906_v28  ;;  %9840 = vmatprep.mubr.msk.f32.mxu0 %vm304_vm0, %v1302_v48  ;;  %v11588_v18 = vunpack.i.h.bf16 %v11586_v13  ;;  %v11587_v24 = vunpack.i.l.bf16 %v11586_v13 }
 0x288   :  { %10911 = vmatpush3.bf16.xpose.msk.msra.mxu0 %vm13134_vm1, %v10906_v28 }
 0x289   :  { %11685 = vrot.lane.b32.xlu1 %v13304_v53, %s12714_s23  ;;  %10946 = vmatprep.subr.msk.bf16.mxu0 %vm13134_vm1, %v10944_v37  ;;  %v10956_v34 = vpack.c.bf16 %v11588_v18, %v11587_v24 }
 0x28a   :  { %v11596_v26 = vpop.permute.xlu0 %11595  ;;  %v11581_v7 = vpop.permute.xlu1 %11580 }
 0x28b   :  { %v11583_v25 = vunpack.i.h.bf16 %v11581_v7  ;;  %v11582_v29 = vunpack.i.l.bf16 %v11581_v7 }
 0x28d   :  { %11690 = vrot.lane.b32.xlu1 %v13332_v20, %s12714_s23  ;;  %v10950_v62 = vpack.c.bf16 %v11583_v25, %v11582_v29  ;;  %v11598_v25 = vunpack.i.h.bf16 %v11596_v26  ;;  %v11597_v29 = vunpack.i.l.bf16 %v11596_v26  ;;  %v13719_v20 = vld [vmem:[%s17507_s1 + $0x68] sm:$0xff] }
 0x28e   :  { %v1308_v33 = vpop.permute.xlu0 %1307  ;;  %v11591_v44 = vpop.permute.xlu1 %11590 }
 0x28f   :  { %9841 = vmatmul.mubr.msk.f32.vlgmr.msra.gmra.mrb[48].mxu0 %vm304_vm0, %v1304_v60  ;;  %v11593_v35 = vunpack.i.h.bf16 %v11591_v44  ;;  %v11592_v23 = vunpack.i.l.bf16 %v11591_v44 }
 0x290   :  { %10949 = vmatpush3.bf16.xpose.msk.msra.mxu0 %vm13134_vm1, %v10944_v37 }
 0x291   :  { %11705 = vrot.lane.b32.xlu1 %v13194_v9, %s12715_s24  ;;  %10952 = vmatprep.subr.msk.bf16.mxu0 %vm13134_vm1, %v10950_v62  ;;  %v10962_v48 = vpack.c.bf16 %v11593_v35, %v11592_v23 }
 0x292   :  { %v1310_v47 = vpop.permute.xlu0 %1309  ;;  %v1306_v58 = vpop.permute.xlu1 %1305 }
 0x293   :  { %9843 = vmatprep.mubr.msk.f32.mxu0 %vm304_vm0, %v1306_v58 }
 0x294   :  { %9844 = vmatmul.mubr.msk.f32.gmra.mrb[50].mxu0 %vm304_vm0, %v1308_v33 }
 0x295   :  { %9846 = vmatprep.mubr.msk.f32.mxu0 %vm304_vm0, %v1310_v47 }
 0x296   :  { %v1314_v63 = vpop.permute.xlu0 %1313  ;;  %v11601_v60 = vpop.permute.xlu1 %11600 }
 0x297   :  { %v11603_v58 = vunpack.i.h.bf16 %v11601_v60  ;;  %v11602_v26 = vunpack.i.l.bf16 %v11601_v60 }
 0x298   :  { %10955 = vmatpush3.bf16.xpose.msk.msra.mxu0 %vm13134_vm1, %v10950_v62  ;;  %v10968_v62 = vpack.c.bf16 %v11598_v25, %v11597_v29 }
 0x299   :  { %10958 = vmatprep.subr.msk.bf16.mxu0 %vm13134_vm1, %v10956_v34 }
 0x29a   :  { %v11606_v9 = vpop.permute.xlu0 %11605  ;;  %v1312_v55 = vpop.permute.xlu1 %1311 }
 0x29b   :  { %9847 = vmatmul.mubr.msk.f32.gmra.mrb[52].mxu0 %vm304_vm0, %v1312_v55  ;;  %v11608_v35 = vunpack.i.h.bf16 %v11606_v9  ;;  %v11607_v23 = vunpack.i.l.bf16 %v11606_v9 }
 0x29c   :  { %9849 = vmatprep.mubr.msk.f32.mxu0 %vm304_vm0, %v1314_v63  ;;  %v10974_v63 = vpack.c.bf16 %v11603_v58, %v11602_v26 }
 0x29e   :  { %v1320_v28 = vpop.permute.xlu0 %1319  ;;  %v1316_v13 = vpop.permute.xlu1 %1315 }
 0x29f   :  { %9850 = vmatmul.mubr.msk.f32.gmra.mrb[54].mxu0 %vm304_vm0, %v1316_v13 }
 0x2a0   :  { %10961 = vmatpush3.bf16.xpose.msk.msra.mxu0 %vm13134_vm1, %v10956_v34 }
 0x2a1   :  { %10964 = vmatprep.subr.msk.bf16.mxu0 %vm13134_vm1, %v10962_v48 }
 0x2a2   :  { %v1324_v37 = vpop.permute.xlu0 %1323  ;;  %v1318_v7 = vpop.permute.xlu1 %1317 }
 0x2a3   :  { %9852 = vmatprep.mubr.msk.f32.mxu0 %vm304_vm0, %v1318_v7 }
 0x2a4   :  { %9853 = vmatmul.mubr.msk.f32.gmra.mrb[56].mxu0 %vm304_vm0, %v1320_v28  ;;  %v10980_v28 = vpack.c.bf16 %v11608_v35, %v11607_v23 }
 0x2a6   :  { %v1322_v33 = vpop.permute.xlu1 %1321  ;;  %v1326_v44 = vpop.permute.xlu0 %1325 }
 0x2a7   :  { %9855 = vmatprep.mubr.msk.f32.mxu0 %vm304_vm0, %v1322_v33 }
 0x2a8   :  { %9856 = vmatmul.mubr.msk.f32.gmra.mrb[58].mxu0 %vm304_vm0, %v1324_v37 }
 0x2a9   :  { %10967 = vmatpush3.bf16.xpose.msk.msra.mxu0 %vm13134_vm1, %v10962_v48  ;;  %9858 = vmatprep.mubr.msk.f32.mxu0 %vm304_vm0, %v1326_v44 }
 0x2aa   :  { %10970 = vmatprep.subr.msk.bf16.mxu0 %vm13134_vm1, %v10968_v62  ;;  %v11611_v47 = vpop.permute.xlu1 %11610  ;;  %v1330_v18 = vpop.permute.xlu0 %1329 }
 0x2ab   :  { %v11613_v48 = vunpack.i.h.bf16 %v11611_v47  ;;  %v11612_v37 = vunpack.i.l.bf16 %v11611_v47 }
 0x2ad   :  { %v10986_v25 = vpack.c.bf16 %v11613_v48, %v11612_v37 }
 0x2ae   :  { %v1328_v24 = vpop.permute.xlu1 %1327  ;;  %v2089_v55 = vpop.permute.xlu0 %2088 }
 0x2af   :  { %9859 = vmatmul.mubr.msk.f32.gmra.mrb[60].mxu0 %vm304_vm0, %v1328_v24 }
 0x2b0   :  { %9861 = vmatprep.mubr.msk.f32.mxu0 %vm304_vm0, %v1330_v18 }
 0x2b1   :  { %10973 = vmatpush3.bf16.xpose.msk.msra.mxu0 %vm13134_vm1, %v10968_v62 }
 0x2b2   :  { %10976 = vmatprep.subr.msk.bf16.mxu0 %vm13134_vm1, %v10974_v63  ;;  %v1332_v34 = vpop.permute.xlu1 %1331  ;;  %v2093_v29 = vpop.permute.xlu0 %2092 }
 0x2b3   :  { %9862 = vmatmul.mubr.msk.f32.gmra.mrb[62].mxu0 %vm304_vm0, %v1332_v34 }
 0x2b4   :  { %9952 = vmatprep.mubr.msk.f32.mxu0 %vm304_vm0, %v2089_v55 }
 0x2b6   :  { %v2091_v60 = vpop.permute.xlu1 %2090  ;;  %v2097_v44 = vpop.permute.xlu0 %2096 }
 0x2b9   :  { %10979 = vmatpush3.bf16.xpose.msk.msra.mxu0 %vm13134_vm1, %v10974_v63 }
 0x2ba   :  { %10982 = vmatprep.subr.msk.bf16.mxu0 %vm13134_vm1, %v10980_v28  ;;  %v2095_v13 = vpop.permute.xlu1 %2094  ;;  %v2101_v26 = vpop.permute.xlu0 %2100 }
 0x2be   :  { %v2099_v7 = vpop.permute.xlu1 %2098  ;;  %v2105_v18 = vpop.permute.xlu0 %2104 }
 0x2c1   :  { %10985 = vmatpush3.bf16.xpose.msk.msra.mxu0 %vm13134_vm1, %v10980_v28 }
 0x2c2   :  { %10988 = vmatprep.subr.msk.bf16.mxu0 %vm13134_vm1, %v10986_v25  ;;  %v2109_v35 = vpop.permute.xlu0 %2108 }
 0x2c3   :  { %v2103_v9 = vpop.permute.xlu1 %2102 }
 0x2c6   :  { %v2113_v23 = vpop.permute.xlu0 %2112 }
 0x2c7   :  { %v2107_v33 = vpop.permute.xlu1 %2106 }
 0x2c9   :  { %10991 = vmatpush3.bf16.xpose.msk.msra.mxu0 %vm13134_vm1, %v10986_v25 }
 0x2cb   :  { %v2111_v62 = vpop.permute.xlu1 %2110 }
 0x2cf   :  { %v2115_v58 = vpop.permute.xlu1 %2114 }
 0x2d0   :  { %9953 = vmatmul.mubr.msk.f32.vlgmr.msra.gmra.mrb[64].mxu0 %vm304_vm0, %v2091_v60  ;;  %v2117_v60 = vpop.permute.xlu0 %2116 }
 0x2d1   :  { %9955 = vmatprep.mubr.msk.f32.mxu0 %vm304_vm0, %v2093_v29 }
 0x2d3   :  { %v2119_v47 = vpop.permute.xlu1 %2118 }
 0x2d4   :  { %9956 = vmatmul.mubr.msk.f32.gmra.mrb[66].mxu0 %vm304_vm0, %v2095_v13  ;;  %v13604_v13 = vld [vmem:[%s17507_s1 + $0x8] sm:$0xff]  ;;  %v13755_v59 = vpop.permute.xlu0 %11625 }
 0x2d5   :  { %9958 = vmatprep.mubr.msk.f32.mxu0 %vm304_vm0, %v2097_v44  ;;  %v13620_v44 = vld [vmem:[%s17507_s1 + $0x18] sm:$0xff] }
 0x2d7   :  { %v11616_v24 = vpop.permute.xlu1 %11615 }
 0x2d8   :  { %v11618_v63 = vunpack.i.h.bf16 %v11616_v24  ;;  %v11617_v34 = vunpack.i.l.bf16 %v11616_v24  ;;  %9959 = vmatmul.mubr.msk.f32.gmra.mrb[68].mxu0 %vm304_vm0, %v2099_v7  ;;  %v13609_v7 = vld [vmem:[%s17507_s1] sm:$0xff]  ;;  %v13759_v27 = vpop.permute.xlu0 %11635 }
 0x2d9   :  { %9961 = vmatprep.mubr.msk.f32.mxu0 %vm304_vm0, %v2101_v26 }
 0x2da   :  { %v13589_v55 = vpack.c.bf16 %v11618_v63, %v11617_v34  ;;  %v13630_v63 = vld [vmem:[%s17507_s1 + $0x10] sm:$0xff]  ;;  %v13635_v34 = vld [vmem:[%s17507_s1 + $0x20] sm:$0xff] }
 0x2dc   :  { %10913 = vmatprep.subr.bf16.mxu1 %v13589_v55  ;;  %9962 = vmatmul.mubr.msk.f32.gmra.mrb[70].mxu0 %vm304_vm0, %v2103_v9  ;;  %v13763_v49 = vpop.permute.xlu0 %11645 }
 0x2dd   :  { %9964 = vmatprep.mubr.msk.f32.mxu0 %vm304_vm0, %v2105_v18  ;;  %17793 = vst [vmem:[#allocation72_spill] sm:$0xff] %v13763_v49 }
 0x2e0   :  { %9965 = vmatmul.mubr.msk.f32.gmra.mrb[72].mxu0 %vm304_vm0, %v2107_v33  ;;  %v13775_v16 = vpop.permute.xlu0 %11655 }
 0x2e1   :  { %9967 = vmatprep.mubr.msk.f32.mxu0 %vm304_vm0, %v2109_v35  ;;  %17795 = vst [vmem:[#allocation74_spill] sm:$0xff] %v13775_v16 }
 0x2e4   :  { %9968 = vmatmul.mubr.msk.f32.gmra.mrb[74].mxu0 %vm304_vm0, %v2111_v62 }
 0x2e5   :  { %9970 = vmatprep.mubr.msk.f32.mxu0 %vm304_vm0, %v2113_v23 }
 0x2e8   :  { %9971 = vmatmul.mubr.msk.f32.gmra.mrb[76].mxu0 %vm304_vm0, %v2115_v58 }
 0x2e9   :  { %9973 = vmatprep.mubr.msk.f32.mxu0 %vm304_vm0, %v2117_v60 }
 0x2ec   :  { %v9730_v28 = vpop.f32.mrb[32].mxu1  ;;  %9974 = vmatmul.mubr.msk.f32.gmra.mrb[78].mxu0 %vm304_vm0, %v2119_v47 }
 0x2ed   :  { %v917_v48 = vmul.f32 0.17677669, %v9730_v28  ;;  %v837_v37 = vpop.f32.mrb[33].mxu1 }
 0x2ee   :  { %v916_v25 = vmul.f32 0.17677669, %v837_v37 }
 0x2ef   :  { %v13612_v9 = vadd.f32 %v917_v48, %v13604_v13 }
 0x2f0   :  { %v9733_v29 = vpop.f32.mrb[34].mxu1  ;;  %v13615_v33 = vadd.f32 %v916_v25, %v13609_v7  ;;  %v13647_v25 = vld [vmem:[%s17507_s1 + $0x28] sm:$0xff] }
 0x2f1   :  { %v919_v62 = vmul.f32 0.17677669, %v9733_v29  ;;  %950 = vmax.xlane.f32.xlu1 %v13612_v9  ;;  %v847_v58 = vpop.f32.mrb[35].mxu1  ;;  %v13652_v29 = vld [vmem:[%s17507_s1 + $0x30] sm:$0xff] }
 0x2f2   :  { %948 = vmax.xlane.f32.xlu0 %v13615_v33  ;;  %v918_v47 = vmul.f32 0.17677669, %v847_v58 }
 0x2f3   :  { %v13625_v26 = vadd.f32 %v919_v62, %v13620_v44 }
 0x2f4   :  { %v9736_v18 = vpop.f32.mrb[36].mxu1  ;;  %v13639_v28 = vadd.f32 %v918_v47, %v13630_v63 }
 0x2f5   :  { %v857_v24 = vpop.f32.mrb[37].mxu1  ;;  %v921_v23 = vmul.f32 0.17677669, %v9736_v18 }
 0x2f6   :  { %v920_v35 = vmul.f32 0.17677669, %v857_v24  ;;  %954 = vmax.xlane.f32.xlu0 %v13625_v26 }
 0x2f7   :  { %v13657_v18 = vadd.f32 %v921_v23, %v13647_v25 }
 0x2f8   :  { %v9739_v60 = vpop.f32.mrb[38].mxu1  ;;  %v13642_v48 = vadd.f32 %v920_v35, %v13635_v34 }
 0x2f9   :  { %v867_v37 = vpop.f32.mrb[39].mxu1  ;;  %v923_v58 = vmul.f32 0.17677669, %v9739_v60 }
 0x2fa   :  { %v922_v62 = vmul.f32 0.17677669, %v867_v37  ;;  %952 = vmax.xlane.f32.xlu0 %v13639_v28  ;;  %956 = vmax.xlane.f32.xlu1 %v13642_v48  ;;  %v13670_v37 = vld [vmem:[%s17507_s1 + $0x40] sm:$0xff] }
 0x2fc   :  { %v9742_v47 = vpop.f32.mrb[40].mxu1  ;;  %v13660_v24 = vadd.f32 %v922_v62, %v13652_v29  ;;  %v13675_v62 = vadd.f32 %v923_v58, %v13665_v8 }
 0x2fd   :  { %v877_v35 = vpop.f32.mrb[41].mxu1  ;;  %v925_v23 = vmul.f32 0.17677669, %v9742_v47 }
 0x2fe   :  { %v924_v39 = vmul.f32 0.17677669, %v877_v35  ;;  %958 = vmax.xlane.f32.xlu0 %v13657_v18  ;;  %960 = vmax.xlane.f32.xlu1 %v13660_v24  ;;  %v13688_v35 = vld [vmem:[%s17507_s1 + $0x50] sm:$0xff] }
 0x300   :  { %v9745_v60 = vpop.f32.mrb[42].mxu1  ;;  %v13678_v5 = vadd.f32 %v924_v39, %v13670_v37  ;;  %v13693_v39 = vadd.f32 %v925_v23, %v13683_v50 }
 0x301   :  { %v887_v17 = vpop.f32.mrb[43].mxu1  ;;  %v927_v58 = vmul.f32 0.17677669, %v9745_v60 }
 0x302   :  { %v926_v45 = vmul.f32 0.17677669, %v887_v17  ;;  %962 = vmax.xlane.f32.xlu0 %v13675_v62  ;;  %964 = vmax.xlane.f32.xlu1 %v13678_v5  ;;  %v13706_v17 = vld [vmem:[%s17507_s1 + $0x60] sm:$0xff] }
 0x304   :  { %v9748_v47 = vpop.f32.mrb[44].mxu1  ;;  %v13696_v56 = vadd.f32 %v926_v45, %v13688_v35  ;;  %v13711_v45 = vadd.f32 %v927_v58, %v13701_v3 }
 0x305   :  { %v897_v54 = vpop.f32.mrb[45].mxu1  ;;  %v929_v23 = vmul.f32 0.17677669, %v9748_v47 }
 0x306   :  { %v928_v15 = vmul.f32 0.17677669, %v897_v54  ;;  %966 = vmax.xlane.f32.xlu0 %v13693_v39  ;;  %968 = vmax.xlane.f32.xlu1 %v13696_v56  ;;  %v13724_v54 = vld [vmem:[%s17507_s1 + $0x70] sm:$0xff] }
 0x308   :  { %v9751_v60 = vpop.f32.mrb[46].mxu1  ;;  %v13714_v46 = vadd.f32 %v928_v15, %v13706_v17  ;;  %v13729_v15 = vadd.f32 %v929_v23, %v13719_v20 }
 0x309   :  { %v907_v31 = vpop.f32.mrb[47].mxu1  ;;  %v931_v58 = vmul.f32 0.17677669, %v9751_v60  ;;  %v13745_v60 = vpop.permute.xlu1 %11620 }
 0x30a   :  { %v930_v53 = vmul.f32 0.17677669, %v907_v31  ;;  %970 = vmax.xlane.f32.xlu0 %v13711_v45  ;;  %972 = vmax.xlane.f32.xlu1 %v13714_v46 }
 0x30b   :  { %v13742_v31 = vadd.f32 %v931_v58, %v13737_v11 }
 0x30c   :  { %v13732_v47 = vadd.f32 %v930_v53, %v13724_v54 }
 0x30d   :  { %v13747_v23 = vpop.permute.xlu1 %11630 }
 0x30e   :  { %974 = vmax.xlane.f32.xlu0 %v13729_v15  ;;  %976 = vmax.xlane.f32.xlu1 %v13732_v47 }
 0x311   :  { %v13749_v53 = vpop.permute.xlu1 %11640 }
 0x312   :  { %978 = vmax.xlane.f32.xlu0 %v13742_v31  ;;  %17788 = vst [vmem:[#allocation67_spill] sm:$0xff] %v13749_v53 }
 0x315   :  { %v13751_v32 = vpop.permute.xlu1 %11650 }
 0x316   :  { %17789 = vst [vmem:[#allocation68_spill] sm:$0xff] %v13751_v32 }
 0x319   :  { %v13753_v2 = vpop.permute.xlu1 %11660 }
 0x31a   :  { %17790 = vst [vmem:[#allocation69_spill] sm:$0xff] %v13753_v2 }
 0x31d   :  { %v13757_v4 = vpop.permute.xlu1 %11670 }
 0x31e   :  { %17791 = vst [vmem:[#allocation70_spill] sm:$0xff] %v13757_v4 }
 0x321   :  { %v13761_v58 = vpop.permute.xlu1 %11675 }
 0x322   :  { %17792 = vst [vmem:[#allocation71_spill] sm:$0xff] %v13761_v58 }
 0x325   :  { %v13772_v0 = vpop.permute.xlu1 %11680 }
 0x326   :  { %17794 = vst [vmem:[#allocation73_spill] sm:$0xff] %v13772_v0 }
 0x362   :  { %v9842_v36 = vpop.f32.mrb[48].mxu0 }
 0x363   :  { %v1575_v42 = vmul.f32 0.17677669, %v9842_v36  ;;  %v1495_v52 = vpop.f32.mrb[49].mxu0 }
 0x364   :  { %v1574_v10 = vmul.f32 0.17677669, %v1495_v52 }
 0x365   :  { %v13766_v61 = vadd.f32 %v1575_v42, %v13604_v13 }
 0x366   :  { %v13769_v51 = vadd.f32 %v1574_v10, %v13609_v7  ;;  %v13785_v10 = vpop.permute.xlu1 %11685 }
 0x367   :  { %v9845_v21 = vpop.f32.mrb[50].mxu0  ;;  %1608 = vmax.xlane.f32.xlu0 %v13766_v61  ;;  %17796 = vst [vmem:[#allocation75_spill] sm:$0xff] %v13785_v10 }
 0x368   :  { %v1577_v57 = vmul.f32 0.17677669, %v9845_v21  ;;  %v1505_v14 = vpop.f32.mrb[51].mxu0  ;;  %1606 = vmax.xlane.f32.xlu1 %v13769_v51  ;;  %v13787_v21 = vpop.permute.xlu0 %11665 }
 0x369   :  { %v1576_v36 = vmul.f32 0.17677669, %v1505_v14  ;;  %17797 = vst [vmem:[#allocation76_spill] sm:$0xff] %v13787_v21 }
 0x36a   :  { %v13778_v52 = vadd.f32 %v1577_v57, %v13620_v44  ;;  %v13796_v19 = vpop.permute.xlu1 %11690 }
 0x36b   :  { %v13781_v42 = vadd.f32 %v1576_v36, %v13630_v63  ;;  %17798 = vst [vmem:[#allocation77_spill] sm:$0xff] %v13796_v19 }
 0x36c   :  { %1612 = vmax.xlane.f32.xlu0 %v13778_v52  ;;  %v13799_v4 = vpop.permute.xlu0 %11695 }
 0x36d   :  { %1610 = vmax.xlane.f32.xlu1 %v13781_v42  ;;  %17799 = vst [vmem:[#allocation78_spill] sm:$0xff] %v13799_v4 }
 0x36e   :  { %v9848_v22 = vpop.f32.mrb[52].mxu0  ;;  %v13809_v19 = vpop.permute.xlu1 %11705 }
 0x36f   :  { %v1579_v12 = vmul.f32 0.17677669, %v9848_v22  ;;  %v1515_v41 = vpop.f32.mrb[53].mxu0  ;;  %17800 = vst [vmem:[#allocation79_spill] sm:$0xff] %v13809_v19 }
 0x370   :  { %v1578_v0 = vmul.f32 0.17677669, %v1515_v41  ;;  %v13814_v4 = vpop.permute.xlu0 %11700 }
 0x371   :  { %v13790_v14 = vadd.f32 %v1579_v12, %v13647_v25  ;;  %17801 = vst [vmem:[#allocation80_spill] sm:$0xff] %v13814_v4 }
 0x372   :  { %v9851_v57 = vpop.f32.mrb[54].mxu0  ;;  %v13793_v1 = vadd.f32 %v1578_v0, %v13635_v34 }
 0x373   :  { %v1581_v36 = vmul.f32 0.17677669, %v9851_v57  ;;  %v1525_v58 = vpop.f32.mrb[55].mxu0  ;;  %1616 = vmax.xlane.f32.xlu0 %v13790_v14 }
 0x374   :  { %v1580_v10 = vmul.f32 0.17677669, %v1525_v58  ;;  %1614 = vmax.xlane.f32.xlu1 %v13793_v1 }
 0x375   :  { %v13802_v41 = vadd.f32 %v1581_v36, %v13665_v8 }
 0x376   :  { %v13805_v12 = vadd.f32 %v1580_v10, %v13652_v29 }
 0x377   :  { %v9854_v22 = vpop.f32.mrb[56].mxu0  ;;  %1620 = vmax.xlane.f32.xlu0 %v13802_v41 }
 0x378   :  { %v1583_v0 = vmul.f32 0.17677669, %v9854_v22  ;;  %v1535_v57 = vpop.f32.mrb[57].mxu0  ;;  %1618 = vmax.xlane.f32.xlu1 %v13805_v12 }
 0x379   :  { %v1582_v21 = vmul.f32 0.17677669, %v1535_v57 }
 0x37a   :  { %v13812_v58 = vadd.f32 %v1583_v0, %v13683_v50 }
 0x37b   :  { %v9857_v36 = vpop.f32.mrb[58].mxu0  ;;  %v13817_v2 = vadd.f32 %v1582_v21, %v13670_v37 }
 0x37c   :  { %v1585_v10 = vmul.f32 0.17677669, %v9857_v36  ;;  %v1545_v43 = vpop.f32.mrb[59].mxu0  ;;  %1624 = vmax.xlane.f32.xlu0 %v13812_v58 }
 0x37d   :  { %v1584_v22 = vmul.f32 0.17677669, %v1545_v43  ;;  %1622 = vmax.xlane.f32.xlu1 %v13817_v2 }
 0x37e   :  { %v951_v38 = vpop.xlane.xlu1 %950  ;;  %v13822_v57 = vadd.f32 %v1585_v10, %v13701_v3 }
 0x37f   :  { %v981_v19 = vmax.f32 %v951_v38, 0.0  ;;  %v949_v0 = vpop.xlane.xlu0 %948  ;;  %v13825_v6 = vadd.f32 %v1584_v22, %v13688_v35 }
 0x380   :  { %v980_v4 = vmax.f32 %v949_v0, 0.0  ;;  %1628 = vmax.xlane.f32.xlu0 %v13822_v57 }
 0x381   :  { %v997_v21 = vsub.f32 %v13612_v9, %v981_v19  ;;  %1626 = vmax.xlane.f32.xlu1 %v13825_v6 }
 0x382   :  { %v996_v43 = vsub.f32 %v13615_v33, %v980_v4  ;;  %v9860_v36 = vpop.f32.mrb[60].mxu0 }
 0x383   :  { %v1014_v40 = vmul.f32 1.442695, %v997_v21  ;;  %v1587_v16 = vmul.f32 0.17677669, %v9860_v36  ;;  %v955_v32 = vpop.xlane.xlu0 %954  ;;  %v1555_v10 = vpop.f32.mrb[61].mxu0 }
 0x384   :  { %v1012_v49 = vmul.f32 1.442695, %v996_v43  ;;  %v983_v38 = vmax.f32 %v955_v32, 0.0  ;;  %v1586_v30 = vmul.f32 0.17677669, %v1555_v10 }
 0x385   :  { %12016 = vpow2.f32 %v1014_v40  ;;  %v13832_v22 = vadd.f32 %v1587_v16, %v13719_v20 }
 0x386   :  { %12018 = vpow2.f32 %v1012_v49  ;;  %v999_v0 = vsub.f32 %v13625_v26, %v983_v38  ;;  %v13836_v19 = vadd.f32 %v1586_v30, %v13706_v17  ;;  %v9863_v9 = vpop.f32.mrb[62].mxu0 }
 0x387   :  { %v1589_v4 = vmul.f32 0.17677669, %v9863_v9  ;;  %v953_v33 = vpop.xlane.xlu0 %952  ;;  %v957_v21 = vpop.xlane.xlu1 %956  ;;  %1632 = vmax.xlane.f32.xlu0 %v13832_v22 }
 0x388   :  { %v1018_v36 = vmul.f32 1.442695, %v999_v0  ;;  %v982_v43 = vmax.f32 %v953_v33, 0.0  ;;  %v984_v32 = vmax.f32 %v957_v21, 0.0  ;;  %v1565_v10 = vpop.f32.mrb[63].mxu0  ;;  %1630 = vmax.xlane.f32.xlu1 %v13836_v19 }
 0x389   :  { %v1588_v40 = vmul.f32 0.17677669, %v1565_v10  ;;  %v13841_v49 = vadd.f32 %v1589_v4, %v13737_v11 }
 0x38a   :  { %12020 = vpow2.f32 %v1018_v36  ;;  %v998_v30 = vsub.f32 %v13639_v28, %v982_v43  ;;  %v1000_v16 = vsub.f32 %v13642_v48, %v984_v32 }
 0x38b   :  { %v13846_v26 = vadd.f32 %v1588_v40, %v13724_v54  ;;  %v959_v38 = vpop.xlane.xlu0 %958  ;;  %v961_v9 = vpop.xlane.xlu1 %960  ;;  %1636 = vmax.xlane.f32.xlu0 %v13841_v49 }
 0x38c   :  { %v1016_v0 = vmul.f32 1.442695, %v998_v30  ;;  %v985_v33 = vmax.f32 %v959_v38, 0.0  ;;  %v986_v21 = vmax.f32 %v961_v9, 0.0  ;;  %v1020_v53 = vmul.f32 1.442695, %v1000_v16 }
 0x38d   :  { %1634 = vmax.xlane.f32.xlu1 %v13846_v26 }
 0x38e   :  { %12022 = vpow2.f32 %v1016_v0  ;;  %v1001_v4 = vsub.f32 %v13657_v18, %v985_v33  ;;  %v1002_v28 = vsub.f32 %v13660_v24, %v986_v21 }
 0x38f   :  { %v13852_v36 = vpop.eup %12016  ;;  %v963_v48 = vpop.xlane.xlu0 %962  ;;  %12024 = vpow2.f32 %v1020_v53 }
 0x390   :  { %v965_v43 = vpop.xlane.xlu1 %964  ;;  %v13854_v32 = vpop.eup %12018  ;;  %v1022_v10 = vmul.f32 1.442695, %v1001_v4  ;;  %v987_v40 = vmax.f32 %v963_v48, 0.0  ;;  %1046 = vadd.xlane.f32.xlu0 %v13852_v36  ;;  %v1024_v30 = vmul.f32 1.442695, %v1002_v28 }
 0x391   :  { %1044 = vadd.xlane.f32.xlu1 %v13854_v32  ;;  %v988_v18 = vmax.f32 %v965_v43, 0.0 }
 0x392   :  { %12026 = vpow2.f32 %v1022_v10  ;;  %v1003_v16 = vsub.f32 %v13675_v62, %v987_v40 }
 0x393   :  { %v967_v38 = vpop.xlane.xlu0 %966  ;;  %12028 = vpow2.f32 %v1024_v30  ;;  %v1004_v33 = vsub.f32 %v13678_v5, %v988_v18 }
 0x394   :  { %v13859_v24 = vpop.eup %12020  ;;  %v1026_v9 = vmul.f32 1.442695, %v1003_v16  ;;  %v989_v0 = vmax.f32 %v967_v38, 0.0  ;;  %v969_v10 = vpop.xlane.xlu1 %968 }
 0x395   :  { %1050 = vadd.xlane.f32.xlu0 %v13859_v24  ;;  %v1028_v62 = vmul.f32 1.442695, %v1004_v33  ;;  %v990_v5 = vmax.f32 %v969_v10, 0.0 }
 0x396   :  { %12030 = vpow2.f32 %v1026_v9  ;;  %v1005_v53 = vsub.f32 %v13693_v39, %v989_v0 }
 0x397   :  { %v971_v21 = vpop.xlane.xlu0 %970  ;;  %v1006_v38 = vsub.f32 %v13696_v56, %v990_v5 }
 0x398   :  { %v13864_v4 = vpop.eup %12022  ;;  %v1030_v28 = vmul.f32 1.442695, %v1005_v53  ;;  %v991_v48 = vmax.f32 %v971_v21, 0.0  ;;  %v973_v0 = vpop.xlane.xlu1 %972 }
 0x399   :  { %1048 = vadd.xlane.f32.xlu1 %v13864_v4  ;;  %v13867_v43 = vpop.eup %12024 }
 0x39a   :  { %12032 = vpow2.f32 %v1030_v28  ;;  %17802 = vst [vmem:[#allocation81_spill] sm:$0xff] %v13867_v43  ;;  %v1007_v39 = vsub.f32 %v13711_v45, %v991_v48  ;;  %v1032_v48 = vmul.f32 1.442695, %v1006_v38 }
 0x39b   :  { %12034 = vpow2.f32 %v1028_v62  ;;  %v975_v16 = vpop.xlane.xlu0 %974  ;;  %v992_v62 = vmax.f32 %v973_v0, 0.0 }
 0x39c   :  { %v13869_v40 = vpop.eup %12026  ;;  %v1034_v9 = vmul.f32 1.442695, %v1007_v39  ;;  %v993_v33 = vmax.f32 %v975_v16, 0.0  ;;  %v977_v0 = vpop.xlane.xlu1 %976 }
 0x39d   :  { %17803 = vst [vmem:[#allocation82_spill] sm:$0xff] %v13869_v40  ;;  %1054 = vadd.xlane.f32.xlu0 %v13869_v40  ;;  %1052 = vadd.xlane.f32.xlu1 %v13867_v43  ;;  %v13874_v30 = vpop.eup %12028  ;;  %v1008_v40 = vsub.f32 %v13714_v46, %v992_v62  ;;  %v994_v62 = vmax.f32 %v977_v0, 0.0 }
 0x39e   :  { %17804 = vst [vmem:[#allocation83_spill] sm:$0xff] %v13874_v30  ;;  %12036 = vpow2.f32 %v1034_v9  ;;  %v1009_v10 = vsub.f32 %v13729_v15, %v993_v33 }
 0x39f   :  { %12038 = vpow2.f32 %v1032_v48  ;;  %v1036_v46 = vmul.f32 1.442695, %v1008_v40 }
 0x3a0   :  { %v13876_v18 = vpop.eup %12030  ;;  %v1038_v38 = vmul.f32 1.442695, %v1009_v10 }
 0x3a1   :  { %17805 = vst [vmem:[#allocation84_spill] sm:$0xff] %v13876_v18  ;;  %1058 = vadd.xlane.f32.xlu0 %v13876_v18  ;;  %1056 = vadd.xlane.f32.xlu1 %v13874_v30  ;;  %v979_v18 = vpop.xlane.xlu0 %978 }
 0x3a2   :  { %v995_v9 = vmax.f32 %v979_v18, 0.0  ;;  %12040 = vpow2.f32 %v1038_v38 }
 0x3a3   :  { %v9954_v53 = vpop.f32.mrb[64].mxu0  ;;  %12042 = vpow2.f32 %v1036_v46 }
 0x3a4   :  { %v13881_v21 = vpop.eup %12032  ;;  %v2282_v28 = vpop.f32.mrb[65].mxu0  ;;  %v2362_v43 = vmul.f32 0.17677669, %v9954_v53 }
 0x3a5   :  { %v2361_v45 = vmul.f32 0.17677669, %v2282_v28  ;;  %1062 = vadd.xlane.f32.xlu0 %v13881_v21  ;;  %v13888_v5 = vpop.eup %12034 }
 0x3a7   :  { %v13886_v30 = vadd.f32 %v2361_v45, %v13609_v7  ;;  %v9957_v56 = vpop.f32.mrb[66].mxu0  ;;  %v13897_v7 = vadd.f32 %v2362_v43, %v13604_v13  ;;  %v1011_v45 = vsub.f32 %v13742_v31, %v995_v9  ;;  %v1010_v43 = vsub.f32 %v13732_v47, %v994_v62 }
 0x3a8   :  { %v2364_v39 = vmul.f32 0.17677669, %v9957_v56  ;;  %v2292_v16 = vpop.f32.mrb[67].mxu0  ;;  %v13905_v10 = vpop.eup %12036 }
 0x3a9   :  { %1060 = vadd.xlane.f32.xlu0 %v13888_v5  ;;  %2393 = vmax.xlane.f32.xlu1 %v13886_v30  ;;  %v2363_v33 = vmul.f32 0.17677669, %v2292_v16  ;;  %v1042_v40 = vmul.f32 1.442695, %v1011_v45  ;;  %v1040_v38 = vmul.f32 1.442695, %v1010_v43 }
 0x3aa   :  { %v13894_v15 = vadd.f32 %v2364_v39, %v13620_v44 }
 0x3ab   :  { %v9960_v53 = vpop.f32.mrb[68].mxu0  ;;  %v13903_v18 = vadd.f32 %v2363_v33, %v13630_v63  ;;  %v13913_v63 = vpop.eup %12038  ;;  %12044 = vpow2.f32 %v1042_v40 }
 0x3ac   :  { %v2302_v28 = vpop.f32.mrb[69].mxu0  ;;  %v2366_v44 = vmul.f32 0.17677669, %v9960_v53  ;;  %v13920_v33 = vpop.eup %12040  ;;  %12046 = vpow2.f32 %v1040_v38 }
 0x3ad   :  { %2395 = vmax.xlane.f32.xlu0 %v13897_v7  ;;  %2399 = vmax.xlane.f32.xlu1 %v13894_v15  ;;  %v2365_v31 = vmul.f32 0.17677669, %v2302_v28  ;;  %v13927_v62 = vpop.eup %12042 }
 0x3ae   :  { %v13911_v56 = vadd.f32 %v2366_v44, %v13647_v25 }
 0x3af   :  { %v9963_v48 = vpop.f32.mrb[70].mxu0  ;;  %v13918_v9 = vadd.f32 %v2365_v31, %v13635_v34 }
 0x3b0   :  { %v2312_v13 = vpop.f32.mrb[71].mxu0  ;;  %v2368_v0 = vmul.f32 0.17677669, %v9963_v48 }
 0x3b1   :  { %1066 = vadd.xlane.f32.xlu0 %v13905_v10  ;;  %2397 = vmax.xlane.f32.xlu1 %v13903_v18  ;;  %v2367_v28 = vmul.f32 0.17677669, %v2312_v13 }
 0x3b2   :  { %v13925_v53 = vadd.f32 %v2368_v0, %v13665_v8 }
 0x3b3   :  { %v9966_v39 = vpop.f32.mrb[72].mxu0  ;;  %v13932_v34 = vadd.f32 %v2367_v28, %v13652_v29 }
 0x3b4   :  { %v2322_v16 = vpop.f32.mrb[73].mxu0  ;;  %v2370_v8 = vmul.f32 0.17677669, %v9966_v39 }
 0x3b5   :  { %1064 = vadd.xlane.f32.xlu0 %v13913_v63  ;;  %2403 = vmax.xlane.f32.xlu1 %v13911_v56  ;;  %v13934_v43 = vpop.eup %12044  ;;  %v2369_v0 = vmul.f32 0.17677669, %v2322_v16 }
 0x3b6   :  { %v13941_v38 = vpop.eup %12046  ;;  %v13946_v29 = vadd.f32 %v2370_v8, %v13683_v50 }
 0x3b7   :  { %v9969_v47 = vpop.f32.mrb[74].mxu0 }
 0x3b8   :  { %v2332_v25 = vpop.f32.mrb[75].mxu0  ;;  %v2372_v39 = vmul.f32 0.17677669, %v9969_v47 }
 0x3b9   :  { %1070 = vadd.xlane.f32.xlu0 %v13920_v33  ;;  %2401 = vmax.xlane.f32.xlu1 %v13918_v9 }
 0x3bb   :  { %v9972_v46 = vpop.f32.mrb[76].mxu0 }
 0x3bc   :  { %v2342_v45 = vpop.f32.mrb[77].mxu0  ;;  %v2374_v44 = vmul.f32 0.17677669, %v9972_v46  ;;  %v13958_v46 = vadd.f32 %v2372_v39, %v13701_v3 }
 0x3bd   :  { %1068 = vadd.xlane.f32.xlu0 %v13927_v62  ;;  %2407 = vmax.xlane.f32.xlu1 %v13925_v53 }
 0x3be   :  { %v13939_v13 = vadd.f32 %v2374_v44, %v13719_v20  ;;  %v13954_v20 = vadd.f32 %v2369_v0, %v13670_v37  ;;  %v2371_v44 = vmul.f32 0.17677669, %v2332_v25 }
 0x3bf   :  { %v9975_v48 = vpop.f32.mrb[78].mxu0 }
 0x3c0   :  { %v2352_v40 = vpop.f32.mrb[79].mxu0  ;;  %v13962_v50 = vadd.f32 %v2371_v44, %v13688_v35  ;;  %v2376_v37 = vmul.f32 0.17677669, %v9975_v48 }
 0x3c1   :  { %1074 = vadd.xlane.f32.xlu0 %v13934_v43  ;;  %2405 = vmax.xlane.f32.xlu1 %v13932_v34  ;;  %v2375_v31 = vmul.f32 0.17677669, %v2352_v40 }
 0x3c2   :  { %v13970_v47 = vadd.f32 %v2376_v37, %v13737_v11 }
 0x3c3   :  { %v13949_v28 = vadd.f32 %v2375_v31, %v13724_v54  ;;  %v2373_v54 = vmul.f32 0.17677669, %v2342_v45 }
 0x3c5   :  { %2419 = vmax.xlane.f32.xlu1 %v13939_v13  ;;  %1072 = vadd.xlane.f32.xlu0 %v13941_v38  ;;  %17806 = vst [vmem:[#allocation85_spill] sm:$0xff] %v13949_v28  ;;  %v13966_v16 = vadd.f32 %v2373_v54, %v13706_v17 }
 0x3c9   :  { %2421 = vmax.xlane.f32.xlu1 %v13949_v28  ;;  %2411 = vmax.xlane.f32.xlu0 %v13946_v29 }
 0x3cd   :  { %2409 = vmax.xlane.f32.xlu0 %v13954_v20 }
 0x3d1   :  { %2415 = vmax.xlane.f32.xlu0 %v13958_v46 }
 0x3d5   :  { %2413 = vmax.xlane.f32.xlu0 %v13962_v50 }
 0x3d9   :  { %2417 = vmax.xlane.f32.xlu0 %v13966_v16 }
 0x3dd   :  { %2423 = vmax.xlane.f32.xlu0 %v13970_v47 }
 0x3f4   :  { %v1609_v3 = vpop.xlane.xlu0 %1608 }
 0x3f5   :  { %v1639_v25 = vmax.f32 %v1609_v3, 0.0  ;;  %v1607_v40 = vpop.xlane.xlu1 %1606 }
 0x3f6   :  { %v1638_v8 = vmax.f32 %v1607_v40, 0.0 }
 0x3f7   :  { %v1655_v35 = vsub.f32 %v13766_v61, %v1639_v25 }
 0x3f8   :  { %v1654_v45 = vsub.f32 %v13769_v51, %v1638_v8 }
 0x3f9   :  { %v1672_v31 = vmul.f32 1.442695, %v1655_v35  ;;  %v1613_v0 = vpop.xlane.xlu0 %1612 }
 0x3fa   :  { %v1670_v17 = vmul.f32 1.442695, %v1654_v45  ;;  %v1641_v39 = vmax.f32 %v1613_v0, 0.0  ;;  %v1611_v48 = vpop.xlane.xlu1 %1610 }
 0x3fb   :  { %12048 = vpow2.f32 %v1672_v31  ;;  %v1640_v44 = vmax.f32 %v1611_v48, 0.0 }
 0x3fc   :  { %12050 = vpow2.f32 %v1670_v17  ;;  %v1657_v11 = vsub.f32 %v13778_v52, %v1641_v39 }
 0x3fd   :  { %v1656_v54 = vsub.f32 %v13781_v42, %v1640_v44 }
 0x3fe   :  { %v1676_v37 = vmul.f32 1.442695, %v1657_v11 }
 0x3ff   :  { %v1674_v3 = vmul.f32 1.442695, %v1656_v54 }
 0x400   :  { %12052 = vpow2.f32 %v1676_v37  ;;  %v1617_v40 = vpop.xlane.xlu0 %1616 }
 0x401   :  { %v1643_v28 = vmax.f32 %v1617_v40, 0.0  ;;  %v1615_v61 = vpop.xlane.xlu1 %1614  ;;  %12054 = vpow2.f32 %v1674_v3 }
 0x402   :  { %v1642_v25 = vmax.f32 %v1615_v61, 0.0 }
 0x403   :  { %v1659_v51 = vsub.f32 %v13790_v14, %v1643_v28 }
 0x404   :  { %v1658_v8 = vsub.f32 %v13793_v1, %v1642_v25  ;;  %v1621_v35 = vpop.xlane.xlu0 %1620 }
 0x405   :  { %v13979_v45 = vpop.eup %12048  ;;  %v1680_v31 = vmul.f32 1.442695, %v1659_v51  ;;  %v1645_v0 = vmax.f32 %v1621_v35, 0.0  ;;  %v1619_v52 = vpop.xlane.xlu1 %1618 }
 0x406   :  { %v13981_v17 = vpop.eup %12050  ;;  %v1678_v42 = vmul.f32 1.442695, %v1658_v8  ;;  %v1644_v39 = vmax.f32 %v1619_v52, 0.0  ;;  %1704 = vadd.xlane.f32.xlu0 %v13979_v45 }
 0x407   :  { %12056 = vpow2.f32 %v1680_v31  ;;  %v1661_v48 = vsub.f32 %v13802_v41, %v1645_v0  ;;  %1702 = vadd.xlane.f32.xlu1 %v13981_v17 }
 0x408   :  { %12058 = vpow2.f32 %v1678_v42  ;;  %v1660_v1 = vsub.f32 %v13805_v12, %v1644_v39 }
 0x409   :  { %v1684_v14 = vmul.f32 1.442695, %v1661_v48  ;;  %v1625_v28 = vpop.xlane.xlu0 %1624 }
 0x40a   :  { %v13987_v44 = vpop.eup %12052  ;;  %v1682_v11 = vmul.f32 1.442695, %v1660_v1  ;;  %v1647_v54 = vmax.f32 %v1625_v28, 0.0  ;;  %v1623_v37 = vpop.xlane.xlu1 %1622 }
 0x40b   :  { %12060 = vpow2.f32 %v1684_v14  ;;  %v1646_v3 = vmax.f32 %v1623_v37, 0.0  ;;  %1708 = vadd.xlane.f32.xlu0 %v13987_v44  ;;  %v13992_v25 = vpop.eup %12054 }
 0x40c   :  { %12062 = vpow2.f32 %v1682_v11  ;;  %v1663_v40 = vsub.f32 %v13812_v58, %v1647_v54 }
 0x40d   :  { %v1662_v41 = vsub.f32 %v13817_v2, %v1646_v3  ;;  %v1629_v61 = vpop.xlane.xlu0 %1628 }
 0x40e   :  { %v1688_v12 = vmul.f32 1.442695, %v1663_v40  ;;  %v1649_v51 = vmax.f32 %v1629_v61, 0.0  ;;  %v1627_v8 = vpop.xlane.xlu1 %1626 }
 0x40f   :  { %v1686_v35 = vmul.f32 1.442695, %v1662_v41  ;;  %v1648_v31 = vmax.f32 %v1627_v8, 0.0  ;;  %1706 = vadd.xlane.f32.xlu0 %v13992_v25 }
 0x410   :  { %12064 = vpow2.f32 %v1688_v12  ;;  %v1665_v0 = vsub.f32 %v13822_v57, %v1649_v51 }
 0x411   :  { %v13996_v52 = vpop.eup %12056  ;;  %12066 = vpow2.f32 %v1686_v35  ;;  %v1664_v58 = vsub.f32 %v13825_v6, %v1648_v31 }
 0x412   :  { %v13999_v42 = vpop.eup %12058  ;;  %v1692_v2 = vmul.f32 1.442695, %v1665_v0 }
 0x413   :  { %v1690_v39 = vmul.f32 1.442695, %v1664_v58  ;;  %1712 = vadd.xlane.f32.xlu0 %v13996_v52  ;;  %1710 = vadd.xlane.f32.xlu1 %v13999_v42 }
 0x414   :  { %12068 = vpow2.f32 %v1692_v2  ;;  %v1633_v48 = vpop.xlane.xlu0 %1632 }
 0x415   :  { %v14003_v1 = vpop.eup %12060  ;;  %12070 = vpow2.f32 %v1690_v39  ;;  %v1651_v14 = vmax.f32 %v1633_v48, 0.0  ;;  %v1631_v57 = vpop.xlane.xlu1 %1630 }
 0x416   :  { %v14005_v28 = vpop.eup %12062  ;;  %v1650_v11 = vmax.f32 %v1631_v57, 0.0 }
 0x417   :  { %v1667_v6 = vsub.f32 %v13832_v22, %v1651_v14  ;;  %1716 = vadd.xlane.f32.xlu0 %v14003_v1  ;;  %1714 = vadd.xlane.f32.xlu1 %v14005_v28 }
 0x418   :  { %v1666_v54 = vsub.f32 %v13836_v19, %v1650_v11  ;;  %v1637_v37 = vpop.xlane.xlu0 %1636 }
 0x419   :  { %v1696_v3 = vmul.f32 1.442695, %v1667_v6  ;;  %v1653_v40 = vmax.f32 %v1637_v37, 0.0 }
 0x41a   :  { %v14011_v41 = vpop.eup %12064  ;;  %v1694_v61 = vmul.f32 1.442695, %v1666_v54  ;;  %v1635_v12 = vpop.xlane.xlu1 %1634 }
 0x41b   :  { %v14013_v51 = vpop.eup %12066  ;;  %12072 = vpow2.f32 %v1696_v3  ;;  %v1669_v8 = vsub.f32 %v13841_v49, %v1653_v40  ;;  %v1652_v35 = vmax.f32 %v1635_v12, 0.0  ;;  %1720 = vadd.xlane.f32.xlu0 %v14011_v41 }
 0x41c   :  { %12074 = vpow2.f32 %v1694_v61  ;;  %1718 = vadd.xlane.f32.xlu1 %v14013_v51 }
 0x41d   :  { %v1700_v22 = vmul.f32 1.442695, %v1669_v8  ;;  %v1668_v19 = vsub.f32 %v13846_v26, %v1652_v35  ;;  %v1047_v31 = vpop.xlane.xlu0 %1046  ;;  %v11623_v35 = vunpack.i.h.bf16 %v13745_v60 }
 0x41e   :  { %v14019_v0 = vpop.eup %12068  ;;  %vm1077_vm2 = vcmp.gt.f32.partialorder %v1047_v31, 0.0  ;;  %v1045_v58 = vpop.xlane.xlu1 %1044 }
 0x41f   :  { %v14021_v2 = vpop.eup %12070  ;;  %12076 = vpow2.f32 %v1700_v22  ;;  %v1698_v39 = vmul.f32 1.442695, %v1668_v19  ;;  %v1093_v48 = vsel %vm1077_vm2, %v1047_v31, 1.0  ;;  %vm1076_vm3 = vcmp.gt.f32.partialorder %v1045_v58, 0.0  ;;  %1724 = vadd.xlane.f32.xlu0 %v14019_v0 }
 0x420   :  { %12078 = vrcp.f32 %v1093_v48  ;;  %v1092_v49 = vsel %vm1076_vm3, %v1045_v58, 1.0  ;;  %1722 = vadd.xlane.f32.xlu1 %v14021_v2  ;;  %v11622_v22 = vunpack.i.l.bf16 %v13745_v60 }
 0x421   :  { %12080 = vpow2.f32 %v1698_v39 }
 0x422   :  { %12082 = vrcp.f32 %v1092_v49  ;;  %v1051_v26 = vpop.xlane.xlu0 %1050 }
 0x423   :  { %vm1079_vm4 = vcmp.gt.f32.partialorder %v1051_v26, 0.0 }
 0x424   :  { %v1095_v57 = vsel %vm1079_vm4, %v1051_v26, 1.0  ;;  %v11628_v26 = vunpack.i.h.bf16 %v13755_v59 }
 0x425   :  { %v14025_v14 = vpop.eup %12072  ;;  %12084 = vrcp.f32 %v1095_v57  ;;  %v11627_v57 = vunpack.i.l.bf16 %v13755_v59 }
 0x426   :  { %v14027_v11 = vpop.eup %12074  ;;  %v1049_v6 = vpop.xlane.xlu1 %1048  ;;  %1728 = vadd.xlane.f32.xlu0 %v14025_v14 }
 0x427   :  { %vm1078_vm5 = vcmp.gt.f32.partialorder %v1049_v6, 0.0  ;;  %1726 = vadd.xlane.f32.xlu1 %v14027_v11 }
 0x428   :  { %v1094_v54 = vsel %vm1078_vm5, %v1049_v6, 1.0 }
 0x429   :  { %v14031_v37 = vpop.eup %12076  ;;  %12086 = vrcp.f32 %v1094_v54  ;;  %v10916_v54 = vpack.c.bf16 %v11623_v35, %v11622_v22 }
 0x42a   :  { %v12079_v3 = vpop.eup %12078  ;;  %v1055_v40 = vpop.xlane.xlu0 %1054  ;;  %1732 = vadd.xlane.f32.xlu0 %v14031_v37 }
 0x42b   :  { %v1053_v61 = vpop.xlane.xlu1 %1052  ;;  %v14034_v12 = vpop.eup %12080  ;;  %vm1081_vm6 = vcmp.gt.f32.partialorder %v1055_v40, 0.0  ;;  %v1125_v49 = vmul.f32 %v12079_v3, %v13852_v36  ;;  %v11633_v36 = vunpack.i.h.bf16 %v13747_v23  ;;  %v11632_v3 = vunpack.i.l.bf16 %v13747_v23 }
 0x42c   :  { %vm1080_vm7 = vcmp.gt.f32.partialorder %v1053_v61, 0.0  ;;  %v12083_v8 = vpop.eup %12082  ;;  %v1097_v19 = vsel %vm1081_vm6, %v1055_v40, 1.0  ;;  %1730 = vadd.xlane.f32.xlu1 %v14034_v12 }
 0x42d   :  { %v1096_v31 = vsel %vm1080_vm7, %v1053_v61, 1.0  ;;  %12088 = vrcp.f32 %v1097_v19  ;;  %v1124_v58 = vmul.f32 %v12083_v8, %v13854_v32  ;;  %v10920_v8 = vpack.c.bf16 %v11628_v26, %v11627_v57 }
 0x42e   :  { %12090 = vrcp.f32 %v1096_v31  ;;  %v1059_v39 = vpop.xlane.xlu0 %1058 }
 0x42f   :  { %v1057_v48 = vpop.xlane.xlu1 %1056  ;;  %vm1083_vm8 = vcmp.gt.f32.partialorder %v1059_v39, 0.0  ;;  %9784 = vmatprep.mubr.f32.mxu1 %v1124_v58  ;;  %v12085_v32 = vpop.eup %12084  ;;  %v11638_v58 = vunpack.i.h.bf16 %v13759_v27 }
 0x430   :  { %vm1082_vm9 = vcmp.gt.f32.partialorder %v1057_v48, 0.0  ;;  %v1099_v60 = vsel %vm1083_vm8, %v1059_v39, 1.0  ;;  %9785 = vmatmul.mubr.f32.vlgmr.msra.gmra.mrb[48].mxu1 %v1125_v49  ;;  %v1127_v35 = vmul.f32 %v12085_v32, %v13859_v24  ;;  %v11637_v39 = vunpack.i.l.bf16 %v13759_v27  ;;  %v17807_v49 = vld [vmem:[#allocation82_spill] sm:$0xff]  ;;  %v17808_v24 = vld [vmem:[#allocation81_spill] sm:$0xff] }
 0x431   :  { %v1098_v6 = vsel %vm1082_vm9, %v1057_v48, 1.0  ;;  %12092 = vrcp.f32 %v1099_v60  ;;  %10915 = vmatpush3.bf16.msra.mxu1 %v13589_v55 }
 0x432   :  { %12094 = vrcp.f32 %v1098_v6  ;;  %10917 = vmatprep.subr.bf16.mxu1 %v10916_v54  ;;  %v1063_v40 = vpop.xlane.xlu0 %1062 }
 0x433   :  { %v12087_v61 = vpop.eup %12086  ;;  %vm1085_vm10 = vcmp.gt.f32.partialorder %v1063_v40, 0.0 }
 0x434   :  { %v1126_v59 = vmul.f32 %v12087_v61, %v13864_v4  ;;  %v1101_v19 = vsel %vm1085_vm10, %v1063_v40, 1.0  ;;  %v10924_v4 = vpack.c.bf16 %v11633_v36, %v11632_v3  ;;  %v17809_v40 = vld [vmem:[#allocation67_spill] sm:$0xff]  ;;  %v10928_v36 = vpack.c.bf16 %v11638_v58, %v11637_v39  ;;  %v17810_v3 = vld [vmem:[#allocation84_spill] sm:$0xff] }
 0x435   :  { %10919 = vmatpush3.bf16.msra.mxu1 %v10916_v54  ;;  %12096 = vrcp.f32 %v1101_v19  ;;  %v11643_v61 = vunpack.i.h.bf16 %v17809_v40 }
 0x436   :  { %10921 = vmatprep.subr.bf16.mxu1 %v10920_v8  ;;  %v1061_v22 = vpop.xlane.xlu0 %1060  ;;  %9787 = vmatprep.mubr.f32.mxu1 %v1126_v59  ;;  %v14048_v55 = vpop.xlane.xlu1 %2393  ;;  %v11642_v59 = vunpack.i.l.bf16 %v17809_v40 }
 0x437   :  { %v12089_v31 = vpop.eup %12088  ;;  %vm1084_vm11 = vcmp.gt.f32.partialorder %v1061_v22, 0.0  ;;  %9788 = vmatmul.mubr.f32.gmra.mrb[50].mxu1 %v1127_v35  ;;  %v17811_v35 = vld [vmem:[#allocation47_spill] sm:$0xff] }
 0x438   :  { %v12091_v23 = vpop.eup %12090  ;;  %v1100_v48 = vsel %vm1084_vm11, %v1061_v22, 1.0  ;;  %v1129_v26 = vmul.f32 %v12089_v31, %v17807_v49  ;;  %v17812_v22 = vld [vmem:[#allocation83_spill] sm:$0xff]  ;;  %v10932_v39 = vpack.c.bf16 %v11643_v61, %v11642_v59 }
 0x439   :  { %12098 = vrcp.f32 %v1100_v48  ;;  %10923 = vmatpush3.bf16.msra.mxu1 %v10920_v8  ;;  %v1128_v57 = vmul.f32 %v12091_v23, %v17808_v24  ;;  %v17813_v48 = vld [vmem:[#allocation72_spill] sm:$0xff] }
 0x43a   :  { %10925 = vmatprep.subr.bf16.mxu1 %v10924_v4  ;;  %v2396_v60 = vpop.xlane.xlu0 %2395  ;;  %v14054_v6 = vpop.xlane.xlu1 %2399  ;;  %v11648_v49 = vunpack.i.h.bf16 %v17813_v48  ;;  %v11647_v24 = vunpack.i.l.bf16 %v17813_v48 }
 0x43b   :  { %v12093_v54 = vpop.eup %12092  ;;  %v2426_v32 = vmax.f32 %v2396_v60, 0.0  ;;  %9790 = vmatprep.mubr.f32.mxu1 %v1128_v57 }
 0x43c   :  { %v12095_v27 = vpop.eup %12094  ;;  %9791 = vmatmul.mubr.f32.gmra.mrb[52].mxu1 %v1129_v26  ;;  %v1131_v19 = vmul.f32 %v12093_v54, %v17810_v3  ;;  %v10936_v54 = vpack.c.bf16 %v11648_v49, %v11647_v24 }
 0x43d   :  { %v2442_v8 = vsub.f32 %v13897_v7, %v2426_v32  ;;  %10927 = vmatpush3.bf16.msra.mxu1 %v10924_v4  ;;  %11715 = vrot.lane.b32.xlu1 %v17811_v35, %s12715_s24  ;;  %v1130_v31 = vmul.f32 %v12095_v27, %v17812_v22  ;;  %v17814_v32 = vld [vmem:[#allocation68_spill] sm:$0xff] }
 0x43e   :  { %10929 = vmatprep.subr.bf16.mxu1 %v10928_v36  ;;  %v1067_v23 = vpop.xlane.xlu0 %1066  ;;  %v2398_v58 = vpop.xlane.xlu1 %2397  ;;  %v11653_v27 = vunpack.i.h.bf16 %v17814_v32  ;;  %v11652_v40 = vunpack.i.l.bf16 %v17814_v32 }
 0x43f   :  { %v2459_v57 = vmul.f32 1.442695, %v2442_v8  ;;  %vm1087_vm12 = vcmp.gt.f32.partialorder %v1067_v23, 0.0  ;;  %9793 = vmatprep.mubr.f32.mxu1 %v1130_v31  ;;  %v12097_v7 = vpop.eup %12096  ;;  %v2425_v31 = vmax.f32 %v14048_v55, 0.0 }
 0x440   :  { %9794 = vmatmul.mubr.f32.gmra.mrb[54].mxu1 %v1131_v19  ;;  %v1103_v4 = vsel %vm1087_vm12, %v1067_v23, 1.0  ;;  %v1133_v61 = vmul.f32 %v12097_v7, %v13881_v21  ;;  %v10940_v23 = vpack.c.bf16 %v11653_v27, %v11652_v40  ;;  %v2427_v7 = vmax.f32 %v2398_v58, 0.0 }
 0x441   :  { %12100 = vpow2.f32 %v2459_v57  ;;  %10931 = vmatpush3.bf16.msra.mxu1 %v10928_v36  ;;  %v17815_v36 = vld [vmem:[#allocation74_spill] sm:$0xff]  ;;  %v2441_v24 = vsub.f32 %v13886_v30, %v2425_v31 }
 0x442   :  { %10933 = vmatprep.subr.bf16.mxu1 %v10932_v39  ;;  %v1065_v26 = vpop.xlane.xlu0 %1064  ;;  %12102 = vrcp.f32 %v1103_v4  ;;  %v2404_v35 = vpop.xlane.xlu1 %2403  ;;  %v11658_v19 = vunpack.i.h.bf16 %v17815_v36  ;;  %v11657_v22 = vunpack.i.l.bf16 %v17815_v36 }
 0x443   :  { %v12099_v60 = vpop.eup %12098  ;;  %vm1086_vm13 = vcmp.gt.f32.partialorder %v1065_v26, 0.0  ;;  %v2430_v27 = vmax.f32 %v2404_v35, 0.0 }
 0x444   :  { %v1102_v3 = vsel %vm1086_vm13, %v1065_v26, 1.0  ;;  %v1132_v8 = vmul.f32 %v12099_v60, %v13888_v5  ;;  %v2457_v60 = vmul.f32 1.442695, %v2441_v24 }
 0x445   :  { %10935 = vmatpush3.bf16.msra.mxu1 %v10932_v39  ;;  %12104 = vrcp.f32 %v1102_v3  ;;  %v14076_v39 = vpack.c.bf16 %v11658_v19, %v11657_v22 }
 0x446   :  { %10937 = vmatprep.subr.bf16.mxu1 %v10936_v54  ;;  %v1071_v59 = vpop.xlane.xlu0 %1070  ;;  %9796 = vmatprep.mubr.f32.mxu1 %v1132_v8  ;;  %v2402_v21 = vpop.xlane.xlu1 %2401 }
 0x447   :  { %vm1089_vm14 = vcmp.gt.f32.partialorder %v1071_v59, 0.0  ;;  %9797 = vmatmul.mubr.f32.gmra.mrb[56].mxu1 %v1133_v61  ;;  %v2429_v36 = vmax.f32 %v2402_v21, 0.0 }
 0x448   :  { %v1105_v5 = vsel %vm1089_vm14, %v1071_v59, 1.0  ;;  %v2446_v59 = vsub.f32 %v13911_v56, %v2430_v27 }
 0x449   :  { %10939 = vmatpush3.bf16.msra.mxu1 %v10936_v54  ;;  %12106 = vrcp.f32 %v1105_v5  ;;  %v2443_v54 = vsub.f32 %v13903_v18, %v2427_v7  ;;  %v2445_v31 = vsub.f32 %v13918_v9, %v2429_v36 }
 0x44a   :  { %10941 = vmatprep.subr.bf16.mxu1 %v10940_v23  ;;  %v1069_v48 = vpop.xlane.xlu0 %1068  ;;  %v14080_v32 = vpop.xlane.xlu1 %2407 }
 0x44b   :  { %v14072_v49 = vpop.eup %12100  ;;  %vm1088_vm15 = vcmp.gt.f32.partialorder %v1069_v48, 0.0  ;;  %v2461_v61 = vmul.f32 1.442695, %v2443_v54  ;;  %v2465_v21 = vmul.f32 1.442695, %v2445_v31 }
 0x44c   :  { %v1104_v57 = vsel %vm1088_vm15, %v1069_v48, 1.0  ;;  %2491 = vadd.xlane.f32.xlu0 %v14072_v49  ;;  %v12103_v4 = vpop.eup %12102 }
 0x44d   :  { %10943 = vmatpush3.bf16.msra.mxu1 %v10940_v23  ;;  %12108 = vrcp.f32 %v1104_v57  ;;  %v1135_v58 = vmul.f32 %v12103_v4, %v13905_v10  ;;  %v2467_v10 = vmul.f32 1.442695, %v2446_v59 }
 0x44e   :  { %10993 = vmatprep.subr.bf16.mxu1 %v14076_v39  ;;  %v1075_v55 = vpop.xlane.xlu0 %1074  ;;  %12110 = vpow2.f32 %v2457_v60  ;;  %v17816_v60 = vld [vmem:[#allocation41_spill] sm:$0xff] }
 0x44f   :  { %vm1091_vm2 = vcmp.gt.f32.partialorder %v1075_v55, 0.0  ;;  %v12105_v26 = vpop.eup %12104 }
 0x450   :  { %v1134_v30 = vmul.f32 %v12105_v26, %v13913_v63  ;;  %v1107_v40 = vsel %vm1091_vm2, %v1075_v55, 1.0  ;;  %v2406_v63 = vpop.xlane.xlu1 %2405 }
 0x451   :  { %12112 = vrcp.f32 %v1107_v40  ;;  %v2431_v23 = vmax.f32 %v2406_v63, 0.0 }
 0x452   :  { %v1073_v3 = vpop.xlane.xlu0 %1072  ;;  %9799 = vmatprep.mubr.f32.mxu1 %v1134_v30 }
 0x453   :  { %vm1090_vm3 = vcmp.gt.f32.partialorder %v1073_v3, 0.0  ;;  %9800 = vmatmul.mubr.f32.gmra.mrb[58].mxu1 %v1135_v58  ;;  %v12107_v19 = vpop.eup %12106  ;;  %v2447_v24 = vsub.f32 %v13932_v34, %v2431_v23 }
 0x454   :  { %v1106_v8 = vsel %vm1090_vm3, %v1073_v3, 1.0  ;;  %v1137_v48 = vmul.f32 %v12107_v19, %v13920_v33  ;;  %v2420_v55 = vpop.xlane.xlu1 %2419 }
 0x455   :  { %12114 = vrcp.f32 %v1106_v8  ;;  %v2438_v26 = vmax.f32 %v2420_v55, 0.0 }
 0x456   :  { %v14085_v18 = vpop.xlane.xlu0 %2411  ;;  %12116 = vpow2.f32 %v2461_v61 }
 0x457   :  { %v12109_v35 = vpop.eup %12108  ;;  %12118 = vpow2.f32 %v2467_v10 }
 0x458   :  { %v1136_v22 = vmul.f32 %v12109_v35, %v13927_v62  ;;  %v14090_v56 = vpop.eup %12110  ;;  %12120 = vpow2.f32 %v2465_v21  ;;  %v2469_v62 = vmul.f32 1.442695, %v2447_v24 }
 0x45a   :  { %v2410_v5 = vpop.xlane.xlu0 %2409  ;;  %9802 = vmatprep.mubr.f32.mxu1 %v1136_v22  ;;  %12122 = vpow2.f32 %v2469_v62  ;;  %v2434_v22 = vmax.f32 %v14085_v18, 0.0  ;;  %v17817_v62 = vld [vmem:[#allocation60_spill] sm:$0xff] }
 0x45b   :  { %9803 = vmatmul.mubr.f32.gmra.mrb[60].mxu1 %v1137_v48  ;;  %v12113_v7 = vpop.eup %12112  ;;  %v2433_v10 = vmax.f32 %v2410_v5, 0.0 }
 0x45c   :  { %v1139_v54 = vmul.f32 %v12113_v7, %v13934_v43  ;;  %v2428_v43 = vmax.f32 %v14054_v6, 0.0 }
 0x45e   :  { %v2416_v57 = vpop.xlane.xlu0 %2415 }
 0x45f   :  { %v12115_v4 = vpop.eup %12114  ;;  %v2436_v48 = vmax.f32 %v2416_v57, 0.0 }
 0x460   :  { %v1138_v9 = vmul.f32 %v12115_v4, %v13941_v38  ;;  %v14098_v30 = vpop.eup %12116  ;;  %v2454_v38 = vsub.f32 %v13939_v13, %v2438_v26  ;;  %v2432_v13 = vmax.f32 %v14080_v32, 0.0  ;;  %v2450_v32 = vsub.f32 %v13946_v29, %v2434_v22 }
 0x461   :  { %2489 = vadd.xlane.f32.xlu1 %v14090_v56  ;;  %v14103_v8 = vpop.eup %12118  ;;  %v2452_v7 = vsub.f32 %v13958_v46, %v2436_v48  ;;  %v17821_v48 = vld [vmem:[#allocation76_spill] sm:$0xff] }
 0x462   :  { %v2414_v33 = vpop.xlane.xlu0 %2413  ;;  %11710 = vrot.lane.b32.xlu0 %v17816_v60, %s12715_s24  ;;  %9805 = vmatprep.mubr.f32.mxu1 %v1138_v9  ;;  %v2483_v61 = vmul.f32 1.442695, %v2454_v38  ;;  %v14108_v36 = vpop.eup %12120  ;;  %v2448_v6 = vsub.f32 %v13925_v53, %v2432_v13  ;;  %v2475_v23 = vmul.f32 1.442695, %v2450_v32  ;;  %v2449_v53 = vsub.f32 %v13954_v20, %v2433_v10 }
 0x463   :  { %v2435_v34 = vmax.f32 %v2414_v33, 0.0  ;;  %9806 = vmatmul.mubr.f32.gmra.mrb[62].mxu1 %v1139_v54  ;;  %v2479_v55 = vmul.f32 1.442695, %v2452_v7  ;;  %v17818_v33 = vld [vmem:[#allocation66_spill] sm:$0xff] }
 0x464   :  { %v14113_v63 = vpop.eup %12122  ;;  %v2473_v24 = vmul.f32 1.442695, %v2449_v53 }
 0x465   :  { %v2451_v27 = vsub.f32 %v13962_v50, %v2435_v34  ;;  %2493 = vadd.xlane.f32.xlu1 %v14098_v30  ;;  %v2444_v50 = vsub.f32 %v13894_v15, %v2428_v43  ;;  %v2471_v15 = vmul.f32 1.442695, %v2448_v6 }
 0x466   :  { %v2418_v40 = vpop.xlane.xlu0 %2417 }
 0x467   :  { %v2477_v3 = vmul.f32 1.442695, %v2451_v27  ;;  %v2437_v58 = vmax.f32 %v2418_v40, 0.0  ;;  %v2463_v35 = vmul.f32 1.442695, %v2444_v50  ;;  %v17819_v40 = vld [vmem:[#allocation20_spill] sm:$0xff] }
 0x469   :  { %12124 = vpow2.f32 %v2477_v3  ;;  %2499 = vadd.xlane.f32.xlu1 %v14103_v8  ;;  %v2453_v59 = vsub.f32 %v13966_v16, %v2437_v58 }
 0x46a   :  { %12126 = vpow2.f32 %v2483_v61  ;;  %v2424_v18 = vpop.xlane.xlu0 %2423 }
 0x46b   :  { %v2481_v19 = vmul.f32 1.442695, %v2453_v59  ;;  %v2440_v29 = vmax.f32 %v2424_v18, 0.0  ;;  %v11668_v18 = vunpack.i.h.bf16 %v17821_v48 }
 0x46d   :  { %2497 = vadd.xlane.f32.xlu1 %v14108_v36  ;;  %12128 = vpow2.f32 %v2481_v19  ;;  %v2456_v4 = vsub.f32 %v13970_v47, %v2440_v29  ;;  %v2422_v47 = vpop.xlane.xlu1 %2421  ;;  %v11667_v29 = vunpack.i.l.bf16 %v17821_v48 }
 0x46e   :  { %12130 = vpow2.f32 %v2463_v35  ;;  %v17820_v35 = vld [vmem:[#allocation69_spill] sm:$0xff] }
 0x46f   :  { %12132 = vpow2.f32 %v2471_v15  ;;  %v2487_v57 = vmul.f32 1.442695, %v2456_v4  ;;  %v11663_v6 = vunpack.i.h.bf16 %v17820_v35  ;;  %v11662_v22 = vunpack.i.l.bf16 %v17820_v35  ;;  %v17822_v4 = vld [vmem:[#allocation85_spill] sm:$0xff] }
 0x470   :  { %12134 = vpow2.f32 %v2475_v23  ;;  %v2439_v15 = vmax.f32 %v2422_v47, 0.0 }
 0x471   :  { %2501 = vadd.xlane.f32.xlu1 %v14113_v63  ;;  %12136 = vpow2.f32 %v2473_v24 }
 0x472   :  { %12138 = vpow2.f32 %v2479_v55  ;;  %v10996_v55 = vpack.c.bf16 %v11663_v6, %v11662_v22 }
 0x473   :  { %v14118_v16 = vpop.eup %12124  ;;  %12140 = vpow2.f32 %v2487_v57  ;;  %v2455_v57 = vsub.f32 %v17822_v4, %v2439_v15  ;;  %v17828_v4 = vld [vmem:[#allocation31_spill] sm:$0xff] }
 0x474   :  { %v14122_v31 = vpop.eup %12126 }
 0x475   :  { %2509 = vadd.xlane.f32.xlu1 %v14118_v16 }
 0x477   :  { %v14126_v21 = vpop.eup %12128 }
 0x478   :  { %v14130_v5 = vpop.eup %12130 }
 0x479   :  { %2515 = vadd.xlane.f32.xlu1 %v14122_v31  ;;  %v14134_v20 = vpop.eup %12132 }
 0x47a   :  { %v14137_v9 = vpop.eup %12134 }
 0x47b   :  { %v14140_v46 = vpop.eup %12136 }
 0x47c   :  { %v14145_v26 = vpop.eup %12138 }
 0x47d   :  { %2513 = vadd.xlane.f32.xlu1 %v14126_v21  ;;  %v14150_v54 = vpop.eup %12140 }
 0x481   :  { %2495 = vadd.xlane.f32.xlu0 %v14130_v5 }
 0x485   :  { %2503 = vadd.xlane.f32.xlu0 %v14134_v20 }
 0x489   :  { %2507 = vadd.xlane.f32.xlu0 %v14137_v9 }
 0x48d   :  { %2505 = vadd.xlane.f32.xlu0 %v14140_v46 }
 0x48e   :  { %11725 = vrot.lane.b32.xlu1 %v17817_v62, %s12715_s24 }
 0x491   :  { %2511 = vadd.xlane.f32.xlu0 %v14145_v26 }
 0x492   :  { %11730 = vrot.lane.b32.xlu1 %v17818_v33, %s12715_s24 }
 0x493   :  { %v1705_v60 = vpop.xlane.xlu0 %1704 }
 0x494   :  { %vm1735_vm4 = vcmp.gt.f32.partialorder %v1705_v60, 0.0  ;;  %v1703_v34 = vpop.xlane.xlu1 %1702 }
 0x495   :  { %v1751_v27 = vsel %vm1735_vm4, %v1705_v60, 1.0  ;;  %2519 = vadd.xlane.f32.xlu0 %v14150_v54  ;;  %vm1734_vm5 = vcmp.gt.f32.partialorder %v1703_v34, 0.0  ;;  %v17823_v60 = vld [vmem:[#allocation70_spill] sm:$0xff] }
 0x496   :  { %12142 = vrcp.f32 %v1751_v27  ;;  %v1750_v38 = vsel %vm1734_vm5, %v1703_v34, 1.0  ;;  %2859 = vrot.lane.b32.xlu1 %v17819_v40, %s12715_s24  ;;  %v11673_v34 = vunpack.i.h.bf16 %v17823_v60  ;;  %v11672_v27 = vunpack.i.l.bf16 %v17823_v60  ;;  %v17829_v60 = vld [vmem:[#allocation75_spill] sm:$0xff] }
 0x497   :  { %12144 = vrcp.f32 %v1750_v38  ;;  %v11000_v40 = vpack.c.bf16 %v11668_v18, %v11667_v29  ;;  %v17827_v18 = vld [vmem:[#allocation73_spill] sm:$0xff] }
 0x498   :  { %v1709_v3 = vpop.xlane.xlu0 %1708 }
 0x499   :  { %vm1737_vm6 = vcmp.gt.f32.partialorder %v1709_v3, 0.0 }
 0x49a   :  { %v1753_v58 = vsel %vm1737_vm6, %v1709_v3, 1.0  ;;  %v2485_v3 = vmul.f32 1.442695, %v2455_v57 }
 0x49b   :  { %12146 = vrcp.f32 %v1753_v58 }
 0x49c   :  { %v1707_v43 = vpop.xlane.xlu0 %1706 }
 0x49d   :  { %vm1736_vm7 = vcmp.gt.f32.partialorder %v1707_v43, 0.0 }
 0x49e   :  { %v1752_v61 = vsel %vm1736_vm7, %v1707_v43, 1.0 }
 0x49f   :  { %12148 = vrcp.f32 %v1752_v61  ;;  %v17824_v61 = vld [vmem:[#allocation54_spill] sm:$0xff] }
 0x4a0   :  { %v12143_v59 = vpop.eup %12142  ;;  %v1713_v50 = vpop.xlane.xlu0 %1712 }
 0x4a1   :  { %v1711_v13 = vpop.xlane.xlu1 %1710  ;;  %v12145_v19 = vpop.eup %12144  ;;  %vm1739_vm8 = vcmp.gt.f32.partialorder %v1713_v50, 0.0  ;;  %v1783_v53 = vmul.f32 %v12143_v59, %v13979_v45 }
 0x4a2   :  { %vm1738_vm9 = vcmp.gt.f32.partialorder %v1711_v13, 0.0  ;;  %v1755_v32 = vsel %vm1739_vm8, %v1713_v50, 1.0  ;;  %v1782_v23 = vmul.f32 %v12145_v19, %v13981_v17  ;;  %v17825_v19 = vld [vmem:[#allocation71_spill] sm:$0xff] }
 0x4a3   :  { %v1754_v10 = vsel %vm1738_vm9, %v1711_v13, 1.0  ;;  %12150 = vrcp.f32 %v1755_v32  ;;  %v11678_v35 = vunpack.i.h.bf16 %v17825_v19  ;;  %v11677_v6 = vunpack.i.l.bf16 %v17825_v19 }
 0x4a4   :  { %12152 = vrcp.f32 %v1754_v10  ;;  %v1717_v24 = vpop.xlane.xlu0 %1716  ;;  %9896 = vmatprep.mubr.f32.mxu1 %v1782_v23  ;;  %v17826_v23 = vld [vmem:[#allocation26_spill] sm:$0xff] }
 0x4a5   :  { %v1715_v7 = vpop.xlane.xlu1 %1714  ;;  %vm1741_vm10 = vcmp.gt.f32.partialorder %v1717_v24, 0.0  ;;  %9897 = vmatmul.mubr.f32.vlgmr.msra.gmra.mrb[64].mxu1 %v1783_v53  ;;  %v12147_v45 = vpop.eup %12146 }
 0x4a6   :  { %vm1740_vm11 = vcmp.gt.f32.partialorder %v1715_v7, 0.0  ;;  %v1757_v62 = vsel %vm1741_vm10, %v1717_v24, 1.0  ;;  %10995 = vmatpush3.bf16.msra.mxu1 %v14076_v39  ;;  %v1785_v59 = vmul.f32 %v12147_v45, %v13987_v44  ;;  %v11683_v24 = vunpack.i.h.bf16 %v17827_v18 }
 0x4a7   :  { %v1756_v47 = vsel %vm1740_vm11, %v1715_v7, 1.0  ;;  %12154 = vrcp.f32 %v1757_v62  ;;  %10997 = vmatprep.subr.bf16.mxu1 %v10996_v55  ;;  %v11682_v7 = vunpack.i.l.bf16 %v17827_v18 }
 0x4a8   :  { %12156 = vrcp.f32 %v1756_v47  ;;  %v1721_v17 = vpop.xlane.xlu0 %1720 }
 0x4a9   :  { %v12149_v33 = vpop.eup %12148  ;;  %vm1743_vm12 = vcmp.gt.f32.partialorder %v1721_v17, 0.0  ;;  %v1719_v38 = vpop.xlane.xlu1 %1718 }
 0x4aa   :  { %v1759_v58 = vsel %vm1743_vm12, %v1721_v17, 1.0  ;;  %10999 = vmatpush3.bf16.msra.mxu1 %v10996_v55  ;;  %vm1742_vm13 = vcmp.gt.f32.partialorder %v1719_v38, 0.0  ;;  %v1784_v43 = vmul.f32 %v12149_v33, %v13992_v25  ;;  %v11004_v25 = vpack.c.bf16 %v11673_v34, %v11672_v27 }
 0x4ab   :  { %12158 = vrcp.f32 %v1759_v58  ;;  %v1758_v39 = vsel %vm1742_vm13, %v1719_v38, 1.0  ;;  %11720 = vrot.lane.b32.xlu0 %v17824_v61, %s12715_s24  ;;  %11001 = vmatprep.subr.bf16.mxu1 %v11000_v40  ;;  %v11008_v55 = vpack.c.bf16 %v11678_v35, %v11677_v6  ;;  %v11012_v17 = vpack.c.bf16 %v11683_v24, %v11682_v7  ;;  %v17832_v6 = vld [vmem:[#allocation42_spill] sm:$0xff] }
 0x4ac   :  { %12160 = vrcp.f32 %v1758_v39  ;;  %v1725_v50 = vpop.xlane.xlu0 %1724  ;;  %9899 = vmatprep.mubr.f32.mxu1 %v1784_v43  ;;  %v11688_v34 = vunpack.i.h.bf16 %v17829_v60 }
 0x4ad   :  { %v12151_v13 = vpop.eup %12150  ;;  %vm1745_vm14 = vcmp.gt.f32.partialorder %v1725_v50, 0.0  ;;  %9900 = vmatmul.mubr.f32.gmra.mrb[66].mxu1 %v1785_v59  ;;  %v1723_v22 = vpop.xlane.xlu1 %1722  ;;  %12162 = vpow2.f32 %v2485_v3 }
 0x4ae   :  { %v12153_v15 = vpop.eup %12152  ;;  %v1761_v32 = vsel %vm1745_vm14, %v1725_v50, 1.0  ;;  %11003 = vmatpush3.bf16.msra.mxu1 %v11000_v40  ;;  %vm1744_vm15 = vcmp.gt.f32.partialorder %v1723_v22, 0.0  ;;  %v1787_v10 = vmul.f32 %v12151_v13, %v13996_v52  ;;  %v17831_v50 = vld [vmem:[#allocation77_spill] sm:$0xff] }
 0x4af   :  { %12164 = vrcp.f32 %v1761_v32  ;;  %v1760_v44 = vsel %vm1744_vm15, %v1723_v22, 1.0  ;;  %2863 = vrot.lane.b32.xlu0 %v17826_v23, %s12715_s24  ;;  %11005 = vmatprep.subr.bf16.mxu1 %v11004_v25  ;;  %v1786_v53 = vmul.f32 %v12153_v15, %v13999_v42  ;;  %v11693_v13 = vunpack.i.h.bf16 %v17831_v50 }
 0x4b0   :  { %12166 = vrcp.f32 %v1760_v44  ;;  %v11692_v19 = vunpack.i.l.bf16 %v17831_v50  ;;  %v17834_v44 = vld [vmem:[#allocation48_spill] sm:$0xff] }
 0x4b1   :  { %v12155_v48 = vpop.eup %12154  ;;  %9902 = vmatprep.mubr.f32.mxu1 %v1786_v53 }
 0x4b2   :  { %v12157_v29 = vpop.eup %12156  ;;  %9903 = vmatmul.mubr.f32.gmra.mrb[68].mxu1 %v1787_v10  ;;  %v1789_v52 = vmul.f32 %v12155_v48, %v14003_v1  ;;  %v11687_v1 = vunpack.i.l.bf16 %v17829_v60  ;;  %v11020_v10 = vpack.c.bf16 %v11693_v13, %v11692_v19 }
 0x4b3   :  { %11007 = vmatpush3.bf16.msra.mxu1 %v11004_v25  ;;  %2867 = vrot.lane.b32.xlu0 %v17828_v4, %s12715_s24  ;;  %v1729_v57 = vpop.xlane.xlu0 %1728  ;;  %v1788_v62 = vmul.f32 %v12157_v29, %v14005_v28  ;;  %v17830_v28 = vld [vmem:[#allocation36_spill] sm:$0xff]  ;;  %v17833_v25 = vld [vmem:[#allocation78_spill] sm:$0xff] }
 0x4b4   :  { %11009 = vmatprep.subr.bf16.mxu1 %v11008_v55  ;;  %vm1747_vm2 = vcmp.gt.f32.partialorder %v1729_v57, 0.0  ;;  %v1727_v42 = vpop.xlane.xlu1 %1726  ;;  %v11698_v15 = vunpack.i.h.bf16 %v17833_v25  ;;  %v11697_v32 = vunpack.i.l.bf16 %v17833_v25  ;;  %v17838_v4 = vld [vmem:[#allocation30_spill] sm:$0xff]  ;;  %v17851_v25 = vld [vmem:[#allocation79_spill] sm:$0xff] }
 0x4b5   :  { %v12159_v47 = vpop.eup %12158  ;;  %v1763_v45 = vsel %vm1747_vm2, %v1729_v57, 1.0  ;;  %9905 = vmatprep.mubr.f32.mxu1 %v1788_v62  ;;  %vm1746_vm3 = vcmp.gt.f32.partialorder %v1727_v42, 0.0  ;;  %v17840_v57 = vld [vmem:[#allocation40_spill] sm:$0xff] }
 0x4b6   :  { %v12161_v33 = vpop.eup %12160  ;;  %12168 = vrcp.f32 %v1763_v45  ;;  %v1762_v27 = vsel %vm1746_vm3, %v1727_v42, 1.0  ;;  %9906 = vmatmul.mubr.f32.gmra.mrb[70].mxu1 %v1789_v52  ;;  %v1791_v58 = vmul.f32 %v12159_v47, %v14011_v41  ;;  %v11024_v48 = vpack.c.bf16 %v11698_v15, %v11697_v32  ;;  %v17841_v62 = vld [vmem:[#allocation28_spill] sm:$0xff]  ;;  %v17842_v42 = vld [vmem:[#allocation33_spill] sm:$0xff]  ;;  %v17845_v47 = vld [vmem:[#allocation50_spill] sm:$0xff] }
 0x4b7   :  { %12170 = vrcp.f32 %v1762_v27  ;;  %11011 = vmatpush3.bf16.msra.mxu1 %v11008_v55  ;;  %2871 = vrot.lane.b32.xlu0 %v17830_v28, %s12715_s24  ;;  %v1733_v38 = vpop.xlane.xlu0 %1732  ;;  %v1790_v40 = vmul.f32 %v12161_v33, %v14013_v51  ;;  %v14186_v3 = vpop.eup %12162  ;;  %v11016_v51 = vpack.c.bf16 %v11688_v34, %v11687_v1  ;;  %v17837_v55 = vld [vmem:[#allocation61_spill] sm:$0xff]  ;;  %v17847_v33 = vld [vmem:[#allocation63_spill] sm:$0xff]  ;;  %v11708_v15 = vunpack.i.h.bf16 %v17851_v25 }
 0x4b8   :  { %11013 = vmatprep.subr.bf16.mxu1 %v11012_v17  ;;  %vm1749_vm4 = vcmp.gt.f32.partialorder %v1733_v38, 0.0  ;;  %v17846_v45 = vld [vmem:[#allocation57_spill] sm:$0xff]  ;;  %v17849_v28 = vld [vmem:[#allocation35_spill] sm:$0xff] }
 0x4b9   :  { %v12165_v43 = vpop.eup %12164  ;;  %v1765_v39 = vsel %vm1749_vm4, %v1733_v38, 1.0  ;;  %v1731_v61 = vpop.xlane.xlu1 %1730  ;;  %9908 = vmatprep.mubr.f32.mxu1 %v1790_v40  ;;  %v17848_v34 = vld [vmem:[#allocation25_spill] sm:$0xff] }
 0x4ba   :  { %v12167_v59 = vpop.eup %12166  ;;  %vm1748_vm5 = vcmp.gt.f32.partialorder %v1731_v61, 0.0  ;;  %2517 = vadd.xlane.f32.xlu1 %v14186_v3  ;;  %9909 = vmatmul.mubr.f32.gmra.mrb[72].mxu1 %v1791_v58  ;;  %12172 = vrcp.f32 %v1765_v39  ;;  %v1793_v22 = vmul.f32 %v12165_v43, %v14019_v0  ;;  %v17835_v0 = vld [vmem:[#allocation55_spill] sm:$0xff] }
 0x4bb   :  { %v1764_v35 = vsel %vm1748_vm5, %v1731_v61, 1.0  ;;  %11015 = vmatpush3.bf16.msra.mxu1 %v11012_v17  ;;  %2875 = vrot.lane.b32.xlu0 %v17832_v6, %s12715_s24  ;;  %v1792_v41 = vmul.f32 %v12167_v59, %v14021_v2  ;;  %v17850_v59 = vld [vmem:[#allocation80_spill] sm:$0xff] }
 0x4bc   :  { %12174 = vrcp.f32 %v1764_v35  ;;  %11017 = vmatprep.subr.bf16.mxu1 %v11016_v51  ;;  %v11703_v50 = vunpack.i.h.bf16 %v17850_v59  ;;  %v11702_v13 = vunpack.i.l.bf16 %v17850_v59 }
 0x4bd   :  { %9911 = vmatprep.mubr.f32.mxu1 %v1792_v41  ;;  %v14230_v60 = vpop.permute.xlu1 %11715 }
 0x4be   :  { %9912 = vmatmul.mubr.f32.gmra.mrb[74].mxu1 %v1793_v22  ;;  %v11030_v6 = vpack.c.bf16 %v11703_v50, %v11702_v13 }
 0x4bf   :  { %11019 = vmatpush3.bf16.msra.mxu1 %v11016_v51  ;;  %2879 = vrot.lane.b32.xlu0 %v17834_v44, %s12715_s24 }
 0x4c0   :  { %v12169_v23 = vpop.eup %12168  ;;  %11021 = vmatprep.subr.bf16.mxu1 %v11020_v10 }
 0x4c1   :  { %v12171_v53 = vpop.eup %12170  ;;  %v1795_v18 = vmul.f32 %v12169_v23, %v14025_v14  ;;  %v17839_v14 = vld [vmem:[#allocation22_spill] sm:$0xff] }
 0x4c2   :  { %v1794_v2 = vmul.f32 %v12171_v53, %v14027_v11 }
 0x4c3   :  { %11023 = vmatpush3.bf16.msra.mxu1 %v11020_v10  ;;  %2883 = vrot.lane.b32.xlu0 %v17835_v0, %s12715_s24 }
 0x4c4   :  { %11026 = vmatprep.subr.msk.bf16.mxu1 %vm13134_vm1, %v11024_v48  ;;  %9914 = vmatprep.mubr.f32.mxu1 %v1794_v2  ;;  %v12173_v7 = vpop.eup %12172 }
 0x4c5   :  { %9915 = vmatmul.mubr.f32.gmra.mrb[76].mxu1 %v1795_v18  ;;  %v1797_v11 = vmul.f32 %v12173_v7, %v14031_v37  ;;  %v17844_v37 = vld [vmem:[#allocation44_spill] sm:$0xff] }
 0x4c6   :  { %v12175_v29 = vpop.eup %12174 }
 0x4c7   :  { %2887 = vrot.lane.b32.xlu0 %v17837_v55, %s12715_s24  ;;  %v1796_v52 = vmul.f32 %v12175_v29, %v14034_v12  ;;  %v17843_v12 = vld [vmem:[#allocation38_spill] sm:$0xff] }
 0x4c9   :  { %9917 = vmatprep.mubr.f32.mxu1 %v1796_v52 }
 0x4ca   :  { %9918 = vmatmul.mubr.f32.gmra.mrb[78].mxu1 %v1797_v11 }
 0x4cb   :  { %11740 = vrot.lane.b32.xlu0 %v17838_v4, %s12715_s24  ;;  %2861 = vrot.lane.b32.xlu1 %v17839_v14, %s12715_s24 }
 0x4cf   :  { %11750 = vrot.lane.b32.xlu0 %v17840_v57, %s12715_s24  ;;  %2865 = vrot.lane.b32.xlu1 %v17841_v62, %s12715_s24 }
 0x4d3   :  { %2869 = vrot.lane.b32.xlu1 %v17842_v42, %s12715_s24  ;;  %v11718_v42 = vunpack.i.h.bf16 %v14230_v60 }
 0x4d7   :  { %2873 = vrot.lane.b32.xlu1 %v17843_v12, %s12715_s24  ;;  %v11717_v12 = vunpack.i.l.bf16 %v14230_v60 }
 0x4d9   :  { %v2492_v17 = vpop.xlane.xlu0 %2491 }
 0x4da   :  { %vm2522_vm6 = vcmp.gt.f32.partialorder %v2492_v17, 0.0 }
 0x4db   :  { %2877 = vrot.lane.b32.xlu1 %v17844_v37, %s12715_s24  ;;  %v2538_v1 = vsel %vm2522_vm6, %v2492_v17, 1.0 }
 0x4dc   :  { %12176 = vrcp.f32 %v2538_v1 }
 0x4dd   :  { %v11711_v23 = vpop.permute.xlu0 %11710 }
 0x4de   :  { %v11713_v53 = vunpack.i.h.bf16 %v11711_v23 }
 0x4df   :  { %2881 = vrot.lane.b32.xlu1 %v17845_v47, %s12715_s24 }
 0x4e3   :  { %2885 = vrot.lane.b32.xlu1 %v17846_v45, %s12715_s24 }
 0x4e6   :  { %v12177_v39 = vpop.eup %12176 }
 0x4e7   :  { %2889 = vrot.lane.b32.xlu1 %v17847_v33, %s12715_s24  ;;  %v2570_v51 = vmul.f32 %v12177_v39, %v14072_v49  ;;  %v11048_v33 = vpack.c.bf16 %v11718_v42, %v11717_v12 }
 0x4eb   :  { %11735 = vrot.lane.b32.xlu1 %v17848_v34, %s12715_s24 }
 0x4ee   :  { %v2490_v27 = vpop.xlane.xlu1 %2489 }
 0x4ef   :  { %vm2521_vm7 = vcmp.gt.f32.partialorder %v2490_v27, 0.0  ;;  %11745 = vrot.lane.b32.xlu1 %v17849_v28, %s12715_s24 }
 0x4f0   :  { %v2537_v38 = vsel %vm2521_vm7, %v2490_v27, 1.0 }
 0x4f1   :  { %12178 = vrcp.f32 %v2537_v38 }
 0x4f2   :  { %v2494_v40 = vpop.xlane.xlu1 %2493 }
 0x4f3   :  { %vm2523_vm8 = vcmp.gt.f32.partialorder %v2494_v40, 0.0 }
 0x4f4   :  { %v2539_v58 = vsel %vm2523_vm8, %v2494_v40, 1.0 }
 0x4f5   :  { %12180 = vrcp.f32 %v2539_v58 }
 0x4f6   :  { %v2500_v43 = vpop.xlane.xlu1 %2499 }
 0x4f7   :  { %vm2526_vm10 = vcmp.gt.f32.partialorder %v2500_v43, 0.0 }
 0x4f8   :  { %v2542_v52 = vsel %vm2526_vm10, %v2500_v43, 1.0 }
 0x4fa   :  { %v2498_v41 = vpop.xlane.xlu1 %2497 }
 0x4fb   :  { %v12179_v61 = vpop.eup %12178  ;;  %vm2525_vm9 = vcmp.gt.f32.partialorder %v2498_v41, 0.0 }
 0x4fc   :  { %v2569_v19 = vmul.f32 %v12179_v61, %v14090_v56  ;;  %v11707_v56 = vunpack.i.l.bf16 %v17851_v25  ;;  %v2541_v18 = vsel %vm2525_vm9, %v2498_v41, 1.0 }
 0x4fd   :  { %12182 = vrcp.f32 %v2541_v18 }
 0x4fe   :  { %10008 = vmatprep.mubr.f32.mxu1 %v2569_v19  ;;  %v2502_v10 = vpop.xlane.xlu1 %2501  ;;  %v11036_v44 = vpack.c.bf16 %v11708_v15, %v11707_v56 }
 0x4ff   :  { %v12181_v35 = vpop.eup %12180  ;;  %10009 = vmatmul.mubr.f32.vlgmr.msra.gmra.mrb[80].mxu1 %v2570_v51  ;;  %vm2527_vm11 = vcmp.gt.f32.partialorder %v2502_v10, 0.0 }
 0x500   :  { %11029 = vmatpush3.bf16.xpose.msk.msra.mxu1 %vm13134_vm1, %v11024_v48  ;;  %v2571_v22 = vmul.f32 %v12181_v35, %v14098_v30  ;;  %v11712_v48 = vunpack.i.l.bf16 %v11711_v23  ;;  %v2543_v14 = vsel %vm2527_vm11, %v2502_v10, 1.0 }
 0x501   :  { %11032 = vmatprep.subr.msk.bf16.mxu1 %vm13134_vm1, %v11030_v6 }
 0x502   :  { %10011 = vmatprep.mubr.f32.mxu1 %v2571_v22  ;;  %v2510_v2 = vpop.xlane.xlu1 %2509  ;;  %v11042_v29 = vpack.c.bf16 %v11713_v53, %v11712_v48 }
 0x503   :  { %v9786_v32 = vpop.f32.mrb[48].mxu1  ;;  %vm2531_vm14 = vcmp.gt.f32.partialorder %v2510_v2, 0.0 }
 0x504   :  { %1286 = vst.msk [vmem:[#allocation2 + $0x8] sm:$0xff] %vm304_vm0, %v9786_v32  ;;  %v1206_v49 = vpop.f32.mrb[49].mxu1  ;;  %v2547_v1 = vsel %vm2531_vm14, %v2510_v2, 1.0 }
 0x505   :  { %1285 = vst.msk [vmem:[#allocation2] sm:$0xff] %vm304_vm0, %v1206_v49 }
 0x506   :  { %v2516_v57 = vpop.xlane.xlu1 %2515 }
 0x507   :  { %v12183_v27 = vpop.eup %12182  ;;  %vm2534_vm4 = vcmp.gt.f32.partialorder %v2516_v57, 0.0 }
 0x508   :  { %11035 = vmatpush3.bf16.xpose.msk.msra.mxu1 %vm13134_vm1, %v11030_v6  ;;  %v2573_v50 = vmul.f32 %v12183_v27, %v14108_v36 }
 0x509   :  { %11038 = vmatprep.subr.msk.bf16.mxu1 %vm13134_vm1, %v11036_v44 }
 0x50a   :  { %v9789_v30 = vpop.f32.mrb[50].mxu1  ;;  %v2514_v34 = vpop.xlane.xlu1 %2513 }
 0x50b   :  { %1288 = vst.msk [vmem:[#allocation2 + $0x18] sm:$0xff] %vm304_vm0, %v9789_v30  ;;  %v1216_v0 = vpop.f32.mrb[51].mxu1  ;;  %vm2533_vm2 = vcmp.gt.f32.partialorder %v2514_v34, 0.0 }
 0x50c   :  { %1287 = vst.msk [vmem:[#allocation2 + $0x10] sm:$0xff] %vm304_vm0, %v1216_v0  ;;  %v2549_v59 = vsel %vm2533_vm2, %v2514_v34, 1.0 }
 0x50e   :  { %v2496_v7 = vpop.xlane.xlu0 %2495  ;;  %v11726_v36 = vpop.permute.xlu1 %11725 }
 0x50f   :  { %v9792_v55 = vpop.f32.mrb[52].mxu1  ;;  %vm2524_vm12 = vcmp.gt.f32.partialorder %v2496_v7, 0.0  ;;  %v11728_v10 = vunpack.i.h.bf16 %v11726_v36 }
 0x510   :  { %1290 = vst.msk [vmem:[#allocation2 + $0x28] sm:$0xff] %vm304_vm0, %v9792_v55  ;;  %v2540_v11 = vsel %vm2524_vm12, %v2496_v7, 1.0  ;;  %v1226_v4 = vpop.f32.mrb[53].mxu1  ;;  %11041 = vmatpush3.bf16.xpose.msk.msra.mxu1 %vm13134_vm1, %v11036_v44  ;;  %v11727_v44 = vunpack.i.l.bf16 %v11726_v36 }
 0x511   :  { %12184 = vrcp.f32 %v2540_v11  ;;  %1289 = vst.msk [vmem:[#allocation2 + $0x20] sm:$0xff] %vm304_vm0, %v1226_v4  ;;  %11044 = vmatprep.subr.msk.bf16.mxu1 %vm13134_vm1, %v11042_v29 }
 0x512   :  { %v2504_v62 = vpop.xlane.xlu0 %2503  ;;  %12186 = vrcp.f32 %v2542_v52  ;;  %v11060_v7 = vpack.c.bf16 %v11728_v10, %v11727_v44 }
 0x513   :  { %v9795_v37 = vpop.f32.mrb[54].mxu1  ;;  %vm2528_vm13 = vcmp.gt.f32.partialorder %v2504_v62, 0.0  ;;  %12188 = vrcp.f32 %v2543_v14 }
 0x514   :  { %1292 = vst.msk [vmem:[#allocation2 + $0x38] sm:$0xff] %vm304_vm0, %v9795_v37  ;;  %v2544_v47 = vsel %vm2528_vm13, %v2504_v62, 1.0  ;;  %v1236_v45 = vpop.f32.mrb[55].mxu1 }
 0x515   :  { %1291 = vst.msk [vmem:[#allocation2 + $0x30] sm:$0xff] %vm304_vm0, %v1236_v45  ;;  %12190 = vrcp.f32 %v2544_v47 }
 0x516   :  { %v2508_v17 = vpop.xlane.xlu0 %2507  ;;  %12192 = vrcp.f32 %v2547_v1 }
 0x517   :  { %vm2530_vm15 = vcmp.gt.f32.partialorder %v2508_v17, 0.0 }
 0x518   :  { %11047 = vmatpush3.bf16.xpose.msk.msra.mxu1 %vm13134_vm1, %v11042_v29  ;;  %v2546_v60 = vsel %vm2530_vm15, %v2508_v17, 1.0  ;;  %v11731_v29 = vpop.permute.xlu1 %11730 }
 0x519   :  { %11050 = vmatprep.subr.msk.bf16.mxu1 %vm13134_vm1, %v11048_v33  ;;  %12194 = vrcp.f32 %v2546_v60  ;;  %v11732_v52 = vunpack.i.l.bf16 %v11731_v29 }
 0x51a   :  { %v9798_v28 = vpop.f32.mrb[56].mxu1  ;;  %v2506_v38 = vpop.xlane.xlu0 %2505 }
 0x51b   :  { %v12185_v40 = vpop.eup %12184  ;;  %1294 = vst.msk [vmem:[#allocation2 + $0x48] sm:$0xff] %vm304_vm0, %v9798_v28  ;;  %vm2529_vm3 = vcmp.gt.f32.partialorder %v2506_v38, 0.0  ;;  %v1246_v58 = vpop.f32.mrb[57].mxu1 }
 0x51c   :  { %v2545_v43 = vsel %vm2529_vm3, %v2506_v38, 1.0  ;;  %1293 = vst.msk [vmem:[#allocation2 + $0x40] sm:$0xff] %vm304_vm0, %v1246_v58  ;;  %v2572_v39 = vmul.f32 %v12185_v40, %v14130_v5  ;;  %v12187_v61 = vpop.eup %12186  ;;  %v2550_v5 = vsel %vm2534_vm4, %v2516_v57, 1.0  ;;  %v2860_v42 = vpop.permute.xlu1 %2859 }
 0x51d   :  { %12196 = vrcp.f32 %v2545_v43  ;;  %v12189_v13 = vpop.eup %12188  ;;  %v2574_v35 = vmul.f32 %v12187_v61, %v14103_v8 }
 0x51e   :  { %v2512_v19 = vpop.xlane.xlu0 %2511  ;;  %10012 = vmatmul.mubr.f32.gmra.mrb[82].mxu1 %v2572_v39  ;;  %12198 = vrcp.f32 %v2549_v59  ;;  %v2575_v41 = vmul.f32 %v12189_v13, %v14113_v63 }
 0x51f   :  { %vm2532_vm5 = vcmp.gt.f32.partialorder %v2512_v19, 0.0  ;;  %10014 = vmatprep.mubr.f32.mxu1 %v2573_v50  ;;  %v12191_v6 = vpop.eup %12190 }
 0x520   :  { %v2548_v51 = vsel %vm2532_vm5, %v2512_v19, 1.0  ;;  %11053 = vmatpush3.bf16.xpose.msk.msra.mxu1 %vm13134_vm1, %v11048_v33  ;;  %v2576_v25 = vmul.f32 %v12191_v6, %v14134_v20  ;;  %v12193_v15 = vpop.eup %12192 }
 0x521   :  { %12200 = vrcp.f32 %v2548_v51  ;;  %v2579_v0 = vmul.f32 %v12193_v15, %v14118_v16  ;;  %v11733_v16 = vunpack.i.h.bf16 %v11731_v29 }
 0x522   :  { %v2520_v22 = vpop.xlane.xlu0 %2519  ;;  %10015 = vmatmul.mubr.f32.gmra.mrb[84].mxu1 %v2574_v35  ;;  %12202 = vrcp.f32 %v2550_v5 }
 0x523   :  { %10017 = vmatprep.mubr.f32.mxu1 %v2575_v41  ;;  %v12195_v56 = vpop.eup %12194  ;;  %v11066_v57 = vpack.c.bf16 %v11733_v16, %v11732_v52  ;;  %vm2536_vm6 = vcmp.gt.f32.partialorder %v2520_v22, 0.0 }
 0x524   :  { %v2578_v20 = vmul.f32 %v12195_v56, %v14137_v9  ;;  %v2552_v12 = vsel %vm2536_vm6, %v2520_v22, 1.0  ;;  %vm2071_vm6 = vcmask 523520  }
 0x525   :  { %12204 = vrcp.f32 %v2552_v12 }
 0x526   :  { %v11721_v32 = vpop.permute.xlu0 %11720  ;;  %10018 = vmatmul.mubr.f32.gmra.mrb[86].mxu1 %v2576_v25  ;;  %v9801_v8 = vpop.f32.mrb[58].mxu1 }
 0x527   :  { %v12197_v49 = vpop.eup %12196  ;;  %v11723_v23 = vunpack.i.h.bf16 %v11721_v32  ;;  %v11722_v30 = vunpack.i.l.bf16 %v11721_v32  ;;  %1296 = vst.msk [vmem:[#allocation2 + $0x58] sm:$0xff] %vm304_vm0, %v9801_v8  ;;  %v1256_v63 = vpop.f32.mrb[59].mxu1 }
 0x528   :  { %v2577_v53 = vmul.f32 %v12197_v49, %v14140_v46  ;;  %1295 = vst.msk [vmem:[#allocation2 + $0x50] sm:$0xff] %vm304_vm0, %v1256_v63  ;;  %v12199_v2 = vpop.eup %12198 }
 0x529   :  { %v11054_v48 = vpack.c.bf16 %v11723_v23, %v11722_v30  ;;  %v2581_v55 = vmul.f32 %v12199_v2, %v14126_v21  ;;  %v17852_v23 = vmov 0.0  }
 0x52a   :  { %10020 = vmatprep.mubr.f32.mxu1 %v2577_v53  ;;  %v2864_v62 = vpop.permute.xlu0 %2863 }
 0x52b   :  { %v12201_v18 = vpop.eup %12200  ;;  %10021 = vmatmul.mubr.f32.gmra.mrb[88].mxu1 %v2578_v20  ;;  %11056 = vmatprep.subr.msk.bf16.mxu1 %vm13134_vm1, %v11054_v48 }
 0x52c   :  { %10023 = vmatprep.mubr.f32.mxu1 %v2579_v0  ;;  %11059 = vmatpush3.bf16.xpose.msk.msra.mxu1 %vm13134_vm1, %v11054_v48  ;;  %v2580_v46 = vmul.f32 %v12201_v18, %v14145_v26  ;;  %v12203_v9 = vpop.eup %12202 }
 0x52d   :  { %11062 = vmatprep.subr.msk.bf16.mxu1 %vm13134_vm1, %v11060_v7  ;;  %v2582_v14 = vmul.f32 %v12203_v9, %v14122_v31 }
 0x52e   :  { %v9804_v11 = vpop.f32.mrb[60].mxu1  ;;  %v2868_v31 = vpop.permute.xlu0 %2867 }
 0x52f   :  { %10024 = vmatmul.mubr.f32.gmra.mrb[90].mxu1 %v2580_v46  ;;  %1298 = vst.msk [vmem:[#allocation2 + $0x68] sm:$0xff] %vm304_vm0, %v9804_v11  ;;  %v1266_v4 = vpop.f32.mrb[61].mxu1  ;;  %v12205_v1 = vpop.eup %12204 }
 0x530   :  { %10026 = vmatprep.mubr.f32.mxu1 %v2581_v55  ;;  %1297 = vst.msk [vmem:[#allocation2 + $0x60] sm:$0xff] %vm304_vm0, %v1266_v4  ;;  %v2584_v38 = vmul.f32 %v12205_v1, %v14150_v54 }
 0x532   :  { %v2872_v45 = vpop.permute.xlu0 %2871 }
 0x533   :  { %10027 = vmatmul.mubr.f32.gmra.mrb[92].mxu1 %v2582_v14 }
 0x534   :  { %11065 = vmatpush3.bf16.xpose.msk.msra.mxu1 %vm13134_vm1, %v11060_v7 }
 0x535   :  { %11068 = vmatprep.subr.msk.bf16.mxu1 %vm13134_vm1, %v11066_v57 }
 0x536   :  { %v9807_v21 = vpop.f32.mrb[62].mxu1  ;;  %v2876_v34 = vpop.permute.xlu0 %2875 }
 0x537   :  { %1300 = vst.msk [vmem:[#allocation2 + $0x78] sm:$0xff] %vm304_vm0, %v9807_v21  ;;  %v1276_v26 = vpop.f32.mrb[63].mxu1 }
 0x538   :  { %1299 = vst.msk [vmem:[#allocation2 + $0x70] sm:$0xff] %vm304_vm0, %v1276_v26 }
 0x53a   :  { %v2880_v40 = vpop.permute.xlu0 %2879 }
 0x53c   :  { %11071 = vmatpush3.bf16.xpose.msk.msra.mxu1 %vm13134_vm1, %v11066_v57 }
 0x53e   :  { %v2884_v39 = vpop.permute.xlu0 %2883 }
 0x547   :  { %v2518_v37 = vpop.xlane.xlu1 %2517 }
 0x548   :  { %vm2535_vm7 = vcmp.gt.f32.partialorder %v2518_v37, 0.0 }
 0x549   :  { %v2551_v47 = vsel %vm2535_vm7, %v2518_v37, 1.0 }
 0x54a   :  { %12206 = vrcp.f32 %v2551_v47 }
 0x54b   :  { %v2862_v17 = vpop.permute.xlu1 %2861 }
 0x54f   :  { %v2866_v33 = vpop.permute.xlu1 %2865 }
 0x553   :  { %v2870_v60 = vpop.permute.xlu1 %2869 }
 0x554   :  { %v12207_v27 = vpop.eup %12206 }
 0x555   :  { %v2583_v28 = vmul.f32 %v12207_v27, %v14186_v3  ;;  %v2888_v3 = vpop.permute.xlu0 %2887 }
 0x557   :  { %10029 = vmatprep.mubr.f32.mxu1 %v2583_v28  ;;  %v2874_v58 = vpop.permute.xlu1 %2873  ;;  %v12664_v28 = vld [vmem:[%s17507_s1 + $0x8] sm:$0xff] }
 0x558   :  { %10030 = vmatmul.mubr.f32.gmra.mrb[94].mxu1 %v2584_v38 }
 0x559   :  { %10064 = vmatprep.mubr.msk.f32.mxu1 %vm304_vm0, %v2860_v42  ;;  %v11741_v50 = vpop.permute.xlu0 %11740 }
 0x55a   :  { %v11743_v19 = vunpack.i.h.bf16 %v11741_v50  ;;  %v11742_v51 = vunpack.i.l.bf16 %v11741_v50 }
 0x55b   :  { %v2878_v43 = vpop.permute.xlu1 %2877 }
 0x55c   :  { %10065 = vmatmul.mubr.msk.f32.vlgmr.msra.gmra.mrb[96].mxu1 %vm304_vm0, %v2862_v17  ;;  %v11076_v25 = vpack.c.bf16 %v11743_v19, %v11742_v51  ;;  %v12667_v51 = vld [vmem:[%s17507_s1 + $0x10] sm:$0xff] }
 0x55d   :  { %10067 = vmatprep.mubr.msk.f32.mxu1 %vm304_vm0, %v2864_v62  ;;  %v11751_v15 = vpop.permute.xlu0 %11750 }
 0x55e   :  { %v11753_v56 = vunpack.i.h.bf16 %v11751_v15  ;;  %v11752_v32 = vunpack.i.l.bf16 %v11751_v15  ;;  %v12669_v15 = vld [vmem:[%s17507_s1 + $0x28] sm:$0xff] }
 0x55f   :  { %v2882_v61 = vpop.permute.xlu1 %2881 }
 0x560   :  { %10068 = vmatmul.mubr.msk.f32.gmra.mrb[98].mxu1 %vm304_vm0, %v2866_v33  ;;  %v11084_v44 = vpack.c.bf16 %v11753_v56, %v11752_v32 }
 0x561   :  { %10070 = vmatprep.mubr.msk.f32.mxu1 %vm304_vm0, %v2868_v31 }
 0x563   :  { %v2886_v59 = vpop.permute.xlu1 %2885 }
 0x564   :  { %10071 = vmatmul.mubr.msk.f32.gmra.mrb[100].mxu1 %vm304_vm0, %v2870_v60 }
 0x565   :  { %10073 = vmatprep.mubr.msk.f32.mxu1 %vm304_vm0, %v2872_v45 }
 0x567   :  { %v2890_v54 = vpop.permute.xlu1 %2889 }
 0x568   :  { %10074 = vmatmul.mubr.msk.f32.gmra.mrb[102].mxu1 %vm304_vm0, %v2874_v58 }
 0x569   :  { %10076 = vmatprep.mubr.msk.f32.mxu1 %vm304_vm0, %v2876_v34 }
 0x56b   :  { %v11736_v13 = vpop.permute.xlu1 %11735 }
 0x56c   :  { %v11738_v35 = vunpack.i.h.bf16 %v11736_v13  ;;  %v11737_v6 = vunpack.i.l.bf16 %v11736_v13  ;;  %10077 = vmatmul.mubr.msk.f32.gmra.mrb[104].mxu1 %vm304_vm0, %v2878_v43 }
 0x56d   :  { %10079 = vmatprep.mubr.msk.f32.mxu1 %vm304_vm0, %v2880_v40  ;;  %v12665_v40 = vld [vmem:[%s17507_s1] sm:$0xff] }
 0x56e   :  { %v11072_v5 = vpack.c.bf16 %v11738_v35, %v11737_v6 }
 0x56f   :  { %v11746_v41 = vpop.permute.xlu1 %11745 }
 0x570   :  { %v11748_v22 = vunpack.i.h.bf16 %v11746_v41  ;;  %v11747_v36 = vunpack.i.l.bf16 %v11746_v41  ;;  %10080 = vmatmul.mubr.msk.f32.gmra.mrb[106].mxu1 %vm304_vm0, %v2882_v61  ;;  %11073 = vmatprep.subr.bf16.mxu0 %v11072_v5 }
 0x571   :  { %10082 = vmatprep.mubr.msk.f32.mxu1 %vm304_vm0, %v2884_v39  ;;  %11075 = vmatpush3.bf16.msra.mxu0 %v11072_v5  ;;  %v12668_v5 = vld [vmem:[%s17507_s1 + $0x20] sm:$0xff] }
 0x572   :  { %11077 = vmatprep.subr.bf16.mxu0 %v11076_v25  ;;  %v11080_v49 = vpack.c.bf16 %v11748_v22, %v11747_v36 }
 0x574   :  { %10083 = vmatmul.mubr.msk.f32.gmra.mrb[108].mxu1 %vm304_vm0, %v2886_v59 }
 0x575   :  { %10085 = vmatprep.mubr.msk.f32.mxu1 %vm304_vm0, %v2888_v3  ;;  %11079 = vmatpush3.bf16.msra.mxu0 %v11076_v25  ;;  %v12666_v3 = vld [vmem:[%s17507_s1 + $0x18] sm:$0xff] }
 0x576   :  { %11081 = vmatprep.subr.bf16.mxu0 %v11080_v49 }
 0x578   :  { %10086 = vmatmul.mubr.msk.f32.gmra.mrb[110].mxu1 %vm304_vm0, %v2890_v54  ;;  %v14320_v10 = vpop.f32.mrb[64].mxu1 }
 0x579   :  { %11083 = vmatpush3.bf16.msra.mxu0 %v11080_v49  ;;  %v14322_v8 = vpop.f32.mrb[65].mxu1  ;;  %4508 = vmatprep.mubr.f32.mxu1 %v17852_v23  ;;  %v12670_v49 = vld [vmem:[%s17507_s1 + $0x30] sm:$0xff] }
 0x57a   :  { %11085 = vmatprep.subr.bf16.mxu0 %v11084_v44 }
 0x57d   :  { %11087 = vmatpush3.bf16.msra.mxu0 %v11084_v44 }
 0x580   :  { %v14325_v30 = vpop.f32.mrb[66].mxu1 }
 0x581   :  { %v14327_v63 = vpop.f32.mrb[67].mxu1 }
 0x585   :  { %v14329_v53 = vpop.f32.mrb[68].mxu1 }
 0x586   :  { %v14331_v48 = vpop.f32.mrb[69].mxu1 }
 0x589   :  { %v14333_v20 = vpop.f32.mrb[70].mxu1 }
 0x58a   :  { %v14335_v2 = vpop.f32.mrb[71].mxu1 }
 0x58d   :  { %v14337_v0 = vpop.f32.mrb[72].mxu1 }
 0x58e   :  { %v14339_v18 = vpop.f32.mrb[73].mxu1 }
 0x591   :  { %v14341_v7 = vpop.f32.mrb[74].mxu1 }
 0x592   :  { %v14343_v29 = vpop.f32.mrb[75].mxu1 }
 0x598   :  { %v14345_v46 = vpop.f32.mrb[76].mxu1 }
 0x599   :  { %v14347_v9 = vpop.f32.mrb[77].mxu1 }
 0x59d   :  { %v14349_v55 = vpop.f32.mrb[78].mxu1 }
 0x59e   :  { %v14351_v16 = vpop.f32.mrb[79].mxu1 }
 0x5d2   :  { %v14353_v52 = vpop.f32.mrb[80].mxu1 }
 0x5d3   :  { %v14355_v11 = vpop.f32.mrb[81].mxu1 }
 0x5f1   :  { %v14357_v4 = vpop.f32.mrb[82].mxu1 }
 0x5f2   :  { %v14359_v14 = vpop.f32.mrb[83].mxu1 }
 0x5f5   :  { %v14361_v57 = vpop.f32.mrb[84].mxu1 }
 0x5f6   :  { %v14363_v21 = vpop.f32.mrb[85].mxu1 }
 0x5f9   :  { %v14365_v26 = vpop.f32.mrb[86].mxu1 }
 0x5fa   :  { %v14367_v62 = vpop.f32.mrb[87].mxu1 }
 0x5fe   :  { %v14369_v42 = vpop.f32.mrb[88].mxu1 }
 0x5ff   :  { %v14371_v31 = vpop.f32.mrb[89].mxu1 }
 0x602   :  { %v14373_v12 = vpop.f32.mrb[90].mxu1 }
 0x603   :  { %v14375_v37 = vpop.f32.mrb[91].mxu1 }
 0x606   :  { %v14377_v47 = vpop.f32.mrb[92].mxu1 }
 0x607   :  { %v14379_v45 = vpop.f32.mrb[93].mxu1 }
 0x62b   :  { %v14381_v17 = vpop.f32.mrb[94].mxu1 }
 0x62c   :  { %17853 = vst [vmem:[#allocation82_spill] sm:$0xff] %v14381_v17  ;;  %v14383_v33 = vpop.f32.mrb[95].mxu1 }
 0x62f   :  { %v10066_v34 = vpop.f32.mrb[96].mxu1 }
 0x630   :  { %v3133_v1 = vmul.f32 0.17677669, %v10066_v34  ;;  %v3053_v60 = vpop.f32.mrb[97].mxu1 }
 0x631   :  { %v3132_v27 = vmul.f32 0.17677669, %v3053_v60 }
 0x632   :  { %v14388_v38 = vadd.f32 %v12664_v28, %v3133_v1 }
 0x633   :  { %v14393_v58 = vadd.f32 %v12665_v40, %v3132_v27  ;;  %v10069_v43 = vpop.f32.mrb[98].mxu1  ;;  %v12671_v27 = vld [vmem:[%s17507_s1 + $0x38] sm:$0xff] }
 0x634   :  { %v3135_v39 = vmul.f32 0.17677669, %v10069_v43  ;;  %3166 = vmax.xlane.f32.xlu1 %v14388_v38  ;;  %v3063_v61 = vpop.f32.mrb[99].mxu1  ;;  %v12672_v43 = vld [vmem:[%s17507_s1 + $0x40] sm:$0xff] }
 0x635   :  { %3164 = vmax.xlane.f32.xlu0 %v14393_v58  ;;  %v3134_v54 = vmul.f32 0.17677669, %v3063_v61 }
 0x636   :  { %v14400_v59 = vadd.f32 %v12666_v3, %v3135_v39 }
 0x637   :  { %v10072_v50 = vpop.f32.mrb[100].mxu1  ;;  %v14406_v35 = vadd.f32 %v12667_v51, %v3134_v54  ;;  %v12674_v51 = vld [vmem:[%s17507_s1 + $0x50] sm:$0xff] }
 0x638   :  { %v3073_v13 = vpop.f32.mrb[101].mxu1  ;;  %v3137_v6 = vmul.f32 0.17677669, %v10072_v50  ;;  %v12673_v50 = vld [vmem:[%s17507_s1 + $0x48] sm:$0xff] }
 0x639   :  { %v3136_v19 = vmul.f32 0.17677669, %v3073_v13  ;;  %3170 = vmax.xlane.f32.xlu0 %v14400_v59 }
 0x63a   :  { %v14418_v56 = vadd.f32 %v12669_v15, %v3137_v6 }
 0x63b   :  { %v14411_v41 = vadd.f32 %v12668_v5, %v3136_v19  ;;  %v10075_v22 = vpop.f32.mrb[102].mxu1 }
 0x63c   :  { %v3083_v36 = vpop.f32.mrb[103].mxu1  ;;  %v3139_v32 = vmul.f32 0.17677669, %v10075_v22 }
 0x63d   :  { %v3138_v25 = vmul.f32 0.17677669, %v3083_v36  ;;  %3168 = vmax.xlane.f32.xlu0 %v14406_v35  ;;  %3172 = vmax.xlane.f32.xlu1 %v14411_v41 }
 0x63e   :  { %v14430_v28 = vadd.f32 %v12671_v27, %v3139_v32 }
 0x63f   :  { %v14423_v44 = vadd.f32 %v12670_v49, %v3138_v25  ;;  %v10078_v34 = vpop.f32.mrb[104].mxu1  ;;  %v12675_v25 = vld [vmem:[%s17507_s1 + $0x58] sm:$0xff]  ;;  %v12676_v49 = vld [vmem:[%s17507_s1 + $0x60] sm:$0xff] }
 0x640   :  { %v3093_v1 = vpop.f32.mrb[105].mxu1  ;;  %v3141_v40 = vmul.f32 0.17677669, %v10078_v34 }
 0x641   :  { %v3140_v60 = vmul.f32 0.17677669, %v3093_v1  ;;  %3174 = vmax.xlane.f32.xlu0 %v14418_v56  ;;  %3176 = vmax.xlane.f32.xlu1 %v14423_v44 }
 0x642   :  { %v14442_v13 = vadd.f32 %v12673_v50, %v3141_v40  ;;  %v12677_v40 = vld [vmem:[%s17507_s1 + $0x68] sm:$0xff]  ;;  %v12679_v50 = vld [vmem:[%s17507_s1 + $0x78] sm:$0xff] }
 0x643   :  { %v14435_v39 = vadd.f32 %v12672_v43, %v3140_v60  ;;  %v10081_v61 = vpop.f32.mrb[106].mxu1 }
 0x644   :  { %v3103_v3 = vpop.f32.mrb[107].mxu1  ;;  %v3143_v19 = vmul.f32 0.17677669, %v10081_v61 }
 0x645   :  { %v3142_v54 = vmul.f32 0.17677669, %v3103_v3  ;;  %3178 = vmax.xlane.f32.xlu0 %v14430_v28  ;;  %3180 = vmax.xlane.f32.xlu1 %v14435_v39  ;;  %v12678_v3 = vld [vmem:[%s17507_s1 + $0x70] sm:$0xff] }
 0x646   :  { %v14454_v15 = vadd.f32 %v12675_v25, %v3143_v19 }
 0x647   :  { %v14447_v6 = vadd.f32 %v12674_v51, %v3142_v54  ;;  %v10084_v5 = vpop.f32.mrb[108].mxu1  ;;  %v17854_v51 = vld [vmem:[#allocation46_spill] sm:$0xff] }
 0x648   :  { %v3113_v22 = vpop.f32.mrb[109].mxu1  ;;  %v3145_v32 = vmul.f32 0.17677669, %v10084_v5  ;;  %v17855_v5 = vld [vmem:[#allocation52_spill] sm:$0xff] }
 0x649   :  { %v3144_v36 = vmul.f32 0.17677669, %v3113_v22  ;;  %3182 = vmax.xlane.f32.xlu0 %v14442_v13  ;;  %3184 = vmax.xlane.f32.xlu1 %v14447_v6 }
 0x64a   :  { %v14466_v43 = vadd.f32 %v12677_v40, %v3145_v32 }
 0x64b   :  { %v14459_v34 = vadd.f32 %v12676_v49, %v3144_v36  ;;  %v10087_v1 = vpop.f32.mrb[110].mxu1 }
 0x64c   :  { %v3123_v60 = vpop.f32.mrb[111].mxu1  ;;  %v3147_v61 = vmul.f32 0.17677669, %v10087_v1 }
 0x64d   :  { %v3146_v27 = vmul.f32 0.17677669, %v3123_v60  ;;  %3186 = vmax.xlane.f32.xlu0 %v14454_v15  ;;  %3188 = vmax.xlane.f32.xlu1 %v14459_v34 }
 0x64e   :  { %v14478_v19 = vadd.f32 %v12679_v50, %v3147_v61 }
 0x64f   :  { %v14471_v54 = vadd.f32 %v12678_v3, %v3146_v27 }
 0x651   :  { %3190 = vmax.xlane.f32.xlu0 %v14466_v43  ;;  %3192 = vmax.xlane.f32.xlu1 %v14471_v54 }
 0x655   :  { %3194 = vmax.xlane.f32.xlu0 %v14478_v19 }
 0x662   :  { %11755 = vrot.lane.b32.xlu1 %v17854_v51, %s12715_s24 }
 0x66b   :  { %11760 = vrot.lane.b32.xlu0 %v17855_v5, %s12715_s24 }
 0x6c1   :  { %v3167_v22 = vpop.xlane.xlu1 %3166 }
 0x6c2   :  { %v3197_v36 = vmax.f32 %v3167_v22, 0.0  ;;  %v3165_v25 = vpop.xlane.xlu0 %3164 }
 0x6c3   :  { %v3196_v32 = vmax.f32 %v3165_v25, 0.0 }
 0x6c4   :  { %v3213_v49 = vsub.f32 %v14388_v38, %v3197_v36 }
 0x6c5   :  { %v3212_v1 = vsub.f32 %v14393_v58, %v3196_v32 }
 0x6c6   :  { %v3230_v60 = vmul.f32 1.442695, %v3213_v49  ;;  %v3171_v27 = vpop.xlane.xlu0 %3170 }
 0x6c7   :  { %v3228_v40 = vmul.f32 1.442695, %v3212_v1  ;;  %v3199_v61 = vmax.f32 %v3171_v27, 0.0 }
 0x6c8   :  { %12208 = vpow2.f32 %v3230_v60 }
 0x6c9   :  { %12210 = vpow2.f32 %v3228_v40  ;;  %v3215_v3 = vsub.f32 %v14400_v59, %v3199_v61 }
 0x6ca   :  { %v3169_v50 = vpop.xlane.xlu0 %3168  ;;  %v3173_v51 = vpop.xlane.xlu1 %3172 }
 0x6cb   :  { %v3234_v24 = vmul.f32 1.442695, %v3215_v3  ;;  %v3198_v5 = vmax.f32 %v3169_v50, 0.0  ;;  %v3200_v23 = vmax.f32 %v3173_v51, 0.0 }
 0x6cd   :  { %12212 = vpow2.f32 %v3234_v24  ;;  %v3214_v22 = vsub.f32 %v14406_v35, %v3198_v5  ;;  %v3216_v38 = vsub.f32 %v14411_v41, %v3200_v23 }
 0x6ce   :  { %v3175_v36 = vpop.xlane.xlu0 %3174  ;;  %v3177_v58 = vpop.xlane.xlu1 %3176 }
 0x6cf   :  { %v3232_v25 = vmul.f32 1.442695, %v3214_v22  ;;  %v3236_v32 = vmul.f32 1.442695, %v3216_v38  ;;  %v3202_v49 = vmax.f32 %v3177_v58, 0.0 }
 0x6d1   :  { %12214 = vpow2.f32 %v3232_v25  ;;  %v3218_v24 = vsub.f32 %v14423_v44, %v3202_v49 }
 0x6d2   :  { %v14490_v1 = vpop.eup %12208  ;;  %v3179_v60 = vpop.xlane.xlu0 %3178  ;;  %12216 = vpow2.f32 %v3236_v32 }
 0x6d3   :  { %17856 = vst [vmem:[#allocation81_spill] sm:$0xff] %v14490_v1  ;;  %v3181_v59 = vpop.xlane.xlu1 %3180  ;;  %v14492_v27 = vpop.eup %12210  ;;  %v3203_v40 = vmax.f32 %v3179_v60, 0.0  ;;  %3262 = vadd.xlane.f32.xlu1 %v14490_v1  ;;  %v3240_v50 = vmul.f32 1.442695, %v3218_v24 }
 0x6d4   :  { %17857 = vst [vmem:[#allocation67_spill] sm:$0xff] %v14492_v27  ;;  %3260 = vadd.xlane.f32.xlu0 %v14492_v27  ;;  %v17863_v27 = vld [vmem:[#allocation65_spill] sm:$0xff] }
 0x6d5   :  { %v3219_v23 = vsub.f32 %v14430_v28, %v3203_v40  ;;  %v17862_v40 = vld [vmem:[#allocation59_spill] sm:$0xff] }
 0x6d6   :  { %v3183_v35 = vpop.xlane.xlu0 %3182 }
 0x6d7   :  { %v3185_v41 = vpop.xlane.xlu1 %3184  ;;  %v14498_v61 = vpop.eup %12212  ;;  %v3242_v3 = vmul.f32 1.442695, %v3219_v23 }
 0x6d8   :  { %17858 = vst [vmem:[#allocation84_spill] sm:$0xff] %v14498_v61  ;;  %3266 = vadd.xlane.f32.xlu0 %v14498_v61  ;;  %v3201_v61 = vmax.f32 %v3175_v36, 0.0  ;;  %v3206_v1 = vmax.f32 %v3185_v41, 0.0 }
 0x6d9   :  { %12218 = vpow2.f32 %v3242_v3 }
 0x6da   :  { %v3187_v51 = vpop.xlane.xlu0 %3186  ;;  %12220 = vpow2.f32 %v3240_v50 }
 0x6db   :  { %v3189_v5 = vpop.xlane.xlu1 %3188  ;;  %v14501_v22 = vpop.eup %12214 }
 0x6dc   :  { %17859 = vst [vmem:[#allocation47_spill] sm:$0xff] %v14501_v22  ;;  %3264 = vadd.xlane.f32.xlu0 %v14501_v22  ;;  %v14504_v58 = vpop.eup %12216 }
 0x6dd   :  { %17860 = vst [vmem:[#allocation83_spill] sm:$0xff] %v14504_v58 }
 0x6de   :  { %v3191_v38 = vpop.xlane.xlu0 %3190 }
 0x6df   :  { %v3193_v44 = vpop.xlane.xlu1 %3192 }
 0x6e0   :  { %3268 = vadd.xlane.f32.xlu0 %v14504_v58  ;;  %v3210_v36 = vmax.f32 %v3193_v44, 0.0  ;;  %v3209_v44 = vmax.f32 %v3191_v38, 0.0 }
 0x6e2   :  { %v3195_v28 = vpop.xlane.xlu0 %3194 }
 0x6e3   :  { %v11756_v25 = vpop.permute.xlu1 %11755  ;;  %v14507_v32 = vpop.eup %12218 }
 0x6e4   :  { %17861 = vst [vmem:[#allocation72_spill] sm:$0xff] %v14507_v32  ;;  %v11758_v49 = vunpack.i.h.bf16 %v11756_v25  ;;  %v11757_v60 = vunpack.i.l.bf16 %v11756_v25  ;;  %3274 = vadd.xlane.f32.xlu0 %v14507_v32  ;;  %11765 = vrot.lane.b32.xlu1 %v17862_v40, %s12715_s24  ;;  %v14512_v3 = vpop.eup %12220  ;;  %v3217_v25 = vsub.f32 %v14418_v56, %v3201_v61  ;;  %v3204_v32 = vmax.f32 %v3181_v59, 0.0 }
 0x6e5   :  { %v3226_v59 = vsub.f32 %v14471_v54, %v3210_v36  ;;  %v3211_v61 = vmax.f32 %v3195_v28, 0.0 }
 0x6e6   :  { %v11761_v24 = vpop.permute.xlu0 %11760  ;;  %v11088_v23 = vpack.c.bf16 %v11758_v49, %v11757_v60  ;;  %v3238_v22 = vmul.f32 1.442695, %v3217_v25  ;;  %v3220_v40 = vsub.f32 %v14435_v39, %v3204_v32  ;;  %v3222_v60 = vsub.f32 %v14447_v6, %v3206_v1  ;;  %v17867_v25 = vld [vmem:[#allocation84_spill] sm:$0xff] }
 0x6e7   :  { %v11763_v50 = vunpack.i.h.bf16 %v11761_v24  ;;  %v11762_v17 = vunpack.i.l.bf16 %v11761_v24  ;;  %v3208_v24 = vmax.f32 %v3189_v5, 0.0  ;;  %v3205_v39 = vmax.f32 %v3183_v35, 0.0 }
 0x6e8   :  { %11089 = vmatprep.subr.bf16.mxu0 %v11088_v23  ;;  %3272 = vadd.xlane.f32.xlu0 %v14512_v3  ;;  %12222 = vpow2.f32 %v3238_v22  ;;  %v3244_v49 = vmul.f32 1.442695, %v3220_v40  ;;  %v3256_v6 = vmul.f32 1.442695, %v3226_v59  ;;  %v3227_v1 = vsub.f32 %v14478_v19, %v3211_v61 }
 0x6e9   :  { %11091 = vmatpush3.bf16.msra.mxu0 %v11088_v23  ;;  %v11092_v58 = vpack.c.bf16 %v11763_v50, %v11762_v17  ;;  %v3248_v17 = vmul.f32 1.442695, %v3222_v60  ;;  %v3207_v5 = vmax.f32 %v3187_v51, 0.0 }
 0x6ea   :  { %12224 = vpow2.f32 %v3244_v49  ;;  %v17868_v49 = vld [vmem:[#allocation83_spill] sm:$0xff] }
 0x6eb   :  { %11093 = vmatprep.subr.bf16.mxu0 %v11092_v58  ;;  %12226 = vpow2.f32 %v3248_v17  ;;  %v3223_v35 = vsub.f32 %v14454_v15, %v3207_v5 }
 0x6ed   :  { %11095 = vmatpush3.bf16.msra.mxu0 %v11092_v58  ;;  %v3224_v58 = vsub.f32 %v14459_v34, %v3208_v24  ;;  %v3258_v34 = vmul.f32 1.442695, %v3227_v1  ;;  %v3250_v19 = vmul.f32 1.442695, %v3223_v35 }
 0x6ef   :  { %v3252_v56 = vmul.f32 1.442695, %v3224_v58 }
 0x6f1   :  { %12228 = vpow2.f32 %v3252_v56 }
 0x6f2   :  { %v14522_v41 = vpop.eup %12222  ;;  %12230 = vpow2.f32 %v3256_v6 }
 0x6f3   :  { %12232 = vpow2.f32 %v3258_v34 }
 0x6f4   :  { %v14527_v22 = vpop.eup %12224 }
 0x6f5   :  { %v14531_v28 = vpop.eup %12226 }
 0x6fb   :  { %v14535_v51 = vpop.eup %12228 }
 0x6fc   :  { %v14538_v23 = vpop.eup %12230 }
 0x6fd   :  { %v14541_v15 = vpop.eup %12232 }
 0x6fe   :  { %11770 = vrot.lane.b32.xlu0 %v17863_v27, %s12715_s24  ;;  %v3221_v27 = vsub.f32 %v14442_v13, %v3205_v39  ;;  %v3225_v13 = vsub.f32 %v14466_v43, %v3209_v44  ;;  %v17869_v44 = vld [vmem:[#allocation72_spill] sm:$0xff] }
 0x700   :  { %v3246_v54 = vmul.f32 1.442695, %v3221_v27  ;;  %v3254_v32 = vmul.f32 1.442695, %v3225_v13 }
 0x702   :  { %12234 = vpow2.f32 %v3246_v54 }
 0x703   :  { %12236 = vpow2.f32 %v3250_v19 }
 0x704   :  { %12238 = vpow2.f32 %v3254_v32 }
 0x708   :  { %3270 = vadd.xlane.f32.xlu1 %v14522_v41 }
 0x70c   :  { %3276 = vadd.xlane.f32.xlu1 %v14527_v22  ;;  %v14543_v38 = vpop.eup %12234 }
 0x70d   :  { %v14547_v43 = vpop.eup %12236 }
 0x70e   :  { %v14550_v50 = vpop.eup %12238 }
 0x710   :  { %3280 = vadd.xlane.f32.xlu1 %v14531_v28 }
 0x714   :  { %3284 = vadd.xlane.f32.xlu1 %v14535_v51 }
 0x718   :  { %3288 = vadd.xlane.f32.xlu1 %v14538_v23 }
 0x71c   :  { %3290 = vadd.xlane.f32.xlu1 %v14541_v15 }
 0x71d   :  { %3278 = vadd.xlane.f32.xlu0 %v14543_v38 }
 0x721   :  { %3282 = vadd.xlane.f32.xlu0 %v14547_v43 }
 0x725   :  { %3286 = vadd.xlane.f32.xlu0 %v14550_v50 }
 0x72d   :  { %2023 = vrot.lane.b32.xlu1 %v14322_v8, %s12715_s24 }
 0x731   :  { %2794 = vrot.lane.b32.xlu1 %v14355_v11, %s12714_s23 }
 0x735   :  { %2796 = vrot.lane.b32.xlu1 %v14353_v52, %s12714_s23 }
 0x739   :  { %2027 = vrot.lane.b32.xlu1 %v14327_v63, %s12715_s24 }
 0x73b   :  { %2025 = vrot.lane.b32.xlu0 %v14320_v10, %s12715_s24 }
 0x73d   :  { %2798 = vrot.lane.b32.xlu1 %v14359_v14, %s12714_s23 }
 0x73f   :  { %2029 = vrot.lane.b32.xlu0 %v14325_v30, %s12715_s24 }
 0x741   :  { %2031 = vrot.lane.b32.xlu1 %v14331_v48, %s12715_s24 }
 0x743   :  { %2800 = vrot.lane.b32.xlu0 %v14357_v4, %s12714_s23 }
 0x745   :  { %2802 = vrot.lane.b32.xlu1 %v14363_v21, %s12714_s23 }
 0x747   :  { %2033 = vrot.lane.b32.xlu0 %v14329_v53, %s12715_s24 }
 0x749   :  { %2035 = vrot.lane.b32.xlu1 %v14335_v2, %s12715_s24 }
 0x74b   :  { %2804 = vrot.lane.b32.xlu0 %v14361_v57, %s12714_s23 }
 0x74d   :  { %2806 = vrot.lane.b32.xlu1 %v14367_v62, %s12714_s23 }
 0x74f   :  { %2037 = vrot.lane.b32.xlu0 %v14333_v20, %s12715_s24 }
 0x751   :  { %2039 = vrot.lane.b32.xlu1 %v14339_v18, %s12715_s24 }
 0x753   :  { %2808 = vrot.lane.b32.xlu0 %v14365_v26, %s12714_s23 }
 0x755   :  { %2810 = vrot.lane.b32.xlu1 %v14371_v31, %s12714_s23  ;;  %v17865_v31 = vld [vmem:[#allocation81_spill] sm:$0xff] }
 0x757   :  { %2041 = vrot.lane.b32.xlu0 %v14337_v0, %s12715_s24 }
 0x759   :  { %2043 = vrot.lane.b32.xlu1 %v14343_v29, %s12715_s24  ;;  %v17864_v29 = vld [vmem:[#allocation67_spill] sm:$0xff] }
 0x75b   :  { %2812 = vrot.lane.b32.xlu0 %v14369_v42, %s12714_s23 }
 0x75d   :  { %2814 = vrot.lane.b32.xlu1 %v14375_v37, %s12714_s23 }
 0x75f   :  { %2045 = vrot.lane.b32.xlu0 %v14341_v7, %s12715_s24 }
 0x760   :  { %v3263_v10 = vpop.xlane.xlu1 %3262 }
 0x761   :  { %v3261_v8 = vpop.xlane.xlu0 %3260  ;;  %2047 = vrot.lane.b32.xlu1 %v14347_v9, %s12715_s24  ;;  %vm3293_vm9 = vcmp.gt.f32.partialorder %v3263_v10, 0.0 }
 0x762   :  { %vm3292_vm8 = vcmp.gt.f32.partialorder %v3261_v8, 0.0  ;;  %v3309_v9 = vsel %vm3293_vm9, %v3263_v10, 1.0  ;;  %vm2842_vm9 = vcmask 785920  }
 0x763   :  { %v3308_v30 = vsel %vm3292_vm8, %v3261_v8, 1.0  ;;  %2816 = vrot.lane.b32.xlu0 %v14373_v12, %s12714_s23 }
 0x764   :  { %12240 = vrcp.f32 %v3308_v30  ;;  %v11766_v63 = vpop.permute.xlu1 %11765 }
 0x765   :  { %v11768_v53 = vunpack.i.h.bf16 %v11766_v63  ;;  %v11767_v48 = vunpack.i.l.bf16 %v11766_v63  ;;  %v3267_v20 = vpop.xlane.xlu0 %3266  ;;  %2818 = vrot.lane.b32.xlu1 %v14379_v45, %s12714_s23  ;;  %12242 = vrcp.f32 %v3309_v9 }
 0x766   :  { %vm3295_vm11 = vcmp.gt.f32.partialorder %v3267_v20, 0.0 }
 0x767   :  { %2049 = vrot.lane.b32.xlu0 %v14345_v46, %s12715_s24  ;;  %v11096_v2 = vpack.c.bf16 %v11768_v53, %v11767_v48  ;;  %v3311_v11 = vsel %vm3295_vm11, %v3267_v20, 1.0 }
 0x769   :  { %v3265_v0 = vpop.xlane.xlu0 %3264  ;;  %2051 = vrot.lane.b32.xlu1 %v14351_v16, %s12715_s24  ;;  %11097 = vmatprep.subr.bf16.mxu0 %v11096_v2 }
 0x76a   :  { %11099 = vmatpush3.bf16.msra.mxu0 %v11096_v2  ;;  %vm3294_vm10 = vcmp.gt.f32.partialorder %v3265_v0, 0.0 }
 0x76b   :  { %2820 = vrot.lane.b32.xlu0 %v14377_v47, %s12714_s23  ;;  %v3310_v16 = vsel %vm3294_vm10, %v3265_v0, 1.0  ;;  %v17866_v47 = vld [vmem:[#allocation47_spill] sm:$0xff] }
 0x76c   :  { %12244 = vrcp.f32 %v3310_v16 }
 0x76d   :  { %v3269_v18 = vpop.xlane.xlu0 %3268  ;;  %2822 = vrot.lane.b32.xlu1 %v14383_v33, %s12714_s23  ;;  %12246 = vrcp.f32 %v3311_v11 }
 0x76e   :  { %v12241_v7 = vpop.eup %12240  ;;  %vm3296_vm12 = vcmp.gt.f32.partialorder %v3269_v18, 0.0 }
 0x76f   :  { %2053 = vrot.lane.b32.xlu0 %v14349_v55, %s12715_s24  ;;  %v3340_v46 = vmul.f32 %v12241_v7, %v17864_v29  ;;  %v3312_v4 = vsel %vm3296_vm12, %v3269_v18, 1.0  ;;  %v12243_v55 = vpop.eup %12242  ;;  %vm3613_vm12 = vcmask 1048320  }
 0x770   :  { %12248 = vrcp.f32 %v3312_v4  ;;  %v3341_v12 = vmul.f32 %v12243_v55, %v17865_v31 }
 0x771   :  { %10120 = vmatprep.mubr.f32.mxu0 %v3340_v46  ;;  %v3275_v52 = vpop.xlane.xlu0 %3274 }
 0x772   :  { %vm3299_vm14 = vcmp.gt.f32.partialorder %v3275_v52, 0.0 }
 0x773   :  { %v3315_v58 = vsel %vm3299_vm14, %v3275_v52, 1.0 }
 0x775   :  { %v3273_v14 = vpop.xlane.xlu0 %3272 }
 0x776   :  { %v12245_v42 = vpop.eup %12244  ;;  %vm3298_vm13 = vcmp.gt.f32.partialorder %v3273_v14, 0.0 }
 0x777   :  { %v12247_v37 = vpop.eup %12246  ;;  %v3342_v45 = vmul.f32 %v12245_v42, %v17866_v47  ;;  %v3314_v24 = vsel %vm3298_vm13, %v3273_v14, 1.0 }
 0x778   :  { %v3343_v40 = vmul.f32 %v12247_v37, %v17867_v25  ;;  %12250 = vrcp.f32 %v3314_v24 }
 0x779   :  { %v11771_v57 = vpop.permute.xlu0 %11770 }
 0x77a   :  { %v11773_v21 = vunpack.i.h.bf16 %v11771_v57  ;;  %v11772_v26 = vunpack.i.l.bf16 %v11771_v57  ;;  %v12249_v33 = vpop.eup %12248 }
 0x77b   :  { %v3344_v60 = vmul.f32 %v12249_v33, %v17868_v49 }
 0x77c   :  { %v11100_v62 = vpack.c.bf16 %v11773_v21, %v11772_v26 }
 0x77e   :  { %11101 = vmatprep.subr.bf16.mxu0 %v11100_v62 }
 0x77f   :  { %11103 = vmatpush3.bf16.msra.mxu0 %v11100_v62 }
 0x782   :  { %10121 = vmatmul.mubr.f32.vlgmr.msra.gmra.mrb[80].mxu0 %v3341_v12  ;;  %v12251_v39 = vpop.eup %12250 }
 0x783   :  { %10123 = vmatprep.mubr.f32.mxu0 %v3342_v45  ;;  %v3346_v34 = vmul.f32 %v12251_v39, %v14512_v3 }
 0x786   :  { %10124 = vmatmul.mubr.f32.gmra.mrb[82].mxu0 %v3343_v40 }
 0x787   :  { %10126 = vmatprep.mubr.f32.mxu0 %v3344_v60 }
 0x795   :  { %v3271_v17 = vpop.xlane.xlu1 %3270 }
 0x796   :  { %vm3297_vm15 = vcmp.gt.f32.partialorder %v3271_v17, 0.0 }
 0x797   :  { %v3313_v36 = vsel %vm3297_vm15, %v3271_v17, 1.0 }
 0x798   :  { %12252 = vrcp.f32 %v3313_v36 }
 0x799   :  { %v3277_v56 = vpop.xlane.xlu1 %3276  ;;  %12254 = vrcp.f32 %v3315_v58 }
 0x79a   :  { %vm3300_vm2 = vcmp.gt.f32.partialorder %v3277_v56, 0.0 }
 0x79b   :  { %v3316_v59 = vsel %vm3300_vm2, %v3277_v56, 1.0 }
 0x79c   :  { %12256 = vrcp.f32 %v3316_v59 }
 0x79d   :  { %v3281_v61 = vpop.xlane.xlu1 %3280 }
 0x79e   :  { %vm3302_vm3 = vcmp.gt.f32.partialorder %v3281_v61, 0.0 }
 0x79f   :  { %v3318_v32 = vsel %vm3302_vm3, %v3281_v61, 1.0 }
 0x7a0   :  { %12258 = vrcp.f32 %v3318_v32 }
 0x7a1   :  { %v3285_v6 = vpop.xlane.xlu1 %3284 }
 0x7a2   :  { %v12253_v1 = vpop.eup %12252  ;;  %vm3304_vm4 = vcmp.gt.f32.partialorder %v3285_v6, 0.0 }
 0x7a3   :  { %v3345_v27 = vmul.f32 %v12253_v1, %v14522_v41  ;;  %v12255_v5 = vpop.eup %12254  ;;  %v3320_v3 = vsel %vm3304_vm4, %v3285_v6, 1.0 }
 0x7a4   :  { %v3347_v19 = vmul.f32 %v12255_v5, %v17869_v44 }
 0x7a5   :  { %v3289_v54 = vpop.xlane.xlu1 %3288  ;;  %10127 = vmatmul.mubr.f32.gmra.mrb[84].mxu0 %v3345_v27  ;;  %v12716_v27 = vmov 0  }
 0x7a6   :  { %v12257_v35 = vpop.eup %12256  ;;  %10129 = vmatprep.mubr.f32.mxu0 %v3346_v34  ;;  %vm3306_vm7 = vcmp.gt.f32.partialorder %v3289_v54, 0.0  ;;  %11774 = vset.pattern.permute.xlu1 %v12716_v27 }
 0x7a7   :  { %v3348_v13 = vmul.f32 %v12257_v35, %v14527_v22  ;;  %v3322_v53 = vsel %vm3306_vm7, %v3289_v54, 1.0  ;;  %11775 = vset.pattern.permute.xlu0 %v12716_v27 }
 0x7a9   :  { %v3291_v10 = vpop.xlane.xlu1 %3290  ;;  %10130 = vmatmul.mubr.f32.gmra.mrb[86].mxu0 %v3347_v19 }
 0x7aa   :  { %v3279_v8 = vpop.xlane.xlu0 %3278  ;;  %10132 = vmatprep.mubr.f32.mxu0 %v3348_v13  ;;  %vm3307_vm10 = vcmp.gt.f32.partialorder %v3291_v10, 0.0  ;;  %v12259_v7 = vpop.eup %12258 }
 0x7ab   :  { %vm3301_vm5 = vcmp.gt.f32.partialorder %v3279_v8, 0.0  ;;  %v3323_v2 = vsel %vm3307_vm10, %v3291_v10, 1.0  ;;  %v3350_v52 = vmul.f32 %v12259_v7, %v14531_v28  ;;  %v70_v7 = vld [vmem:[%s17508_s2 + $0x20] sm:$0xff] }
 0x7ac   :  { %v3317_v41 = vsel %vm3301_vm5, %v3279_v8, 1.0 }
 0x7ad   :  { %12260 = vrcp.f32 %v3317_v41  ;;  %v2024_v30 = vpop.permute.xlu1 %2023 }
 0x7ae   :  { %2072 = vst.msk [vmem:[#allocation2] sm:$0xff] %vm2071_vm6, %v2024_v30  ;;  %v3283_v63 = vpop.xlane.xlu0 %3282  ;;  %12262 = vrcp.f32 %v3320_v3  ;;  %v66_v30 = vld [vmem:[%s17508_s2] sm:$0xff] }
 0x7af   :  { %vm3303_vm8 = vcmp.gt.f32.partialorder %v3283_v63, 0.0 }
 0x7b0   :  { %v3319_v22 = vsel %vm3303_vm8, %v3283_v63, 1.0 }
 0x7b1   :  { %12264 = vrcp.f32 %v3319_v22  ;;  %v2795_v48 = vpop.permute.xlu1 %2794 }
 0x7b2   :  { %2843 = vst.msk [vmem:[#allocation2] sm:$0xff] %vm2842_vm9, %v2795_v48  ;;  %v3287_v20 = vpop.xlane.xlu0 %3286  ;;  %12266 = vrcp.f32 %v3322_v53  ;;  %v68_v53 = vld [vmem:[%s17508_s2 + $0x10] sm:$0xff] }
 0x7b3   :  { %vm3305_vm11 = vcmp.gt.f32.partialorder %v3287_v20, 0.0 }
 0x7b4   :  { %v3321_v0 = vsel %vm3305_vm11, %v3287_v20, 1.0  ;;  %v17870_v20 = vld [vmem:[#allocation82_spill] sm:$0xff] }
 0x7b5   :  { %12268 = vrcp.f32 %v3321_v0  ;;  %v2797_v18 = vpop.permute.xlu1 %2796  ;;  %v67_v0 = vld [vmem:[%s17508_s2 + $0x8] sm:$0xff] }
 0x7b6   :  { %v2026_v29 = vpop.permute.xlu0 %2025  ;;  %12270 = vrcp.f32 %v3323_v2 }
 0x7b7   :  { %v12261_v46 = vpop.eup %12260  ;;  %2073 = vst.msk [vmem:[#allocation2 + $0x8] sm:$0xff] %vm2071_vm6, %v2026_v29  ;;  %v71_v29 = vld [vmem:[%s17508_s2 + $0x28] sm:$0xff] }
 0x7b8   :  { %2844 = vst.msk [vmem:[#allocation2 + $0x8] sm:$0xff] %vm2842_vm9, %v2797_v18  ;;  %v3349_v9 = vmul.f32 %v12261_v46, %v14543_v38  ;;  %v12263_v11 = vpop.eup %12262  ;;  %v69_v18 = vld [vmem:[%s17508_s2 + $0x18] sm:$0xff]  ;;  %v72_v46 = vld [vmem:[%s17508_s2 + $0x30] sm:$0xff] }
 0x7b9   :  { %v2028_v16 = vpop.permute.xlu1 %2027  ;;  %v3352_v26 = vmul.f32 %v12263_v11, %v14535_v51 }
 0x7ba   :  { %2074 = vst.msk [vmem:[#allocation2 + $0x10] sm:$0xff] %vm2071_vm6, %v2028_v16  ;;  %v2030_v4 = vpop.permute.xlu0 %2029  ;;  %10133 = vmatmul.mubr.f32.gmra.mrb[88].mxu0 %v3349_v9  ;;  %v73_v9 = vld [vmem:[%s17508_s2 + $0x38] sm:$0xff]  ;;  %v74_v16 = vld [vmem:[%s17508_s2 + $0x40] sm:$0xff] }
 0x7bb   :  { %v12265_v14 = vpop.eup %12264  ;;  %2075 = vst.msk [vmem:[#allocation2 + $0x18] sm:$0xff] %vm2071_vm6, %v2030_v4  ;;  %10135 = vmatprep.mubr.f32.mxu0 %v3350_v52  ;;  %v75_v52 = vld [vmem:[%s17508_s2 + $0x48] sm:$0xff] }
 0x7bc   :  { %v3351_v57 = vmul.f32 %v12265_v14, %v14547_v43  ;;  %v12267_v62 = vpop.eup %12266 }
 0x7bd   :  { %v2799_v21 = vpop.permute.xlu1 %2798  ;;  %v3354_v12 = vmul.f32 %v12267_v62, %v14538_v23 }
 0x7be   :  { %2845 = vst.msk [vmem:[#allocation2 + $0x10] sm:$0xff] %vm2842_vm9, %v2799_v21  ;;  %v2801_v38 = vpop.permute.xlu0 %2800  ;;  %10136 = vmatmul.mubr.f32.gmra.mrb[90].mxu0 %v3351_v57  ;;  %v17871_v21 = vld [vmem:[#allocation53_spill] sm:$0xff] }
 0x7bf   :  { %v12269_v28 = vpop.eup %12268  ;;  %2846 = vst.msk [vmem:[#allocation2 + $0x18] sm:$0xff] %vm2842_vm9, %v2801_v38  ;;  %10138 = vmatprep.mubr.f32.mxu0 %v3352_v26  ;;  %v17872_v26 = vld [vmem:[#allocation21_spill] sm:$0xff]  ;;  %v14721_v38 = vld [vmem:[%s17509_s8] ss:$0 sm:$0xff] }
 0x7c0   :  { %v3353_v55 = vmul.f32 %v12269_v28, %v14550_v50  ;;  %v12271_v42 = vpop.eup %12270  ;;  %v14715_v62 = vadd.f32 %v17872_v26, %v17871_v21  ;;  %v14726_v28 = vld [vmem:[%s17510_s7] ss:$0 sm:$0xff] }
 0x7c1   :  { %v2032_v31 = vpop.permute.xlu1 %2031  ;;  %v3355_v51 = vmul.f32 %v12271_v42, %v14541_v15 }
 0x7c2   :  { %2076 = vst.msk [vmem:[#allocation2 + $0x20] sm:$0xff] %vm2071_vm6, %v2032_v31  ;;  %v2034_v43 = vpop.permute.xlu0 %2033  ;;  %10139 = vmatmul.mubr.f32.gmra.mrb[92].mxu0 %v3353_v55  ;;  %v17873_v55 = vld [vmem:[#allocation29_spill] sm:$0xff] }
 0x7c3   :  { %2077 = vst.msk [vmem:[#allocation2 + $0x28] sm:$0xff] %vm2071_vm6, %v2034_v43  ;;  %10141 = vmatprep.mubr.f32.mxu0 %v3354_v12  ;;  %v14730_v42 = vadd.f32 %v17873_v55, %v17871_v21  ;;  %v3676_v12 = vmul.f32 %v14721_v38, %v14715_v62 }
 0x7c5   :  { %v2803_v37 = vpop.permute.xlu1 %2802 }
 0x7c6   :  { %2847 = vst.msk [vmem:[#allocation2 + $0x20] sm:$0xff] %vm2842_vm9, %v2803_v37  ;;  %v2805_v47 = vpop.permute.xlu0 %2804  ;;  %10142 = vmatmul.mubr.f32.gmra.mrb[94].mxu0 %v3355_v51 }
 0x7c7   :  { %2848 = vst.msk [vmem:[#allocation2 + $0x28] sm:$0xff] %vm2842_vm9, %v2805_v47  ;;  %v3679_v47 = vmul.f32 %v14721_v38, %v14730_v42 }
 0x7c9   :  { %v2036_v50 = vpop.permute.xlu1 %2035 }
 0x7ca   :  { %2078 = vst.msk [vmem:[#allocation2 + $0x30] sm:$0xff] %vm2071_vm6, %v2036_v50  ;;  %v2038_v23 = vpop.permute.xlu0 %2037 }
 0x7cb   :  { %2079 = vst.msk [vmem:[#allocation2 + $0x38] sm:$0xff] %vm2071_vm6, %v2038_v23 }
 0x7cd   :  { %v2807_v45 = vpop.permute.xlu1 %2806 }
 0x7ce   :  { %2849 = vst.msk [vmem:[#allocation2 + $0x30] sm:$0xff] %vm2842_vm9, %v2807_v45  ;;  %v2809_v33 = vpop.permute.xlu0 %2808  ;;  %v17874_v45 = vld [vmem:[#allocation27_spill] sm:$0xff] }
 0x7cf   :  { %2850 = vst.msk [vmem:[#allocation2 + $0x38] sm:$0xff] %vm2842_vm9, %v2809_v33  ;;  %v14748_v33 = vadd.f32 %v17874_v45, %v17871_v21  ;;  %v17883_v45 = vld [vmem:[#allocation49_spill] sm:$0xff] }
 0x7d1   :  { %v2040_v15 = vpop.permute.xlu1 %2039 }
 0x7d2   :  { %2080 = vst.msk [vmem:[#allocation2 + $0x40] sm:$0xff] %vm2071_vm6, %v2040_v15  ;;  %v2042_v25 = vpop.permute.xlu0 %2041 }
 0x7d3   :  { %2081 = vst.msk [vmem:[#allocation2 + $0x48] sm:$0xff] %vm2071_vm6, %v2042_v25 }
 0x7d5   :  { %v2811_v40 = vpop.permute.xlu1 %2810 }
 0x7d6   :  { %2851 = vst.msk [vmem:[#allocation2 + $0x40] sm:$0xff] %vm2842_vm9, %v2811_v40  ;;  %v2813_v49 = vpop.permute.xlu0 %2812  ;;  %v3678_v40 = vmul.f32 %v14721_v38, %v14748_v33 }
 0x7d7   :  { %2852 = vst.msk [vmem:[#allocation2 + $0x48] sm:$0xff] %vm2842_vm9, %v2813_v49 }
 0x7d9   :  { %v2044_v60 = vpop.permute.xlu1 %2043 }
 0x7da   :  { %2082 = vst.msk [vmem:[#allocation2 + $0x50] sm:$0xff] %vm2071_vm6, %v2044_v60  ;;  %v2046_v24 = vpop.permute.xlu0 %2045 }
 0x7db   :  { %2083 = vst.msk [vmem:[#allocation2 + $0x58] sm:$0xff] %vm2071_vm6, %v2046_v24  ;;  %v17875_v24 = vld [vmem:[#allocation23_spill] sm:$0xff] }
 0x7dd   :  { %v2815_v17 = vpop.permute.xlu1 %2814 }
 0x7de   :  { %2853 = vst.msk [vmem:[#allocation2 + $0x50] sm:$0xff] %vm2842_vm9, %v2815_v17  ;;  %v2817_v58 = vpop.permute.xlu0 %2816  ;;  %v14758_v17 = vadd.f32 %v17875_v24, %v17871_v21 }
 0x7df   :  { %2854 = vst.msk [vmem:[#allocation2 + $0x58] sm:$0xff] %vm2842_vm9, %v2817_v58 }
 0x7e1   :  { %v2048_v36 = vpop.permute.xlu1 %2047 }
 0x7e2   :  { %2084 = vst.msk [vmem:[#allocation2 + $0x60] sm:$0xff] %vm2071_vm6, %v2048_v36  ;;  %v2050_v56 = vpop.permute.xlu0 %2049  ;;  %v3677_v36 = vmul.f32 %v14721_v38, %v14758_v17 }
 0x7e3   :  { %2085 = vst.msk [vmem:[#allocation2 + $0x68] sm:$0xff] %vm2071_vm6, %v2050_v56 }
 0x7e5   :  { %v2819_v59 = vpop.permute.xlu1 %2818 }
 0x7e6   :  { %2855 = vst.msk [vmem:[#allocation2 + $0x60] sm:$0xff] %vm2842_vm9, %v2819_v59  ;;  %v2821_v61 = vpop.permute.xlu0 %2820 }
 0x7e7   :  { %2856 = vst.msk [vmem:[#allocation2 + $0x68] sm:$0xff] %vm2842_vm9, %v2821_v61 }
 0x7e9   :  { %v2052_v39 = vpop.permute.xlu1 %2051 }
 0x7ea   :  { %2086 = vst.msk [vmem:[#allocation2 + $0x70] sm:$0xff] %vm2071_vm6, %v2052_v39  ;;  %v2054_v6 = vpop.permute.xlu0 %2053 }
 0x7eb   :  { %2087 = vst.msk [vmem:[#allocation2 + $0x78] sm:$0xff] %vm2071_vm6, %v2054_v6  ;;  %v17876_v6 = vld [vmem:[#allocation34_spill] sm:$0xff] }
 0x7ed   :  { %v2823_v1 = vpop.permute.xlu1 %2822 }
 0x7ee   :  { %2857 = vst.msk [vmem:[#allocation2 + $0x70] sm:$0xff] %vm2842_vm9, %v2823_v1  ;;  %v14768_v1 = vadd.f32 %v17876_v6, %v17871_v21 }
 0x855   :  { %v10122_v5 = vpop.f32.mrb[80].mxu0 }
 0x856   :  { %3567 = vrot.lane.b32.xlu0 %v10122_v5, %s12713_s22  ;;  %v3470_v34 = vpop.f32.mrb[81].mxu0  ;;  %v17877_v5 = vld [vmem:[#allocation32_spill] sm:$0xff] }
 0x857   :  { %3565 = vrot.lane.b32.xlu1 %v3470_v34, %s12713_s22  ;;  %v14773_v34 = vadd.f32 %v17877_v5, %v17871_v21  ;;  %v17884_v5 = vld [vmem:[#allocation58_spill] sm:$0xff] }
 0x859   :  { %v10125_v54 = vpop.f32.mrb[82].mxu0 }
 0x85a   :  { %3571 = vrot.lane.b32.xlu0 %v10125_v54, %s12713_s22  ;;  %v3480_v35 = vpop.f32.mrb[83].mxu0 }
 0x85b   :  { %3569 = vrot.lane.b32.xlu1 %v3480_v35, %s12713_s22  ;;  %v3681_v35 = vmul.f32 %v14721_v38, %v14768_v1 }
 0x878   :  { %v10128_v44 = vpop.f32.mrb[84].mxu0 }
 0x879   :  { %3575 = vrot.lane.b32.xlu0 %v10128_v44, %s12713_s22  ;;  %v3490_v19 = vpop.f32.mrb[85].mxu0  ;;  %v17878_v44 = vld [vmem:[#allocation39_spill] sm:$0xff] }
 0x87a   :  { %3573 = vrot.lane.b32.xlu1 %v3490_v19, %s12713_s22  ;;  %v14782_v19 = vadd.f32 %v17878_v44, %v17871_v21 }
 0x87c   :  { %v10131_v13 = vpop.f32.mrb[86].mxu0 }
 0x87d   :  { %3579 = vrot.lane.b32.xlu0 %v10131_v13, %s12713_s22  ;;  %v3500_v32 = vpop.f32.mrb[87].mxu0 }
 0x87e   :  { %3577 = vrot.lane.b32.xlu1 %v3500_v32, %s12713_s22 }
 0x88d   :  { %v10134_v10 = vpop.f32.mrb[88].mxu0 }
 0x88e   :  { %3583 = vrot.lane.b32.xlu0 %v10134_v10, %s12713_s22  ;;  %v3510_v8 = vpop.f32.mrb[89].mxu0  ;;  %v3680_v10 = vmul.f32 %v14721_v38, %v14773_v34 }
 0x88f   :  { %3581 = vrot.lane.b32.xlu1 %v3510_v8, %s12713_s22  ;;  %v17879_v8 = vld [vmem:[#allocation37_spill] sm:$0xff] }
 0x891   :  { %v10137_v41 = vpop.f32.mrb[90].mxu0 }
 0x892   :  { %3587 = vrot.lane.b32.xlu0 %v10137_v41, %s12713_s22  ;;  %v3520_v3 = vpop.f32.mrb[91].mxu0  ;;  %v14792_v41 = vadd.f32 %v17879_v8, %v17871_v21 }
 0x893   :  { %3585 = vrot.lane.b32.xlu1 %v3520_v3, %s12713_s22 }
 0x895   :  { %v10140_v63 = vpop.f32.mrb[92].mxu0 }
 0x896   :  { %3591 = vrot.lane.b32.xlu0 %v10140_v63, %s12713_s22  ;;  %v3530_v22 = vpop.f32.mrb[93].mxu0 }
 0x897   :  { %3902 = vperm.xlu1 %11774, %v66_v30  }
 0x899   :  { %v10143_v48 = vpop.f32.mrb[94].mxu0 }
 0x89a   :  { %2824 = vrot.lane.b32.xlu0 %v17870_v20, %s12714_s23  ;;  %v3540_v2 = vpop.f32.mrb[95].mxu0 }
 0x89b   :  { %3912 = vperm.xlu1 %11774, %v68_v53   ;;  %v3683_v53 = vmul.f32 %v14721_v38, %v14782_v19 }
 0x89e   :  { %3907 = vperm.xlu0 %11775, %v67_v0  }
 0x89f   :  { %3589 = vrot.lane.b32.xlu1 %v3530_v22, %s12713_s22 }
 0x8a3   :  { %3595 = vrot.lane.b32.xlu1 %v10143_v48, %s12713_s22 }
 0x8a7   :  { %3593 = vrot.lane.b32.xlu1 %v3540_v2, %s12713_s22  ;;  %v3682_v2 = vmul.f32 %v14721_v38, %v14792_v41 }
 0x8ab   :  { %3917 = vperm.xlu1 %11774, %v69_v18  }
 0x8af   :  { %3922 = vperm.xlu1 %11774, %v70_v7  }
 0x8b3   :  { %3927 = vperm.xlu1 %11774, %v71_v29  }
 0x8b7   :  { %3932 = vperm.xlu1 %11774, %v72_v46  }
 0x8bb   :  { %3937 = vperm.xlu1 %11774, %v73_v9  }
 0x8bf   :  { %3942 = vperm.xlu1 %11774, %v74_v16   ;;  %v17880_v16 = vld [vmem:[#allocation45_spill] sm:$0xff] }
 0x8c3   :  { %3947 = vperm.xlu1 %11774, %v75_v52   ;;  %v14812_v52 = vadd.f32 %v17880_v16, %v17871_v21 }
 0x8c5   :  { %v3685_v55 = vmul.f32 %v14721_v38, %v14812_v52 }
 0x8c8   :  { %v3568_v11 = vpop.permute.xlu0 %3567 }
 0x8c9   :  { %3615 = vst.msk [vmem:[#allocation2 + $0x8] sm:$0xff] %vm3613_vm12, %v3568_v11  ;;  %v3566_v4 = vpop.permute.xlu1 %3565 }
 0x8ca   :  { %3614 = vst.msk [vmem:[#allocation2] sm:$0xff] %vm3613_vm12, %v3566_v4  ;;  %v17881_v4 = vld [vmem:[#allocation43_spill] sm:$0xff] }
 0x8cc   :  { %v3572_v14 = vpop.permute.xlu0 %3571 }
 0x8cd   :  { %3617 = vst.msk [vmem:[#allocation2 + $0x18] sm:$0xff] %vm3613_vm12, %v3572_v14  ;;  %v3570_v57 = vpop.permute.xlu1 %3569  ;;  %v14817_v14 = vadd.f32 %v17881_v4, %v17871_v21  ;;  %v17889_v4 = vld [vmem:[#allocation62_spill] sm:$0xff] }
 0x8ce   :  { %3616 = vst.msk [vmem:[#allocation2 + $0x10] sm:$0xff] %vm3613_vm12, %v3570_v57 }
 0x8d0   :  { %v14754_v60 = vld [vmem:[#allocation2 + $0x8] sm:$0xff] }
 0x8d1   :  { %v14732_v31 = vld [vmem:[#allocation2] sm:$0xff]  ;;  %v3654_v58 = vmul.f32 %v14726_v28, %v14754_v60 }
 0x8d2   :  { %v3653_v43 = vmul.f32 %v14726_v28, %v14732_v31 }
 0x8d3   :  { %v3693_v56 = vadd.f32 %v3677_v36, %v3654_v58 }
 0x8d4   :  { %v3692_v51 = vadd.f32 %v3676_v12, %v3653_v43  ;;  %v14738_v37 = vld [vmem:[#allocation2 + $0x18] sm:$0xff]  ;;  %v17882_v12 = vld [vmem:[#allocation51_spill] sm:$0xff] }
 0x8d5   :  { %v3656_v50 = vmul.f32 %v14726_v28, %v14738_v37  ;;  %v14744_v23 = vld [vmem:[#allocation2 + $0x10] sm:$0xff]  ;;  %v14826_v43 = vadd.f32 %v17882_v12, %v17871_v21 }
 0x8d6   :  { %3708 = vadd.xlane.f32.xlu0 %v3692_v51  ;;  %v3655_v25 = vmul.f32 %v14726_v28, %v14744_v23 }
 0x8d7   :  { %v3695_v15 = vadd.f32 %v3679_v47, %v3656_v50  ;;  %v3684_v50 = vmul.f32 %v14721_v38, %v14817_v14  ;;  %v3687_v36 = vmul.f32 %v14721_v38, %v14826_v43 }
 0x8d8   :  { %v3694_v49 = vadd.f32 %v3678_v40, %v3655_v25 }
 0x8da   :  { %3714 = vadd.xlane.f32.xlu0 %v3695_v15  ;;  %v14837_v15 = vadd.f32 %v17883_v45, %v17871_v21  ;;  %v81_v45 = vld [vmem:[%s17508_s2 + $0x78] sm:$0xff] }
 0x8dc   :  { %v3686_v21 = vmul.f32 %v14721_v38, %v14837_v15 }
 0x8de   :  { %3712 = vadd.xlane.f32.xlu0 %v3694_v49 }
 0x8e7   :  { %3710 = vadd.xlane.f32.xlu1 %v3693_v56 }
 0x8eb   :  { %v3576_v59 = vpop.permute.xlu0 %3575 }
 0x8ec   :  { %3619 = vst.msk [vmem:[#allocation2 + $0x28] sm:$0xff] %vm3613_vm12, %v3576_v59  ;;  %v3574_v61 = vpop.permute.xlu1 %3573 }
 0x8ed   :  { %3618 = vst.msk [vmem:[#allocation2 + $0x20] sm:$0xff] %vm3613_vm12, %v3574_v61 }
 0x8ef   :  { %v3580_v39 = vpop.permute.xlu0 %3579 }
 0x8f0   :  { %3621 = vst.msk [vmem:[#allocation2 + $0x38] sm:$0xff] %vm3613_vm12, %v3580_v39  ;;  %v3578_v27 = vpop.permute.xlu1 %3577 }
 0x8f1   :  { %3620 = vst.msk [vmem:[#allocation2 + $0x30] sm:$0xff] %vm3613_vm12, %v3578_v27 }
 0x8f3   :  { %v14776_v54 = vld [vmem:[#allocation2 + $0x28] sm:$0xff] }
 0x8f4   :  { %v3658_v13 = vmul.f32 %v14726_v28, %v14776_v54  ;;  %v14786_v32 = vld [vmem:[#allocation2 + $0x20] sm:$0xff] }
 0x8f5   :  { %v3657_v3 = vmul.f32 %v14726_v28, %v14786_v32 }
 0x8f6   :  { %v3697_v30 = vadd.f32 %v3681_v35, %v3658_v13  ;;  %v3689_v35 = vmul.f32 %v14721_v38, %v17884_v5 }
 0x8f7   :  { %v3696_v63 = vadd.f32 %v3680_v10, %v3657_v3  ;;  %v14796_v22 = vld [vmem:[#allocation2 + $0x38] sm:$0xff] }
 0x8f8   :  { %3718 = vadd.xlane.f32.xlu0 %v3697_v30  ;;  %v3660_v48 = vmul.f32 %v14726_v28, %v14796_v22  ;;  %v14802_v20 = vld [vmem:[#allocation2 + $0x30] sm:$0xff] }
 0x8f9   :  { %3716 = vadd.xlane.f32.xlu1 %v3696_v63  ;;  %v3659_v0 = vmul.f32 %v14726_v28, %v14802_v20 }
 0x8fa   :  { %v3699_v18 = vadd.f32 %v3683_v53, %v3660_v48  ;;  %v17887_v48 = vld [vmem:[#allocation56_spill] sm:$0xff] }
 0x8fb   :  { %v3698_v7 = vadd.f32 %v3682_v2, %v3659_v0  ;;  %v3688_v2 = vmul.f32 %v14721_v38, %v17887_v48 }
 0x8fc   :  { %3722 = vadd.xlane.f32.xlu0 %v3699_v18 }
 0x8fd   :  { %3720 = vadd.xlane.f32.xlu1 %v3698_v7 }
 0x900   :  { %v3584_v29 = vpop.permute.xlu0 %3583 }
 0x901   :  { %3623 = vst.msk [vmem:[#allocation2 + $0x48] sm:$0xff] %vm3613_vm12, %v3584_v29  ;;  %v3582_v46 = vpop.permute.xlu1 %3581  ;;  %v17888_v29 = vld [vmem:[#allocation64_spill] sm:$0xff] }
 0x902   :  { %3622 = vst.msk [vmem:[#allocation2 + $0x40] sm:$0xff] %vm3613_vm12, %v3582_v46  ;;  %v3691_v46 = vmul.f32 %v14721_v38, %v17888_v29 }
 0x904   :  { %v3588_v9 = vpop.permute.xlu0 %3587 }
 0x905   :  { %3625 = vst.msk [vmem:[#allocation2 + $0x58] sm:$0xff] %vm3613_vm12, %v3588_v9  ;;  %v3586_v11 = vpop.permute.xlu1 %3585 }
 0x906   :  { %3624 = vst.msk [vmem:[#allocation2 + $0x50] sm:$0xff] %vm3613_vm12, %v3586_v11 }
 0x908   :  { %v3592_v57 = vpop.permute.xlu0 %3591  ;;  %v14820_v26 = vld [vmem:[#allocation2 + $0x48] sm:$0xff] }
 0x909   :  { %3627 = vst.msk [vmem:[#allocation2 + $0x68] sm:$0xff] %vm3613_vm12, %v3592_v57  ;;  %v3662_v51 = vmul.f32 %v14726_v28, %v14820_v26  ;;  %v14831_v47 = vld [vmem:[#allocation2 + $0x40] sm:$0xff]  ;;  %v3690_v57 = vmul.f32 %v14721_v38, %v17889_v4  ;;  %v79_v38 = vld [vmem:[%s17508_s2 + $0x68] sm:$0xff] }
 0x90a   :  { %v3661_v25 = vmul.f32 %v14726_v28, %v14831_v47 }
 0x90b   :  { %v3701_v40 = vadd.f32 %v3685_v55, %v3662_v51  ;;  %v77_v51 = vld [vmem:[%s17508_s2 + $0x58] sm:$0xff] }
 0x90c   :  { %v2825_v49 = vpop.permute.xlu0 %2824  ;;  %v3700_v24 = vadd.f32 %v3684_v50, %v3661_v25  ;;  %v14841_v58 = vld [vmem:[#allocation2 + $0x58] sm:$0xff]  ;;  %v76_v50 = vld [vmem:[%s17508_s2 + $0x50] sm:$0xff] }
 0x90d   :  { %2858 = vst.msk [vmem:[#allocation2 + $0x78] sm:$0xff] %vm2842_vm9, %v2825_v49  ;;  %3726 = vadd.xlane.f32.xlu0 %v3701_v40  ;;  %v3664_v56 = vmul.f32 %v14726_v28, %v14841_v58  ;;  %v14848_v59 = vld [vmem:[#allocation2 + $0x50] sm:$0xff] }
 0x90e   :  { %3724 = vadd.xlane.f32.xlu1 %v3700_v24  ;;  %v3663_v61 = vmul.f32 %v14726_v28, %v14848_v59  ;;  %v80_v25 = vld [vmem:[%s17508_s2 + $0x70] sm:$0xff] }
 0x90f   :  { %v3703_v39 = vadd.f32 %v3687_v36, %v3664_v56 }
 0x910   :  { %v3702_v6 = vadd.f32 %v3686_v21, %v3663_v61  ;;  %v14854_v27 = vld [vmem:[#allocation2 + $0x68] sm:$0xff] }
 0x911   :  { %3730 = vadd.xlane.f32.xlu0 %v3703_v39  ;;  %v3666_v44 = vmul.f32 %v14726_v28, %v14854_v27 }
 0x912   :  { %3728 = vadd.xlane.f32.xlu1 %v3702_v6 }
 0x913   :  { %v3705_v13 = vadd.f32 %v3689_v35, %v3666_v44 }
 0x915   :  { %3734 = vadd.xlane.f32.xlu0 %v3705_v13 }
 0x916   :  { %v14860_v10 = vpop.permute.xlu1 %3902 }
 0x917   :  { %17885 = vst [vmem:[#allocation68_spill] sm:$0xff] %v14860_v10 }
 0x91a   :  { %v14862_v8 = vpop.permute.xlu1 %3912 }
 0x91b   :  { %17886 = vst [vmem:[#allocation74_spill] sm:$0xff] %v14862_v8 }
 0x91d   :  { %v14913_v21 = vpop.permute.xlu0 %3907 }
 0x91e   :  { %v3590_v3 = vpop.permute.xlu1 %3589  ;;  %17895 = vst [vmem:[#allocation76_spill] sm:$0xff] %v14913_v21 }
 0x91f   :  { %3626 = vst.msk [vmem:[#allocation2 + $0x60] sm:$0xff] %vm3613_vm12, %v3590_v3 }
 0x922   :  { %v3596_v30 = vpop.permute.xlu1 %3595 }
 0x923   :  { %3629 = vst.msk [vmem:[#allocation2 + $0x78] sm:$0xff] %vm3613_vm12, %v3596_v30 }
 0x926   :  { %v3594_v63 = vpop.permute.xlu1 %3593  ;;  %v14866_v53 = vld [vmem:[#allocation2 + $0x60] sm:$0xff] }
 0x927   :  { %3628 = vst.msk [vmem:[#allocation2 + $0x70] sm:$0xff] %vm3613_vm12, %v3594_v63  ;;  %v3665_v0 = vmul.f32 %v14726_v28, %v14866_v53 }
 0x929   :  { %v3704_v18 = vadd.f32 %v3688_v2, %v3665_v0 }
 0x92a   :  { %v14873_v7 = vld [vmem:[#allocation2 + $0x78] sm:$0xff]  ;;  %v14903_v40 = vpop.permute.xlu1 %3917 }
 0x92b   :  { %3732 = vadd.xlane.f32.xlu1 %v3704_v18  ;;  %v3668_v9 = vmul.f32 %v14726_v28, %v14873_v7  ;;  %17890 = vst [vmem:[#allocation41_spill] sm:$0xff] %v14903_v40 }
 0x92d   :  { %v3707_v16 = vadd.f32 %v3691_v46, %v3668_v9 }
 0x92e   :  { %v14879_v11 = vld [vmem:[#allocation2 + $0x70] sm:$0xff]  ;;  %v14905_v49 = vpop.permute.xlu1 %3922 }
 0x92f   :  { %3738 = vadd.xlane.f32.xlu0 %v3707_v16  ;;  %v3667_v55 = vmul.f32 %v14726_v28, %v14879_v11  ;;  %v78_v28 = vld [vmem:[%s17508_s2 + $0x60] sm:$0xff]  ;;  %17891 = vst [vmem:[#allocation60_spill] sm:$0xff] %v14905_v49 }
 0x931   :  { %v3706_v12 = vadd.f32 %v3690_v57, %v3667_v55 }
 0x932   :  { %v14907_v24 = vpop.permute.xlu1 %3927 }
 0x933   :  { %3736 = vadd.xlane.f32.xlu1 %v3706_v12  ;;  %17892 = vst [vmem:[#allocation66_spill] sm:$0xff] %v14907_v24 }
 0x936   :  { %v14909_v36 = vpop.permute.xlu1 %3932 }
 0x937   :  { %17893 = vst [vmem:[#allocation20_spill] sm:$0xff] %v14909_v36 }
 0x93a   :  { %v14911_v56 = vpop.permute.xlu1 %3937 }
 0x93b   :  { %17894 = vst [vmem:[#allocation69_spill] sm:$0xff] %v14911_v56 }
 0x93e   :  { %v14915_v61 = vpop.permute.xlu1 %3942 }
 0x93f   :  { %17896 = vst [vmem:[#allocation85_spill] sm:$0xff] %v14915_v61 }
 0x942   :  { %v14917_v6 = vpop.permute.xlu1 %3947 }
 0x943   :  { %17897 = vst [vmem:[#allocation70_spill] sm:$0xff] %v14917_v6 }
 0x944   :  { %3957 = vperm.xlu1 %11774, %v77_v51  }
 0x945   :  { %3952 = vperm.xlu0 %11775, %v76_v50  }
 0x948   :  { %3967 = vperm.xlu1 %11774, %v79_v38  }
 0x949   :  { %3962 = vperm.xlu0 %11775, %v78_v28  }
 0x94c   :  { %3977 = vperm.xlu1 %11774, %v81_v45  }
 0x94d   :  { %3972 = vperm.xlu0 %11775, %v80_v25  }
 0x963   :  { %v3709_v39 = vpop.xlane.xlu0 %3708 }
 0x964   :  { %v8757_v3 = vmul.f32 -1.442695, %v3709_v39 }
 0x967   :  { %v3715_v35 = vpop.xlane.xlu0 %3714 }
 0x968   :  { %v8760_v0 = vmul.f32 -1.442695, %v3715_v35 }
 0x96b   :  { %v3713_v30 = vpop.xlane.xlu0 %3712 }
 0x96c   :  { %v8759_v63 = vmul.f32 -1.442695, %v3713_v30 }
 0x974   :  { %v3711_v44 = vpop.xlane.xlu1 %3710 }
 0x975   :  { %v8758_v13 = vmul.f32 -1.442695, %v3711_v44 }
 0x977   :  { %12272 = vpow2.f32 %v8758_v13 }
 0x978   :  { %12274 = vpow2.f32 %v8757_v3 }
 0x979   :  { %12276 = vpow2.f32 %v8759_v63 }
 0x97a   :  { %12278 = vpow2.f32 %v8760_v0 }
 0x981   :  { %v12273_v9 = vpop.eup %12272 }
 0x982   :  { %v12275_v16 = vpop.eup %12274  ;;  %v3789_v12 = vadd.f32 1.0, %v12273_v9 }
 0x983   :  { %v3788_v51 = vadd.f32 1.0, %v12275_v16  ;;  %v12277_v38 = vpop.eup %12276 }
 0x984   :  { %v3790_v45 = vadd.f32 1.0, %v12277_v38  ;;  %v12279_v25 = vpop.eup %12278 }
 0x985   :  { %v3719_v46 = vpop.xlane.xlu0 %3718  ;;  %v3791_v3 = vadd.f32 1.0, %v12279_v25 }
 0x986   :  { %v3717_v2 = vpop.xlane.xlu1 %3716  ;;  %v8762_v57 = vmul.f32 -1.442695, %v3719_v46 }
 0x987   :  { %v8761_v18 = vmul.f32 -1.442695, %v3717_v2 }
 0x989   :  { %12280 = vpow2.f32 %v8761_v18  ;;  %v3723_v28 = vpop.xlane.xlu0 %3722 }
 0x98a   :  { %v3721_v55 = vpop.xlane.xlu1 %3720  ;;  %12282 = vpow2.f32 %v8762_v57  ;;  %v8764_v35 = vmul.f32 -1.442695, %v3723_v28 }
 0x98b   :  { %v8763_v50 = vmul.f32 -1.442695, %v3721_v55  ;;  %12284 = vrcp.f32 %v3789_v12 }
 0x98c   :  { %12286 = vrcp.f32 %v3788_v51 }
 0x98d   :  { %12288 = vpow2.f32 %v8763_v50 }
 0x98e   :  { %12290 = vrcp.f32 %v3790_v45 }
 0x98f   :  { %12292 = vpow2.f32 %v8764_v35 }
 0x993   :  { %v12281_v39 = vpop.eup %12280 }
 0x994   :  { %v3792_v30 = vadd.f32 1.0, %v12281_v39  ;;  %v12283_v2 = vpop.eup %12282 }
 0x995   :  { %v12285_v0 = vpop.eup %12284  ;;  %v3793_v57 = vadd.f32 1.0, %v12283_v2 }
 0x996   :  { %v12287_v46 = vpop.eup %12286  ;;  %v3853_v55 = vsub.f32 1.0, %v12285_v0 }
 0x997   :  { %v12289_v16 = vpop.eup %12288  ;;  %v3852_v51 = vsub.f32 1.0, %v12287_v46  ;;  %v3836_v2 = vmul.f32 %v12287_v46, %v14715_v62 }
 0x998   :  { %v3794_v50 = vadd.f32 1.0, %v12289_v16  ;;  %v12291_v28 = vpop.eup %12290  ;;  %v3869_v45 = vmul.f32 %v3853_v55, %v14754_v60 }
 0x999   :  { %v12293_v25 = vpop.eup %12292 }
 0x99a   :  { %v3727_v63 = vpop.xlane.xlu0 %3726 }
 0x99b   :  { %v3725_v44 = vpop.xlane.xlu1 %3724  ;;  %v8766_v9 = vmul.f32 -1.442695, %v3727_v63 }
 0x99c   :  { %v8765_v13 = vmul.f32 -1.442695, %v3725_v44  ;;  %v3868_v44 = vmul.f32 %v3852_v51, %v14732_v31 }
 0x99e   :  { %12294 = vpow2.f32 %v8765_v13  ;;  %v3731_v38 = vpop.xlane.xlu0 %3730  ;;  %v3854_v13 = vsub.f32 1.0, %v12291_v28 }
 0x99f   :  { %12296 = vrcp.f32 %v3791_v3  ;;  %v3729_v18 = vpop.xlane.xlu1 %3728  ;;  %v8768_v39 = vmul.f32 -1.442695, %v3731_v38  ;;  %v3837_v3 = vmul.f32 %v12285_v0, %v14758_v17  ;;  %v3838_v17 = vmul.f32 %v12291_v28, %v14748_v33 }
 0x9a0   :  { %12298 = vrcp.f32 %v3792_v30  ;;  %v8767_v12 = vmul.f32 -1.442695, %v3729_v18 }
 0x9a1   :  { %12300 = vpow2.f32 %v8766_v9  ;;  %v14923_v18 = vadd.f32 %v3869_v45, %v3837_v3  ;;  %v3795_v9 = vadd.f32 1.0, %v12293_v25 }
 0x9a2   :  { %12302 = vrcp.f32 %v3793_v57  ;;  %v3735_v60 = vpop.xlane.xlu0 %3734  ;;  %v14925_v57 = vadd.f32 %v3868_v44, %v3836_v2 }
 0x9a3   :  { %12304 = vpow2.f32 %v8767_v12  ;;  %v3870_v12 = vmul.f32 %v3854_v13, %v14744_v23  ;;  %v3981_v0 = vmul.f32 %v14913_v21, %v14923_v18  ;;  %v8770_v62 = vmul.f32 -1.442695, %v3735_v60 }
 0x9a4   :  { %12306 = vrcp.f32 %v3794_v50  ;;  %v3980_v38 = vmul.f32 %v14860_v10, %v14925_v57 }
 0x9a5   :  { %12308 = vpow2.f32 %v8768_v39  ;;  %v14934_v25 = vadd.f32 %v3870_v12, %v3838_v17  ;;  %v4021_v28 = vmul.f32 %v3981_v0, %v3981_v0 }
 0x9a6   :  { %12310 = vrcp.f32 %v3795_v9  ;;  %v4020_v2 = vmul.f32 %v3980_v38, %v3980_v38 }
 0x9a8   :  { %v12295_v35 = vpop.eup %12294  ;;  %v4036_v12 = vadd.f32 %v4021_v28, %v4020_v2 }
 0x9a9   :  { %v12297_v30 = vpop.eup %12296  ;;  %v3796_v16 = vadd.f32 1.0, %v12295_v35 }
 0x9aa   :  { %v12299_v63 = vpop.eup %12298  ;;  %v3855_v55 = vsub.f32 1.0, %v12297_v30  ;;  %v3839_v33 = vmul.f32 %v12297_v30, %v14730_v42 }
 0x9ab   :  { %v3856_v31 = vsub.f32 1.0, %v12299_v63  ;;  %v12301_v51 = vpop.eup %12300  ;;  %12312 = vrcp.f32 %v3796_v16  ;;  %v3840_v13 = vmul.f32 %v12299_v63, %v14773_v34 }
 0x9ac   :  { %v12303_v46 = vpop.eup %12302  ;;  %v3871_v45 = vmul.f32 %v3855_v55, %v14738_v37  ;;  %v3797_v39 = vadd.f32 1.0, %v12301_v51  ;;  %12314 = vpow2.f32 %v8770_v62  ;;  %v3982_v37 = vmul.f32 %v14862_v8, %v14934_v25 }
 0x9ad   :  { %v12305_v50 = vpop.eup %12304  ;;  %v3872_v23 = vmul.f32 %v3856_v31, %v14786_v32  ;;  %v3857_v44 = vsub.f32 1.0, %v12303_v46  ;;  %v3996_v55 = vadd.f32 %v3981_v0, %v3980_v38 }
 0x9ae   :  { %v12307_v35 = vpop.eup %12306  ;;  %v3798_v3 = vadd.f32 1.0, %v12305_v50  ;;  %v14939_v9 = vadd.f32 %v3871_v45, %v3839_v33  ;;  %12316 = vrcp.f32 %v3797_v39  ;;  %v4022_v51 = vmul.f32 %v3982_v37, %v3982_v37 }
 0x9af   :  { %v12309_v16 = vpop.eup %12308  ;;  %v14943_v60 = vadd.f32 %v3872_v23, %v3840_v13  ;;  %v3858_v32 = vsub.f32 1.0, %v12307_v35  ;;  %v3873_v30 = vmul.f32 %v3857_v44, %v14776_v54  ;;  %v3841_v50 = vmul.f32 %v12303_v46, %v14768_v1 }
 0x9b0   :  { %12318 = vrcp.f32 %v3798_v3  ;;  %v12311_v34 = vpop.eup %12310  ;;  %v3983_v63 = vmul.f32 %v14903_v40, %v14939_v9  ;;  %v3799_v17 = vadd.f32 1.0, %v12309_v16  ;;  %v3997_v23 = vadd.f32 %v3996_v55, %v3982_v37 }
 0x9b1   :  { %v3874_v45 = vmul.f32 %v3858_v32, %v14802_v20  ;;  %v3984_v0 = vmul.f32 %v14905_v49, %v14943_v60  ;;  %v4037_v54 = vadd.f32 %v4036_v12, %v4022_v51  ;;  %v14952_v39 = vadd.f32 %v3873_v30, %v3841_v50 }
 0x9b2   :  { %v3859_v33 = vsub.f32 1.0, %v12311_v34  ;;  %v3842_v28 = vmul.f32 %v12307_v35, %v14792_v41  ;;  %v4023_v3 = vmul.f32 %v3983_v63, %v3983_v63  ;;  %v3998_v16 = vadd.f32 %v3997_v23, %v3983_v63 }
 0x9b3   :  { %v4024_v20 = vmul.f32 %v3984_v0, %v3984_v0  ;;  %v3985_v41 = vmul.f32 %v14907_v24, %v14952_v39  ;;  %v3843_v35 = vmul.f32 %v12311_v34, %v14782_v19 }
 0x9b4   :  { %v14955_v1 = vadd.f32 %v3874_v45, %v3842_v28  ;;  %v4038_v32 = vadd.f32 %v4037_v54, %v4023_v3  ;;  %v3875_v12 = vmul.f32 %v3859_v33, %v14796_v22 }
 0x9b5   :  { %v12313_v62 = vpop.eup %12312  ;;  %v4025_v23 = vmul.f32 %v3985_v41, %v3985_v41 }
 0x9b6   :  { %v12315_v13 = vpop.eup %12314  ;;  %v3860_v2 = vsub.f32 1.0, %v12313_v62  ;;  %v3986_v51 = vmul.f32 %v14909_v36, %v14955_v1  ;;  %v4039_v63 = vadd.f32 %v4038_v32, %v4024_v20  ;;  %v3844_v45 = vmul.f32 %v12313_v62, %v14817_v14 }
 0x9b7   :  { %v3801_v37 = vadd.f32 1.0, %v12315_v13  ;;  %v14965_v22 = vadd.f32 %v3875_v12, %v3843_v35 }
 0x9b8   :  { %v3733_v42 = vpop.xlane.xlu1 %3732  ;;  %v3876_v30 = vmul.f32 %v3860_v2, %v14831_v47  ;;  %v4026_v34 = vmul.f32 %v3986_v51, %v3986_v51  ;;  %v4040_v28 = vadd.f32 %v4039_v63, %v4025_v23 }
 0x9b9   :  { %v8769_v31 = vmul.f32 -1.442695, %v3733_v42  ;;  %v12317_v42 = vpop.eup %12316  ;;  %v3987_v14 = vmul.f32 %v14911_v56, %v14965_v22 }
 0x9ba   :  { %v3861_v50 = vsub.f32 1.0, %v12317_v42  ;;  %v14967_v19 = vadd.f32 %v3876_v30, %v3844_v45  ;;  %v3845_v3 = vmul.f32 %v12317_v42, %v14812_v52 }
 0x9bb   :  { %12320 = vpow2.f32 %v8769_v31  ;;  %v12319_v31 = vpop.eup %12318 }
 0x9bc   :  { %v3739_v38 = vpop.xlane.xlu0 %3738  ;;  %12322 = vrcp.f32 %v3799_v17  ;;  %v3999_v17 = vadd.f32 %v3998_v16, %v3984_v0  ;;  %v3862_v33 = vsub.f32 1.0, %v12319_v31  ;;  %v3877_v0 = vmul.f32 %v3861_v50, %v14820_v26 }
 0x9bd   :  { %v8772_v44 = vmul.f32 -1.442695, %v3739_v38  ;;  %v3988_v20 = vmul.f32 %v14915_v61, %v14967_v19  ;;  %v4041_v16 = vadd.f32 %v4040_v28, %v4026_v34 }
 0x9be   :  { %v4000_v47 = vadd.f32 %v3999_v17, %v3985_v41  ;;  %v3878_v2 = vmul.f32 %v3862_v33, %v14848_v59  ;;  %v14976_v32 = vadd.f32 %v3877_v0, %v3845_v3  ;;  %v4027_v41 = vmul.f32 %v3987_v14, %v3987_v14 }
 0x9bf   :  { %12324 = vpow2.f32 %v8772_v44  ;;  %v4028_v52 = vmul.f32 %v3988_v20, %v3988_v20 }
 0x9c0   :  { %v3737_v46 = vpop.xlane.xlu1 %3736  ;;  %v4042_v17 = vadd.f32 %v4041_v16, %v4027_v41 }
 0x9c1   :  { %v8771_v55 = vmul.f32 -1.442695, %v3737_v46  ;;  %v4001_v46 = vadd.f32 %v4000_v47, %v3986_v51  ;;  %v3989_v51 = vmul.f32 %v14917_v6, %v14976_v32 }
 0x9c2   :  { %v4043_v45 = vadd.f32 %v4042_v17, %v4028_v52 }
 0x9c3   :  { %12326 = vpow2.f32 %v8771_v55  ;;  %v4002_v42 = vadd.f32 %v4001_v46, %v3987_v14  ;;  %v4029_v47 = vmul.f32 %v3989_v51, %v3989_v51 }
 0x9c4   :  { %12328 = vrcp.f32 %v3801_v37  ;;  %v3846_v37 = vmul.f32 %v12319_v31, %v14837_v15  ;;  %v14979_v12 = vpop.permute.xlu0 %3952 }
 0x9c5   :  { %v12321_v38 = vpop.eup %12320  ;;  %17898 = vst [vmem:[#allocation54_spill] sm:$0xff] %v14979_v12  ;;  %v4003_v31 = vadd.f32 %v4002_v42, %v3988_v20 }
 0x9c6   :  { %v3800_v54 = vadd.f32 1.0, %v12321_v38  ;;  %v12323_v44 = vpop.eup %12322  ;;  %v14981_v30 = vadd.f32 %v3878_v2, %v3846_v37 }
 0x9c7   :  { %v3863_v26 = vsub.f32 1.0, %v12323_v44  ;;  %v3847_v38 = vmul.f32 %v12323_v44, %v14826_v43  ;;  %v4004_v0 = vadd.f32 %v4003_v31, %v3989_v51 }
 0x9c8   :  { %12330 = vrcp.f32 %v3800_v54  ;;  %v3990_v63 = vmul.f32 %v14979_v12, %v14981_v30  ;;  %v14989_v54 = vpop.permute.xlu1 %3957  ;;  %v15000_v16 = vpop.permute.xlu0 %3962 }
 0x9c9   :  { %v12325_v13 = vpop.eup %12324  ;;  %v3879_v15 = vmul.f32 %v3863_v26, %v14841_v58  ;;  %17899 = vst [vmem:[#allocation71_spill] sm:$0xff] %v14989_v54  ;;  %v4044_v58 = vadd.f32 %v4043_v45, %v4029_v47  ;;  %17900 = vst [vmem:[#allocation26_spill] sm:$0xff] %v15000_v16 }
 0x9ca   :  { %v3803_v62 = vadd.f32 1.0, %v12325_v13  ;;  %v4030_v34 = vmul.f32 %v3990_v63, %v3990_v63  ;;  %v4005_v44 = vadd.f32 %v4004_v0, %v3990_v63 }
 0x9cb   :  { %v14991_v28 = vadd.f32 %v3879_v15, %v3847_v38 }
 0x9cc   :  { %12332 = vrcp.f32 %v3803_v62  ;;  %v4045_v46 = vadd.f32 %v4044_v58, %v4030_v34  ;;  %v15019_v45 = vpop.permute.xlu0 %3972  ;;  %v4156_v58 = vld [vmem:[%s17511_s11] sm:$0xff] }
 0x9cd   :  { %v12327_v55 = vpop.eup %12326  ;;  %v3991_v3 = vmul.f32 %v14989_v54, %v14991_v28  ;;  %17902 = vst [vmem:[#allocation31_spill] sm:$0xff] %v15019_v45 }
 0x9ce   :  { %v3802_v35 = vadd.f32 1.0, %v12327_v55  ;;  %v12329_v59 = vpop.eup %12328 }
 0x9cf   :  { %v3865_v23 = vsub.f32 1.0, %v12329_v59  ;;  %v3849_v37 = vmul.f32 %v12329_v59, %v17884_v5  ;;  %v4031_v41 = vmul.f32 %v3991_v3, %v3991_v3 }
 0x9d0   :  { %12334 = vrcp.f32 %v3802_v35 }
 0x9d1   :  { %v3881_v43 = vmul.f32 %v3865_v23, %v14854_v27  ;;  %v4006_v27 = vadd.f32 %v4005_v44, %v3991_v3  ;;  %v4046_v51 = vadd.f32 %v4045_v46, %v4031_v41  ;;  %v4157_v3 = vld [vmem:[%s17511_s11 + $0x8] sm:$0xff] }
 0x9d2   :  { %v12331_v50 = vpop.eup %12330  ;;  %v11104_v44 = vpack.c.bf16 %v4157_v3, %v4156_v58  ;;  %v4168_v58 = vld [vmem:[%s17511_s11 + $0x60] sm:$0xff]  ;;  %v4169_v3 = vld [vmem:[%s17511_s11 + $0x68] sm:$0xff] }
 0x9d3   :  { %v3864_v33 = vsub.f32 1.0, %v12331_v50  ;;  %v3848_v13 = vmul.f32 %v12331_v50, %v17887_v48  ;;  %v15008_v35 = vadd.f32 %v3881_v43, %v3849_v37  ;;  %v4158_v43 = vld [vmem:[%s17511_s11 + $0x10] sm:$0xff]  ;;  %v4160_v37 = vld [vmem:[%s17511_s11 + $0x20] sm:$0xff] }
 0x9d4   :  { %11105 = vmatprep.subr.bf16.mxu0 %v11104_v44 }
 0x9d5   :  { %v3880_v14 = vmul.f32 %v3864_v33, %v14866_v53  ;;  %v15005_v53 = vpop.permute.xlu1 %3967  ;;  %11107 = vmatpush3.bf16.msra.mxu0 %v11104_v44  ;;  %v4170_v44 = vld [vmem:[%s17511_s11 + $0x70] sm:$0xff] }
 0x9d6   :  { %v12333_v62 = vpop.eup %12332  ;;  %17901 = vst [vmem:[#allocation73_spill] sm:$0xff] %v15005_v53  ;;  %v3993_v5 = vmul.f32 %v15005_v53, %v15008_v35 }
 0x9d7   :  { %v14998_v2 = vadd.f32 %v3880_v14, %v3848_v13  ;;  %v3867_v20 = vsub.f32 1.0, %v12333_v62  ;;  %v3851_v17 = vmul.f32 %v12333_v62, %v17888_v29 }
 0x9d8   :  { %v4033_v29 = vmul.f32 %v3993_v5, %v3993_v5 }
 0x9d9   :  { %v3992_v48 = vmul.f32 %v15000_v16, %v14998_v2  ;;  %v3883_v26 = vmul.f32 %v3867_v20, %v14873_v7  ;;  %v15021_v38 = vpop.permute.xlu1 %3977  ;;  %v4159_v20 = vld [vmem:[%s17511_s11 + $0x18] sm:$0xff] }
 0x9da   :  { %v12335_v55 = vpop.eup %12334  ;;  %17903 = vst [vmem:[#allocation75_spill] sm:$0xff] %v15021_v38  ;;  %v11108_v46 = vpack.c.bf16 %v4159_v20, %v4158_v43  ;;  %v11128_v43 = vpack.c.bf16 %v4169_v3, %v4168_v58  ;;  %v4171_v20 = vld [vmem:[%s17511_s11 + $0x78] sm:$0xff] }
 0x9db   :  { %v4032_v52 = vmul.f32 %v3992_v48, %v3992_v48  ;;  %v3866_v42 = vsub.f32 1.0, %v12335_v55  ;;  %v4007_v59 = vadd.f32 %v4006_v27, %v3992_v48  ;;  %v3850_v63 = vmul.f32 %v12335_v55, %v17889_v4  ;;  %v4161_v48 = vld [vmem:[%s17511_s11 + $0x28] sm:$0xff] }
 0x9dc   :  { %v15015_v31 = vadd.f32 %v3883_v26, %v3851_v17  ;;  %11109 = vmatprep.subr.bf16.mxu0 %v11108_v46  ;;  %v11112_v26 = vpack.c.bf16 %v4161_v48, %v4160_v37  ;;  %v8777_v37 = vld [vmem:[%s17504_s5 + $0x88] sm:$0xff] }
 0x9dd   :  { %v3882_v15 = vmul.f32 %v3866_v42, %v14879_v11  ;;  %v4047_v7 = vadd.f32 %v4046_v51, %v4032_v52  ;;  %v4008_v23 = vadd.f32 %v4007_v59, %v3993_v5  ;;  %11111 = vmatpush3.bf16.msra.mxu0 %v11108_v46  ;;  %v11132_v46 = vpack.c.bf16 %v4171_v20, %v4170_v44  ;;  %v8781_v48 = vld [vmem:[%s17504_s5 + $0xa8] sm:$0xff] }
 0x9de   :  { %v3995_v47 = vmul.f32 %v15021_v38, %v15015_v31  ;;  %11113 = vmatprep.subr.bf16.mxu0 %v11112_v26 }
 0x9df   :  { %v15017_v50 = vadd.f32 %v3882_v15, %v3850_v63  ;;  %v4048_v4 = vadd.f32 %v4047_v7, %v4033_v29  ;;  %v4162_v63 = vld [vmem:[%s17511_s11 + $0x30] sm:$0xff]  ;;  %v4163_v15 = vld [vmem:[%s17511_s11 + $0x38] sm:$0xff] }
 0x9e0   :  { %v4035_v0 = vmul.f32 %v3995_v47, %v3995_v47  ;;  %v11116_v29 = vpack.c.bf16 %v4163_v15, %v4162_v63 }
 0x9e1   :  { %v3994_v33 = vmul.f32 %v15019_v45, %v15017_v50  ;;  %11115 = vmatpush3.bf16.msra.mxu0 %v11112_v26  ;;  %v8776_v26 = vld [vmem:[%s17504_s5 + $0x80] sm:$0xff] }
 0x9e2   :  { %11117 = vmatprep.subr.bf16.mxu0 %v11116_v29 }
 0x9e3   :  { %v4009_v34 = vadd.f32 %v4008_v23, %v3994_v33  ;;  %v4034_v11 = vmul.f32 %v3994_v33, %v3994_v33 }
 0x9e5   :  { %v4010_v13 = vadd.f32 %v4009_v34, %v3995_v47  ;;  %v4049_v14 = vadd.f32 %v4048_v4, %v4034_v11  ;;  %11119 = vmatpush3.bf16.msra.mxu0 %v11116_v29  ;;  %v4164_v4 = vld [vmem:[%s17511_s11 + $0x40] sm:$0xff]  ;;  %v4165_v34 = vld [vmem:[%s17511_s11 + $0x48] sm:$0xff]  ;;  %v4166_v11 = vld [vmem:[%s17511_s11 + $0x50] sm:$0xff] }
 0x9e7   :  { %4011 = vadd.xlane.f32.xlu0 %v4010_v13  ;;  %v4050_v62 = vadd.f32 %v4049_v14, %v4035_v0  ;;  %v11120_v13 = vpack.c.bf16 %v4165_v34, %v4164_v4  ;;  %v4167_v14 = vld [vmem:[%s17511_s11 + $0x58] sm:$0xff] }
 0x9e9   :  { %4051 = vadd.xlane.f32.xlu1 %v4050_v62  ;;  %v11124_v62 = vpack.c.bf16 %v4167_v14, %v4166_v11  ;;  %11121 = vmatprep.subr.bf16.mxu0 %v11120_v13  ;;  %v15113_v14 = vld [vmem:[%s17512_s9] ss:$0 sm:$0xff] }
 0x9ea   :  { %11123 = vmatpush3.bf16.msra.mxu0 %v11120_v13 }
 0x9eb   :  { %11125 = vmatprep.subr.bf16.mxu0 %v11124_v62 }
 0x9ee   :  { %11127 = vmatpush3.bf16.msra.mxu0 %v11124_v62 }
 0x9ef   :  { %11129 = vmatprep.subr.bf16.mxu0 %v11128_v43 }
 0x9f2   :  { %11131 = vmatpush3.bf16.msra.mxu0 %v11128_v43 }
 0x9f3   :  { %11133 = vmatprep.subr.bf16.mxu0 %v11132_v46 }
 0x9f6   :  { %11135 = vmatpush3.bf16.msra.mxu0 %v11132_v46 }
 0xa74   :  { %v4012_v55 = vpop.xlane.xlu0 %4011 }
 0xa75   :  { %v4013_v41 = vrot.slane %v4012_v55, 4 }
 0xa76   :  { %v4052_v27 = vpop.xlane.xlu1 %4051 }
 0xa77   :  { %v4014_v52 = vadd.f32 %v4013_v41, %v4012_v55  ;;  %v4053_v42 = vrot.slane %v4052_v27, 4  ;;  %v11136_v55 = vpack.c.bf16 %v8781_v48, %v8777_v37  ;;  %v8780_v41 = vld [vmem:[%s17504_s5 + $0xa0] sm:$0xff] }
 0xa79   :  { %v4054_v17 = vadd.f32 %v4053_v42, %v4052_v27  ;;  %v4015_v51 = vrot.slane %v4014_v52, 2  ;;  %v8785_v27 = vld [vmem:[%s17504_s5 + $0xc8] sm:$0xff]  ;;  %v11138_v42 = vpack.c.bf16 %v8780_v41, %v8776_v26  ;;  %11137 = vmatprep.subr.bf16.mxu1 %v11136_v55 }
 0xa7b   :  { %v4016_v5 = vadd.f32 %v4015_v51, %v4014_v52  ;;  %v4055_v59 = vrot.slane %v4054_v17, 2  ;;  %v8789_v52 = vld [vmem:[%s17504_s5 + $0xe8] sm:$0xff]  ;;  %v8784_v51 = vld [vmem:[%s17504_s5 + $0xc0] sm:$0xff]  ;;  %11139 = vmatpush1.bf16.msra.mxu1 %v11138_v42 }
 0xa7d   :  { %v4017_v7 = vrot.slane %v4016_v5, 1  ;;  %v4056_v23 = vadd.f32 %v4055_v59, %v4054_v17  ;;  %v11140_v17 = vpack.c.bf16 %v8789_v52, %v8785_v27 }
 0xa7f   :  { %v4018_v33 = vadd.f32 %v4017_v7, %v4016_v5  ;;  %v4057_v47 = vrot.slane %v4056_v23, 1  ;;  %v8788_v5 = vld [vmem:[%s17504_s5 + $0xe0] sm:$0xff]  ;;  %11141 = vmatprep.subr.bf16.mxu1 %v11140_v17 }
 0xa80   :  { %v11142_v59 = vpack.c.bf16 %v8788_v5, %v8784_v51 }
 0xa81   :  { %11516 = vpush %v4018_v33  ;;  %v4058_v0 = vadd.f32 %v4057_v47, %v4056_v23 }
 0xa82   :  { %11143 = vmatpush1.bf16.msra.mxu1 %v11142_v59 }
 0xa83   :  { %11518 = vpush %v4058_v0 }
 0xab2   :  { %s11517_s2 = spop %11516 }
 0xab3   :  { %s4060_s19 = smul.f32 0.00048828125, %s11517_s2 }
 0xab4   :  { %s11519_s20 = spop %11518 }
 0xab5   :  { %s4062_s21 = smul.f32 %s4060_s19, %s4060_s19  ;;  %v15100_v4 = vstv %s4060_s19 }
 0xab6   :  { %s4061_s4 = smul.f32 0.00048828125, %s11519_s20  ;;  %v4075_v34 = vsub.f32 %v14925_v57, %v15100_v4  ;;  %v4076_v11 = vsub.f32 %v14923_v18, %v15100_v4  ;;  %v4077_v0 = vsub.f32 %v14934_v25, %v15100_v4  ;;  %v4078_v62 = vsub.f32 %v14939_v9, %v15100_v4  ;;  %v15125_v25 = vld [vmem:[%s17513_s10] ss:$0 sm:$0xff] }
 0xab7   :  { %v4079_v18 = vsub.f32 %v14943_v60, %v15100_v4  ;;  %v4080_v37 = vsub.f32 %v14952_v39, %v15100_v4  ;;  %v4081_v26 = vsub.f32 %v14955_v1, %v15100_v4  ;;  %v4082_v39 = vsub.f32 %v14965_v22, %v15100_v4 }
 0xab8   :  { %s4063_s3 = ssub.f32 %s4061_s4, %s4062_s21  ;;  %v4083_v17 = vsub.f32 %v14967_v19, %v15100_v4  ;;  %v4084_v22 = vsub.f32 %v14976_v32, %v15100_v4  ;;  %v4085_v19 = vsub.f32 %v14981_v30, %v15100_v4  ;;  %v4086_v32 = vsub.f32 %v14991_v28, %v15100_v4 }
 0xab9   :  { %v4087_v30 = vsub.f32 %v14998_v2, %v15100_v4  ;;  %v4088_v28 = vsub.f32 %v15008_v35, %v15100_v4  ;;  %v4089_v2 = vsub.f32 %v15017_v50, %v15100_v4  ;;  %v4090_v35 = vsub.f32 %v15015_v31, %v15100_v4 }
 0xaba   :  { %s4064_s26 = smax.f32 %s12717_s25, %s4063_s3  ;;  %v17904_v4 = vmov 0.0  }
 0xabb   :  { %v4065_v63 = vstv %s4064_s26 }
 0xabc   :  { %12336 = vrsqrt.f32 %v4065_v63  ;;  %vm4068_vm13 = vcmp.eq.f32.partialorder %v4065_v63, inf  ;;  %v4071_v23 = vand.u32 2147483648, %v4065_v63  ;;  %vm4070_vm14 = vcmp.eq.f32.partialorder %v4065_v63, 0.0 }
 0xac6   :  { %v12337_v15 = vpop.eup %12336 }
 0xac7   :  { %v4067_v7 = vmul.f32 %v12337_v15, %v4065_v63 }
 0xac9   :  { %v4069_v29 = vsel %vm4068_vm13, %v4065_v63, %v4067_v7 }
 0xaca   :  { %v4072_v33 = vsel %vm4070_vm14, %v4071_v23, %v4069_v29 }
 0xacb   :  { %11520 = vpush %v4072_v33 }
 0xafc   :  { %s11521_s27 = spop %11520 }
 0xafd   :  { %s4091_s28 = sadd.f32 1e-05, %s11521_s27 }
 0xaff   :  { %v4092_v47 = vstv %s4091_s28 }
 0xb00   :  { %12338 = vrcp.f32 %v4092_v47 }
 0xb0a   :  { %v15108_v13 = vpop.eup %12338 }
 0xb0b   :  { %v4094_v58 = vmul.f32 %v15108_v13, %v4075_v34  ;;  %v4095_v57 = vmul.f32 %v15108_v13, %v4076_v11  ;;  %v4096_v3 = vmul.f32 %v15108_v13, %v4077_v0  ;;  %v4097_v43 = vmul.f32 %v15108_v13, %v4078_v62 }
 0xb0c   :  { %v4098_v46 = vmul.f32 %v15108_v13, %v4079_v18  ;;  %v4099_v41 = vmul.f32 %v15108_v13, %v4080_v37  ;;  %v4100_v42 = vmul.f32 %v15108_v13, %v4081_v26  ;;  %v4101_v5 = vmul.f32 %v15108_v13, %v4082_v39 }
 0xb0d   :  { %v4117_v44 = vmul.f32 %v15113_v14, %v4094_v58  ;;  %v4118_v9 = vmul.f32 %v15113_v14, %v4095_v57  ;;  %v4119_v20 = vmul.f32 %v15113_v14, %v4096_v3  ;;  %v4120_v55 = vmul.f32 %v15113_v14, %v4097_v43 }
 0xb0e   :  { %v4121_v52 = vmul.f32 %v15113_v14, %v4098_v46  ;;  %v4122_v51 = vmul.f32 %v15113_v14, %v4099_v41  ;;  %v4123_v63 = vmul.f32 %v15113_v14, %v4100_v42  ;;  %v4102_v15 = vmul.f32 %v15108_v13, %v4083_v17  ;;  %v8787_v17 = vld [vmem:[%s17504_s5 + $0xd8] sm:$0xff] }
 0xb0f   :  { %v4140_v60 = vadd.f32 %v15125_v25, %v4117_v44  ;;  %v4141_v48 = vadd.f32 %v15125_v25, %v4118_v9  ;;  %v4142_v27 = vadd.f32 %v15125_v25, %v4119_v20  ;;  %v4143_v1 = vadd.f32 %v15125_v25, %v4120_v55 }
 0xb10   :  { %v4144_v59 = vadd.f32 %v15125_v25, %v4121_v52  ;;  %v4145_v7 = vadd.f32 %v15125_v25, %v4122_v51  ;;  %v4124_v23 = vmul.f32 %v15113_v14, %v4101_v5  ;;  %v4103_v29 = vmul.f32 %v15108_v13, %v4084_v22  ;;  %v8783_v52 = vld [vmem:[%s17504_s5 + $0xb8] sm:$0xff]  ;;  %v8786_v5 = vld [vmem:[%s17504_s5 + $0xd0] sm:$0xff] }
 0xb11   :  { %10176 = vmatprep.mubr.f32.mxu0 %v4140_v60  ;;  %v4146_v33 = vadd.f32 %v15125_v25, %v4123_v63  ;;  %v4125_v47 = vmul.f32 %v15113_v14, %v4102_v15  ;;  %v4104_v34 = vmul.f32 %v15108_v13, %v4085_v19  ;;  %v4105_v62 = vmul.f32 %v15108_v13, %v4086_v32  ;;  %v15222_v15 = vld [vmem:[%s17514_s12] ss:$0 sm:$0xff]  ;;  %v17906_v32 = vld [vmem:[#allocation4_spill] sm:$0xff] }
 0xb12   :  { %10177 = vmatmul.mubr.f32.vlgmr.msra.gmra.mrb[96].mxu0 %v4141_v48  ;;  %v4147_v11 = vadd.f32 %v15125_v25, %v4124_v23  ;;  %v4126_v0 = vmul.f32 %v15113_v14, %v4103_v29  ;;  %v4106_v3 = vmul.f32 %v15108_v13, %v4087_v30  ;;  %v4107_v44 = vmul.f32 %v15108_v13, %v4088_v28  ;;  %v17905_v29 = vld [vmem:[#allocation3_spill] sm:$0xff]  ;;  %v17909_v28 = vld [vmem:[#allocation5_spill] sm:$0xff] }
 0xb13   :  { %10179 = vmatprep.mubr.f32.mxu0 %v4142_v27  ;;  %v4148_v58 = vadd.f32 %v15125_v25, %v4125_v47  ;;  %v4127_v57 = vmul.f32 %v15113_v14, %v4104_v34  ;;  %v4128_v43 = vmul.f32 %v15113_v14, %v4105_v62  ;;  %v4108_v46 = vmul.f32 %v15108_v13, %v4089_v2 }
 0xb14   :  { %v4149_v18 = vadd.f32 %v15125_v25, %v4126_v0  ;;  %v4129_v20 = vmul.f32 %v15113_v14, %v4106_v3  ;;  %v4130_v50 = vmul.f32 %v15113_v14, %v4107_v44  ;;  %v4109_v60 = vmul.f32 %v15108_v13, %v4090_v35  ;;  %v8779_v13 = vld [vmem:[%s17504_s5 + $0x98] sm:$0xff] }
 0xb15   :  { %v4150_v9 = vadd.f32 %v15125_v25, %v4127_v57  ;;  %v4151_v37 = vadd.f32 %v15125_v25, %v4128_v43  ;;  %v4131_v26 = vmul.f32 %v15113_v14, %v4108_v46  ;;  %v11144_v42 = vpack.c.bf16 %v8783_v52, %v8779_v13  ;;  %v17910_v44 = vld [vmem:[#allocation6_spill] sm:$0xff] }
 0xb16   :  { %10180 = vmatmul.mubr.f32.gmra.mrb[98].mxu0 %v4143_v1  ;;  %v4152_v48 = vadd.f32 %v15125_v25, %v4129_v20  ;;  %v4153_v55 = vadd.f32 %v15125_v25, %v4130_v50  ;;  %v4132_v41 = vmul.f32 %v15113_v14, %v4109_v60  ;;  %v8778_v14 = vld [vmem:[%s17504_s5 + $0x90] sm:$0xff]  ;;  %v8791_v1 = vld [vmem:[%s17504_s5 + $0xf8] sm:$0xff] }
 0xb17   :  { %10182 = vmatprep.mubr.f32.mxu0 %v4144_v59  ;;  %v4154_v27 = vadd.f32 %v15125_v25, %v4131_v26  ;;  %11145 = vmatprep.subr.bf16.mxu0 %v11144_v42  ;;  %v11148_v51 = vpack.c.bf16 %v8791_v1, %v8787_v17  ;;  %v8790_v59 = vld [vmem:[%s17504_s5 + $0xf0] sm:$0xff] }
 0xb18   :  { %v4155_v31 = vadd.f32 %v15125_v25, %v4132_v41  ;;  %v8782_v25 = vld [vmem:[%s17504_s5 + $0xb0] sm:$0xff]  ;;  %v11150_v63 = vpack.c.bf16 %v8790_v59, %v8786_v5  ;;  %v17918_v59 = vld [vmem:[#allocation10_spill] sm:$0xff] }
 0xb19   :  { %v11146_v39 = vpack.c.bf16 %v8782_v25, %v8778_v14  ;;  %v17917_v17 = vld [vmem:[#allocation9_spill] sm:$0xff] }
 0xb1a   :  { %10183 = vmatmul.mubr.f32.gmra.mrb[100].mxu0 %v4145_v7 }
 0xb1b   :  { %10185 = vmatprep.mubr.f32.mxu0 %v4146_v33  ;;  %11147 = vmatpush1.bf16.msra.mxu0 %v11146_v39 }
 0xb1c   :  { %11149 = vmatprep.subr.bf16.mxu0 %v11148_v51 }
 0xb1e   :  { %10186 = vmatmul.mubr.f32.gmra.mrb[102].mxu0 %v4147_v11 }
 0xb1f   :  { %10188 = vmatprep.mubr.f32.mxu0 %v4148_v58  ;;  %11151 = vmatpush1.bf16.msra.mxu0 %v11150_v63 }
 0xb22   :  { %10189 = vmatmul.mubr.f32.gmra.mrb[104].mxu0 %v4149_v18 }
 0xb23   :  { %10191 = vmatprep.mubr.f32.mxu0 %v4150_v9 }
 0xb26   :  { %10192 = vmatmul.mubr.f32.gmra.mrb[106].mxu0 %v4151_v37 }
 0xb27   :  { %10194 = vmatprep.mubr.f32.mxu0 %v4152_v48  ;;  %v17913_v48 = vld [vmem:[#allocation7_spill] sm:$0xff] }
 0xb2a   :  { %10195 = vmatmul.mubr.f32.gmra.mrb[108].mxu0 %v4153_v55 }
 0xb2b   :  { %10197 = vmatprep.mubr.f32.mxu0 %v4154_v27  ;;  %v17914_v27 = vld [vmem:[#allocation8_spill] sm:$0xff] }
 0xb2e   :  { %10198 = vmatmul.mubr.f32.gmra.mrb[110].mxu0 %v4155_v31 }
 0xb2f   :  { %4669 = vmatprep.mubr.f32.mxu0 %v17904_v4 }
 0xbe5   :  { %v10178_v22 = vpop.f32.mrb[96].mxu0 }
 0xbe6   :  { %v4245_v19 = vpop.f32.mrb[97].mxu0  ;;  %v4251_v7 = vadd.f32 %v10178_v22, %v15222_v15 }
 0xbe7   :  { %v4246_v23 = vadd.f32 %v15222_v15, %v4245_v19 }
 0xbe8   :  { %v4325_v30 = vadd.f32 %v4251_v7, %v17906_v32 }
 0xbe9   :  { %v4324_v33 = vadd.f32 %v4246_v23, %v17905_v29  ;;  %v10181_v47 = vpop.f32.mrb[98].mxu0  ;;  %v17921_v29 = vld [vmem:[#allocation11_spill] sm:$0xff] }
 0xbea   :  { %v4255_v34 = vpop.f32.mrb[99].mxu0  ;;  %v15237_v57 = vmax.f32 %v4325_v30, 0.0  ;;  %v4261_v3 = vadd.f32 %v10181_v47, %v15222_v15  ;;  %v17922_v47 = vld [vmem:[#allocation12_spill] sm:$0xff] }
 0xbeb   :  { %v15228_v11 = vmax.f32 %v4324_v33, 0.0  ;;  %v4256_v0 = vadd.f32 %v15222_v15, %v4255_v34 }
 0xbec   :  { %17908 = vst [vmem:[#allocation77_spill] sm:$0xff] %v15237_v57  ;;  %v4327_v9 = vadd.f32 %v4261_v3, %v17910_v44 }
 0xbed   :  { %17907 = vst [vmem:[#allocation36_spill] sm:$0xff] %v15228_v11  ;;  %v10184_v62 = vpop.f32.mrb[100].mxu0  ;;  %8793 = vmatmul.mubr.msk.f32.vlgmr.msra.gmra.mrb[112].mxu1 %vm304_vm0, %v15228_v11  ;;  %8809 = vmatmul.mubr.msk.f32.vlgmr.msra.gmra.mrb[112].mxu0 %vm304_vm0, %v15228_v11  ;;  %v4326_v2 = vadd.f32 %v4256_v0, %v17909_v28  ;;  %v17926_v28 = vld [vmem:[#allocation14_spill] sm:$0xff] }
 0xbee   :  { %v4265_v58 = vpop.f32.mrb[101].mxu0  ;;  %4514 = vmatprep.mubr.f32.mxu1 %v17904_v4  ;;  %4675 = vmatprep.mubr.f32.mxu0 %v17904_v4  ;;  %v15257_v50 = vmax.f32 %v4327_v9, 0.0  ;;  %v4271_v60 = vadd.f32 %v10184_v62, %v15222_v15 }
 0xbef   :  { %v15248_v20 = vmax.f32 %v4326_v2, 0.0  ;;  %v4266_v46 = vadd.f32 %v15222_v15, %v4265_v58  ;;  %v17925_v58 = vld [vmem:[#allocation13_spill] sm:$0xff] }
 0xbf0   :  { %17912 = vst [vmem:[#allocation78_spill] sm:$0xff] %v15257_v50  ;;  %v4329_v31 = vadd.f32 %v4271_v60, %v17914_v27  ;;  %v17933_v27 = vld [vmem:[#allocation17_spill] sm:$0xff] }
 0xbf1   :  { %v10187_v18 = vpop.f32.mrb[102].mxu0  ;;  %8794 = vmatmul.mubr.msk.f32.gmra.mrb[114].mxu1 %vm304_vm0, %v15237_v57  ;;  %8810 = vmatmul.mubr.msk.f32.gmra.mrb[114].mxu0 %vm304_vm0, %v15237_v57  ;;  %17911 = vst [vmem:[#allocation42_spill] sm:$0xff] %v15248_v20  ;;  %v4328_v26 = vadd.f32 %v4266_v46, %v17913_v48  ;;  %v17929_v46 = vld [vmem:[#allocation15_spill] sm:$0xff] }
 0xbf2   :  { %v4275_v43 = vpop.f32.mrb[103].mxu0  ;;  %4520 = vmatprep.mubr.f32.mxu1 %v17904_v4  ;;  %4681 = vmatprep.mubr.f32.mxu0 %v17904_v4  ;;  %v15277_v25 = vmax.f32 %v4329_v31, 0.0  ;;  %v4281_v39 = vadd.f32 %v10187_v18, %v15222_v15 }
 0xbf3   :  { %v15268_v13 = vmax.f32 %v4328_v26, 0.0  ;;  %v4276_v52 = vadd.f32 %v15222_v15, %v4275_v43 }
 0xbf4   :  { %17916 = vst [vmem:[#allocation55_spill] sm:$0xff] %v15277_v25  ;;  %v4331_v63 = vadd.f32 %v4281_v39, %v17918_v59  ;;  %v15385_v39 = vld [vmem:[%s17506_s6 + $0x4] sm:$0xf] }
 0xbf5   :  { %v10190_v35 = vpop.f32.mrb[104].mxu0  ;;  %8795 = vmatmul.mubr.msk.f32.gmra.mrb[116].mxu1 %vm304_vm0, %v15248_v20  ;;  %8811 = vmatmul.mubr.msk.f32.gmra.mrb[116].mxu0 %vm304_vm0, %v15248_v20  ;;  %17915 = vst [vmem:[#allocation48_spill] sm:$0xff] %v15268_v13  ;;  %v4330_v1 = vadd.f32 %v4276_v52, %v17917_v17  ;;  %v17934_v52 = vld [vmem:[#allocation18_spill] sm:$0xff]  ;;  %v17937_v17 = vld [vmem:[#allocation19_spill] sm:$0xff] }
 0xbf6   :  { %v4285_v37 = vpop.f32.mrb[105].mxu0  ;;  %4526 = vmatprep.mubr.f32.mxu1 %v17904_v4  ;;  %4687 = vmatprep.mubr.f32.mxu0 %v17904_v4  ;;  %v15297_v7 = vmax.f32 %v4331_v63, 0.0  ;;  %v4291_v23 = vadd.f32 %v10190_v35, %v15222_v15  ;;  %v17940_v63 = vsub.s32 2, %v17937_v17 }
 0xbf7   :  { %v15288_v22 = vmax.f32 %v4330_v1, 0.0  ;;  %v4286_v19 = vadd.f32 %v15222_v15, %v4285_v37  ;;  %v17930_v37 = vld [vmem:[#allocation16_spill] sm:$0xff]  ;;  %v17938_v1 = vsub.s32 0, %v17937_v17 }
 0xbf8   :  { %17920 = vst [vmem:[#allocation30_spill] sm:$0xff] %v15297_v7  ;;  %v4333_v34 = vadd.f32 %v4291_v23, %v17922_v47 }
 0xbf9   :  { %v10193_v55 = vpop.f32.mrb[106].mxu0  ;;  %8796 = vmatmul.mubr.msk.f32.gmra.mrb[118].mxu1 %vm304_vm0, %v15257_v50  ;;  %8812 = vmatmul.mubr.msk.f32.gmra.mrb[118].mxu0 %vm304_vm0, %v15257_v50  ;;  %17919 = vst [vmem:[#allocation61_spill] sm:$0xff] %v15288_v22  ;;  %v4332_v33 = vadd.f32 %v4286_v19, %v17921_v29  ;;  %v15398_v19 = vrot.slane %v15385_v39, %v17940_v63 }
 0xbfa   :  { %v4295_v41 = vpop.f32.mrb[107].mxu0  ;;  %4532 = vmatprep.mubr.f32.mxu1 %v17904_v4  ;;  %4693 = vmatprep.mubr.f32.mxu0 %v17904_v4  ;;  %v15317_v0 = vmax.f32 %v4333_v34, 0.0  ;;  %v4301_v62 = vadd.f32 %v10193_v55, %v15222_v15 }
 0xbfb   :  { %v15308_v32 = vmax.f32 %v4332_v33, 0.0  ;;  %v4296_v30 = vadd.f32 %v15222_v15, %v4295_v41  ;;  %v17942_v33 = vsub.s32 1, %v17937_v17 }
 0xbfc   :  { %17924 = vst [vmem:[#allocation40_spill] sm:$0xff] %v15317_v0  ;;  %v4335_v2 = vadd.f32 %v4301_v62, %v17926_v28 }
 0xbfd   :  { %v10196_v42 = vpop.f32.mrb[108].mxu0  ;;  %8797 = vmatmul.mubr.msk.f32.gmra.mrb[120].mxu1 %vm304_vm0, %v15268_v13  ;;  %8813 = vmatmul.mubr.msk.f32.gmra.mrb[120].mxu0 %vm304_vm0, %v15268_v13  ;;  %17923 = vst [vmem:[#allocation22_spill] sm:$0xff] %v15308_v32  ;;  %v4334_v3 = vadd.f32 %v4296_v30, %v17925_v58  ;;  %v15405_v47 = vrot.slane %v15385_v39, %v17942_v33 }
 0xbfe   :  { %v4305_v14 = vpop.f32.mrb[109].mxu0  ;;  %4538 = vmatprep.mubr.f32.mxu1 %v17904_v4  ;;  %4699 = vmatprep.mubr.f32.mxu0 %v17904_v4  ;;  %v15337_v44 = vmax.f32 %v4335_v2, 0.0  ;;  %v4311_v9 = vadd.f32 %v10196_v42, %v15222_v15 }
 0xbff   :  { %v15328_v18 = vmax.f32 %v4334_v3, 0.0  ;;  %v4306_v43 = vadd.f32 %v15222_v15, %v4305_v14 }
 0xc00   :  { %17928 = vst [vmem:[#allocation33_spill] sm:$0xff] %v15337_v44  ;;  %v4337_v60 = vadd.f32 %v4311_v9, %v17930_v37 }
 0xc01   :  { %v10199_v51 = vpop.f32.mrb[110].mxu0  ;;  %8798 = vmatmul.mubr.msk.f32.gmra.mrb[122].mxu1 %vm304_vm0, %v15277_v25  ;;  %8814 = vmatmul.mubr.msk.f32.gmra.mrb[122].mxu0 %vm304_vm0, %v15277_v25  ;;  %17927 = vst [vmem:[#allocation28_spill] sm:$0xff] %v15328_v18  ;;  %v4336_v35 = vadd.f32 %v4306_v43, %v17929_v46 }
 0xc02   :  { %v4315_v5 = vpop.f32.mrb[111].mxu0  ;;  %4544 = vmatprep.mubr.f32.mxu1 %v17904_v4  ;;  %4705 = vmatprep.mubr.f32.mxu0 %v17904_v4  ;;  %v15357_v55 = vmax.f32 %v4337_v60, 0.0  ;;  %v4321_v41 = vadd.f32 %v10199_v51, %v15222_v15  ;;  %v15390_v51 = vrot.slane %v15385_v39, %v17938_v1 }
 0xc03   :  { %v15348_v48 = vmax.f32 %v4336_v35, 0.0  ;;  %v4316_v26 = vadd.f32 %v15222_v15, %v4315_v5 }
 0xc04   :  { %17932 = vst [vmem:[#allocation44_spill] sm:$0xff] %v15357_v55  ;;  %v4339_v42 = vadd.f32 %v4321_v41, %v17934_v52 }
 0xc05   :  { %8799 = vmatmul.mubr.msk.f32.gmra.mrb[124].mxu1 %vm304_vm0, %v15288_v22  ;;  %8815 = vmatmul.mubr.msk.f32.gmra.mrb[124].mxu0 %vm304_vm0, %v15288_v22  ;;  %17931 = vst [vmem:[#allocation38_spill] sm:$0xff] %v15348_v48  ;;  %v4338_v31 = vadd.f32 %v4316_v26, %v17933_v27 }
 0xc06   :  { %4550 = vmatprep.mubr.f32.mxu1 %v17904_v4  ;;  %4711 = vmatprep.mubr.f32.mxu0 %v17904_v4  ;;  %v15376_v15 = vmax.f32 %v4339_v42, 0.0 }
 0xc07   :  { %v15368_v14 = vmax.f32 %v4338_v31, 0.0 }
 0xc08   :  { %17936 = vst [vmem:[#allocation57_spill] sm:$0xff] %v15376_v15 }
 0xc09   :  { %8800 = vmatmul.mubr.msk.f32.gmra.mrb[126].mxu1 %vm304_vm0, %v15297_v7  ;;  %8816 = vmatmul.mubr.msk.f32.gmra.mrb[126].mxu0 %vm304_vm0, %v15297_v7  ;;  %17935 = vst [vmem:[#allocation50_spill] sm:$0xff] %v15368_v14 }
 0xc0a   :  { %4556 = vmatprep.mubr.f32.mxu1 %v17904_v4  ;;  %4717 = vmatprep.mubr.f32.mxu0 %v17904_v4 }
 0xc0d   :  { %8801 = vmatmul.mubr.msk.f32.gmra.mrb[128].mxu1 %vm304_vm0, %v15308_v32  ;;  %8817 = vmatmul.mubr.msk.f32.gmra.mrb[128].mxu0 %vm304_vm0, %v15308_v32 }
 0xc0e   :  { %4562 = vmatprep.mubr.f32.mxu1 %v17904_v4  ;;  %4723 = vmatprep.mubr.f32.mxu0 %v17904_v4 }
 0xc11   :  { %8802 = vmatmul.mubr.msk.f32.gmra.mrb[130].mxu1 %vm304_vm0, %v15317_v0  ;;  %8818 = vmatmul.mubr.msk.f32.gmra.mrb[130].mxu0 %vm304_vm0, %v15317_v0 }
 0xc12   :  { %4568 = vmatprep.mubr.f32.mxu1 %v17904_v4  ;;  %4729 = vmatprep.mubr.f32.mxu0 %v17904_v4 }
 0xc15   :  { %8803 = vmatmul.mubr.msk.f32.gmra.mrb[132].mxu1 %vm304_vm0, %v15328_v18  ;;  %8819 = vmatmul.mubr.msk.f32.gmra.mrb[132].mxu0 %vm304_vm0, %v15328_v18 }
 0xc16   :  { %4574 = vmatprep.mubr.f32.mxu1 %v17904_v4  ;;  %4735 = vmatprep.mubr.f32.mxu0 %v17904_v4 }
 0xc19   :  { %8804 = vmatmul.mubr.msk.f32.gmra.mrb[134].mxu1 %vm304_vm0, %v15337_v44  ;;  %8820 = vmatmul.mubr.msk.f32.gmra.mrb[134].mxu0 %vm304_vm0, %v15337_v44 }
 0xc1a   :  { %4580 = vmatprep.mubr.f32.mxu1 %v17904_v4  ;;  %4741 = vmatprep.mubr.f32.mxu0 %v17904_v4 }
 0xc1d   :  { %8805 = vmatmul.mubr.msk.f32.gmra.mrb[136].mxu1 %vm304_vm0, %v15348_v48  ;;  %8821 = vmatmul.mubr.msk.f32.gmra.mrb[136].mxu0 %vm304_vm0, %v15348_v48 }
 0xc1e   :  { %4586 = vmatprep.mubr.f32.mxu1 %v17904_v4  ;;  %4747 = vmatprep.mubr.f32.mxu0 %v17904_v4 }
 0xc21   :  { %8806 = vmatmul.mubr.msk.f32.gmra.mrb[138].mxu1 %vm304_vm0, %v15357_v55  ;;  %8822 = vmatmul.mubr.msk.f32.gmra.mrb[138].mxu0 %vm304_vm0, %v15357_v55 }
 0xc22   :  { %4592 = vmatprep.mubr.f32.mxu1 %v17904_v4  ;;  %4753 = vmatprep.mubr.f32.mxu0 %v17904_v4 }
 0xc25   :  { %8807 = vmatmul.mubr.msk.f32.gmra.mrb[140].mxu1 %vm304_vm0, %v15368_v14  ;;  %8823 = vmatmul.mubr.msk.f32.gmra.mrb[140].mxu0 %vm304_vm0, %v15368_v14 }
 0xc26   :  { %4598 = vmatprep.mubr.f32.mxu1 %v17904_v4  ;;  %4759 = vmatprep.mubr.f32.mxu0 %v17904_v4 }
 0xc29   :  { %8808 = vmatmul.mubr.msk.f32.gmra.mrb[142].mxu1 %vm304_vm0, %v15376_v15  ;;  %8824 = vmatmul.mubr.msk.f32.gmra.mrb[142].mxu0 %vm304_vm0, %v15376_v15 }
 0xcc0   :  { %v4510_v5 = vpop.f32.mrb[112].mxu1  ;;  %v4671_v4 = vpop.f32.mrb[112].mxu0 }
 0xcc1   :  { %v15393_v59 = vadd.f32 %v4510_v5, %v15390_v51  ;;  %v4512_v23 = vpop.f32.mrb[113].mxu1  ;;  %v15400_v29 = vpop.f32.mrb[113].mxu0  ;;  %v4672_v62 = vadd.f32 %v4671_v4, %v15398_v19 }
 0xcc2   :  { %17941 = vst [vmem:[#allocation25_spill] sm:$0xff] %v15400_v29  ;;  %v4513_v43 = vadd.f32 %v4512_v23, %v15405_v47 }
 0xcc3   :  { %17939 = vst [vmem:[#allocation63_spill] sm:$0xff] %v15393_v59  ;;  %10232 = vmatprep.mubr.msk.f32.mxu1 %vm304_vm0, %v15393_v59 }
 0xcc4   :  { %v4516_v34 = vpop.f32.mrb[114].mxu1  ;;  %v4677_v30 = vpop.f32.mrb[114].mxu0 }
 0xcc5   :  { %v15411_v58 = vadd.f32 %v4516_v34, %v15390_v51  ;;  %v4678_v3 = vadd.f32 %v4677_v30, %v15398_v19  ;;  %v4518_v28 = vpop.f32.mrb[115].mxu1  ;;  %v15414_v2 = vpop.f32.mrb[115].mxu0 }
 0xcc6   :  { %17944 = vst [vmem:[#allocation80_spill] sm:$0xff] %v15414_v2  ;;  %v4519_v9 = vadd.f32 %v4518_v28, %v15405_v47 }
 0xcc7   :  { %17943 = vst [vmem:[#allocation35_spill] sm:$0xff] %v15411_v58  ;;  %v11200_v46 = vpack.c.bf16 %v4678_v3, %v4672_v62  ;;  %v15418_v35 = vpack.i.bf16 %v4678_v3, %v4672_v62 }
 0xcc8   :  { %v4522_v37 = vpop.f32.mrb[116].mxu1  ;;  %v4683_v60 = vpop.f32.mrb[116].mxu0  ;;  %v15420_v26 = vpack.i.bf16 %v4519_v9, %v4513_v43  ;;  %v11152_v41 = vpack.c.bf16 %v4519_v9, %v4513_v43 }
 0xcc9   :  { %17945 = vst [vmem:[#allocation79_spill] sm:$0xff] %v15418_v35  ;;  %v15423_v27 = vadd.f32 %v4522_v37, %v15390_v51  ;;  %v4524_v31 = vpop.f32.mrb[117].mxu1  ;;  %v15425_v52 = vpop.f32.mrb[117].mxu0  ;;  %11201 = vmatprep.subr.bf16.mxu0 %v11200_v46  ;;  %v4684_v4 = vadd.f32 %v4683_v60, %v15398_v19 }
 0xcca   :  { %17946 = vst [vmem:[#allocation46_spill] sm:$0xff] %v15420_v26  ;;  %17948 = vst [vmem:[#allocation59_spill] sm:$0xff] %v15425_v52  ;;  %11203 = vmatpush3.bf16.msra.mxu0 %v11200_v46  ;;  %11777 = vrot.lane.b32.xlu0 %v15420_v26, %s12713_s22  ;;  %v4525_v30 = vadd.f32 %v4524_v31, %v15405_v47 }
 0xccb   :  { %17947 = vst [vmem:[#allocation52_spill] sm:$0xff] %v15423_v27  ;;  %11154 = vmatprep.subr.msk.bf16.mxu1 %vm13134_vm1, %v11152_v41 }
 0xccc   :  { %11157 = vmatpush3.bf16.xpose.msk.msra.mxu1 %vm13134_vm1, %v11152_v41  ;;  %v4528_v1 = vpop.f32.mrb[118].mxu1  ;;  %v4689_v5 = vpop.f32.mrb[118].mxu0 }
 0xccd   :  { %v15435_v63 = vadd.f32 %v4528_v1, %v15390_v51  ;;  %v4690_v23 = vadd.f32 %v4689_v5, %v15398_v19  ;;  %v4530_v33 = vpop.f32.mrb[119].mxu1  ;;  %v15438_v34 = vpop.f32.mrb[119].mxu0 }
 0xcce   :  { %17951 = vst [vmem:[#allocation67_spill] sm:$0xff] %v15438_v34  ;;  %v4531_v62 = vadd.f32 %v4530_v33, %v15405_v47 }
 0xccf   :  { %17950 = vst [vmem:[#allocation65_spill] sm:$0xff] %v15435_v63  ;;  %v11204_v3 = vpack.c.bf16 %v4690_v23, %v4684_v4  ;;  %v15442_v28 = vpack.i.bf16 %v4690_v23, %v4684_v4 }
 0xcd0   :  { %v4534_v43 = vpop.f32.mrb[120].mxu1  ;;  %v4695_v9 = vpop.f32.mrb[120].mxu0  ;;  %v15444_v46 = vpack.i.bf16 %v4531_v62, %v4525_v30  ;;  %v11158_v37 = vpack.c.bf16 %v4531_v62, %v4525_v30 }
 0xcd1   :  { %17952 = vst [vmem:[#allocation81_spill] sm:$0xff] %v15442_v28  ;;  %v15447_v60 = vadd.f32 %v4534_v43, %v15390_v51  ;;  %v4536_v41 = vpop.f32.mrb[121].mxu1  ;;  %v15449_v1 = vpop.f32.mrb[121].mxu0  ;;  %11205 = vmatprep.subr.bf16.mxu0 %v11204_v3  ;;  %v4696_v4 = vadd.f32 %v4695_v9, %v15398_v19 }
 0xcd2   :  { %17953 = vst [vmem:[#allocation47_spill] sm:$0xff] %v15444_v46  ;;  %17955 = vst [vmem:[#allocation83_spill] sm:$0xff] %v15449_v1  ;;  %11207 = vmatpush3.bf16.msra.mxu0 %v11204_v3  ;;  %11782 = vrot.lane.b32.xlu1 %v15444_v46, %s12713_s22  ;;  %v4537_v3 = vadd.f32 %v4536_v41, %v15405_v47 }
 0xcd3   :  { %17954 = vst [vmem:[#allocation84_spill] sm:$0xff] %v15447_v60  ;;  %11160 = vmatprep.subr.msk.bf16.mxu1 %vm13134_vm1, %v11158_v37 }
 0xcd4   :  { %11163 = vmatpush3.bf16.xpose.msk.msra.mxu1 %vm13134_vm1, %v11158_v37  ;;  %v4540_v31 = vpop.f32.mrb[122].mxu1  ;;  %v4701_v5 = vpop.f32.mrb[122].mxu0 }
 0xcd5   :  { %v15459_v23 = vadd.f32 %v4540_v31, %v15390_v51  ;;  %v4702_v33 = vadd.f32 %v4701_v5, %v15398_v19  ;;  %v4542_v30 = vpop.f32.mrb[123].mxu1  ;;  %v15462_v62 = vpop.f32.mrb[123].mxu0 }
 0xcd6   :  { %17957 = vst [vmem:[#allocation82_spill] sm:$0xff] %v15462_v62  ;;  %v4543_v43 = vadd.f32 %v4542_v30, %v15405_v47 }
 0xcd7   :  { %17956 = vst [vmem:[#allocation72_spill] sm:$0xff] %v15459_v23  ;;  %v11208_v14 = vpack.c.bf16 %v4702_v33, %v4696_v4  ;;  %v15466_v15 = vpack.i.bf16 %v4702_v33, %v4696_v4 }
 0xcd8   :  { %v4546_v37 = vpop.f32.mrb[124].mxu1  ;;  %v4707_v48 = vpop.f32.mrb[124].mxu0  ;;  %v15468_v55 = vpack.i.bf16 %v4543_v43, %v4537_v3  ;;  %v11164_v9 = vpack.c.bf16 %v4543_v43, %v4537_v3 }
 0xcd9   :  { %17958 = vst [vmem:[#allocation53_spill] sm:$0xff] %v15466_v15  ;;  %v15471_v31 = vadd.f32 %v4546_v37, %v15390_v51  ;;  %v4548_v18 = vpop.f32.mrb[125].mxu1  ;;  %v15473_v5 = vpop.f32.mrb[125].mxu0  ;;  %11209 = vmatprep.subr.bf16.mxu0 %v11208_v14  ;;  %v4708_v33 = vadd.f32 %v4707_v48, %v15398_v19 }
 0xcda   :  { %17959 = vst [vmem:[#allocation21_spill] sm:$0xff] %v15468_v55  ;;  %17961 = vst [vmem:[#allocation27_spill] sm:$0xff] %v15473_v5  ;;  %11211 = vmatpush3.bf16.msra.mxu0 %v11208_v14  ;;  %11787 = vrot.lane.b32.xlu0 %v15468_v55, %s12713_s22  ;;  %v4549_v37 = vadd.f32 %v4548_v18, %v15405_v47 }
 0xcdb   :  { %17960 = vst [vmem:[#allocation29_spill] sm:$0xff] %v15471_v31  ;;  %11166 = vmatprep.subr.msk.bf16.mxu1 %vm13134_vm1, %v11164_v9 }
 0xcdc   :  { %11169 = vmatpush3.bf16.xpose.msk.msra.mxu1 %vm13134_vm1, %v11164_v9  ;;  %v4552_v41 = vpop.f32.mrb[126].mxu1  ;;  %v4713_v4 = vpop.f32.mrb[126].mxu0 }
 0xcdd   :  { %v15483_v30 = vadd.f32 %v4552_v41, %v15390_v51  ;;  %v4714_v3 = vadd.f32 %v4713_v4, %v15398_v19  ;;  %v4554_v43 = vpop.f32.mrb[127].mxu1  ;;  %v15486_v14 = vpop.f32.mrb[127].mxu0 }
 0xcde   :  { %17963 = vst [vmem:[#allocation34_spill] sm:$0xff] %v15486_v14  ;;  %v4555_v44 = vadd.f32 %v4554_v43, %v15405_v47 }
 0xcdf   :  { %17962 = vst [vmem:[#allocation23_spill] sm:$0xff] %v15483_v30  ;;  %v11212_v32 = vpack.c.bf16 %v4714_v3, %v4708_v33  ;;  %v15490_v0 = vpack.i.bf16 %v4714_v3, %v4708_v33 }
 0xce0   :  { %v4558_v9 = vpop.f32.mrb[128].mxu1  ;;  %v4719_v22 = vpop.f32.mrb[128].mxu0  ;;  %v15492_v7 = vpack.i.bf16 %v4555_v44, %v4549_v37  ;;  %v11170_v48 = vpack.c.bf16 %v4555_v44, %v4549_v37 }
 0xce1   :  { %17964 = vst [vmem:[#allocation32_spill] sm:$0xff] %v15490_v0  ;;  %v15495_v41 = vadd.f32 %v4558_v9, %v15390_v51  ;;  %v4560_v13 = vpop.f32.mrb[129].mxu1  ;;  %v15497_v4 = vpop.f32.mrb[129].mxu0  ;;  %11213 = vmatprep.subr.bf16.mxu0 %v11212_v32  ;;  %v4720_v44 = vadd.f32 %v4719_v22, %v15398_v19 }
 0xce2   :  { %17965 = vst [vmem:[#allocation39_spill] sm:$0xff] %v15492_v7  ;;  %17967 = vst [vmem:[#allocation45_spill] sm:$0xff] %v15497_v4  ;;  %11215 = vmatpush3.bf16.msra.mxu0 %v11212_v32  ;;  %11792 = vrot.lane.b32.xlu1 %v15492_v7, %s12713_s22  ;;  %v4561_v9 = vadd.f32 %v4560_v13, %v15405_v47 }
 0xce3   :  { %17966 = vst [vmem:[#allocation37_spill] sm:$0xff] %v15495_v41  ;;  %11172 = vmatprep.subr.msk.bf16.mxu1 %vm13134_vm1, %v11170_v48 }
 0xce4   :  { %11175 = vmatpush3.bf16.xpose.msk.msra.mxu1 %vm13134_vm1, %v11170_v48  ;;  %v4564_v18 = vpop.f32.mrb[130].mxu1  ;;  %v4725_v33 = vpop.f32.mrb[130].mxu0 }
 0xce5   :  { %v15507_v3 = vadd.f32 %v4564_v18, %v15390_v51  ;;  %v4726_v43 = vadd.f32 %v4725_v33, %v15398_v19  ;;  %v4566_v37 = vpop.f32.mrb[131].mxu1  ;;  %v15510_v32 = vpop.f32.mrb[131].mxu0 }
 0xce6   :  { %17969 = vst [vmem:[#allocation51_spill] sm:$0xff] %v15510_v32  ;;  %v4567_v25 = vadd.f32 %v4566_v37, %v15405_v47 }
 0xce7   :  { %17968 = vst [vmem:[#allocation43_spill] sm:$0xff] %v15507_v3  ;;  %v11216_v20 = vpack.c.bf16 %v4726_v43, %v4720_v44  ;;  %v15514_v50 = vpack.i.bf16 %v4726_v43, %v4720_v44 }
 0xce8   :  { %v4570_v48 = vpop.f32.mrb[132].mxu1  ;;  %v4731_v11 = vpop.f32.mrb[132].mxu0  ;;  %v15516_v57 = vpack.i.bf16 %v4567_v25, %v4561_v9  ;;  %v11176_v22 = vpack.c.bf16 %v4567_v25, %v4561_v9 }
 0xce9   :  { %17970 = vst [vmem:[#allocation49_spill] sm:$0xff] %v15514_v50  ;;  %v15519_v18 = vadd.f32 %v4570_v48, %v15390_v51  ;;  %v4572_v38 = vpop.f32.mrb[133].mxu1  ;;  %v15521_v33 = vpop.f32.mrb[133].mxu0  ;;  %11217 = vmatprep.subr.bf16.mxu0 %v11216_v20  ;;  %v4732_v25 = vadd.f32 %v4731_v11, %v15398_v19 }
 0xcea   :  { %17971 = vst [vmem:[#allocation58_spill] sm:$0xff] %v15516_v57  ;;  %17973 = vst [vmem:[#allocation64_spill] sm:$0xff] %v15521_v33  ;;  %11219 = vmatpush3.bf16.msra.mxu0 %v11216_v20  ;;  %11797 = vrot.lane.b32.xlu0 %v15516_v57, %s12713_s22  ;;  %v4573_v48 = vadd.f32 %v4572_v38, %v15405_v47 }
 0xceb   :  { %17972 = vst [vmem:[#allocation56_spill] sm:$0xff] %v15519_v18  ;;  %11178 = vmatprep.subr.msk.bf16.mxu1 %vm13134_vm1, %v11176_v22 }
 0xcec   :  { %11181 = vmatpush3.bf16.xpose.msk.msra.mxu1 %vm13134_vm1, %v11176_v22  ;;  %v4576_v13 = vpop.f32.mrb[134].mxu1  ;;  %v4737_v44 = vpop.f32.mrb[134].mxu0 }
 0xced   :  { %v15531_v43 = vadd.f32 %v4576_v13, %v15390_v51  ;;  %v4738_v37 = vadd.f32 %v4737_v44, %v15398_v19  ;;  %v4578_v9 = vpop.f32.mrb[135].mxu1  ;;  %v15534_v20 = vpop.f32.mrb[135].mxu0 }
 0xcee   :  { %17975 = vst [vmem:[#allocation3_spill] sm:$0xff] %v15534_v20  ;;  %v4579_v45 = vadd.f32 %v4578_v9, %v15405_v47 }
 0xcef   :  { %17974 = vst [vmem:[#allocation62_spill] sm:$0xff] %v15531_v43  ;;  %v11220_v53 = vpack.c.bf16 %v4738_v37, %v4732_v25  ;;  %v15538_v16 = vpack.i.bf16 %v4738_v37, %v4732_v25 }
 0xcf0   :  { %v4582_v22 = vpop.f32.mrb[136].mxu1  ;;  %v4743_v54 = vpop.f32.mrb[136].mxu0  ;;  %v15540_v12 = vpack.i.bf16 %v4579_v45, %v4573_v48  ;;  %v11182_v11 = vpack.c.bf16 %v4579_v45, %v4573_v48 }
 0xcf1   :  { %17976 = vst [vmem:[#allocation4_spill] sm:$0xff] %v15538_v16  ;;  %v15543_v13 = vadd.f32 %v4582_v22, %v15390_v51  ;;  %v4584_v6 = vpop.f32.mrb[137].mxu1  ;;  %v15545_v44 = vpop.f32.mrb[137].mxu0  ;;  %11221 = vmatprep.subr.bf16.mxu0 %v11220_v53  ;;  %v4744_v45 = vadd.f32 %v4743_v54, %v15398_v19 }
 0xcf2   :  { %17978 = vst [vmem:[#allocation6_spill] sm:$0xff] %v15545_v44  ;;  %11223 = vmatpush3.bf16.msra.mxu0 %v11220_v53  ;;  %11802 = vrot.lane.b32.xlu1 %v15540_v12, %s12713_s22  ;;  %v4585_v22 = vadd.f32 %v4584_v6, %v15405_v47  ;;  %v17984_v6 = vsub.s32 3, %v17937_v17 }
 0xcf3   :  { %17977 = vst [vmem:[#allocation5_spill] sm:$0xff] %v15543_v13  ;;  %11184 = vmatprep.subr.msk.bf16.mxu1 %vm13134_vm1, %v11182_v11 }
 0xcf4   :  { %11187 = vmatpush3.bf16.xpose.msk.msra.mxu1 %vm13134_vm1, %v11182_v11  ;;  %v4588_v38 = vpop.f32.mrb[138].mxu1  ;;  %v4749_v25 = vpop.f32.mrb[138].mxu0 }
 0xcf5   :  { %v15555_v37 = vadd.f32 %v4588_v38, %v15390_v51  ;;  %v4750_v9 = vadd.f32 %v4749_v25, %v15398_v19  ;;  %v4590_v48 = vpop.f32.mrb[139].mxu1  ;;  %v15558_v53 = vpop.f32.mrb[139].mxu0 }
 0xcf6   :  { %17980 = vst [vmem:[#allocation8_spill] sm:$0xff] %v15558_v53  ;;  %v4591_v61 = vadd.f32 %v4590_v48, %v15405_v47 }
 0xcf7   :  { %17979 = vst [vmem:[#allocation7_spill] sm:$0xff] %v15555_v37  ;;  %v11224_v56 = vpack.c.bf16 %v4750_v9, %v4744_v45  ;;  %v15562_v36 = vpack.i.bf16 %v4750_v9, %v4744_v45  ;;  %v15578_v45 = vrot.slane %v15385_v39, %v17984_v6 }
 0xcf8   :  { %v4594_v11 = vpop.f32.mrb[140].mxu1  ;;  %v4755_v24 = vpop.f32.mrb[140].mxu0  ;;  %v15564_v49 = vpack.i.bf16 %v4591_v61, %v4585_v22  ;;  %v11188_v54 = vpack.c.bf16 %v4591_v61, %v4585_v22 }
 0xcf9   :  { %17981 = vst [vmem:[#allocation9_spill] sm:$0xff] %v15562_v36  ;;  %v15567_v38 = vadd.f32 %v4594_v11, %v15390_v51  ;;  %v4596_v40 = vpop.f32.mrb[141].mxu1  ;;  %v15569_v25 = vpop.f32.mrb[141].mxu0  ;;  %11225 = vmatprep.subr.bf16.mxu0 %v11224_v56  ;;  %17985 = vst [vmem:[#allocation12_spill] sm:$0xff] %v15578_v45  ;;  %v4756_v48 = vadd.f32 %v4755_v24, %v15398_v19 }
 0xcfa   :  { %17983 = vst [vmem:[#allocation11_spill] sm:$0xff] %v15569_v25  ;;  %11227 = vmatpush3.bf16.msra.mxu0 %v11224_v56  ;;  %11807 = vrot.lane.b32.xlu0 %v15564_v49, %s12713_s22  ;;  %v4597_v21 = vadd.f32 %v4596_v40, %v15405_v47 }
 0xcfb   :  { %17982 = vst [vmem:[#allocation10_spill] sm:$0xff] %v15567_v38  ;;  %11190 = vmatprep.subr.msk.bf16.mxu1 %vm13134_vm1, %v11188_v54 }
 0xcfc   :  { %11193 = vmatpush3.bf16.xpose.msk.msra.mxu1 %vm13134_vm1, %v11188_v54  ;;  %v4600_v61 = vpop.f32.mrb[142].mxu1  ;;  %v4761_v9 = vpop.f32.mrb[142].mxu0 }
 0xcfd   :  { %v15584_v56 = vadd.f32 %v4600_v61, %v15390_v51  ;;  %v4762_v22 = vadd.f32 %v4761_v9, %v15398_v19  ;;  %v4602_v11 = vpop.f32.mrb[143].mxu1  ;;  %v4763_v8 = vpop.f32.mrb[143].mxu0 }
 0xcfe   :  { %v4603_v17 = vadd.f32 %v4602_v11, %v15405_v47  ;;  %v15590_v39 = vadd.f32 %v4763_v8, %v15578_v45  ;;  %5392 = vrot.lane.b32.xlu0 %v15393_v59, %s12713_s22 }
 0xcff   :  { %17986 = vst [vmem:[#allocation13_spill] sm:$0xff] %v15584_v56  ;;  %v11228_v54 = vpack.c.bf16 %v4762_v22, %v4756_v48  ;;  %v15594_v6 = vpack.i.bf16 %v4762_v22, %v4756_v48 }
 0xd00   :  { %17987 = vst [vmem:[#allocation14_spill] sm:$0xff] %v15590_v39  ;;  %v15596_v24 = vpack.i.bf16 %v4603_v17, %v4597_v21  ;;  %v11194_v51 = vpack.c.bf16 %v4603_v17, %v4597_v21 }
 0xd01   :  { %17988 = vst [vmem:[#allocation15_spill] sm:$0xff] %v15594_v6  ;;  %11229 = vmatprep.subr.bf16.mxu0 %v11228_v54 }
 0xd02   :  { %17989 = vst [vmem:[#allocation16_spill] sm:$0xff] %v15596_v24  ;;  %11231 = vmatpush3.bf16.msra.mxu0 %v11228_v54  ;;  %11812 = vrot.lane.b32.xlu1 %v15596_v24, %s12713_s22 }
 0xd03   :  { %11196 = vmatprep.subr.msk.bf16.mxu1 %vm13134_vm1, %v11194_v51  ;;  %5396 = vrot.lane.b32.xlu0 %v15423_v27, %s12713_s22 }
 0xd04   :  { %11199 = vmatpush3.bf16.xpose.msk.msra.mxu1 %vm13134_vm1, %v11194_v51 }
 0xd06   :  { %5394 = vrot.lane.b32.xlu1 %v15411_v58, %s12713_s22 }
 0xd07   :  { %5400 = vrot.lane.b32.xlu0 %v15447_v60, %s12713_s22 }
 0xd0a   :  { %5398 = vrot.lane.b32.xlu1 %v15435_v63, %s12713_s22 }
 0xd0b   :  { %5404 = vrot.lane.b32.xlu0 %v15471_v31, %s12713_s22  ;;  %10233 = vmatmul.mubr.msk.f32.vlgmr.msra.gmra.mrb[144].mxu1 %vm304_vm0, %v15411_v58 }
 0xd0c   :  { %10235 = vmatprep.mubr.msk.f32.mxu1 %vm304_vm0, %v15423_v27 }
 0xd0e   :  { %5402 = vrot.lane.b32.xlu1 %v15459_v23, %s12713_s22 }
 0xd0f   :  { %5408 = vrot.lane.b32.xlu0 %v15495_v41, %s12713_s22  ;;  %10236 = vmatmul.mubr.msk.f32.gmra.mrb[146].mxu1 %vm304_vm0, %v15435_v63 }
 0xd10   :  { %10238 = vmatprep.mubr.msk.f32.mxu1 %vm304_vm0, %v15447_v60 }
 0xd12   :  { %5406 = vrot.lane.b32.xlu1 %v15483_v30, %s12713_s22 }
 0xd13   :  { %5412 = vrot.lane.b32.xlu0 %v15519_v18, %s12713_s22  ;;  %10239 = vmatmul.mubr.msk.f32.gmra.mrb[148].mxu1 %vm304_vm0, %v15459_v23 }
 0xd14   :  { %10241 = vmatprep.mubr.msk.f32.mxu1 %vm304_vm0, %v15471_v31 }
 0xd16   :  { %5410 = vrot.lane.b32.xlu1 %v15507_v3, %s12713_s22 }
 0xd17   :  { %5416 = vrot.lane.b32.xlu0 %v15543_v13, %s12713_s22  ;;  %10242 = vmatmul.mubr.msk.f32.gmra.mrb[150].mxu1 %vm304_vm0, %v15483_v30 }
 0xd18   :  { %10244 = vmatprep.mubr.msk.f32.mxu1 %vm304_vm0, %v15495_v41 }
 0xd1a   :  { %5414 = vrot.lane.b32.xlu1 %v15531_v43, %s12713_s22 }
 0xd1b   :  { %5420 = vrot.lane.b32.xlu0 %v15567_v38, %s12713_s22  ;;  %10245 = vmatmul.mubr.msk.f32.gmra.mrb[152].mxu1 %vm304_vm0, %v15507_v3 }
 0xd1c   :  { %10247 = vmatprep.mubr.msk.f32.mxu1 %vm304_vm0, %v15519_v18 }
 0xd1e   :  { %5418 = vrot.lane.b32.xlu1 %v15555_v37, %s12713_s22 }
 0xd1f   :  { %11822 = vrot.lane.b32.xlu0 %v15442_v28, %s12713_s22  ;;  %10248 = vmatmul.mubr.msk.f32.gmra.mrb[154].mxu1 %vm304_vm0, %v15531_v43 }
 0xd20   :  { %10250 = vmatprep.mubr.msk.f32.mxu1 %vm304_vm0, %v15543_v13 }
 0xd22   :  { %5422 = vrot.lane.b32.xlu1 %v15584_v56, %s12713_s22 }
 0xd23   :  { %11832 = vrot.lane.b32.xlu0 %v15490_v0, %s12713_s22  ;;  %10251 = vmatmul.mubr.msk.f32.gmra.mrb[156].mxu1 %vm304_vm0, %v15555_v37 }
 0xd24   :  { %10253 = vmatprep.mubr.msk.f32.mxu1 %vm304_vm0, %v15567_v38 }
 0xd26   :  { %11817 = vrot.lane.b32.xlu1 %v15418_v35, %s12713_s22 }
 0xd27   :  { %11862 = vrot.lane.b32.xlu0 %v15444_v46, %s12714_s23  ;;  %10254 = vmatmul.mubr.msk.f32.gmra.mrb[158].mxu1 %vm304_vm0, %v15584_v56 }
 0xd2a   :  { %11827 = vrot.lane.b32.xlu1 %v15466_v15, %s12713_s22 }
 0xd2b   :  { %11867 = vrot.lane.b32.xlu0 %v15468_v55, %s12714_s23 }
 0xd2e   :  { %11837 = vrot.lane.b32.xlu1 %v15514_v50, %s12713_s22 }
 0xd32   :  { %11842 = vrot.lane.b32.xlu1 %v15538_v16, %s12713_s22 }
 0xd36   :  { %11847 = vrot.lane.b32.xlu1 %v15562_v36, %s12713_s22  ;;  %v15875_v36 = vld [vmem:[%s17507_s1 + $0x78] sm:$0xff] }
 0xd3a   :  { %11852 = vrot.lane.b32.xlu1 %v15594_v6, %s12713_s22 }
 0xd3c   :  { %v11778_v8 = vpop.permute.xlu0 %11777 }
 0xd3d   :  { %v11780_v40 = vunpack.i.h.bf16 %v11778_v8  ;;  %v11779_v21 = vunpack.i.l.bf16 %v11778_v8 }
 0xd3e   :  { %11857 = vrot.lane.b32.xlu1 %v15420_v26, %s12714_s23 }
 0xd3f   :  { %v11232_v19 = vpack.c.bf16 %v11780_v40, %v11779_v21 }
 0xd41   :  { %11234 = vmatprep.subr.msk.bf16.mxu1 %vm13134_vm1, %v11232_v19 }
 0xd42   :  { %11237 = vmatpush3.bf16.xpose.msk.msra.mxu1 %vm13134_vm1, %v11232_v19 }
 0xd44   :  { %v11783_v47 = vpop.permute.xlu1 %11782 }
 0xd45   :  { %v11785_v61 = vunpack.i.h.bf16 %v11783_v47  ;;  %v11784_v9 = vunpack.i.l.bf16 %v11783_v47 }
 0xd47   :  { %v11238_v48 = vpack.c.bf16 %v11785_v61, %v11784_v9 }
 0xd49   :  { %11240 = vmatprep.subr.msk.bf16.mxu1 %vm13134_vm1, %v11238_v48 }
 0xd4a   :  { %11243 = vmatpush3.bf16.xpose.msk.msra.mxu1 %vm13134_vm1, %v11238_v48 }
 0xd4c   :  { %v11788_v22 = vpop.permute.xlu0 %11787 }
 0xd4d   :  { %v11790_v11 = vunpack.i.h.bf16 %v11788_v22  ;;  %v11789_v17 = vunpack.i.l.bf16 %v11788_v22 }
 0xd4f   :  { %v11244_v54 = vpack.c.bf16 %v11790_v11, %v11789_v17 }
 0xd51   :  { %11246 = vmatprep.subr.msk.bf16.mxu1 %vm13134_vm1, %v11244_v54 }
 0xd52   :  { %11249 = vmatpush3.bf16.xpose.msk.msra.mxu1 %vm13134_vm1, %v11244_v54 }
 0xd54   :  { %v11793_v51 = vpop.permute.xlu1 %11792 }
 0xd55   :  { %v11795_v8 = vunpack.i.h.bf16 %v11793_v51  ;;  %v11794_v40 = vunpack.i.l.bf16 %v11793_v51 }
 0xd57   :  { %v11250_v21 = vpack.c.bf16 %v11795_v8, %v11794_v40 }
 0xd59   :  { %11252 = vmatprep.subr.msk.bf16.mxu1 %vm13134_vm1, %v11250_v21 }
 0xd5a   :  { %11255 = vmatpush3.bf16.xpose.msk.msra.mxu1 %vm13134_vm1, %v11250_v21 }
 0xd5c   :  { %v11798_v19 = vpop.permute.xlu0 %11797 }
 0xd5d   :  { %v11800_v47 = vunpack.i.h.bf16 %v11798_v19  ;;  %v11799_v61 = vunpack.i.l.bf16 %v11798_v19 }
 0xd5f   :  { %v11256_v9 = vpack.c.bf16 %v11800_v47, %v11799_v61 }
 0xd61   :  { %11258 = vmatprep.subr.msk.bf16.mxu1 %vm13134_vm1, %v11256_v9 }
 0xd62   :  { %11261 = vmatpush3.bf16.xpose.msk.msra.mxu1 %vm13134_vm1, %v11256_v9 }
 0xd64   :  { %v11803_v48 = vpop.permute.xlu1 %11802 }
 0xd65   :  { %v11805_v22 = vunpack.i.h.bf16 %v11803_v48  ;;  %v11804_v11 = vunpack.i.l.bf16 %v11803_v48 }
 0xd67   :  { %v11262_v17 = vpack.c.bf16 %v11805_v22, %v11804_v11 }
 0xd69   :  { %11264 = vmatprep.subr.msk.bf16.mxu1 %vm13134_vm1, %v11262_v17 }
 0xd6a   :  { %11267 = vmatpush3.bf16.xpose.msk.msra.mxu1 %vm13134_vm1, %v11262_v17 }
 0xd6c   :  { %v11808_v54 = vpop.permute.xlu0 %11807 }
 0xd6d   :  { %v11810_v51 = vunpack.i.h.bf16 %v11808_v54  ;;  %v11809_v8 = vunpack.i.l.bf16 %v11808_v54 }
 0xd6f   :  { %v11268_v40 = vpack.c.bf16 %v11810_v51, %v11809_v8 }
 0xd70   :  { %v5393_v21 = vpop.permute.xlu0 %5392 }
 0xd71   :  { %11270 = vmatprep.subr.msk.bf16.mxu1 %vm13134_vm1, %v11268_v40  ;;  %10344 = vmatprep.mubr.msk.f32.mxu1 %vm304_vm0, %v5393_v21 }
 0xd72   :  { %11273 = vmatpush3.bf16.xpose.msk.msra.mxu1 %vm13134_vm1, %v11268_v40 }
 0xd74   :  { %v11813_v19 = vpop.permute.xlu1 %11812 }
 0xd75   :  { %v11815_v47 = vunpack.i.h.bf16 %v11813_v19  ;;  %v11814_v61 = vunpack.i.l.bf16 %v11813_v19  ;;  %v5397_v9 = vpop.permute.xlu0 %5396 }
 0xd77   :  { %v11274_v48 = vpack.c.bf16 %v11815_v47, %v11814_v61 }
 0xd78   :  { %v5395_v22 = vpop.permute.xlu1 %5394 }
 0xd79   :  { %11276 = vmatprep.subr.msk.bf16.mxu1 %vm13134_vm1, %v11274_v48  ;;  %v5401_v11 = vpop.permute.xlu0 %5400 }
 0xd7a   :  { %11279 = vmatpush3.bf16.xpose.msk.msra.mxu1 %vm13134_vm1, %v11274_v48 }
 0xd7c   :  { %v5399_v17 = vpop.permute.xlu1 %5398 }
 0xd7d   :  { %v5405_v51 = vpop.permute.xlu0 %5404 }
 0xd80   :  { %v5403_v54 = vpop.permute.xlu1 %5402 }
 0xd81   :  { %10345 = vmatmul.mubr.msk.f32.vlgmr.msra.gmra.mrb[160].mxu1 %vm304_vm0, %v5395_v22  ;;  %v5409_v40 = vpop.permute.xlu0 %5408 }
 0xd82   :  { %10347 = vmatprep.mubr.msk.f32.mxu1 %vm304_vm0, %v5397_v9 }
 0xd84   :  { %v5407_v8 = vpop.permute.xlu1 %5406 }
 0xd85   :  { %10348 = vmatmul.mubr.msk.f32.gmra.mrb[162].mxu1 %vm304_vm0, %v5399_v17  ;;  %v5413_v47 = vpop.permute.xlu0 %5412 }
 0xd86   :  { %10350 = vmatprep.mubr.msk.f32.mxu1 %vm304_vm0, %v5401_v11 }
 0xd88   :  { %v5411_v21 = vpop.permute.xlu1 %5410 }
 0xd89   :  { %10351 = vmatmul.mubr.msk.f32.gmra.mrb[164].mxu1 %vm304_vm0, %v5403_v54  ;;  %v5417_v9 = vpop.permute.xlu0 %5416 }
 0xd8a   :  { %10353 = vmatprep.mubr.msk.f32.mxu1 %vm304_vm0, %v5405_v51 }
 0xd8c   :  { %v5415_v19 = vpop.permute.xlu1 %5414 }
 0xd8d   :  { %10354 = vmatmul.mubr.msk.f32.gmra.mrb[166].mxu1 %vm304_vm0, %v5407_v8  ;;  %v5421_v11 = vpop.permute.xlu0 %5420 }
 0xd8e   :  { %10356 = vmatprep.mubr.msk.f32.mxu1 %vm304_vm0, %v5409_v40 }
 0xd90   :  { %v5419_v61 = vpop.permute.xlu1 %5418 }
 0xd91   :  { %10357 = vmatmul.mubr.msk.f32.gmra.mrb[168].mxu1 %vm304_vm0, %v5411_v21  ;;  %v15891_v37 = vpop.permute.xlu0 %11822 }
 0xd92   :  { %10359 = vmatprep.mubr.msk.f32.mxu1 %vm304_vm0, %v5413_v47  ;;  %v15740_v47 = vld [vmem:[%s17507_s1 + $0x8] sm:$0xff] }
 0xd94   :  { %v5423_v48 = vpop.permute.xlu1 %5422 }
 0xd95   :  { %10360 = vmatmul.mubr.msk.f32.gmra.mrb[170].mxu1 %vm304_vm0, %v5415_v19  ;;  %v15901_v43 = vpop.permute.xlu0 %11832 }
 0xd96   :  { %10362 = vmatprep.mubr.msk.f32.mxu1 %vm304_vm0, %v5417_v9  ;;  %17992 = vst [vmem:[#allocation19_spill] sm:$0xff] %v15901_v43 }
 0xd98   :  { %v11818_v22 = vpop.permute.xlu1 %11817 }
 0xd99   :  { %v11820_v17 = vunpack.i.h.bf16 %v11818_v22  ;;  %v11819_v54 = vunpack.i.l.bf16 %v11818_v22  ;;  %10363 = vmatmul.mubr.msk.f32.gmra.mrb[172].mxu1 %vm304_vm0, %v5419_v61  ;;  %v15748_v61 = vld [vmem:[%s17507_s1] sm:$0xff]  ;;  %v15909_v30 = vpop.permute.xlu0 %11862 }
 0xd9a   :  { %10365 = vmatprep.mubr.msk.f32.mxu1 %vm304_vm0, %v5421_v11  ;;  %17994 = vst [vmem:[#allocation87_spill] sm:$0xff] %v15909_v30 }
 0xd9b   :  { %v15733_v51 = vpack.c.bf16 %v11820_v17, %v11819_v54  ;;  %v15758_v54 = vld [vmem:[%s17507_s1 + $0x18] sm:$0xff] }
 0xd9d   :  { %17990 = vst [vmem:[#allocation17_spill] sm:$0xff] %v15733_v51  ;;  %10366 = vmatmul.mubr.msk.f32.gmra.mrb[174].mxu1 %vm304_vm0, %v5423_v48  ;;  %11281 = vmatprep.subr.bf16.mxu0 %v15733_v51  ;;  %v15913_v23 = vpop.permute.xlu0 %11867 }
 0xd9e   :  { %17996 = vst [vmem:[#allocation89_spill] sm:$0xff] %v15913_v23 }
 0xdde   :  { %v10234_v8 = vpop.f32.mrb[144].mxu1 }
 0xddf   :  { %v5008_v40 = vmul.f32 0.17677669, %v10234_v8  ;;  %v4928_v21 = vpop.f32.mrb[145].mxu1 }
 0xde0   :  { %v5007_v19 = vmul.f32 0.17677669, %v4928_v21 }
 0xde1   :  { %v15743_v9 = vadd.f32 %v15740_v47, %v5008_v40 }
 0xde2   :  { %v15751_v48 = vadd.f32 %v15748_v61, %v5007_v19  ;;  %v10237_v22 = vpop.f32.mrb[146].mxu1 }
 0xde3   :  { %v5010_v11 = vmul.f32 0.17677669, %v10237_v22  ;;  %5041 = vmax.xlane.f32.xlu1 %v15743_v9  ;;  %v4938_v17 = vpop.f32.mrb[147].mxu1  ;;  %v15767_v22 = vld [vmem:[%s17507_s1 + $0x10] sm:$0xff] }
 0xde4   :  { %5039 = vmax.xlane.f32.xlu0 %v15751_v48  ;;  %v5009_v40 = vmul.f32 0.17677669, %v4938_v17 }
 0xde5   :  { %v15761_v8 = vadd.f32 %v15758_v54, %v5010_v11  ;;  %v15775_v11 = vld [vmem:[%s17507_s1 + $0x20] sm:$0xff] }
 0xde6   :  { %v10240_v21 = vpop.f32.mrb[148].mxu1  ;;  %v15770_v39 = vadd.f32 %v15767_v22, %v5009_v40  ;;  %v15785_v40 = vld [vmem:[%s17507_s1 + $0x28] sm:$0xff] }
 0xde7   :  { %v4948_v10 = vpop.f32.mrb[149].mxu1  ;;  %v5012_v25 = vmul.f32 0.17677669, %v10240_v21 }
 0xde8   :  { %v5011_v19 = vmul.f32 0.17677669, %v4948_v10  ;;  %5045 = vmax.xlane.f32.xlu0 %v15761_v8 }
 0xde9   :  { %v15788_v21 = vadd.f32 %v15785_v40, %v5012_v25  ;;  %v15803_v25 = vld [vmem:[%s17507_s1 + $0x38] sm:$0xff] }
 0xdea   :  { %v15778_v17 = vadd.f32 %v15775_v11, %v5011_v19  ;;  %v10243_v10 = vpop.f32.mrb[150].mxu1  ;;  %v15793_v19 = vld [vmem:[%s17507_s1 + $0x30] sm:$0xff] }
 0xdeb   :  { %v4958_v44 = vpop.f32.mrb[151].mxu1  ;;  %v5014_v33 = vmul.f32 0.17677669, %v10243_v10 }
 0xdec   :  { %v5013_v53 = vmul.f32 0.17677669, %v4958_v44  ;;  %5043 = vmax.xlane.f32.xlu0 %v15770_v39  ;;  %5047 = vmax.xlane.f32.xlu1 %v15778_v17 }
 0xded   :  { %v15806_v10 = vadd.f32 %v15803_v25, %v5014_v33  ;;  %v15821_v33 = vld [vmem:[%s17507_s1 + $0x48] sm:$0xff] }
 0xdee   :  { %v15796_v44 = vadd.f32 %v15793_v19, %v5013_v53  ;;  %v10246_v20 = vpop.f32.mrb[152].mxu1  ;;  %v15811_v53 = vld [vmem:[%s17507_s1 + $0x40] sm:$0xff] }
 0xdef   :  { %v4968_v32 = vpop.f32.mrb[153].mxu1  ;;  %v5016_v14 = vmul.f32 0.17677669, %v10246_v20 }
 0xdf0   :  { %v5015_v4 = vmul.f32 0.17677669, %v4968_v32  ;;  %5049 = vmax.xlane.f32.xlu0 %v15788_v21  ;;  %5051 = vmax.xlane.f32.xlu1 %v15796_v44 }
 0xdf1   :  { %v15824_v20 = vadd.f32 %v15821_v33, %v5016_v14  ;;  %v15839_v14 = vld [vmem:[%s17507_s1 + $0x58] sm:$0xff] }
 0xdf2   :  { %v15814_v32 = vadd.f32 %v15811_v53, %v5015_v4  ;;  %v10249_v5 = vpop.f32.mrb[154].mxu1  ;;  %v15829_v4 = vld [vmem:[%s17507_s1 + $0x50] sm:$0xff] }
 0xdf3   :  { %v4978_v62 = vpop.f32.mrb[155].mxu1  ;;  %v5018_v34 = vmul.f32 0.17677669, %v10249_v5 }
 0xdf4   :  { %v5017_v1 = vmul.f32 0.17677669, %v4978_v62  ;;  %5053 = vmax.xlane.f32.xlu0 %v15806_v10  ;;  %5055 = vmax.xlane.f32.xlu1 %v15814_v32 }
 0xdf5   :  { %v15842_v5 = vadd.f32 %v15839_v14, %v5018_v34  ;;  %v15857_v34 = vld [vmem:[%s17507_s1 + $0x68] sm:$0xff] }
 0xdf6   :  { %v15832_v62 = vadd.f32 %v15829_v4, %v5017_v1  ;;  %v10252_v52 = vpop.f32.mrb[156].mxu1  ;;  %v15847_v1 = vld [vmem:[%s17507_s1 + $0x60] sm:$0xff] }
 0xdf7   :  { %v4988_v29 = vpop.f32.mrb[157].mxu1  ;;  %v5020_v45 = vmul.f32 0.17677669, %v10252_v52 }
 0xdf8   :  { %v5019_v2 = vmul.f32 0.17677669, %v4988_v29  ;;  %5057 = vmax.xlane.f32.xlu0 %v15824_v20  ;;  %5059 = vmax.xlane.f32.xlu1 %v15832_v62 }
 0xdf9   :  { %v15860_v52 = vadd.f32 %v15857_v34, %v5020_v45 }
 0xdfa   :  { %v15850_v29 = vadd.f32 %v15847_v1, %v5019_v2  ;;  %v10255_v55 = vpop.f32.mrb[158].mxu1  ;;  %v15865_v2 = vld [vmem:[%s17507_s1 + $0x70] sm:$0xff] }
 0xdfb   :  { %v4998_v46 = vpop.f32.mrb[159].mxu1  ;;  %v5022_v6 = vmul.f32 0.17677669, %v10255_v55 }
 0xdfc   :  { %v5021_v26 = vmul.f32 0.17677669, %v4998_v46  ;;  %5061 = vmax.xlane.f32.xlu0 %v15842_v5  ;;  %5063 = vmax.xlane.f32.xlu1 %v15850_v29 }
 0xdfd   :  { %v15878_v45 = vadd.f32 %v15875_v36, %v5022_v6 }
 0xdfe   :  { %v15868_v46 = vadd.f32 %v15865_v2, %v5021_v26 }
 0xe00   :  { %5065 = vmax.xlane.f32.xlu0 %v15860_v52  ;;  %5067 = vmax.xlane.f32.xlu1 %v15868_v46 }
 0xe04   :  { %5069 = vmax.xlane.f32.xlu0 %v15878_v45 }
 0xe54   :  { %v10346_v55 = vpop.f32.mrb[160].mxu1 }
 0xe55   :  { %v5666_v16 = vmul.f32 0.17677669, %v10346_v55  ;;  %v5586_v0 = vpop.f32.mrb[161].mxu1  ;;  %v15889_v55 = vpop.permute.xlu1 %11827 }
 0xe56   :  { %v5665_v50 = vmul.f32 0.17677669, %v5586_v0 }
 0xe57   :  { %v15882_v26 = vadd.f32 %v15740_v47, %v5666_v16 }
 0xe58   :  { %v15885_v28 = vadd.f32 %v15748_v61, %v5665_v50  ;;  %v10349_v15 = vpop.f32.mrb[162].mxu1 }
 0xe59   :  { %5699 = vmax.xlane.f32.xlu0 %v15882_v26  ;;  %v5596_v38 = vpop.f32.mrb[163].mxu1  ;;  %v15895_v50 = vpop.permute.xlu1 %11837  ;;  %v5668_v58 = vmul.f32 0.17677669, %v10349_v15 }
 0xe5a   :  { %5697 = vmax.xlane.f32.xlu1 %v15885_v28  ;;  %17991 = vst [vmem:[#allocation18_spill] sm:$0xff] %v15895_v50 }
 0xe5c   :  { %v10352_v6 = vpop.f32.mrb[164].mxu1 }
 0xe5d   :  { %v5606_v35 = vpop.f32.mrb[165].mxu1  ;;  %v15905_v3 = vpop.permute.xlu1 %11842  ;;  %v5670_v51 = vmul.f32 0.17677669, %v10352_v6 }
 0xe5e   :  { %17993 = vst [vmem:[#allocation86_spill] sm:$0xff] %v15905_v3  ;;  %v15920_v3 = vadd.f32 %v15758_v54, %v5668_v58 }
 0xe60   :  { %v10355_v13 = vpop.f32.mrb[166].mxu1 }
 0xe61   :  { %v5616_v56 = vpop.f32.mrb[167].mxu1  ;;  %v15911_v27 = vpop.permute.xlu1 %11847  ;;  %v5672_v15 = vmul.f32 0.17677669, %v10355_v13 }
 0xe62   :  { %17995 = vst [vmem:[#allocation88_spill] sm:$0xff] %v15911_v27  ;;  %v5669_v27 = vmul.f32 0.17677669, %v5606_v35  ;;  %v5671_v58 = vmul.f32 0.17677669, %v5616_v56 }
 0xe64   :  { %v10358_v18 = vpop.f32.mrb[168].mxu1 }
 0xe65   :  { %v5626_v0 = vpop.f32.mrb[169].mxu1 }
 0xe66   :  { %v5673_v13 = vmul.f32 0.17677669, %v5626_v0 }
 0xe68   :  { %v10361_v16 = vpop.f32.mrb[170].mxu1 }
 0xe69   :  { %v15893_v47 = vpop.f32.mrb[171].mxu1 }
 0xe6b   :  { %11872 = vrot.lane.b32.xlu1 %v15492_v7, %s12714_s23  ;;  %v15915_v7 = vpop.permute.xlu1 %11852 }
 0xe6c   :  { %v10364_v61 = vpop.f32.mrb[172].mxu1  ;;  %17997 = vst [vmem:[#allocation90_spill] sm:$0xff] %v15915_v7  ;;  %v15931_v7 = vadd.f32 %v15775_v11, %v5669_v27 }
 0xe6d   :  { %v15899_v41 = vpop.f32.mrb[173].mxu1 }
 0xe6f   :  { %11877 = vrot.lane.b32.xlu0 %v15516_v57, %s12714_s23  ;;  %v15917_v59 = vpop.permute.xlu1 %11857  ;;  %v5667_v57 = vmul.f32 0.17677669, %v5596_v38 }
 0xe70   :  { %v10367_v31 = vpop.f32.mrb[174].mxu1  ;;  %17998 = vst [vmem:[#allocation91_spill] sm:$0xff] %v15917_v59  ;;  %v15928_v59 = vadd.f32 %v15785_v40, %v5670_v51  ;;  %v15940_v51 = vadd.f32 %v15793_v19, %v5671_v58  ;;  %v5676_v19 = vmul.f32 0.17677669, %v10361_v16  ;;  %v5675_v16 = vmul.f32 0.17677669, %v15893_v47 }
 0xe71   :  { %v15907_v60 = vpop.f32.mrb[175].mxu1  ;;  %v5040_v42 = vpop.xlane.xlu0 %5039  ;;  %v15923_v30 = vadd.f32 %v15767_v22, %v5667_v57  ;;  %v5674_v22 = vmul.f32 0.17677669, %v10358_v18  ;;  %v15949_v18 = vadd.f32 %v15811_v53, %v5673_v13  ;;  %v5677_v47 = vmul.f32 0.17677669, %v15899_v41 }
 0xe72   :  { %v5071_v35 = vmax.f32 %v5040_v42, 0.0  ;;  %v15959_v53 = vadd.f32 %v15839_v14, %v5676_v19 }
 0xe73   :  { %v5042_v24 = vpop.xlane.xlu1 %5041  ;;  %v15946_v42 = vadd.f32 %v15821_v33, %v5674_v22  ;;  %v5680_v33 = vmul.f32 0.17677669, %v10367_v31  ;;  %v15980_v41 = vadd.f32 %v15847_v1, %v5677_v47 }
 0xe74   :  { %v5072_v23 = vmax.f32 %v5042_v24, 0.0  ;;  %v15937_v24 = vadd.f32 %v15803_v25, %v5672_v15  ;;  %v5087_v56 = vsub.f32 %v15751_v48, %v5071_v35 }
 0xe75   :  { %v5046_v63 = vpop.xlane.xlu0 %5045  ;;  %v15966_v31 = vadd.f32 %v15875_v36, %v5680_v33 }
 0xe76   :  { %v5088_v57 = vsub.f32 %v15743_v9, %v5072_v23  ;;  %v5074_v11 = vmax.f32 %v5046_v63, 0.0  ;;  %v5678_v23 = vmul.f32 0.17677669, %v10364_v61  ;;  %v5103_v25 = vmul.f32 1.442695, %v5087_v56 }
 0xe78   :  { %v5105_v27 = vmul.f32 1.442695, %v5088_v57  ;;  %v5090_v0 = vsub.f32 %v15761_v8, %v5074_v11  ;;  %v15955_v63 = vadd.f32 %v15857_v34, %v5678_v23  ;;  %v15970_v34 = vadd.f32 %v15829_v4, %v5675_v16 }
 0xe79   :  { %v5044_v50 = vpop.xlane.xlu0 %5043  ;;  %v5048_v43 = vpop.xlane.xlu1 %5047 }
 0xe7a   :  { %v5073_v9 = vmax.f32 %v5044_v50, 0.0  ;;  %12340 = vpow2.f32 %v5105_v27  ;;  %v5075_v50 = vmax.f32 %v5048_v43, 0.0  ;;  %v5109_v8 = vmul.f32 1.442695, %v5090_v0 }
 0xe7b   :  { %12342 = vpow2.f32 %v5103_v25  ;;  %v5679_v27 = vmul.f32 0.17677669, %v15907_v60 }
 0xe7c   :  { %v5089_v61 = vsub.f32 %v15770_v39, %v5073_v9  ;;  %v5091_v39 = vsub.f32 %v15778_v17, %v5075_v50  ;;  %12344 = vpow2.f32 %v5109_v8 }
 0xe7d   :  { %v5050_v38 = vpop.xlane.xlu0 %5049  ;;  %v5052_v54 = vpop.xlane.xlu1 %5051  ;;  %v15990_v1 = vadd.f32 %v15865_v2, %v5679_v27 }
 0xe7e   :  { %v5076_v48 = vmax.f32 %v5050_v38, 0.0  ;;  %v5107_v43 = vmul.f32 1.442695, %v5089_v61  ;;  %v5077_v14 = vmax.f32 %v5052_v54, 0.0  ;;  %v5111_v36 = vmul.f32 1.442695, %v5091_v39 }
 0xe80   :  { %v5092_v38 = vsub.f32 %v15788_v21, %v5076_v48  ;;  %12346 = vpow2.f32 %v5107_v43  ;;  %v5093_v17 = vsub.f32 %v15796_v44, %v5077_v14 }
 0xe81   :  { %v5054_v40 = vpop.xlane.xlu0 %5053  ;;  %v5056_v6 = vpop.xlane.xlu1 %5055 }
 0xe82   :  { %v5078_v57 = vmax.f32 %v5054_v40, 0.0  ;;  %v5113_v21 = vmul.f32 1.442695, %v5092_v38  ;;  %v5079_v54 = vmax.f32 %v5056_v6, 0.0  ;;  %v5115_v23 = vmul.f32 1.442695, %v5093_v17 }
 0xe84   :  { %v5094_v22 = vsub.f32 %v15806_v10, %v5078_v57  ;;  %v15977_v4 = vpop.eup %12340  ;;  %12348 = vpow2.f32 %v5113_v21  ;;  %v5095_v44 = vsub.f32 %v15814_v32, %v5079_v54 }
 0xe85   :  { %v5058_v15 = vpop.xlane.xlu0 %5057  ;;  %v5060_v58 = vpop.xlane.xlu1 %5059  ;;  %12350 = vpow2.f32 %v5111_v36 }
 0xe86   :  { %v5080_v13 = vmax.f32 %v5058_v15, 0.0  ;;  %v5117_v10 = vmul.f32 1.442695, %v5094_v22  ;;  %v5081_v6 = vmax.f32 %v5060_v58, 0.0  ;;  %v15987_v19 = vpop.eup %12342  ;;  %v5119_v48 = vmul.f32 1.442695, %v5095_v44 }
 0xe87   :  { %v15996_v61 = vpop.eup %12344 }
 0xe88   :  { %v5096_v56 = vsub.f32 %v15824_v20, %v5080_v13  ;;  %12352 = vpow2.f32 %v5117_v10  ;;  %v5097_v32 = vsub.f32 %v15832_v62, %v5081_v6 }
 0xe89   :  { %v5062_v35 = vpop.xlane.xlu0 %5061  ;;  %v5064_v40 = vpop.xlane.xlu1 %5063  ;;  %12354 = vpow2.f32 %v5115_v23 }
 0xe8a   :  { %v5082_v11 = vmax.f32 %v5062_v35, 0.0  ;;  %v5121_v25 = vmul.f32 1.442695, %v5096_v56  ;;  %v15998_v50 = vpop.eup %12346  ;;  %v5083_v15 = vmax.f32 %v5064_v40, 0.0 }
 0xe8c   :  { %v5098_v20 = vsub.f32 %v15842_v5, %v5082_v11  ;;  %12356 = vpow2.f32 %v5121_v25  ;;  %v5123_v5 = vmul.f32 1.442695, %v5097_v32  ;;  %v5099_v57 = vsub.f32 %v15850_v29, %v5083_v15 }
 0xe8d   :  { %v5066_v9 = vpop.xlane.xlu0 %5065  ;;  %v5068_v60 = vpop.xlane.xlu1 %5067  ;;  %12358 = vpow2.f32 %v5119_v48 }
 0xe8e   :  { %5703 = vmax.xlane.f32.xlu0 %v15920_v3  ;;  %v5084_v0 = vmax.f32 %v5066_v9, 0.0  ;;  %v5085_v33 = vmax.f32 %v5068_v60, 0.0  ;;  %v5125_v2 = vmul.f32 1.442695, %v5098_v20  ;;  %v16004_v62 = vpop.eup %12348 }
 0xe8f   :  { %5701 = vmax.xlane.f32.xlu1 %v15923_v30  ;;  %v16006_v38 = vpop.eup %12350 }
 0xe90   :  { %v5100_v16 = vsub.f32 %v15860_v52, %v5084_v0  ;;  %v5101_v58 = vsub.f32 %v15868_v46, %v5085_v33  ;;  %12360 = vpow2.f32 %v5125_v2  ;;  %v5127_v46 = vmul.f32 1.442695, %v5099_v57 }
 0xe91   :  { %v5070_v8 = vpop.xlane.xlu0 %5069  ;;  %12362 = vpow2.f32 %v5123_v5 }
 0xe92   :  { %5707 = vmax.xlane.f32.xlu0 %v15928_v59  ;;  %v5129_v43 = vmul.f32 1.442695, %v5100_v16  ;;  %v5086_v39 = vmax.f32 %v5070_v8, 0.0  ;;  %v5131_v52 = vmul.f32 1.442695, %v5101_v58  ;;  %v16011_v14 = vpop.eup %12352 }
 0xe93   :  { %5705 = vmax.xlane.f32.xlu1 %v15931_v7  ;;  %v16013_v47 = vpop.eup %12354 }
 0xe94   :  { %12364 = vpow2.f32 %v5129_v43  ;;  %v5102_v35 = vsub.f32 %v15878_v45, %v5086_v39 }
 0xe95   :  { %12366 = vpow2.f32 %v5131_v52 }
 0xe96   :  { %5711 = vmax.xlane.f32.xlu0 %v15937_v24  ;;  %v16018_v29 = vpop.eup %12356  ;;  %12368 = vpow2.f32 %v5127_v46  ;;  %v5133_v22 = vmul.f32 1.442695, %v5102_v35 }
 0xe97   :  { %5709 = vmax.xlane.f32.xlu1 %v15940_v51  ;;  %v16020_v21 = vpop.eup %12358 }
 0xe98   :  { %12370 = vpow2.f32 %v5133_v22 }
 0xe9a   :  { %5715 = vmax.xlane.f32.xlu0 %v15946_v42  ;;  %v16024_v13 = vpop.eup %12360 }
 0xe9b   :  { %5713 = vmax.xlane.f32.xlu1 %v15949_v18  ;;  %v16026_v40 = vpop.eup %12362 }
 0xe9e   :  { %5723 = vmax.xlane.f32.xlu0 %v15955_v63  ;;  %v16030_v45 = vpop.eup %12364 }
 0xe9f   :  { %5719 = vmax.xlane.f32.xlu1 %v15959_v53  ;;  %v16032_v36 = vpop.eup %12366 }
 0xea0   :  { %v16036_v17 = vpop.eup %12368 }
 0xea2   :  { %5727 = vmax.xlane.f32.xlu0 %v15966_v31  ;;  %v16039_v54 = vpop.eup %12370 }
 0xea3   :  { %5717 = vmax.xlane.f32.xlu1 %v15970_v34 }
 0xea6   :  { %5137 = vadd.xlane.f32.xlu0 %v15977_v4 }
 0xea7   :  { %5721 = vmax.xlane.f32.xlu1 %v15980_v41 }
 0xeaa   :  { %5135 = vadd.xlane.f32.xlu0 %v15987_v19 }
 0xeab   :  { %5725 = vmax.xlane.f32.xlu1 %v15990_v1 }
 0xeae   :  { %5141 = vadd.xlane.f32.xlu0 %v15996_v61 }
 0xeaf   :  { %5139 = vadd.xlane.f32.xlu1 %v15998_v50 }
 0xeb2   :  { %5145 = vadd.xlane.f32.xlu0 %v16004_v62 }
 0xeb3   :  { %5143 = vadd.xlane.f32.xlu1 %v16006_v38 }
 0xeb6   :  { %5149 = vadd.xlane.f32.xlu0 %v16011_v14 }
 0xeb7   :  { %5147 = vadd.xlane.f32.xlu1 %v16013_v47 }
 0xeba   :  { %5153 = vadd.xlane.f32.xlu0 %v16018_v29 }
 0xebb   :  { %5151 = vadd.xlane.f32.xlu1 %v16020_v21 }
 0xebe   :  { %5157 = vadd.xlane.f32.xlu0 %v16024_v13 }
 0xebf   :  { %5155 = vadd.xlane.f32.xlu1 %v16026_v40 }
 0xec2   :  { %5161 = vadd.xlane.f32.xlu0 %v16030_v45 }
 0xec3   :  { %5163 = vadd.xlane.f32.xlu1 %v16032_v36 }
 0xec6   :  { %5159 = vadd.xlane.f32.xlu0 %v16036_v17 }
 0xeca   :  { %5165 = vadd.xlane.f32.xlu0 %v16039_v54 }
 0xed4   :  { %11882 = vrot.lane.b32.xlu1 %v15540_v12, %s12714_s23 }
 0xee6   :  { %v5700_v27 = vpop.xlane.xlu0 %5699 }
 0xee7   :  { %v5730_v10 = vmax.f32 %v5700_v27, 0.0  ;;  %v5698_v56 = vpop.xlane.xlu1 %5697 }
 0xee8   :  { %v5729_v11 = vmax.f32 %v5698_v56, 0.0 }
 0xee9   :  { %v5746_v23 = vsub.f32 %v15882_v26, %v5730_v10 }
 0xeea   :  { %v5745_v44 = vsub.f32 %v15885_v28, %v5729_v11  ;;  %v16054_v20 = vpop.permute.xlu0 %11877 }
 0xeeb   :  { %v5763_v6 = vmul.f32 1.442695, %v5746_v23  ;;  %v16056_v26 = vpop.permute.xlu1 %11872 }
 0xeec   :  { %v5761_v9 = vmul.f32 1.442695, %v5745_v44 }
 0xeed   :  { %12372 = vpow2.f32 %v5763_v6 }
 0xeee   :  { %12374 = vpow2.f32 %v5761_v9 }
 0xef7   :  { %v16046_v60 = vpop.eup %12372 }
 0xef8   :  { %5795 = vadd.xlane.f32.xlu0 %v16046_v60  ;;  %v16049_v25 = vpop.eup %12374 }
 0xefc   :  { %5793 = vadd.xlane.f32.xlu0 %v16049_v25 }
 0xf12   :  { %11887 = vrot.lane.b32.xlu0 %v15564_v49, %s12714_s23 }
 0xf1b   :  { %v5704_v28 = vpop.xlane.xlu0 %5703 }
 0xf1c   :  { %v5732_v0 = vmax.f32 %v5704_v28, 0.0  ;;  %v5702_v48 = vpop.xlane.xlu1 %5701 }
 0xf1d   :  { %v5731_v32 = vmax.f32 %v5702_v48, 0.0 }
 0xf1e   :  { %v5748_v33 = vsub.f32 %v15920_v3, %v5732_v0 }
 0xf1f   :  { %v5747_v2 = vsub.f32 %v15923_v30, %v5731_v32  ;;  %v5708_v15 = vpop.xlane.xlu0 %5707 }
 0xf20   :  { %v5734_v16 = vmax.f32 %v5708_v15, 0.0  ;;  %v5706_v5 = vpop.xlane.xlu1 %5705  ;;  %v5767_v57 = vmul.f32 1.442695, %v5748_v33 }
 0xf21   :  { %v5765_v58 = vmul.f32 1.442695, %v5747_v2  ;;  %v5733_v8 = vmax.f32 %v5706_v5, 0.0 }
 0xf22   :  { %v5750_v43 = vsub.f32 %v15928_v59, %v5734_v16 }
 0xf23   :  { %12376 = vpow2.f32 %v5765_v58  ;;  %v5749_v39 = vsub.f32 %v15931_v7, %v5733_v8  ;;  %v5712_v52 = vpop.xlane.xlu0 %5711 }
 0xf24   :  { %v5736_v46 = vmax.f32 %v5712_v52, 0.0  ;;  %v5710_v35 = vpop.xlane.xlu1 %5709  ;;  %v5771_v22 = vmul.f32 1.442695, %v5750_v43  ;;  %12378 = vpow2.f32 %v5767_v57 }
 0xf25   :  { %v5769_v27 = vmul.f32 1.442695, %v5749_v39  ;;  %v5735_v10 = vmax.f32 %v5710_v35, 0.0 }
 0xf26   :  { %v5752_v30 = vsub.f32 %v15937_v24, %v5736_v46 }
 0xf27   :  { %12380 = vpow2.f32 %v5769_v27  ;;  %v5751_v3 = vsub.f32 %v15940_v51, %v5735_v10  ;;  %v5716_v56 = vpop.xlane.xlu0 %5715 }
 0xf28   :  { %v5775_v11 = vmul.f32 1.442695, %v5752_v30  ;;  %v5738_v23 = vmax.f32 %v5716_v56, 0.0  ;;  %v5714_v44 = vpop.xlane.xlu1 %5713  ;;  %12382 = vpow2.f32 %v5771_v22 }
 0xf29   :  { %v5737_v59 = vmax.f32 %v5714_v44, 0.0  ;;  %v5773_v6 = vmul.f32 1.442695, %v5751_v3 }
 0xf2a   :  { %12384 = vpow2.f32 %v5775_v11  ;;  %v5754_v7 = vsub.f32 %v15946_v42, %v5738_v23 }
 0xf2b   :  { %v5724_v9 = vpop.xlane.xlu0 %5723  ;;  %v5753_v33 = vsub.f32 %v15949_v18, %v5737_v59  ;;  %12386 = vpow2.f32 %v5773_v6 }
 0xf2c   :  { %v5742_v28 = vmax.f32 %v5724_v9, 0.0  ;;  %v5720_v0 = vpop.xlane.xlu1 %5719  ;;  %v5779_v24 = vmul.f32 1.442695, %v5754_v7 }
 0xf2d   :  { %v16065_v48 = vpop.eup %12376  ;;  %v5740_v32 = vmax.f32 %v5720_v0, 0.0  ;;  %v5777_v57 = vmul.f32 1.442695, %v5753_v33 }
 0xf2e   :  { %5797 = vadd.xlane.f32.xlu1 %v16065_v48  ;;  %v5758_v51 = vsub.f32 %v15955_v63, %v5742_v28  ;;  %v16071_v42 = vpop.eup %12378  ;;  %12388 = vpow2.f32 %v5779_v24 }
 0xf2f   :  { %v5756_v2 = vsub.f32 %v15959_v53, %v5740_v32  ;;  %v5728_v15 = vpop.xlane.xlu0 %5727 }
 0xf30   :  { %v5718_v16 = vpop.xlane.xlu1 %5717  ;;  %v5787_v43 = vmul.f32 1.442695, %v5758_v51  ;;  %v5744_v30 = vmax.f32 %v5728_v15, 0.0 }
 0xf31   :  { %v16073_v5 = vpop.eup %12380  ;;  %v5783_v58 = vmul.f32 1.442695, %v5756_v2  ;;  %v5739_v8 = vmax.f32 %v5718_v16, 0.0  ;;  %5799 = vadd.xlane.f32.xlu0 %v16071_v42 }
 0xf32   :  { %5801 = vadd.xlane.f32.xlu1 %v16073_v5  ;;  %v16077_v18 = vpop.eup %12382 }
 0xf33   :  { %12390 = vpow2.f32 %v5783_v58  ;;  %v5755_v63 = vsub.f32 %v15970_v34, %v5739_v8  ;;  %v5138_v53 = vpop.xlane.xlu0 %5137 }
 0xf34   :  { %v16080_v39 = vpop.eup %12384  ;;  %vm5168_vm15 = vcmp.gt.f32.partialorder %v5138_v53, 0.0  ;;  %v5722_v52 = vpop.xlane.xlu1 %5721  ;;  %12392 = vpow2.f32 %v5777_v57  ;;  %v11825_v57 = vunpack.i.h.bf16 %v15891_v37 }
 0xf35   :  { %v5741_v46 = vmax.f32 %v5722_v52, 0.0  ;;  %5803 = vadd.xlane.f32.xlu0 %v16077_v18  ;;  %v5184_v35 = vsel %vm5168_vm15, %v5138_v53, 1.0  ;;  %12394 = vpow2.f32 %v5787_v43  ;;  %v5781_v22 = vmul.f32 1.442695, %v5755_v63  ;;  %v16085_v3 = vpop.eup %12386 }
 0xf36   :  { %5807 = vadd.xlane.f32.xlu1 %v16080_v39  ;;  %12396 = vrcp.f32 %v5184_v35  ;;  %v11824_v43 = vunpack.i.l.bf16 %v15891_v37 }
 0xf37   :  { %v5757_v27 = vsub.f32 %v15980_v41, %v5741_v46  ;;  %v5136_v10 = vpop.xlane.xlu0 %5135  ;;  %v5760_v41 = vsub.f32 %v15966_v31, %v5744_v30  ;;  %v11830_v30 = vunpack.i.h.bf16 %v15889_v55 }
 0xf38   :  { %vm5167_vm2 = vcmp.gt.f32.partialorder %v5136_v10, 0.0  ;;  %v5726_v34 = vpop.xlane.xlu1 %5725  ;;  %v16089_v59 = vpop.eup %12388 }
 0xf39   :  { %v5785_v56 = vmul.f32 1.442695, %v5757_v27  ;;  %v5183_v11 = vsel %vm5167_vm2, %v5136_v10, 1.0  ;;  %v5743_v23 = vmax.f32 %v5726_v34, 0.0  ;;  %v5791_v33 = vmul.f32 1.442695, %v5760_v41 }
 0xf3a   :  { %12398 = vrcp.f32 %v5183_v11  ;;  %5805 = vadd.xlane.f32.xlu1 %v16085_v3  ;;  %v11829_v34 = vunpack.i.l.bf16 %v15889_v55  ;;  %v18000_v41 = vld [vmem:[#allocation19_spill] sm:$0xff] }
 0xf3b   :  { %12400 = vpow2.f32 %v5781_v22  ;;  %v5759_v44 = vsub.f32 %v15990_v1, %v5743_v23  ;;  %v5142_v7 = vpop.xlane.xlu0 %5141  ;;  %v11834_v55 = vunpack.i.l.bf16 %v18000_v41 }
 0xf3c   :  { %vm5170_vm3 = vcmp.gt.f32.partialorder %v5142_v7, 0.0  ;;  %v5140_v6 = vpop.xlane.xlu1 %5139  ;;  %12402 = vpow2.f32 %v5785_v56 }
 0xf3d   :  { %v16092_v9 = vpop.eup %12390  ;;  %v5789_v28 = vmul.f32 1.442695, %v5759_v44  ;;  %v5186_v0 = vsel %vm5170_vm3, %v5142_v7, 1.0  ;;  %vm5169_vm4 = vcmp.gt.f32.partialorder %v5140_v6, 0.0  ;;  %v17999_v44 = vld [vmem:[#allocation17_spill] sm:$0xff] }
 0xf3e   :  { %12404 = vrcp.f32 %v5186_v0  ;;  %v5185_v32 = vsel %vm5169_vm4, %v5140_v6, 1.0  ;;  %5811 = vadd.xlane.f32.xlu1 %v16089_v59  ;;  %5815 = vadd.xlane.f32.xlu0 %v16092_v9  ;;  %v16096_v24 = vpop.eup %12392  ;;  %v11835_v6 = vunpack.i.h.bf16 %v18000_v41 }
 0xf3f   :  { %12406 = vpow2.f32 %v5789_v28  ;;  %v5146_v1 = vpop.xlane.xlu0 %5145  ;;  %v16098_v51 = vpop.eup %12394 }
 0xf40   :  { %12408 = vrcp.f32 %v5185_v32  ;;  %vm5172_vm5 = vcmp.gt.f32.partialorder %v5146_v1, 0.0  ;;  %v5144_v31 = vpop.xlane.xlu1 %5143  ;;  %v12397_v16 = vpop.eup %12396 }
 0xf41   :  { %v5188_v2 = vsel %vm5172_vm5, %v5146_v1, 1.0  ;;  %vm5171_vm7 = vcmp.gt.f32.partialorder %v5144_v31, 0.0  ;;  %v5216_v22 = vmul.f32 %v12397_v16, %v15977_v4 }
 0xf42   :  { %12410 = vrcp.f32 %v5188_v2  ;;  %v5187_v15 = vsel %vm5171_vm7, %v5144_v31, 1.0  ;;  %5809 = vadd.xlane.f32.xlu1 %v16096_v24  ;;  %5819 = vadd.xlane.f32.xlu0 %v16098_v51  ;;  %v11288_v31 = vpack.c.bf16 %v11830_v30, %v11829_v34 }
 0xf43   :  { %12412 = vrcp.f32 %v5187_v15  ;;  %v5150_v58 = vpop.xlane.xlu0 %5149 }
 0xf44   :  { %v12399_v8 = vpop.eup %12398  ;;  %12414 = vpow2.f32 %v5791_v33  ;;  %vm5174_vm8 = vcmp.gt.f32.partialorder %v5150_v58, 0.0  ;;  %v5148_v63 = vpop.xlane.xlu1 %5147 }
 0xf45   :  { %v16104_v53 = vpop.eup %12400  ;;  %v5190_v52 = vsel %vm5174_vm8, %v5150_v58, 1.0  ;;  %vm5173_vm10 = vcmp.gt.f32.partialorder %v5148_v63, 0.0  ;;  %v5215_v46 = vmul.f32 %v12399_v8, %v15987_v19  ;;  %v11284_v19 = vpack.c.bf16 %v11825_v57, %v11824_v43  ;;  %v18001_v43 = vld [vmem:[#allocation18_spill] sm:$0xff] }
 0xf46   :  { %12416 = vrcp.f32 %v5190_v52  ;;  %v5189_v35 = vsel %vm5173_vm10, %v5148_v63, 1.0  ;;  %5813 = vadd.xlane.f32.xlu1 %v16104_v53  ;;  %v16109_v27 = vpop.eup %12402  ;;  %v11292_v57 = vpack.c.bf16 %v11835_v6, %v11834_v55  ;;  %v11840_v63 = vunpack.i.h.bf16 %v18001_v43 }
 0xf47   :  { %12418 = vrcp.f32 %v5189_v35  ;;  %10288 = vmatprep.mubr.f32.mxu0 %v5215_v46  ;;  %v5154_v37 = vpop.xlane.xlu0 %5153  ;;  %v11839_v52 = vunpack.i.l.bf16 %v18001_v43 }
 0xf48   :  { %v12405_v10 = vpop.eup %12404  ;;  %vm5176_vm11 = vcmp.gt.f32.partialorder %v5154_v37, 0.0  ;;  %10289 = vmatmul.mubr.f32.vlgmr.msra.gmra.mrb[144].mxu0 %v5216_v22  ;;  %v5152_v56 = vpop.xlane.xlu1 %5151 }
 0xf49   :  { %v16113_v11 = vpop.eup %12406  ;;  %v5192_v23 = vsel %vm5176_vm11, %v5154_v37, 1.0  ;;  %11283 = vmatpush3.bf16.msra.mxu0 %v17999_v44  ;;  %vm5175_vm13 = vcmp.gt.f32.partialorder %v5152_v56, 0.0  ;;  %v5218_v33 = vmul.f32 %v12405_v10, %v15996_v61  ;;  %v18002_v10 = vld [vmem:[#allocation86_spill] sm:$0xff] }
 0xf4a   :  { %v12409_v4 = vpop.eup %12408  ;;  %12420 = vrcp.f32 %v5192_v23  ;;  %v5191_v7 = vsel %vm5175_vm13, %v5152_v56, 1.0  ;;  %11285 = vmatprep.subr.bf16.mxu0 %v11284_v19  ;;  %5817 = vadd.xlane.f32.xlu1 %v16109_v27  ;;  %v11845_v30 = vunpack.i.h.bf16 %v18002_v10  ;;  %v11844_v34 = vunpack.i.l.bf16 %v18002_v10 }
 0xf4b   :  { %12422 = vrcp.f32 %v5191_v7  ;;  %5821 = vadd.xlane.f32.xlu0 %v16113_v11  ;;  %v5158_v28 = vpop.xlane.xlu0 %5157  ;;  %v5217_v0 = vmul.f32 %v12409_v4, %v15998_v50 }
 0xf4c   :  { %v12411_v32 = vpop.eup %12410  ;;  %vm5178_vm14 = vcmp.gt.f32.partialorder %v5158_v28, 0.0  ;;  %v5156_v1 = vpop.xlane.xlu1 %5155  ;;  %v11300_v6 = vpack.c.bf16 %v11845_v30, %v11844_v34  ;;  %v18009_v30 = vld [vmem:[#allocation63_spill] sm:$0xff] }
 0xf4d   :  { %v12413_v2 = vpop.eup %12412  ;;  %v5194_v15 = vsel %vm5178_vm14, %v5158_v28, 1.0  ;;  %10291 = vmatprep.mubr.f32.mxu0 %v5217_v0  ;;  %11287 = vmatpush3.bf16.msra.mxu0 %v11284_v19  ;;  %vm5177_vm15 = vcmp.gt.f32.partialorder %v5156_v1, 0.0  ;;  %v5220_v35 = vmul.f32 %v12411_v32, %v16004_v62  ;;  %v11296_v62 = vpack.c.bf16 %v11840_v63, %v11839_v52  ;;  %v18003_v28 = vld [vmem:[#allocation88_spill] sm:$0xff]  ;;  %v18006_v63 = vld [vmem:[#allocation35_spill] sm:$0xff] }
 0xf4e   :  { %v16122_v16 = vpop.eup %12414  ;;  %12424 = vrcp.f32 %v5194_v15  ;;  %v5193_v58 = vsel %vm5177_vm15, %v5156_v1, 1.0  ;;  %10292 = vmatmul.mubr.f32.gmra.mrb[146].mxu0 %v5218_v33  ;;  %11289 = vmatprep.subr.bf16.mxu0 %v11288_v31  ;;  %v5219_v8 = vmul.f32 %v12413_v2, %v16006_v38  ;;  %v11850_v0 = vunpack.i.h.bf16 %v18003_v28 }
 0xf4f   :  { %12426 = vrcp.f32 %v5193_v58  ;;  %5823 = vadd.xlane.f32.xlu1 %v16122_v16  ;;  %v5162_v50 = vpop.xlane.xlu0 %5161  ;;  %v11849_v32 = vunpack.i.l.bf16 %v18003_v28  ;;  %v18025_v28 = vld [vmem:[#allocation53_spill] sm:$0xff] }
 0xf50   :  { %v12417_v61 = vpop.eup %12416  ;;  %vm5180_vm2 = vcmp.gt.f32.partialorder %v5162_v50, 0.0  ;;  %10294 = vmatprep.mubr.f32.mxu0 %v5219_v8  ;;  %v5164_v46 = vpop.xlane.xlu1 %5163 }
 0xf51   :  { %v12419_v22 = vpop.eup %12418  ;;  %11291 = vmatpush3.bf16.msra.mxu0 %v11288_v31  ;;  %vm5181_vm3 = vcmp.gt.f32.partialorder %v5164_v46, 0.0  ;;  %v5196_v37 = vsel %vm5180_vm2, %v5162_v50, 1.0  ;;  %v5222_v44 = vmul.f32 %v12417_v61, %v16011_v14  ;;  %v18004_v31 = vld [vmem:[#allocation90_spill] sm:$0xff]  ;;  %v11304_v8 = vpack.c.bf16 %v11850_v0, %v11849_v32  ;;  %v18026_v0 = vld [vmem:[#allocation81_spill] sm:$0xff] }
 0xf52   :  { %10295 = vmatmul.mubr.f32.gmra.mrb[148].mxu0 %v5220_v35  ;;  %11293 = vmatprep.subr.bf16.mxu0 %v11292_v57  ;;  %v5221_v38 = vmul.f32 %v12419_v22, %v16013_v47  ;;  %v5197_v23 = vsel %vm5181_vm3, %v5164_v46, 1.0  ;;  %12428 = vrcp.f32 %v5196_v37  ;;  %v11855_v2 = vunpack.i.h.bf16 %v18004_v31  ;;  %v18007_v46 = vld [vmem:[#allocation16_spill] sm:$0xff] }
 0xf53   :  { %v5160_v56 = vpop.xlane.xlu0 %5159  ;;  %v11854_v15 = vunpack.i.l.bf16 %v18004_v31 }
 0xf54   :  { %v12421_v19 = vpop.eup %12420  ;;  %vm5179_vm4 = vcmp.gt.f32.partialorder %v5160_v56, 0.0  ;;  %10297 = vmatprep.mubr.f32.mxu0 %v5221_v38  ;;  %v18008_v38 = vld [vmem:[#allocation65_spill] sm:$0xff] }
 0xf55   :  { %v12423_v4 = vpop.eup %12422  ;;  %v5195_v7 = vsel %vm5179_vm4, %v5160_v56, 1.0  ;;  %11295 = vmatpush3.bf16.msra.mxu0 %v11292_v57  ;;  %v5224_v14 = vmul.f32 %v12421_v19, %v16018_v29  ;;  %v18005_v57 = vld [vmem:[#allocation91_spill] sm:$0xff]  ;;  %v18012_v56 = vld [vmem:[#allocation52_spill] sm:$0xff] }
 0xf56   :  { %12430 = vrcp.f32 %v5195_v7  ;;  %10298 = vmatmul.mubr.f32.gmra.mrb[150].mxu0 %v5222_v44  ;;  %11297 = vmatprep.subr.bf16.mxu0 %v11296_v62  ;;  %v5223_v47 = vmul.f32 %v12423_v4, %v16020_v21  ;;  %v11860_v61 = vunpack.i.h.bf16 %v18005_v57  ;;  %v11859_v43 = vunpack.i.l.bf16 %v18005_v57  ;;  %v18013_v19 = vld [vmem:[#allocation23_spill] sm:$0xff]  ;;  %v18017_v44 = vld [vmem:[#allocation62_spill] sm:$0xff]  ;;  %v18020_v7 = vld [vmem:[#allocation56_spill] sm:$0xff] }
 0xf57   :  { %12432 = vrcp.f32 %v5197_v23  ;;  %v5166_v41 = vpop.xlane.xlu0 %5165  ;;  %v18015_v23 = vld [vmem:[#allocation43_spill] sm:$0xff] }
 0xf58   :  { %v12425_v55 = vpop.eup %12424  ;;  %vm5182_vm5 = vcmp.gt.f32.partialorder %v5166_v41, 0.0  ;;  %10300 = vmatprep.mubr.f32.mxu0 %v5223_v47  ;;  %v11312_v37 = vpack.c.bf16 %v11860_v61, %v11859_v43  ;;  %v18019_v4 = vld [vmem:[#allocation7_spill] sm:$0xff]  ;;  %v18021_v47 = vld [vmem:[#allocation13_spill] sm:$0xff] }
 0xf59   :  { %v12427_v1 = vpop.eup %12426  ;;  %v5198_v33 = vsel %vm5182_vm5, %v5166_v41, 1.0  ;;  %11299 = vmatpush3.bf16.msra.mxu0 %v11296_v62  ;;  %v5226_v58 = vmul.f32 %v12425_v55, %v16024_v13  ;;  %v18018_v62 = vld [vmem:[#allocation37_spill] sm:$0xff]  ;;  %v18024_v55 = vld [vmem:[#allocation10_spill] sm:$0xff]  ;;  %v18034_v61 = vld [vmem:[#allocation87_spill] sm:$0xff] }
 0xf5a   :  { %12434 = vrcp.f32 %v5198_v33  ;;  %10301 = vmatmul.mubr.f32.gmra.mrb[152].mxu0 %v5224_v14  ;;  %11301 = vmatprep.subr.bf16.mxu0 %v11300_v6  ;;  %v5225_v21 = vmul.f32 %v12427_v1, %v16026_v40  ;;  %v11308_v40 = vpack.c.bf16 %v11855_v2, %v11854_v15  ;;  %v18022_v41 = vld [vmem:[#allocation5_spill] sm:$0xff]  ;;  %v18028_v33 = vld [vmem:[#allocation32_spill] sm:$0xff]  ;;  %v11865_v43 = vunpack.i.h.bf16 %v18034_v61 }
 0xf5b   :  { %v18027_v1 = vld [vmem:[#allocation49_spill] sm:$0xff]  ;;  %v18029_v2 = vld [vmem:[#allocation4_spill] sm:$0xff] }
 0xf5c   :  { %10303 = vmatprep.mubr.f32.mxu0 %v5225_v21  ;;  %v12429_v29 = vpop.eup %12428  ;;  %v18030_v15 = vld [vmem:[#allocation9_spill] sm:$0xff] }
 0xf5d   :  { %11303 = vmatpush3.bf16.msra.mxu0 %v11300_v6  ;;  %v5228_v35 = vmul.f32 %v12429_v29, %v16030_v45  ;;  %v18011_v45 = vld [vmem:[#allocation72_spill] sm:$0xff]  ;;  %v18023_v6 = vld [vmem:[#allocation79_spill] sm:$0xff] }
 0xf5e   :  { %10304 = vmatmul.mubr.f32.gmra.mrb[154].mxu0 %v5226_v58  ;;  %11305 = vmatprep.subr.bf16.mxu0 %v11304_v8  ;;  %v18031_v58 = vld [vmem:[#allocation15_spill] sm:$0xff] }
 0xf60   :  { %v12431_v50 = vpop.eup %12430  ;;  %6180 = vrot.lane.b32.xlu1 %v18006_v63, %s12714_s23 }
 0xf61   :  { %v12433_v52 = vpop.eup %12432  ;;  %11307 = vmatpush3.bf16.msra.mxu0 %v11304_v8  ;;  %11892 = vrot.lane.b32.xlu0 %v18007_v46, %s12714_s23  ;;  %v5227_v13 = vmul.f32 %v12431_v50, %v16036_v17  ;;  %v18032_v8 = vld [vmem:[#allocation46_spill] sm:$0xff]  ;;  %v18033_v50 = vld [vmem:[#allocation47_spill] sm:$0xff] }
 0xf62   :  { %11309 = vmatprep.subr.bf16.mxu0 %v11308_v40  ;;  %v5229_v10 = vmul.f32 %v12433_v52, %v16032_v36  ;;  %v18014_v36 = vld [vmem:[#allocation84_spill] sm:$0xff] }
 0xf63   :  { %10306 = vmatprep.mubr.f32.mxu0 %v5227_v13 }
 0xf64   :  { %v12435_v22 = vpop.eup %12434  ;;  %6184 = vrot.lane.b32.xlu1 %v18008_v38, %s12714_s23  ;;  %10307 = vmatmul.mubr.f32.gmra.mrb[156].mxu0 %v5228_v35  ;;  %v18035_v35 = vld [vmem:[#allocation21_spill] sm:$0xff] }
 0xf65   :  { %11311 = vmatpush3.bf16.msra.mxu0 %v11308_v40  ;;  %6178 = vrot.lane.b32.xlu0 %v18009_v30, %s12714_s23  ;;  %v5230_v34 = vmul.f32 %v12435_v22, %v16039_v54  ;;  %v18016_v54 = vld [vmem:[#allocation29_spill] sm:$0xff]  ;;  %v11864_v40 = vunpack.i.l.bf16 %v18034_v61 }
 0xf66   :  { %10309 = vmatprep.mubr.f32.mxu0 %v5229_v10  ;;  %11314 = vmatprep.subr.msk.bf16.mxu0 %vm13134_vm1, %v11312_v37  ;;  %v18036_v10 = vld [vmem:[#allocation89_spill] sm:$0xff] }
 0xf67   :  { %v11318_v22 = vpack.c.bf16 %v11865_v43, %v11864_v40 }
 0xf68   :  { %6188 = vrot.lane.b32.xlu1 %v18011_v45, %s12714_s23  ;;  %10310 = vmatmul.mubr.f32.gmra.mrb[158].mxu0 %v5230_v34  ;;  %v11870_v34 = vunpack.i.h.bf16 %v18036_v10 }
 0xf69   :  { %6182 = vrot.lane.b32.xlu0 %v18012_v56, %s12714_s23 }
 0xf6c   :  { %6192 = vrot.lane.b32.xlu1 %v18013_v19, %s12714_s23 }
 0xf6d   :  { %6186 = vrot.lane.b32.xlu0 %v18014_v36, %s12714_s23 }
 0xf70   :  { %6196 = vrot.lane.b32.xlu1 %v18015_v23, %s12714_s23 }
 0xf71   :  { %6190 = vrot.lane.b32.xlu0 %v18016_v54, %s12714_s23 }
 0xf74   :  { %6200 = vrot.lane.b32.xlu1 %v18017_v44, %s12714_s23 }
 0xf75   :  { %6194 = vrot.lane.b32.xlu0 %v18018_v62, %s12714_s23 }
 0xf78   :  { %6204 = vrot.lane.b32.xlu1 %v18019_v4, %s12714_s23 }
 0xf79   :  { %6198 = vrot.lane.b32.xlu0 %v18020_v7, %s12714_s23 }
 0xf7c   :  { %6208 = vrot.lane.b32.xlu1 %v18021_v47, %s12714_s23 }
 0xf7d   :  { %6202 = vrot.lane.b32.xlu0 %v18022_v41, %s12714_s23 }
 0xf80   :  { %11897 = vrot.lane.b32.xlu1 %v18023_v6, %s12714_s23 }
 0xf81   :  { %6206 = vrot.lane.b32.xlu0 %v18024_v55, %s12714_s23 }
 0xf84   :  { %11907 = vrot.lane.b32.xlu1 %v18025_v28, %s12714_s23 }
 0xf85   :  { %11902 = vrot.lane.b32.xlu0 %v18026_v0, %s12714_s23  ;;  %v5796_v32 = vpop.xlane.xlu0 %5795 }
 0xf86   :  { %vm5826_vm7 = vcmp.gt.f32.partialorder %v5796_v32, 0.0 }
 0xf87   :  { %v5842_v14 = vsel %vm5826_vm7, %v5796_v32, 1.0  ;;  %v11869_v32 = vunpack.i.l.bf16 %v18036_v10 }
 0xf88   :  { %11917 = vrot.lane.b32.xlu1 %v18027_v1, %s12714_s23  ;;  %12436 = vrcp.f32 %v5842_v14 }
 0xf89   :  { %11912 = vrot.lane.b32.xlu0 %v18028_v33, %s12714_s23  ;;  %v5794_v21 = vpop.xlane.xlu0 %5793  ;;  %v11324_v14 = vpack.c.bf16 %v11870_v34, %v11869_v32 }
 0xf8a   :  { %vm5825_vm8 = vcmp.gt.f32.partialorder %v5794_v21, 0.0 }
 0xf8b   :  { %v5841_v31 = vsel %vm5825_vm8, %v5794_v21, 1.0 }
 0xf8c   :  { %12438 = vrcp.f32 %v5841_v31  ;;  %11922 = vrot.lane.b32.xlu1 %v18029_v2, %s12714_s23  ;;  %v11879_v31 = vunpack.i.l.bf16 %v16054_v20 }
 0xf8d   :  { %11927 = vrot.lane.b32.xlu0 %v18030_v15, %s12714_s23  ;;  %v11888_v61 = vpop.permute.xlu0 %11887  ;;  %v16467_v15 = vld [vmem:[%s17507_s1 + $0x70] sm:$0xff] }
 0xf8e   :  { %v11890_v40 = vunpack.i.h.bf16 %v11888_v61  ;;  %18070 = vst [vmem:[#allocation47_spill] sm:$0xff] %v16467_v15 }
 0xf90   :  { %11932 = vrot.lane.b32.xlu1 %v18031_v58, %s12714_s23 }
 0xf91   :  { %11937 = vrot.lane.b32.xlu0 %v18032_v8, %s12715_s24 }
 0xf92   :  { %v12437_v29 = vpop.eup %12436 }
 0xf93   :  { %v5874_v13 = vmul.f32 %v12437_v29, %v16046_v60  ;;  %v11875_v60 = vunpack.i.h.bf16 %v16056_v26  ;;  %v11883_v29 = vpop.permute.xlu1 %11882 }
 0xf95   :  { %11942 = vrot.lane.b32.xlu0 %v18033_v50, %s12715_s24  ;;  %v11884_v50 = vunpack.i.l.bf16 %v11883_v29 }
 0xf96   :  { %v12439_v57 = vpop.eup %12438 }
 0xf97   :  { %v5873_v52 = vmul.f32 %v12439_v57, %v16049_v25  ;;  %v11874_v25 = vunpack.i.l.bf16 %v16056_v26  ;;  %v11885_v26 = vunpack.i.h.bf16 %v11883_v29 }
 0xf99   :  { %11947 = vrot.lane.b32.xlu0 %v18035_v35, %s12715_s24  ;;  %10400 = vmatprep.mubr.f32.mxu0 %v5873_v52  ;;  %v11330_v21 = vpack.c.bf16 %v11875_v60, %v11874_v25  ;;  %v11342_v57 = vpack.c.bf16 %v11885_v26, %v11884_v50  ;;  %v11889_v52 = vunpack.i.l.bf16 %v11888_v61 }
 0xf9a   :  { %10401 = vmatmul.mubr.f32.vlgmr.msra.gmra.mrb[160].mxu0 %v5874_v13 }
 0xf9b   :  { %11317 = vmatpush3.bf16.xpose.msk.msra.mxu0 %vm13134_vm1, %v11312_v37  ;;  %v11880_v37 = vunpack.i.h.bf16 %v16054_v20  ;;  %v11348_v34 = vpack.c.bf16 %v11890_v40, %v11889_v52 }
 0xf9c   :  { %11320 = vmatprep.subr.msk.bf16.mxu0 %vm13134_vm1, %v11318_v22 }
 0xf9d   :  { %v11336_v8 = vpack.c.bf16 %v11880_v37, %v11879_v31 }
 0xfa3   :  { %11323 = vmatpush3.bf16.xpose.msk.msra.mxu0 %vm13134_vm1, %v11318_v22 }
 0xfa4   :  { %11326 = vmatprep.subr.msk.bf16.mxu0 %vm13134_vm1, %v11324_v14 }
 0xfab   :  { %11329 = vmatpush3.bf16.xpose.msk.msra.mxu0 %vm13134_vm1, %v11324_v14 }
 0xfac   :  { %11332 = vmatprep.subr.msk.bf16.mxu0 %vm13134_vm1, %v11330_v21 }
 0xfb3   :  { %11335 = vmatpush3.bf16.xpose.msk.msra.mxu0 %vm13134_vm1, %v11330_v21 }
 0xfb4   :  { %11338 = vmatprep.subr.msk.bf16.mxu0 %vm13134_vm1, %v11336_v8 }
 0xfbb   :  { %11341 = vmatpush3.bf16.xpose.msk.msra.mxu0 %vm13134_vm1, %v11336_v8  ;;  %v5798_v43 = vpop.xlane.xlu1 %5797 }
 0xfbc   :  { %vm5827_vm10 = vcmp.gt.f32.partialorder %v5798_v43, 0.0  ;;  %11344 = vmatprep.subr.msk.bf16.mxu0 %vm13134_vm1, %v11342_v57 }
 0xfbd   :  { %v5843_v20 = vsel %vm5827_vm10, %v5798_v43, 1.0 }
 0xfbe   :  { %12440 = vrcp.f32 %v5843_v20  ;;  %v5800_v13 = vpop.xlane.xlu0 %5799 }
 0xfbf   :  { %vm5828_vm11 = vcmp.gt.f32.partialorder %v5800_v13, 0.0  ;;  %v5802_v35 = vpop.xlane.xlu1 %5801 }
 0xfc0   :  { %v5844_v22 = vsel %vm5828_vm11, %v5800_v13, 1.0  ;;  %vm5829_vm13 = vcmp.gt.f32.partialorder %v5802_v35, 0.0 }
 0xfc1   :  { %12442 = vrcp.f32 %v5844_v22  ;;  %v5845_v10 = vsel %vm5829_vm13, %v5802_v35, 1.0 }
 0xfc2   :  { %12444 = vrcp.f32 %v5845_v10  ;;  %v5804_v32 = vpop.xlane.xlu0 %5803 }
 0xfc3   :  { %vm5830_vm14 = vcmp.gt.f32.partialorder %v5804_v32, 0.0  ;;  %11347 = vmatpush3.bf16.xpose.msk.msra.mxu0 %vm13134_vm1, %v11342_v57  ;;  %v5808_v14 = vpop.xlane.xlu1 %5807 }
 0xfc4   :  { %v5846_v60 = vsel %vm5830_vm14, %v5804_v32, 1.0  ;;  %vm5832_vm15 = vcmp.gt.f32.partialorder %v5808_v14, 0.0  ;;  %11350 = vmatprep.subr.msk.bf16.mxu0 %vm13134_vm1, %v11348_v34 }
 0xfc5   :  { %12446 = vrcp.f32 %v5846_v60  ;;  %v5848_v25 = vsel %vm5832_vm15, %v5808_v14, 1.0 }
 0xfc6   :  { %12448 = vrcp.f32 %v5848_v25 }
 0xfc7   :  { %v5806_v21 = vpop.xlane.xlu1 %5805 }
 0xfc8   :  { %v12441_v37 = vpop.eup %12440  ;;  %vm5831_vm2 = vcmp.gt.f32.partialorder %v5806_v21, 0.0 }
 0xfc9   :  { %v5847_v31 = vsel %vm5831_vm2, %v5806_v21, 1.0  ;;  %v5875_v8 = vmul.f32 %v12441_v37, %v16065_v48 }
 0xfca   :  { %12450 = vrcp.f32 %v5847_v31 }
 0xfcb   :  { %v12443_v29 = vpop.eup %12442  ;;  %11353 = vmatpush3.bf16.xpose.msk.msra.mxu0 %vm13134_vm1, %v11348_v34  ;;  %v5816_v26 = vpop.xlane.xlu0 %5815  ;;  %10403 = vmatprep.mubr.f32.mxu0 %v5875_v8 }
 0xfcc   :  { %v5812_v50 = vpop.xlane.xlu1 %5811  ;;  %v12445_v57 = vpop.eup %12444  ;;  %v5876_v61 = vmul.f32 %v12443_v29, %v16071_v42  ;;  %vm5836_vm4 = vcmp.gt.f32.partialorder %v5816_v26, 0.0 }
 0xfcd   :  { %vm5834_vm3 = vcmp.gt.f32.partialorder %v5812_v50, 0.0  ;;  %v5877_v43 = vmul.f32 %v12445_v57, %v16073_v5  ;;  %v5852_v22 = vsel %vm5836_vm4, %v5816_v26, 1.0 }
 0xfce   :  { %10404 = vmatmul.mubr.f32.gmra.mrb[162].mxu0 %v5876_v61  ;;  %v5850_v40 = vsel %vm5834_vm3, %v5812_v50, 1.0 }
 0xfcf   :  { %v12447_v20 = vpop.eup %12446  ;;  %10406 = vmatprep.mubr.f32.mxu0 %v5877_v43  ;;  %v5820_v52 = vpop.xlane.xlu0 %5819  ;;  %12452 = vrcp.f32 %v5850_v40 }
 0xfd0   :  { %v5810_v48 = vpop.xlane.xlu1 %5809  ;;  %v5878_v13 = vmul.f32 %v12447_v20, %v16077_v18  ;;  %v12449_v10 = vpop.eup %12448  ;;  %vm5838_vm7 = vcmp.gt.f32.partialorder %v5820_v52, 0.0 }
 0xfd1   :  { %vm5833_vm5 = vcmp.gt.f32.partialorder %v5810_v48, 0.0  ;;  %v5854_v14 = vsel %vm5838_vm7, %v5820_v52, 1.0  ;;  %v5880_v60 = vmul.f32 %v12449_v10, %v16080_v39 }
 0xfd2   :  { %v5849_v35 = vsel %vm5833_vm5, %v5810_v48, 1.0  ;;  %10407 = vmatmul.mubr.f32.gmra.mrb[164].mxu0 %v5878_v13 }
 0xfd3   :  { %12454 = vrcp.f32 %v5849_v35 }
 0xfd4   :  { %v5814_v42 = vpop.xlane.xlu1 %5813  ;;  %v12451_v34 = vpop.eup %12450  ;;  %12456 = vrcp.f32 %v5852_v22 }
 0xfd5   :  { %vm5835_vm8 = vcmp.gt.f32.partialorder %v5814_v42, 0.0  ;;  %v5879_v32 = vmul.f32 %v12451_v34, %v16085_v3 }
 0xfd6   :  { %v5851_v5 = vsel %vm5835_vm8, %v5814_v42, 1.0 }
 0xfd7   :  { %12458 = vrcp.f32 %v5851_v5  ;;  %10409 = vmatprep.mubr.f32.mxu0 %v5879_v32 }
 0xfd8   :  { %v5818_v18 = vpop.xlane.xlu1 %5817  ;;  %v5822_v25 = vpop.xlane.xlu0 %5821  ;;  %10410 = vmatmul.mubr.f32.gmra.mrb[166].mxu0 %v5880_v60  ;;  %12460 = vrcp.f32 %v5854_v14 }
 0xfd9   :  { %vm5837_vm10 = vcmp.gt.f32.partialorder %v5818_v18, 0.0  ;;  %vm5839_vm11 = vcmp.gt.f32.partialorder %v5822_v25, 0.0  ;;  %v12453_v31 = vpop.eup %12452 }
 0xfda   :  { %v5853_v21 = vsel %vm5837_vm10, %v5818_v18, 1.0  ;;  %v5855_v37 = vsel %vm5839_vm11, %v5822_v25, 1.0  ;;  %v5882_v20 = vmul.f32 %v12453_v31, %v16089_v59 }
 0xfdb   :  { %12462 = vrcp.f32 %v5853_v21 }
 0xfdc   :  { %12464 = vrcp.f32 %v5855_v37  ;;  %v11893_v8 = vpop.permute.xlu0 %11892  ;;  %v5824_v29 = vpop.xlane.xlu1 %5823 }
 0xfdd   :  { %v12455_v26 = vpop.eup %12454  ;;  %v11895_v3 = vunpack.i.h.bf16 %v11893_v8  ;;  %v11894_v50 = vunpack.i.l.bf16 %v11893_v8  ;;  %vm5840_vm13 = vcmp.gt.f32.partialorder %v5824_v29, 0.0 }
 0xfde   :  { %v5856_v57 = vsel %vm5840_vm13, %v5824_v29, 1.0  ;;  %v5881_v39 = vmul.f32 %v12455_v26, %v16096_v24  ;;  %v12457_v61 = vpop.eup %12456 }
 0xfdf   :  { %v11354_v43 = vpack.c.bf16 %v11895_v3, %v11894_v50  ;;  %12466 = vrcp.f32 %v5856_v57  ;;  %v5884_v24 = vmul.f32 %v12457_v61, %v16092_v9 }
 0xfe0   :  { %v6179_v48 = vpop.permute.xlu0 %6178  ;;  %10412 = vmatprep.mubr.f32.mxu0 %v5881_v39  ;;  %v6181_v52 = vpop.permute.xlu1 %6180 }
 0xfe1   :  { %v12459_v40 = vpop.eup %12458  ;;  %10413 = vmatmul.mubr.f32.gmra.mrb[168].mxu0 %v5882_v20  ;;  %11356 = vmatprep.subr.msk.bf16.mxu0 %vm13134_vm1, %v11354_v43 }
 0xfe2   :  { %v5883_v13 = vmul.f32 %v12459_v40, %v16104_v53  ;;  %11359 = vmatpush3.bf16.xpose.msk.msra.mxu0 %vm13134_vm1, %v11354_v43  ;;  %v12461_v35 = vpop.eup %12460 }
 0xfe3   :  { %v5886_v5 = vmul.f32 %v12461_v35, %v16098_v51 }
 0xfe4   :  { %10415 = vmatprep.mubr.f32.mxu0 %v5883_v13  ;;  %v6183_v10 = vpop.permute.xlu0 %6182  ;;  %v6185_v59 = vpop.permute.xlu1 %6184 }
 0xfe5   :  { %v12463_v22 = vpop.eup %12462  ;;  %10416 = vmatmul.mubr.f32.gmra.mrb[170].mxu0 %v5884_v24 }
 0xfe6   :  { %v12465_v42 = vpop.eup %12464  ;;  %v5885_v34 = vmul.f32 %v12463_v22, %v16109_v27 }
 0xfe7   :  { %v5887_v53 = vmul.f32 %v12465_v42, %v16113_v11 }
 0xfe8   :  { %10418 = vmatprep.mubr.f32.mxu0 %v5885_v34  ;;  %v6187_v32 = vpop.permute.xlu0 %6186  ;;  %v6189_v14 = vpop.permute.xlu1 %6188 }
 0xfe9   :  { %v12467_v60 = vpop.eup %12466  ;;  %10419 = vmatmul.mubr.f32.gmra.mrb[172].mxu0 %v5886_v5 }
 0xfea   :  { %10421 = vmatprep.mubr.f32.mxu0 %v5887_v53  ;;  %v5888_v18 = vmul.f32 %v12467_v60, %v16122_v16 }
 0xfec   :  { %v6191_v9 = vpop.permute.xlu0 %6190  ;;  %v6193_v25 = vpop.permute.xlu1 %6192 }
 0xfed   :  { %10422 = vmatmul.mubr.f32.gmra.mrb[174].mxu0 %v5888_v18 }
 0xfee   :  { %10456 = vmatprep.mubr.msk.f32.mxu0 %vm304_vm0, %v6179_v48 }
 0xff0   :  { %v6195_v21 = vpop.permute.xlu0 %6194  ;;  %v6197_v37 = vpop.permute.xlu1 %6196 }
 0xff1   :  { %10457 = vmatmul.mubr.msk.f32.vlgmr.msra.gmra.mrb[176].mxu0 %vm304_vm0, %v6181_v52 }
 0xff2   :  { %10459 = vmatprep.mubr.msk.f32.mxu0 %vm304_vm0, %v6183_v10 }
 0xff4   :  { %v6199_v51 = vpop.permute.xlu0 %6198  ;;  %v6201_v27 = vpop.permute.xlu1 %6200 }
 0xff5   :  { %10460 = vmatmul.mubr.msk.f32.gmra.mrb[178].mxu0 %vm304_vm0, %v6185_v59 }
 0xff6   :  { %10462 = vmatprep.mubr.msk.f32.mxu0 %vm304_vm0, %v6187_v32 }
 0xff8   :  { %v6203_v11 = vpop.permute.xlu0 %6202  ;;  %v6205_v31 = vpop.permute.xlu1 %6204 }
 0xff9   :  { %10463 = vmatmul.mubr.msk.f32.gmra.mrb[180].mxu0 %vm304_vm0, %v6189_v14 }
 0xffa   :  { %10465 = vmatprep.mubr.msk.f32.mxu0 %vm304_vm0, %v6191_v9 }
 0xffc   :  { %v6207_v16 = vpop.permute.xlu0 %6206  ;;  %v6209_v8 = vpop.permute.xlu1 %6208 }
 0xffd   :  { %10466 = vmatmul.mubr.msk.f32.gmra.mrb[182].mxu0 %vm304_vm0, %v6193_v25 }
 0xffe   :  { %10468 = vmatprep.mubr.msk.f32.mxu0 %vm304_vm0, %v6195_v21 }
0x1000   :  { %v11903_v29 = vpop.permute.xlu0 %11902  ;;  %v11898_v26 = vpop.permute.xlu1 %11897 }
0x1001   :  { %v11905_v3 = vunpack.i.h.bf16 %v11903_v29  ;;  %v11904_v50 = vunpack.i.l.bf16 %v11903_v29  ;;  %v11900_v57 = vunpack.i.h.bf16 %v11898_v26  ;;  %v11899_v39 = vunpack.i.l.bf16 %v11898_v26  ;;  %10469 = vmatmul.mubr.msk.f32.gmra.mrb[184].mxu0 %vm304_vm0, %v6197_v37 }
0x1002   :  { %10471 = vmatprep.mubr.msk.f32.mxu0 %vm304_vm0, %v6199_v51 }
0x1003   :  { %v11360_v61 = vpack.c.bf16 %v11900_v57, %v11899_v39  ;;  %v11364_v48 = vpack.c.bf16 %v11905_v3, %v11904_v50 }
0x1004   :  { %v11908_v43 = vpop.permute.xlu1 %11907  ;;  %v11913_v52 = vpop.permute.xlu0 %11912 }
0x1005   :  { %v11910_v20 = vunpack.i.h.bf16 %v11908_v43  ;;  %v11909_v40 = vunpack.i.l.bf16 %v11908_v43  ;;  %10472 = vmatmul.mubr.msk.f32.gmra.mrb[186].mxu0 %vm304_vm0, %v6201_v27  ;;  %11361 = vmatprep.subr.bf16.mxu1 %v11360_v61  ;;  %v11915_v35 = vunpack.i.h.bf16 %v11913_v52  ;;  %v11914_v24 = vunpack.i.l.bf16 %v11913_v52 }
0x1006   :  { %10474 = vmatprep.mubr.msk.f32.mxu0 %vm304_vm0, %v6203_v11  ;;  %11363 = vmatpush3.bf16.msra.mxu1 %v11360_v61 }
0x1007   :  { %11365 = vmatprep.subr.bf16.mxu1 %v11364_v48  ;;  %v11368_v22 = vpack.c.bf16 %v11910_v20, %v11909_v40  ;;  %v11372_v42 = vpack.c.bf16 %v11915_v35, %v11914_v24 }
0x1008   :  { %v11918_v13 = vpop.permute.xlu1 %11917  ;;  %v11928_v53 = vpop.permute.xlu0 %11927 }
0x1009   :  { %10475 = vmatmul.mubr.msk.f32.gmra.mrb[188].mxu0 %vm304_vm0, %v6205_v31  ;;  %v11920_v10 = vunpack.i.h.bf16 %v11918_v13  ;;  %v11919_v59 = vunpack.i.l.bf16 %v11918_v13  ;;  %v11930_v60 = vunpack.i.h.bf16 %v11928_v53  ;;  %v11929_v18 = vunpack.i.l.bf16 %v11928_v53 }
0x100a   :  { %10477 = vmatprep.mubr.msk.f32.mxu0 %vm304_vm0, %v6207_v16  ;;  %11367 = vmatpush3.bf16.msra.mxu1 %v11364_v48 }
0x100b   :  { %11369 = vmatprep.subr.bf16.mxu1 %v11368_v22  ;;  %v11376_v14 = vpack.c.bf16 %v11920_v10, %v11919_v59  ;;  %v11384_v51 = vpack.c.bf16 %v11930_v60, %v11929_v18 }
0x100c   :  { %v11923_v34 = vpop.permute.xlu1 %11922  ;;  %v11938_v27 = vpop.permute.xlu0 %11937 }
0x100d   :  { %10478 = vmatmul.mubr.msk.f32.gmra.mrb[190].mxu0 %vm304_vm0, %v6209_v8  ;;  %v11925_v5 = vunpack.i.h.bf16 %v11923_v34  ;;  %v11924_v32 = vunpack.i.l.bf16 %v11923_v34  ;;  %v11940_v16 = vunpack.i.h.bf16 %v11938_v27  ;;  %v11939_v8 = vunpack.i.l.bf16 %v11938_v27 }
0x100e   :  { %11371 = vmatpush3.bf16.msra.mxu1 %v11368_v22 }
0x100f   :  { %11373 = vmatprep.subr.bf16.mxu1 %v11372_v42  ;;  %v11380_v9 = vpack.c.bf16 %v11925_v5, %v11924_v32  ;;  %v16277_v26 = vpack.c.bf16 %v11940_v16, %v11939_v8 }
0x1010   :  { %v11933_v25 = vpop.permute.xlu1 %11932 }
0x1011   :  { %v11935_v21 = vunpack.i.h.bf16 %v11933_v25  ;;  %v11934_v37 = vunpack.i.l.bf16 %v11933_v25 }
0x1012   :  { %11375 = vmatpush3.bf16.msra.mxu1 %v11372_v42 }
0x1013   :  { %11377 = vmatprep.subr.bf16.mxu1 %v11376_v14  ;;  %v11388_v29 = vpack.c.bf16 %v11935_v21, %v11934_v37 }
0x1016   :  { %11379 = vmatpush3.bf16.msra.mxu1 %v11376_v14 }
0x1017   :  { %11381 = vmatprep.subr.bf16.mxu1 %v11380_v9 }
0x101a   :  { %11383 = vmatpush3.bf16.msra.mxu1 %v11380_v9 }
0x101b   :  { %11385 = vmatprep.subr.bf16.mxu1 %v11384_v51  ;;  %v10290_v11 = vpop.f32.mrb[144].mxu0 }
0x101c   :  { %5377 = vst.msk [vmem:[#allocation2 + $0x8] sm:$0xff] %vm304_vm0, %v10290_v11  ;;  %v5297_v31 = vpop.f32.mrb[145].mxu0 }
0x101d   :  { %5376 = vst.msk [vmem:[#allocation2] sm:$0xff] %vm304_vm0, %v5297_v31 }
0x101e   :  { %11387 = vmatpush3.bf16.msra.mxu1 %v11384_v51 }
0x101f   :  { %11389 = vmatprep.subr.bf16.mxu1 %v11388_v29 }
0x1021   :  { %v10293_v3 = vpop.f32.mrb[146].mxu0 }
0x1022   :  { %5379 = vst.msk [vmem:[#allocation2 + $0x18] sm:$0xff] %vm304_vm0, %v10293_v3  ;;  %v5307_v50 = vpop.f32.mrb[147].mxu0  ;;  %11391 = vmatpush3.bf16.msra.mxu1 %v11388_v29  ;;  %v16331_v29 = vld [vmem:[%s17507_s1 + $0x8] sm:$0xff] }
0x1023   :  { %5378 = vst.msk [vmem:[#allocation2 + $0x10] sm:$0xff] %vm304_vm0, %v5307_v50  ;;  %11394 = vmatprep.subr.msk.bf16.mxu1 %vm13134_vm1, %v16277_v26  ;;  %18053 = vst [vmem:[#allocation43_spill] sm:$0xff] %v16331_v29  ;;  %v16339_v50 = vld [vmem:[%s17507_s1] sm:$0xff] }
0x1024   :  { %18054 = vst [vmem:[#allocation29_spill] sm:$0xff] %v16339_v50 }
0x1025   :  { %v10296_v57 = vpop.f32.mrb[148].mxu0 }
0x1026   :  { %5381 = vst.msk [vmem:[#allocation2 + $0x28] sm:$0xff] %vm304_vm0, %v10296_v57  ;;  %v5317_v39 = vpop.f32.mrb[149].mxu0 }
0x1027   :  { %5380 = vst.msk [vmem:[#allocation2 + $0x20] sm:$0xff] %vm304_vm0, %v5317_v39 }
0x1029   :  { %v10299_v61 = vpop.f32.mrb[150].mxu0 }
0x102a   :  { %5383 = vst.msk [vmem:[#allocation2 + $0x38] sm:$0xff] %vm304_vm0, %v10299_v61  ;;  %v5327_v43 = vpop.f32.mrb[151].mxu0 }
0x102b   :  { %5382 = vst.msk [vmem:[#allocation2 + $0x30] sm:$0xff] %vm304_vm0, %v5327_v43 }
0x102d   :  { %v10302_v20 = vpop.f32.mrb[152].mxu0 }
0x102e   :  { %5385 = vst.msk [vmem:[#allocation2 + $0x48] sm:$0xff] %vm304_vm0, %v10302_v20  ;;  %v5337_v40 = vpop.f32.mrb[153].mxu0  ;;  %v16349_v20 = vld [vmem:[%s17507_s1 + $0x18] sm:$0xff] }
0x102f   :  { %5384 = vst.msk [vmem:[#allocation2 + $0x40] sm:$0xff] %vm304_vm0, %v5337_v40  ;;  %18055 = vst [vmem:[#allocation62_spill] sm:$0xff] %v16349_v20 }
0x1031   :  { %v10305_v48 = vpop.f32.mrb[154].mxu0 }
0x1032   :  { %5387 = vst.msk [vmem:[#allocation2 + $0x58] sm:$0xff] %vm304_vm0, %v10305_v48  ;;  %v5347_v52 = vpop.f32.mrb[155].mxu0 }
0x1033   :  { %5386 = vst.msk [vmem:[#allocation2 + $0x50] sm:$0xff] %vm304_vm0, %v5347_v52 }
0x1037   :  { %v10308_v13 = vpop.f32.mrb[156].mxu0 }
0x1038   :  { %5389 = vst.msk [vmem:[#allocation2 + $0x68] sm:$0xff] %vm304_vm0, %v10308_v13  ;;  %v5357_v35 = vpop.f32.mrb[157].mxu0 }
0x1039   :  { %5388 = vst.msk [vmem:[#allocation2 + $0x60] sm:$0xff] %vm304_vm0, %v5357_v35  ;;  %v16358_v35 = vld [vmem:[%s17507_s1 + $0x10] sm:$0xff] }
0x103a   :  { %18056 = vst [vmem:[#allocation37_spill] sm:$0xff] %v16358_v35 }
0x103b   :  { %v10311_v24 = vpop.f32.mrb[158].mxu0 }
0x103c   :  { %5391 = vst.msk [vmem:[#allocation2 + $0x78] sm:$0xff] %vm304_vm0, %v10311_v24  ;;  %v5367_v22 = vpop.f32.mrb[159].mxu0 }
0x103d   :  { %5390 = vst.msk [vmem:[#allocation2 + $0x70] sm:$0xff] %vm304_vm0, %v5367_v22 }
0x106d   :  { %v16296_v10 = vpop.f32.mrb[160].mxu0 }
0x106e   :  { %18037 = vst [vmem:[#allocation17_spill] sm:$0xff] %v16296_v10  ;;  %v16298_v59 = vpop.f32.mrb[161].mxu0  ;;  %v16423_v10 = vld [vmem:[%s17507_s1 + $0x20] sm:$0xff] }
0x106f   :  { %18038 = vst [vmem:[#allocation19_spill] sm:$0xff] %v16298_v59  ;;  %18064 = vst [vmem:[#allocation53_spill] sm:$0xff] %v16423_v10  ;;  %v16429_v59 = vld [vmem:[%s17507_s1 + $0x30] sm:$0xff] }
0x1070   :  { %18065 = vst [vmem:[#allocation81_spill] sm:$0xff] %v16429_v59 }
0x10a1   :  { %v16300_v42 = vpop.f32.mrb[162].mxu0 }
0x10a2   :  { %18039 = vst [vmem:[#allocation18_spill] sm:$0xff] %v16300_v42  ;;  %v16302_v34 = vpop.f32.mrb[163].mxu0  ;;  %v16458_v42 = vld [vmem:[%s17507_s1 + $0x60] sm:$0xff] }
0x10a3   :  { %18040 = vst [vmem:[#allocation86_spill] sm:$0xff] %v16302_v34  ;;  %18069 = vst [vmem:[#allocation46_spill] sm:$0xff] %v16458_v42 }
0x10a5   :  { %v16304_v5 = vpop.f32.mrb[164].mxu0 }
0x10a6   :  { %18041 = vst [vmem:[#allocation88_spill] sm:$0xff] %v16304_v5  ;;  %v16306_v32 = vpop.f32.mrb[165].mxu0 }
0x10a7   :  { %18042 = vst [vmem:[#allocation90_spill] sm:$0xff] %v16306_v32 }
0x10ab   :  { %v16308_v14 = vpop.f32.mrb[166].mxu0 }
0x10ac   :  { %18043 = vst [vmem:[#allocation91_spill] sm:$0xff] %v16308_v14  ;;  %v16310_v53 = vpop.f32.mrb[167].mxu0 }
0x10ad   :  { %18044 = vst [vmem:[#allocation35_spill] sm:$0xff] %v16310_v53 }
0x10b4   :  { %v16312_v60 = vpop.f32.mrb[168].mxu0 }
0x10b5   :  { %18045 = vst [vmem:[#allocation16_spill] sm:$0xff] %v16312_v60  ;;  %v16314_v18 = vpop.f32.mrb[169].mxu0 }
0x10b6   :  { %18046 = vst [vmem:[#allocation65_spill] sm:$0xff] %v16314_v18  ;;  %v18059_v18 = vld [vmem:[#allocation39_spill] sm:$0xff] }
0x10b8   :  { %v16316_v9 = vpop.f32.mrb[170].mxu0 }
0x10b9   :  { %18047 = vst [vmem:[#allocation63_spill] sm:$0xff] %v16316_v9  ;;  %v16318_v25 = vpop.f32.mrb[171].mxu0 }
0x10ba   :  { %18048 = vst [vmem:[#allocation24_spill] sm:$0xff] %v16318_v25 }
0x10bc   :  { %v16320_v21 = vpop.f32.mrb[172].mxu0 }
0x10bd   :  { %18049 = vst [vmem:[#allocation72_spill] sm:$0xff] %v16320_v21  ;;  %v16322_v37 = vpop.f32.mrb[173].mxu0 }
0x10be   :  { %18050 = vst [vmem:[#allocation52_spill] sm:$0xff] %v16322_v37 }
0x10c0   :  { %v16324_v51 = vpop.f32.mrb[174].mxu0 }
0x10c1   :  { %18051 = vst [vmem:[#allocation23_spill] sm:$0xff] %v16324_v51  ;;  %v16326_v27 = vpop.f32.mrb[175].mxu0 }
0x10c2   :  { %18052 = vst [vmem:[#allocation84_spill] sm:$0xff] %v16326_v27 }
0x10c4   :  { %v10458_v11 = vpop.f32.mrb[176].mxu0 }
0x10c5   :  { %v6452_v31 = vmul.f32 0.17677669, %v10458_v11  ;;  %v6372_v16 = vpop.f32.mrb[177].mxu0 }
0x10c6   :  { %v6451_v8 = vmul.f32 0.17677669, %v6372_v16  ;;  %v16367_v16 = vld [vmem:[%s17507_s1 + $0x28] sm:$0xff] }
0x10c7   :  { %v16334_v3 = vadd.f32 %v16331_v29, %v6452_v31  ;;  %18057 = vst [vmem:[#allocation7_spill] sm:$0xff] %v16367_v16 }
0x10c8   :  { %v16342_v57 = vadd.f32 %v16339_v50, %v6451_v8  ;;  %v10461_v39 = vpop.f32.mrb[178].mxu0 }
0x10c9   :  { %v6454_v61 = vmul.f32 0.17677669, %v10461_v39  ;;  %6485 = vmax.xlane.f32.xlu1 %v16334_v3  ;;  %v6382_v43 = vpop.f32.mrb[179].mxu0 }
0x10ca   :  { %6483 = vmax.xlane.f32.xlu0 %v16342_v57  ;;  %v6453_v48 = vmul.f32 0.17677669, %v6382_v43 }
0x10cb   :  { %v16352_v40 = vadd.f32 %v16349_v20, %v6454_v61 }
0x10cc   :  { %v10464_v52 = vpop.f32.mrb[180].mxu0  ;;  %v16361_v24 = vadd.f32 %v16358_v35, %v6453_v48  ;;  %v16376_v48 = vld [vmem:[%s17507_s1 + $0x38] sm:$0xff] }
0x10cd   :  { %v6392_v13 = vpop.f32.mrb[181].mxu0  ;;  %v6456_v22 = vmul.f32 0.17677669, %v10464_v52  ;;  %18058 = vst [vmem:[#allocation56_spill] sm:$0xff] %v16376_v48 }
0x10ce   :  { %6489 = vmax.xlane.f32.xlu0 %v16352_v40  ;;  %v6455_v60 = vmul.f32 0.17677669, %v6392_v13  ;;  %v18066_v13 = vld [vmem:[#allocation58_spill] sm:$0xff] }
0x10cf   :  { %v16370_v8 = vadd.f32 %v16367_v16, %v6456_v22  ;;  %v16387_v22 = vld [vmem:[%s17507_s1 + $0x48] sm:$0xff] }
0x10d0   :  { %v10467_v11 = vpop.f32.mrb[182].mxu0  ;;  %18060 = vst [vmem:[#allocation13_spill] sm:$0xff] %v16387_v22 }
0x10d1   :  { %v6402_v31 = vpop.f32.mrb[183].mxu0  ;;  %v6458_v39 = vmul.f32 0.17677669, %v10467_v11 }
0x10d2   :  { %6487 = vmax.xlane.f32.xlu0 %v16361_v24 }
0x10d3   :  { %v16379_v52 = vadd.f32 %v16376_v48, %v6458_v39 }
0x10d4   :  { %v10470_v61 = vpop.f32.mrb[184].mxu0 }
0x10d5   :  { %v6412_v43 = vpop.f32.mrb[185].mxu0  ;;  %v6460_v27 = vmul.f32 0.17677669, %v10470_v61  ;;  %v16396_v61 = vld [vmem:[%s17507_s1 + $0x58] sm:$0xff] }
0x10d6   :  { %6493 = vmax.xlane.f32.xlu0 %v16370_v8  ;;  %18061 = vst [vmem:[#allocation5_spill] sm:$0xff] %v16396_v61  ;;  %v6459_v14 = vmul.f32 0.17677669, %v6412_v43  ;;  %v16449_v43 = vld [vmem:[%s17507_s1 + $0x50] sm:$0xff] }
0x10d7   :  { %v16390_v11 = vadd.f32 %v16387_v22, %v6460_v27  ;;  %18068 = vst [vmem:[#allocation32_spill] sm:$0xff] %v16449_v43 }
0x10d8   :  { %v10473_v37 = vpop.f32.mrb[186].mxu0 }
0x10d9   :  { %v6422_v25 = vpop.f32.mrb[187].mxu0  ;;  %v6462_v51 = vmul.f32 0.17677669, %v10473_v37  ;;  %v16405_v37 = vld [vmem:[%s17507_s1 + $0x68] sm:$0xff] }
0x10da   :  { %11952 = vrot.lane.b32.xlu1 %v18059_v18, %s12715_s24  ;;  %6497 = vmax.xlane.f32.xlu0 %v16379_v52  ;;  %18062 = vst [vmem:[#allocation79_spill] sm:$0xff] %v16405_v37  ;;  %v6461_v5 = vmul.f32 0.17677669, %v6422_v25 }
0x10db   :  { %v16399_v18 = vadd.f32 %v16396_v61, %v6462_v51  ;;  %v16414_v51 = vld [vmem:[%s17507_s1 + $0x78] sm:$0xff] }
0x10dc   :  { %v10476_v53 = vpop.f32.mrb[188].mxu0  ;;  %18063 = vst [vmem:[#allocation10_spill] sm:$0xff] %v16414_v51 }
0x10dd   :  { %v6432_v39 = vpop.f32.mrb[189].mxu0  ;;  %v6464_v21 = vmul.f32 0.17677669, %v10476_v53 }
0x10de   :  { %6501 = vmax.xlane.f32.xlu0 %v16390_v11 }
0x10df   :  { %v16408_v27 = vadd.f32 %v16405_v37, %v6464_v21  ;;  %v6457_v21 = vmul.f32 0.17677669, %v6402_v31 }
0x10e0   :  { %v10479_v32 = vpop.f32.mrb[190].mxu0 }
0x10e1   :  { %v6442_v9 = vpop.f32.mrb[191].mxu0  ;;  %v6466_v34 = vmul.f32 0.17677669, %v10479_v32  ;;  %v6471_v32 = vadd.f32 %v16423_v10, %v6455_v60  ;;  %v16440_v60 = vld [vmem:[%s17507_s1 + $0x40] sm:$0xff] }
0x10e2   :  { %6505 = vmax.xlane.f32.xlu0 %v16399_v18  ;;  %18067 = vst [vmem:[#allocation49_spill] sm:$0xff] %v16440_v60  ;;  %v16443_v31 = vadd.f32 %v16440_v60, %v6459_v14  ;;  %v6465_v25 = vmul.f32 0.17677669, %v6442_v9 }
0x10e3   :  { %v16417_v53 = vadd.f32 %v16414_v51, %v6466_v34  ;;  %v16432_v34 = vadd.f32 %v16429_v59, %v6457_v21  ;;  %v16452_v21 = vadd.f32 %v16449_v43, %v6461_v5 }
0x10e4   :  { %v16470_v5 = vadd.f32 %v16467_v15, %v6465_v25 }
0x10e6   :  { %6509 = vmax.xlane.f32.xlu0 %v16408_v27 }
0x10ea   :  { %6513 = vmax.xlane.f32.xlu0 %v16417_v53 }
0x10fe   :  { %6491 = vmax.xlane.f32.xlu1 %v6471_v32 }
0x1100   :  { %11957 = vrot.lane.b32.xlu0 %v18066_v13, %s12715_s24  ;;  %v6463_v13 = vmul.f32 0.17677669, %v6432_v39  ;;  %v16473_v39 = vpop.permute.xlu0 %11942 }
0x1102   :  { %6495 = vmax.xlane.f32.xlu1 %v16432_v34  ;;  %v16461_v14 = vadd.f32 %v16458_v42, %v6463_v13 }
0x1104   :  { %v16475_v58 = vpop.permute.xlu0 %11947 }
0x1106   :  { %6499 = vmax.xlane.f32.xlu1 %v16443_v31 }
0x110a   :  { %6503 = vmax.xlane.f32.xlu1 %v16452_v21 }
0x110e   :  { %6507 = vmax.xlane.f32.xlu1 %v16461_v14 }
0x1112   :  { %6511 = vmax.xlane.f32.xlu1 %v16470_v5 }
0x1156   :  { %v6486_v2 = vpop.xlane.xlu1 %6485 }
0x1157   :  { %v6516_v13 = vmax.f32 %v6486_v2, 0.0  ;;  %v6484_v51 = vpop.xlane.xlu0 %6483 }
0x1158   :  { %v6515_v9 = vmax.f32 %v6484_v51, 0.0 }
0x1159   :  { %v6532_v37 = vsub.f32 %v16334_v3, %v6516_v13 }
0x115a   :  { %v6531_v42 = vsub.f32 %v16342_v57, %v6515_v9 }
0x115b   :  { %v6549_v61 = vmul.f32 1.442695, %v6532_v37  ;;  %v6490_v22 = vpop.xlane.xlu0 %6489 }
0x115c   :  { %v6547_v43 = vmul.f32 1.442695, %v6531_v42  ;;  %v6518_v57 = vmax.f32 %v6490_v22, 0.0 }
0x115d   :  { %12468 = vpow2.f32 %v6549_v61  ;;  %v16489_v61 = vpop.permute.xlu1 %11952 }
0x115e   :  { %12470 = vpow2.f32 %v6547_v43  ;;  %18071 = vst [vmem:[#allocation87_spill] sm:$0xff] %v16489_v61  ;;  %v6534_v43 = vsub.f32 %v16352_v40, %v6518_v57 }
0x115f   :  { %v6488_v2 = vpop.xlane.xlu0 %6487 }
0x1160   :  { %v6517_v37 = vmax.f32 %v6488_v2, 0.0  ;;  %v6553_v16 = vmul.f32 1.442695, %v6534_v43 }
0x1162   :  { %v6533_v9 = vsub.f32 %v16361_v24, %v6517_v37  ;;  %12472 = vpow2.f32 %v6553_v16 }
0x1163   :  { %v6494_v60 = vpop.xlane.xlu0 %6493 }
0x1164   :  { %v6520_v13 = vmax.f32 %v6494_v60, 0.0  ;;  %v6551_v35 = vmul.f32 1.442695, %v6533_v9 }
0x1166   :  { %12474 = vpow2.f32 %v6551_v35 }
0x1167   :  { %v16479_v25 = vpop.eup %12468  ;;  %v6498_v3 = vpop.xlane.xlu0 %6497 }
0x1168   :  { %v16481_v15 = vpop.eup %12470  ;;  %6581 = vadd.xlane.f32.xlu0 %v16479_v25  ;;  %v6522_v20 = vmax.f32 %v6498_v3, 0.0 }
0x1169   :  { %6579 = vadd.xlane.f32.xlu1 %v16481_v15 }
0x116a   :  { %v6538_v40 = vsub.f32 %v16379_v52, %v6522_v20 }
0x116b   :  { %v6502_v42 = vpop.xlane.xlu0 %6501 }
0x116c   :  { %v6561_v37 = vmul.f32 1.442695, %v6538_v40  ;;  %v6524_v3 = vmax.f32 %v6502_v42, 0.0  ;;  %v16499_v52 = vpop.eup %12472 }
0x116f   :  { %v6506_v51 = vpop.xlane.xlu0 %6505 }
0x1170   :  { %v6526_v10 = vmax.f32 %v6506_v51, 0.0 }
0x1172   :  { %v6542_v2 = vsub.f32 %v16399_v18, %v6526_v10  ;;  %v6540_v10 = vsub.f32 %v16390_v11, %v6524_v3 }
0x1174   :  { %v6569_v57 = vmul.f32 1.442695, %v6542_v2  ;;  %v6565_v18 = vmul.f32 1.442695, %v6540_v10 }
0x117a   :  { %11962 = vrot.lane.b32.xlu1 %v15540_v12, %s12715_s24  ;;  %v6536_v12 = vsub.f32 %v16370_v8, %v6520_v13 }
0x117c   :  { %v6557_v29 = vmul.f32 1.442695, %v6536_v12 }
0x117e   :  { %11967 = vrot.lane.b32.xlu0 %v15564_v49, %s12715_s24  ;;  %v6510_v49 = vpop.xlane.xlu0 %6509  ;;  %12476 = vpow2.f32 %v6557_v29  ;;  %v16501_v29 = vpop.eup %12474 }
0x117f   :  { %v6528_v61 = vmax.f32 %v6510_v49, 0.0 }
0x1181   :  { %v6544_v8 = vsub.f32 %v16408_v27, %v6528_v61 }
0x1188   :  { %v16506_v61 = vpop.eup %12476 }
0x118b   :  { %v6492_v48 = vpop.xlane.xlu1 %6491 }
0x118c   :  { %v6519_v59 = vmax.f32 %v6492_v48, 0.0 }
0x118e   :  { %v6535_v50 = vsub.f32 %v6471_v32, %v6519_v59  ;;  %v6573_v32 = vmul.f32 1.442695, %v6544_v8 }
0x118f   :  { %v6496_v22 = vpop.xlane.xlu1 %6495 }
0x1190   :  { %v6555_v24 = vmul.f32 1.442695, %v6535_v50  ;;  %v6521_v60 = vmax.f32 %v6496_v22, 0.0 }
0x1192   :  { %12478 = vpow2.f32 %v6555_v24  ;;  %v6537_v59 = vsub.f32 %v16432_v34, %v6521_v60 }
0x1193   :  { %v6500_v48 = vpop.xlane.xlu1 %6499  ;;  %12480 = vpow2.f32 %v6569_v57 }
0x1194   :  { %12482 = vpow2.f32 %v6561_v37  ;;  %v6559_v35 = vmul.f32 1.442695, %v6537_v59  ;;  %v6523_v20 = vmax.f32 %v6500_v48, 0.0 }
0x1195   :  { %12484 = vpow2.f32 %v6573_v32 }
0x1196   :  { %12486 = vpow2.f32 %v6559_v35  ;;  %v6539_v27 = vsub.f32 %v16443_v31, %v6523_v20  ;;  %v6514_v31 = vpop.xlane.xlu0 %6513 }
0x1197   :  { %v6504_v16 = vpop.xlane.xlu1 %6503  ;;  %12488 = vpow2.f32 %v6565_v18  ;;  %v6530_v40 = vmax.f32 %v6514_v31, 0.0 }
0x1198   :  { %v6525_v34 = vmax.f32 %v6504_v16, 0.0  ;;  %v6563_v13 = vmul.f32 1.442695, %v6539_v27 }
0x1199   :  { %v6546_v48 = vsub.f32 %v16417_v53, %v6530_v40 }
0x119a   :  { %v6541_v9 = vsub.f32 %v16452_v21, %v6525_v34 }
0x119b   :  { %v6508_v50 = vpop.xlane.xlu1 %6507  ;;  %v6577_v37 = vmul.f32 1.442695, %v6546_v48 }
0x119c   :  { %v16508_v51 = vpop.eup %12478  ;;  %v6527_v12 = vmax.f32 %v6508_v50, 0.0 }
0x119d   :  { %6585 = vadd.xlane.f32.xlu0 %v16499_v52  ;;  %v16514_v49 = vpop.eup %12480 }
0x119e   :  { %6583 = vadd.xlane.f32.xlu1 %v16501_v29  ;;  %v16516_v2 = vpop.eup %12482  ;;  %v6543_v24 = vsub.f32 %v16461_v14, %v6527_v12 }
0x119f   :  { %v6512_v42 = vpop.xlane.xlu1 %6511  ;;  %v16521_v60 = vpop.eup %12484 }
0x11a0   :  { %v6529_v11 = vmax.f32 %v6512_v42, 0.0  ;;  %v16523_v21 = vpop.eup %12486  ;;  %v6571_v57 = vmul.f32 1.442695, %v6543_v24 }
0x11a1   :  { %6589 = vadd.xlane.f32.xlu0 %v16506_v61  ;;  %v16528_v8 = vpop.eup %12488 }
0x11a2   :  { %v6545_v43 = vsub.f32 %v16470_v5, %v6529_v11  ;;  %6587 = vadd.xlane.f32.xlu1 %v16508_v51  ;;  %v6567_v5 = vmul.f32 1.442695, %v6541_v9 }
0x11a4   :  { %v6575_v22 = vmul.f32 1.442695, %v6545_v43 }
0x11a5   :  { %6601 = vadd.xlane.f32.xlu0 %v16514_v49 }
0x11a6   :  { %12490 = vpow2.f32 %v6575_v22  ;;  %6593 = vadd.xlane.f32.xlu1 %v16516_v2 }
0x11a7   :  { %12492 = vpow2.f32 %v6563_v13 }
0x11a8   :  { %12494 = vpow2.f32 %v6567_v5 }
0x11a9   :  { %6605 = vadd.xlane.f32.xlu0 %v16521_v60  ;;  %12496 = vpow2.f32 %v6571_v57 }
0x11aa   :  { %6591 = vadd.xlane.f32.xlu1 %v16523_v21  ;;  %12498 = vpow2.f32 %v6577_v37 }
0x11ae   :  { %6597 = vadd.xlane.f32.xlu1 %v16528_v8 }
0x11b0   :  { %v16531_v3 = vpop.eup %12490 }
0x11b1   :  { %v16533_v14 = vpop.eup %12492  ;;  %6607 = vadd.xlane.f32.xlu0 %v16531_v3 }
0x11b2   :  { %6595 = vadd.xlane.f32.xlu1 %v16533_v14  ;;  %v16537_v59 = vpop.eup %12494 }
0x11b3   :  { %v16540_v53 = vpop.eup %12496 }
0x11b4   :  { %v16543_v16 = vpop.eup %12498 }
0x11b6   :  { %6599 = vadd.xlane.f32.xlu1 %v16537_v59 }
0x11ba   :  { %6603 = vadd.xlane.f32.xlu1 %v16540_v53 }
0x11be   :  { %6609 = vadd.xlane.f32.xlu1 %v16543_v16 }
0x11c7   :  { %11972 = vrot.lane.b32.xlu0 %v18007_v46, %s12715_s24 }
0x11cb   :  { %6948 = vrot.lane.b32.xlu0 %v18009_v30, %s12715_s24 }
0x11cf   :  { %6950 = vrot.lane.b32.xlu1 %v18006_v63, %s12715_s24  ;;  %6952 = vrot.lane.b32.xlu0 %v18012_v56, %s12715_s24  ;;  %v11958_v63 = vpop.permute.xlu0 %11957 }
0x11d3   :  { %6954 = vrot.lane.b32.xlu1 %v18008_v38, %s12715_s24  ;;  %6956 = vrot.lane.b32.xlu0 %v18014_v36, %s12715_s24  ;;  %v11945_v36 = vunpack.i.h.bf16 %v16473_v39 }
0x11d7   :  { %6958 = vrot.lane.b32.xlu1 %v18011_v45, %s12715_s24  ;;  %6960 = vrot.lane.b32.xlu0 %v18016_v54, %s12715_s24 }
0x11db   :  { %6962 = vrot.lane.b32.xlu1 %v18013_v19, %s12715_s24  ;;  %6964 = vrot.lane.b32.xlu0 %v18018_v62, %s12715_s24 }
0x11df   :  { %6966 = vrot.lane.b32.xlu1 %v18015_v23, %s12715_s24  ;;  %6968 = vrot.lane.b32.xlu0 %v18020_v7, %s12715_s24  ;;  %v11944_v23 = vunpack.i.l.bf16 %v16473_v39  ;;  %v11949_v7 = vunpack.i.l.bf16 %v16475_v58 }
0x11e1   :  { %v11398_v62 = vpack.c.bf16 %v11945_v36, %v11944_v23 }
0x11e3   :  { %6970 = vrot.lane.b32.xlu1 %v18017_v44, %s12715_s24  ;;  %6972 = vrot.lane.b32.xlu0 %v18022_v41, %s12715_s24  ;;  %v18072_v41 = vld [vmem:[#allocation87_spill] sm:$0xff] }
0x11e7   :  { %6974 = vrot.lane.b32.xlu1 %v18019_v4, %s12715_s24  ;;  %6976 = vrot.lane.b32.xlu0 %v18024_v55, %s12715_s24  ;;  %v11950_v4 = vunpack.i.h.bf16 %v16475_v58  ;;  %v11954_v55 = vunpack.i.l.bf16 %v18072_v41 }
0x11eb   :  { %6978 = vrot.lane.b32.xlu1 %v18021_v47, %s12715_s24  ;;  %11982 = vrot.lane.b32.xlu0 %v18026_v0, %s12715_s24  ;;  %v11404_v47 = vpack.c.bf16 %v11950_v4, %v11949_v7  ;;  %v11960_v0 = vunpack.i.h.bf16 %v11958_v63 }
0x11ef   :  { %11977 = vrot.lane.b32.xlu1 %v18023_v6, %s12715_s24  ;;  %11992 = vrot.lane.b32.xlu0 %v18028_v33, %s12715_s24  ;;  %v11955_v6 = vunpack.i.h.bf16 %v18072_v41 }
0x11f3   :  { %11987 = vrot.lane.b32.xlu1 %v18025_v28, %s12715_s24  ;;  %v11410_v28 = vpack.c.bf16 %v11955_v6, %v11954_v55 }
0x11f5   :  { %v6582_v46 = vpop.xlane.xlu0 %6581 }
0x11f6   :  { %vm6612_vm14 = vcmp.gt.f32.partialorder %v6582_v46, 0.0  ;;  %v6580_v38 = vpop.xlane.xlu1 %6579 }
0x11f7   :  { %v6628_v30 = vsel %vm6612_vm14, %v6582_v46, 1.0  ;;  %vm6611_vm15 = vcmp.gt.f32.partialorder %v6580_v38, 0.0  ;;  %11997 = vrot.lane.b32.xlu1 %v18027_v1, %s12715_s24  ;;  %v11959_v1 = vunpack.i.l.bf16 %v11958_v63 }
0x11f8   :  { %12500 = vrcp.f32 %v6628_v30  ;;  %v6627_v45 = vsel %vm6611_vm15, %v6580_v38, 1.0 }
0x11f9   :  { %12502 = vrcp.f32 %v6627_v45  ;;  %v11416_v33 = vpack.c.bf16 %v11960_v0, %v11959_v1  ;;  %v11968_v39 = vpop.permute.xlu0 %11967 }
0x11fa   :  { %v11970_v10 = vunpack.i.h.bf16 %v11968_v39  ;;  %v11969_v35 = vunpack.i.l.bf16 %v11968_v39 }
0x11fc   :  { %v11428_v34 = vpack.c.bf16 %v11970_v10, %v11969_v35 }
0x1202   :  { %v12501_v56 = vpop.eup %12500 }
0x1203   :  { %v12503_v19 = vpop.eup %12502  ;;  %v6660_v44 = vmul.f32 %v12501_v56, %v16479_v25 }
0x1204   :  { %v6659_v54 = vmul.f32 %v12503_v19, %v16481_v15  ;;  %v11963_v15 = vpop.permute.xlu1 %11962 }
0x1205   :  { %v11965_v58 = vunpack.i.h.bf16 %v11963_v15 }
0x1206   :  { %10512 = vmatprep.mubr.f32.mxu1 %v6659_v54 }
0x1207   :  { %10513 = vmatmul.mubr.f32.vlgmr.msra.gmra.mrb[176].mxu1 %v6660_v44 }
0x1208   :  { %11397 = vmatpush3.bf16.xpose.msk.msra.mxu1 %vm13134_vm1, %v16277_v26  ;;  %v11964_v26 = vunpack.i.l.bf16 %v11963_v15 }
0x1209   :  { %11400 = vmatprep.subr.msk.bf16.mxu1 %vm13134_vm1, %v11398_v62 }
0x120a   :  { %v11422_v25 = vpack.c.bf16 %v11965_v58, %v11964_v26 }
0x1210   :  { %11403 = vmatpush3.bf16.xpose.msk.msra.mxu1 %vm13134_vm1, %v11398_v62 }
0x1211   :  { %11406 = vmatprep.subr.msk.bf16.mxu1 %vm13134_vm1, %v11404_v47 }
0x1218   :  { %11409 = vmatpush3.bf16.xpose.msk.msra.mxu1 %vm13134_vm1, %v11404_v47 }
0x1219   :  { %11412 = vmatprep.subr.msk.bf16.mxu1 %vm13134_vm1, %v11410_v28 }
0x1220   :  { %11415 = vmatpush3.bf16.xpose.msk.msra.mxu1 %vm13134_vm1, %v11410_v28 }
0x1221   :  { %11418 = vmatprep.subr.msk.bf16.mxu1 %vm13134_vm1, %v11416_v33 }
0x1228   :  { %11421 = vmatpush3.bf16.xpose.msk.msra.mxu1 %vm13134_vm1, %v11416_v33 }
0x1229   :  { %11424 = vmatprep.subr.msk.bf16.mxu1 %vm13134_vm1, %v11422_v25 }
0x122a   :  { %v6586_v32 = vpop.xlane.xlu0 %6585 }
0x122b   :  { %vm6614_vm2 = vcmp.gt.f32.partialorder %v6586_v32, 0.0  ;;  %v6584_v20 = vpop.xlane.xlu1 %6583 }
0x122c   :  { %v6630_v50 = vsel %vm6614_vm2, %v6586_v32, 1.0  ;;  %vm6613_vm3 = vcmp.gt.f32.partialorder %v6584_v20, 0.0 }
0x122d   :  { %12504 = vrcp.f32 %v6630_v50  ;;  %v6629_v18 = vsel %vm6613_vm3, %v6584_v20, 1.0 }
0x122e   :  { %12506 = vrcp.f32 %v6629_v18  ;;  %v6590_v27 = vpop.xlane.xlu0 %6589 }
0x122f   :  { %vm6616_vm4 = vcmp.gt.f32.partialorder %v6590_v27, 0.0  ;;  %v6588_v42 = vpop.xlane.xlu1 %6587 }
0x1230   :  { %v6632_v11 = vsel %vm6616_vm4, %v6590_v27, 1.0  ;;  %vm6615_vm5 = vcmp.gt.f32.partialorder %v6588_v42, 0.0  ;;  %11427 = vmatpush3.bf16.xpose.msk.msra.mxu1 %vm13134_vm1, %v11422_v25 }
0x1231   :  { %12508 = vrcp.f32 %v6632_v11  ;;  %v6631_v43 = vsel %vm6615_vm5, %v6588_v42, 1.0  ;;  %11430 = vmatprep.subr.msk.bf16.mxu1 %vm13134_vm1, %v11428_v34 }
0x1232   :  { %12510 = vrcp.f32 %v6631_v43  ;;  %v6602_v9 = vpop.xlane.xlu0 %6601 }
0x1233   :  { %v6594_v13 = vpop.xlane.xlu1 %6593  ;;  %vm6622_vm11 = vcmp.gt.f32.partialorder %v6602_v9, 0.0 }
0x1234   :  { %vm6618_vm7 = vcmp.gt.f32.partialorder %v6594_v13, 0.0 }
0x1235   :  { %v6634_v12 = vsel %vm6618_vm7, %v6594_v13, 1.0 }
0x1236   :  { %12512 = vrcp.f32 %v6634_v12  ;;  %v6606_v48 = vpop.xlane.xlu0 %6605 }
0x1237   :  { %v12505_v31 = vpop.eup %12504  ;;  %v6592_v22 = vpop.xlane.xlu1 %6591  ;;  %vm6624_vm14 = vcmp.gt.f32.partialorder %v6606_v48, 0.0 }
0x1238   :  { %v12507_v40 = vpop.eup %12506  ;;  %vm6617_vm8 = vcmp.gt.f32.partialorder %v6592_v22, 0.0  ;;  %11433 = vmatpush3.bf16.xpose.msk.msra.mxu1 %vm13134_vm1, %v11428_v34  ;;  %v6662_v57 = vmul.f32 %v12505_v31, %v16499_v52  ;;  %v6640_v4 = vsel %vm6624_vm14, %v6606_v48, 1.0 }
0x1239   :  { %v6633_v5 = vsel %vm6617_vm8, %v6592_v22, 1.0  ;;  %v6661_v24 = vmul.f32 %v12507_v40, %v16501_v29  ;;  %v6638_v29 = vsel %vm6622_vm11, %v6602_v9, 1.0 }
0x123a   :  { %12514 = vrcp.f32 %v6633_v5 }
0x123b   :  { %v12509_v37 = vpop.eup %12508  ;;  %10515 = vmatprep.mubr.f32.mxu1 %v6661_v24  ;;  %v6598_v63 = vpop.xlane.xlu1 %6597 }
0x123c   :  { %v12511_v46 = vpop.eup %12510  ;;  %vm6620_vm10 = vcmp.gt.f32.partialorder %v6598_v63, 0.0  ;;  %10516 = vmatmul.mubr.f32.gmra.mrb[178].mxu1 %v6662_v57  ;;  %v6664_v56 = vmul.f32 %v12509_v37, %v16506_v61 }
0x123d   :  { %v6663_v38 = vmul.f32 %v12511_v46, %v16508_v51  ;;  %v6636_v30 = vsel %vm6620_vm10, %v6598_v63, 1.0 }
0x123e   :  { %v6608_v45 = vpop.xlane.xlu0 %6607  ;;  %12516 = vrcp.f32 %v6636_v30 }
0x123f   :  { %10518 = vmatprep.mubr.f32.mxu1 %v6663_v38  ;;  %v6596_v19 = vpop.xlane.xlu1 %6595  ;;  %vm6625_vm15 = vcmp.gt.f32.partialorder %v6608_v45, 0.0 }
0x1240   :  { %vm6619_vm13 = vcmp.gt.f32.partialorder %v6596_v19, 0.0  ;;  %10519 = vmatmul.mubr.f32.gmra.mrb[180].mxu1 %v6664_v56  ;;  %v12513_v23 = vpop.eup %12512  ;;  %v6641_v41 = vsel %vm6625_vm15, %v6608_v45, 1.0 }
0x1241   :  { %v6635_v52 = vsel %vm6619_vm13, %v6596_v19, 1.0  ;;  %v6666_v55 = vmul.f32 %v12513_v23, %v16516_v2 }
0x1242   :  { %12518 = vrcp.f32 %v6635_v52  ;;  %v11973_v36 = vpop.permute.xlu0 %11972 }
0x1243   :  { %v11975_v54 = vunpack.i.h.bf16 %v11973_v36  ;;  %v11974_v44 = vunpack.i.l.bf16 %v11973_v36  ;;  %v6600_v51 = vpop.xlane.xlu1 %6599  ;;  %12520 = vrcp.f32 %v6638_v29 }
0x1244   :  { %v12515_v62 = vpop.eup %12514  ;;  %vm6621_vm2 = vcmp.gt.f32.partialorder %v6600_v51, 0.0 }
0x1245   :  { %v11434_v61 = vpack.c.bf16 %v11975_v54, %v11974_v44  ;;  %v6637_v7 = vsel %vm6621_vm2, %v6600_v51, 1.0  ;;  %v6665_v47 = vmul.f32 %v12515_v62, %v16523_v21 }
0x1246   :  { %12522 = vrcp.f32 %v6637_v7  ;;  %v6949_v6 = vpop.permute.xlu0 %6948 }
0x1247   :  { %10521 = vmatprep.mubr.f32.mxu1 %v6665_v47  ;;  %v6604_v28 = vpop.xlane.xlu1 %6603  ;;  %11436 = vmatprep.subr.msk.bf16.mxu1 %vm13134_vm1, %v11434_v61  ;;  %12524 = vrcp.f32 %v6640_v4 }
0x1248   :  { %vm6623_vm3 = vcmp.gt.f32.partialorder %v6604_v28, 0.0  ;;  %10522 = vmatmul.mubr.f32.gmra.mrb[182].mxu1 %v6666_v55  ;;  %12526 = vrcp.f32 %v6641_v41  ;;  %v12517_v1 = vpop.eup %12516 }
0x1249   :  { %v6639_v0 = vsel %vm6623_vm3, %v6604_v28, 1.0  ;;  %11439 = vmatpush3.bf16.xpose.msk.msra.mxu1 %vm13134_vm1, %v11434_v61  ;;  %v6668_v25 = vmul.f32 %v12517_v1, %v16528_v8 }
0x124a   :  { %12528 = vrcp.f32 %v6639_v0  ;;  %v6953_v21 = vpop.permute.xlu0 %6952 }
0x124b   :  { %v6610_v33 = vpop.xlane.xlu1 %6609 }
0x124c   :  { %v12519_v15 = vpop.eup %12518  ;;  %vm6626_vm4 = vcmp.gt.f32.partialorder %v6610_v33, 0.0 }
0x124d   :  { %v6642_v2 = vsel %vm6626_vm4, %v6610_v33, 1.0  ;;  %v6667_v58 = vmul.f32 %v12519_v15, %v16533_v14  ;;  %v12521_v26 = vpop.eup %12520 }
0x124e   :  { %12530 = vrcp.f32 %v6642_v2  ;;  %v6957_v39 = vpop.permute.xlu0 %6956  ;;  %v6670_v50 = vmul.f32 %v12521_v26, %v16514_v49 }
0x124f   :  { %10524 = vmatprep.mubr.f32.mxu1 %v6667_v58  ;;  %v6951_v32 = vpop.permute.xlu1 %6950 }
0x1250   :  { %v12523_v10 = vpop.eup %12522  ;;  %10525 = vmatmul.mubr.f32.gmra.mrb[184].mxu1 %v6668_v25 }
0x1251   :  { %v6669_v17 = vmul.f32 %v12523_v10, %v16537_v59  ;;  %v12525_v35 = vpop.eup %12524 }
0x1252   :  { %v6961_v20 = vpop.permute.xlu0 %6960  ;;  %v12527_v18 = vpop.eup %12526  ;;  %v6672_v8 = vmul.f32 %v12525_v35, %v16521_v60 }
0x1253   :  { %10527 = vmatprep.mubr.f32.mxu1 %v6669_v17  ;;  %v6955_v27 = vpop.permute.xlu1 %6954  ;;  %v6673_v43 = vmul.f32 %v12527_v18, %v16531_v3  ;;  %v18074_v17 = vld [vmem:[#allocation29_spill] sm:$0xff] }
0x1254   :  { %v12529_v34 = vpop.eup %12528  ;;  %10528 = vmatmul.mubr.f32.gmra.mrb[186].mxu1 %v6670_v50 }
0x1255   :  { %v6671_v14 = vmul.f32 %v12529_v34, %v16540_v53 }
0x1256   :  { %v6965_v42 = vpop.permute.xlu0 %6964 }
0x1257   :  { %10530 = vmatprep.mubr.f32.mxu1 %v6671_v14  ;;  %v6959_v11 = vpop.permute.xlu1 %6958 }
0x1258   :  { %v12531_v13 = vpop.eup %12530  ;;  %10531 = vmatmul.mubr.f32.gmra.mrb[188].mxu1 %v6672_v8 }
0x1259   :  { %10533 = vmatprep.mubr.f32.mxu1 %v6673_v43  ;;  %v6674_v59 = vmul.f32 %v12531_v13, %v16543_v16  ;;  %v18076_v43 = vld [vmem:[#allocation37_spill] sm:$0xff] }
0x125a   :  { %v6969_v49 = vpop.permute.xlu0 %6968 }
0x125b   :  { %v6963_v9 = vpop.permute.xlu1 %6962 }
0x125c   :  { %10534 = vmatmul.mubr.f32.gmra.mrb[190].mxu1 %v6674_v59 }
0x125d   :  { %10568 = vmatprep.mubr.msk.f32.mxu1 %vm304_vm0, %v6949_v6 }
0x125e   :  { %v6973_v53 = vpop.permute.xlu0 %6972 }
0x125f   :  { %v6967_v12 = vpop.permute.xlu1 %6966 }
0x1260   :  { %10569 = vmatmul.mubr.msk.f32.vlgmr.msra.gmra.mrb[192].mxu1 %vm304_vm0, %v6951_v32  ;;  %v18073_v32 = vld [vmem:[#allocation43_spill] sm:$0xff] }
0x1261   :  { %10571 = vmatprep.mubr.msk.f32.mxu1 %vm304_vm0, %v6953_v21 }
0x1262   :  { %v6977_v3 = vpop.permute.xlu0 %6976 }
0x1263   :  { %v6971_v60 = vpop.permute.xlu1 %6970 }
0x1264   :  { %10572 = vmatmul.mubr.msk.f32.gmra.mrb[194].mxu1 %vm304_vm0, %v6955_v27  ;;  %v18075_v27 = vld [vmem:[#allocation62_spill] sm:$0xff] }
0x1265   :  { %10574 = vmatprep.mubr.msk.f32.mxu1 %vm304_vm0, %v6957_v39 }
0x1266   :  { %v11983_v22 = vpop.permute.xlu0 %11982 }
0x1267   :  { %v6975_v31 = vpop.permute.xlu1 %6974  ;;  %v11985_v5 = vunpack.i.h.bf16 %v11983_v22  ;;  %v11984_v24 = vunpack.i.l.bf16 %v11983_v22  ;;  %v18079_v22 = vld [vmem:[#allocation81_spill] sm:$0xff] }
0x1268   :  { %10575 = vmatmul.mubr.msk.f32.gmra.mrb[196].mxu1 %vm304_vm0, %v6959_v11 }
0x1269   :  { %10577 = vmatprep.mubr.msk.f32.mxu1 %vm304_vm0, %v6961_v20  ;;  %v11444_v30 = vpack.c.bf16 %v11985_v5, %v11984_v24 }
0x126a   :  { %v11993_v45 = vpop.permute.xlu0 %11992 }
0x126b   :  { %v6979_v16 = vpop.permute.xlu1 %6978  ;;  %v11995_v56 = vunpack.i.h.bf16 %v11993_v45  ;;  %v11994_v19 = vunpack.i.l.bf16 %v11993_v45 }
0x126c   :  { %10578 = vmatmul.mubr.msk.f32.gmra.mrb[198].mxu1 %vm304_vm0, %v6963_v9 }
0x126d   :  { %10580 = vmatprep.mubr.msk.f32.mxu1 %vm304_vm0, %v6965_v42  ;;  %v11452_v54 = vpack.c.bf16 %v11995_v56, %v11994_v19  ;;  %v18082_v19 = vld [vmem:[#allocation13_spill] sm:$0xff] }
0x126f   :  { %v11978_v40 = vpop.permute.xlu1 %11977 }
0x1270   :  { %v11980_v48 = vunpack.i.h.bf16 %v11978_v40  ;;  %v11979_v57 = vunpack.i.l.bf16 %v11978_v40  ;;  %10581 = vmatmul.mubr.msk.f32.gmra.mrb[200].mxu1 %vm304_vm0, %v6967_v12 }
0x1271   :  { %10583 = vmatprep.mubr.msk.f32.mxu1 %vm304_vm0, %v6969_v49  ;;  %v18077_v49 = vld [vmem:[#allocation53_spill] sm:$0xff] }
0x1272   :  { %v11440_v37 = vpack.c.bf16 %v11980_v48, %v11979_v57  ;;  %v18080_v57 = vld [vmem:[#allocation56_spill] sm:$0xff] }
0x1273   :  { %v11988_v63 = vpop.permute.xlu1 %11987 }
0x1274   :  { %v11990_v46 = vunpack.i.h.bf16 %v11988_v63  ;;  %v11989_v38 = vunpack.i.l.bf16 %v11988_v63  ;;  %10584 = vmatmul.mubr.msk.f32.gmra.mrb[202].mxu1 %vm304_vm0, %v6971_v60  ;;  %11441 = vmatprep.subr.bf16.mxu0 %v11440_v37 }
0x1275   :  { %10586 = vmatprep.mubr.msk.f32.mxu1 %vm304_vm0, %v6973_v53  ;;  %11443 = vmatpush3.bf16.msra.mxu0 %v11440_v37 }
0x1276   :  { %11445 = vmatprep.subr.bf16.mxu0 %v11444_v30  ;;  %v11448_v29 = vpack.c.bf16 %v11990_v46, %v11989_v38  ;;  %v18081_v46 = vld [vmem:[#allocation49_spill] sm:$0xff] }
0x1277   :  { %v11998_v52 = vpop.permute.xlu1 %11997 }
0x1278   :  { %10587 = vmatmul.mubr.msk.f32.gmra.mrb[204].mxu1 %vm304_vm0, %v6975_v31  ;;  %v12000_v36 = vunpack.i.h.bf16 %v11998_v52  ;;  %v11999_v23 = vunpack.i.l.bf16 %v11998_v52 }
0x1279   :  { %10589 = vmatprep.mubr.msk.f32.mxu1 %vm304_vm0, %v6977_v3  ;;  %11447 = vmatpush3.bf16.msra.mxu0 %v11444_v30  ;;  %v18078_v3 = vld [vmem:[#allocation7_spill] sm:$0xff] }
0x127a   :  { %11449 = vmatprep.subr.bf16.mxu0 %v11448_v29  ;;  %v11456_v44 = vpack.c.bf16 %v12000_v36, %v11999_v23  ;;  %v18083_v36 = vld [vmem:[#allocation32_spill] sm:$0xff] }
0x127c   :  { %10590 = vmatmul.mubr.msk.f32.gmra.mrb[206].mxu1 %vm304_vm0, %v6979_v16 }
0x127d   :  { %11451 = vmatpush3.bf16.msra.mxu0 %v11448_v29 }
0x127e   :  { %11453 = vmatprep.subr.bf16.mxu0 %v11452_v54 }
0x1281   :  { %11455 = vmatpush3.bf16.msra.mxu0 %v11452_v54 }
0x1282   :  { %11457 = vmatprep.subr.bf16.mxu0 %v11456_v44 }
0x1285   :  { %11459 = vmatpush3.bf16.msra.mxu0 %v11456_v44 }
0x12da   :  { %v16659_v51 = vpop.f32.mrb[176].mxu1 }
0x12db   :  { %v16661_v62 = vpop.f32.mrb[177].mxu1 }
0x130f   :  { %v16663_v4 = vpop.f32.mrb[178].mxu1 }
0x1310   :  { %v16665_v61 = vpop.f32.mrb[179].mxu1 }
0x1313   :  { %v16667_v7 = vpop.f32.mrb[180].mxu1 }
0x1314   :  { %v16669_v47 = vpop.f32.mrb[181].mxu1 }
0x131b   :  { %v16671_v41 = vpop.f32.mrb[182].mxu1 }
0x131c   :  { %v16673_v6 = vpop.f32.mrb[183].mxu1 }
0x1323   :  { %v16675_v55 = vpop.f32.mrb[184].mxu1 }
0x1324   :  { %v16677_v28 = vpop.f32.mrb[185].mxu1 }
0x1327   :  { %v16679_v0 = vpop.f32.mrb[186].mxu1 }
0x1328   :  { %v16681_v21 = vpop.f32.mrb[187].mxu1 }
0x132b   :  { %v16683_v1 = vpop.f32.mrb[188].mxu1 }
0x132c   :  { %v16685_v33 = vpop.f32.mrb[189].mxu1 }
0x132f   :  { %v16687_v15 = vpop.f32.mrb[190].mxu1 }
0x1330   :  { %v16689_v2 = vpop.f32.mrb[191].mxu1 }
0x1333   :  { %v10570_v58 = vpop.f32.mrb[192].mxu1 }
0x1334   :  { %v7222_v26 = vmul.f32 0.17677669, %v10570_v58  ;;  %v7142_v39 = vpop.f32.mrb[193].mxu1 }
0x1335   :  { %v7221_v25 = vmul.f32 0.17677669, %v7142_v39 }
0x1336   :  { %v16692_v10 = vadd.f32 %v18073_v32, %v7222_v26  ;;  %v18084_v26 = vld [vmem:[#allocation5_spill] sm:$0xff]  ;;  %v18085_v32 = vld [vmem:[#allocation46_spill] sm:$0xff] }
0x1337   :  { %v16695_v35 = vadd.f32 %v18074_v17, %v7221_v25  ;;  %v10573_v20 = vpop.f32.mrb[194].mxu1 }
0x1338   :  { %v7224_v50 = vmul.f32 0.17677669, %v10573_v20  ;;  %7255 = vmax.xlane.f32.xlu1 %v16692_v10  ;;  %v7152_v18 = vpop.f32.mrb[195].mxu1 }
0x1339   :  { %7253 = vmax.xlane.f32.xlu0 %v16695_v35  ;;  %v7223_v14 = vmul.f32 0.17677669, %v7152_v18 }
0x133a   :  { %v16700_v34 = vadd.f32 %v18075_v27, %v7224_v50  ;;  %v18086_v27 = vld [vmem:[#allocation79_spill] sm:$0xff] }
0x133b   :  { %v10576_v42 = vpop.f32.mrb[196].mxu1  ;;  %v16704_v13 = vadd.f32 %v18076_v43, %v7223_v14  ;;  %v18088_v43 = vld [vmem:[#allocation10_spill] sm:$0xff] }
0x133c   :  { %v7162_v8 = vpop.f32.mrb[197].mxu1  ;;  %v7226_v59 = vmul.f32 0.17677669, %v10576_v42 }
0x133d   :  { %v7225_v11 = vmul.f32 0.17677669, %v7162_v8  ;;  %7259 = vmax.xlane.f32.xlu0 %v16700_v34  ;;  %v18087_v8 = vld [vmem:[#allocation47_spill] sm:$0xff] }
0x133e   :  { %v16712_v31 = vadd.f32 %v18078_v3, %v7226_v59 }
0x133f   :  { %v16707_v9 = vadd.f32 %v18077_v49, %v7225_v11  ;;  %v10579_v12 = vpop.f32.mrb[198].mxu1  ;;  %v18089_v49 = vld [vmem:[#allocation4_spill] sm:$0xff] }
0x1340   :  { %v7172_v53 = vpop.f32.mrb[199].mxu1  ;;  %v7228_v16 = vmul.f32 0.17677669, %v10579_v12 }
0x1341   :  { %v7227_v60 = vmul.f32 0.17677669, %v7172_v53  ;;  %7257 = vmax.xlane.f32.xlu0 %v16704_v13  ;;  %7261 = vmax.xlane.f32.xlu1 %v16707_v9 }
0x1342   :  { %v16720_v37 = vadd.f32 %v18080_v57, %v7228_v16 }
0x1343   :  { %v16715_v40 = vadd.f32 %v18079_v22, %v7227_v60  ;;  %v10582_v5 = vpop.f32.mrb[200].mxu1 }
0x1344   :  { %v7182_v24 = vpop.f32.mrb[201].mxu1  ;;  %v7230_v63 = vmul.f32 0.17677669, %v10582_v5 }
0x1345   :  { %v7229_v48 = vmul.f32 0.17677669, %v7182_v24  ;;  %7263 = vmax.xlane.f32.xlu0 %v16712_v31  ;;  %7265 = vmax.xlane.f32.xlu1 %v16715_v40 }
0x1346   :  { %v16728_v29 = vadd.f32 %v18082_v19, %v7230_v63 }
0x1347   :  { %v16723_v38 = vadd.f32 %v18081_v46, %v7229_v48  ;;  %v10585_v30 = vpop.f32.mrb[202].mxu1 }
0x1348   :  { %v7192_v45 = vpop.f32.mrb[203].mxu1  ;;  %v7232_v52 = vmul.f32 0.17677669, %v10585_v30 }
0x1349   :  { %v7231_v56 = vmul.f32 0.17677669, %v7192_v45  ;;  %7267 = vmax.xlane.f32.xlu0 %v16720_v37  ;;  %7269 = vmax.xlane.f32.xlu1 %v16723_v38 }
0x134a   :  { %v16736_v39 = vadd.f32 %v18084_v26, %v7232_v52 }
0x134b   :  { %v16731_v23 = vadd.f32 %v18083_v36, %v7231_v56  ;;  %v10588_v54 = vpop.f32.mrb[204].mxu1 }
0x134c   :  { %v7202_v44 = vpop.f32.mrb[205].mxu1  ;;  %v7234_v25 = vmul.f32 0.17677669, %v10588_v54 }
0x134d   :  { %v7233_v58 = vmul.f32 0.17677669, %v7202_v44  ;;  %7271 = vmax.xlane.f32.xlu0 %v16728_v29  ;;  %7273 = vmax.xlane.f32.xlu1 %v16731_v23 }
0x134e   :  { %v16744_v14 = vadd.f32 %v18086_v27, %v7234_v25 }
0x134f   :  { %v16739_v17 = vadd.f32 %v18085_v32, %v7233_v58  ;;  %v10591_v20 = vpop.f32.mrb[206].mxu1 }
0x1350   :  { %v7212_v50 = vpop.f32.mrb[207].mxu1  ;;  %v7236_v42 = vmul.f32 0.17677669, %v10591_v20 }
0x1351   :  { %v7235_v18 = vmul.f32 0.17677669, %v7212_v50  ;;  %7275 = vmax.xlane.f32.xlu0 %v16736_v39  ;;  %7277 = vmax.xlane.f32.xlu1 %v16739_v17 }
0x1352   :  { %v16752_v59 = vadd.f32 %v18088_v43, %v7236_v42 }
0x1353   :  { %v16747_v11 = vadd.f32 %v18087_v8, %v7235_v18 }
0x1355   :  { %7279 = vmax.xlane.f32.xlu0 %v16744_v14  ;;  %7281 = vmax.xlane.f32.xlu1 %v16747_v11 }
0x1359   :  { %7283 = vmax.xlane.f32.xlu0 %v16752_v59 }
0x1366   :  { %12002 = vrot.lane.b32.xlu1 %v18089_v49, %s12715_s24 }
0x13c5   :  { %v7256_v12 = vpop.xlane.xlu1 %7255 }
0x13c6   :  { %v7286_v53 = vmax.f32 %v7256_v12, 0.0  ;;  %v7254_v60 = vpop.xlane.xlu0 %7253 }
0x13c7   :  { %v7285_v3 = vmax.f32 %v7254_v60, 0.0 }
0x13c8   :  { %v7302_v16 = vsub.f32 %v16692_v10, %v7286_v53 }
0x13c9   :  { %v7301_v22 = vsub.f32 %v16695_v35, %v7285_v3 }
0x13ca   :  { %v7319_v5 = vmul.f32 1.442695, %v7302_v16  ;;  %v7260_v24 = vpop.xlane.xlu0 %7259 }
0x13cb   :  { %v7317_v48 = vmul.f32 1.442695, %v7301_v22  ;;  %v7288_v57 = vmax.f32 %v7260_v24, 0.0 }
0x13cc   :  { %12532 = vpow2.f32 %v7319_v5 }
0x13cd   :  { %12534 = vpow2.f32 %v7317_v48  ;;  %v7304_v63 = vsub.f32 %v16700_v34, %v7288_v57 }
0x13ce   :  { %v7258_v46 = vpop.xlane.xlu0 %7257  ;;  %v7262_v30 = vpop.xlane.xlu1 %7261 }
0x13cf   :  { %v7323_v45 = vmul.f32 1.442695, %v7304_v63  ;;  %v7287_v56 = vmax.f32 %v7258_v46, 0.0  ;;  %v7289_v19 = vmax.f32 %v7262_v30, 0.0 }
0x13d1   :  { %12536 = vpow2.f32 %v7323_v45  ;;  %v7303_v52 = vsub.f32 %v16704_v13, %v7287_v56  ;;  %v7305_v10 = vsub.f32 %v16707_v9, %v7289_v19  ;;  %v18090_v19 = vld [vmem:[#allocation15_spill] sm:$0xff] }
0x13d2   :  { %v7264_v36 = vpop.xlane.xlu0 %7263  ;;  %v7266_v35 = vpop.xlane.xlu1 %7265 }
0x13d3   :  { %v7321_v54 = vmul.f32 1.442695, %v7303_v52  ;;  %v7290_v44 = vmax.f32 %v7264_v36, 0.0  ;;  %v7325_v58 = vmul.f32 1.442695, %v7305_v10  ;;  %v7291_v25 = vmax.f32 %v7266_v35, 0.0 }
0x13d5   :  { %12538 = vpow2.f32 %v7321_v54  ;;  %v7306_v26 = vsub.f32 %v16712_v31, %v7290_v44  ;;  %v7307_v13 = vsub.f32 %v16715_v40, %v7291_v25 }
0x13d6   :  { %v16763_v34 = vpop.eup %12532  ;;  %v7268_v32 = vpop.xlane.xlu0 %7267  ;;  %12540 = vpow2.f32 %v7325_v58  ;;  %v18091_v58 = vld [vmem:[#allocation9_spill] sm:$0xff] }
0x13d7   :  { %v7270_v20 = vpop.xlane.xlu1 %7269  ;;  %v16765_v50 = vpop.eup %12534  ;;  %v7327_v18 = vmul.f32 1.442695, %v7306_v26  ;;  %v7292_v27 = vmax.f32 %v7268_v32, 0.0  ;;  %7351 = vadd.xlane.f32.xlu1 %v16763_v34  ;;  %v7329_v12 = vmul.f32 1.442695, %v7307_v13 }
0x13d8   :  { %7349 = vadd.xlane.f32.xlu0 %v16765_v50  ;;  %v7293_v53 = vmax.f32 %v7270_v20, 0.0 }
0x13d9   :  { %12542 = vpow2.f32 %v7327_v18  ;;  %v7308_v9 = vsub.f32 %v16720_v37, %v7292_v27 }
0x13da   :  { %v7272_v31 = vpop.xlane.xlu0 %7271  ;;  %v7309_v40 = vsub.f32 %v16723_v38, %v7293_v53 }
0x13db   :  { %v7274_v42 = vpop.xlane.xlu1 %7273  ;;  %v16771_v8 = vpop.eup %12536  ;;  %v7331_v43 = vmul.f32 1.442695, %v7308_v9  ;;  %v7294_v49 = vmax.f32 %v7272_v31, 0.0 }
0x13dc   :  { %7355 = vadd.xlane.f32.xlu0 %v16771_v8  ;;  %v7333_v48 = vmul.f32 1.442695, %v7309_v40  ;;  %v7295_v52 = vmax.f32 %v7274_v42, 0.0  ;;  %v18093_v40 = vld [vmem:[#allocation88_spill] sm:$0xff] }
0x13dd   :  { %12544 = vpow2.f32 %v7331_v43  ;;  %v7310_v60 = vsub.f32 %v16728_v29, %v7294_v49 }
0x13de   :  { %12546 = vpow2.f32 %v7329_v12  ;;  %v7311_v10 = vsub.f32 %v16731_v23, %v7295_v52  ;;  %v7276_v26 = vpop.xlane.xlu0 %7275 }
0x13df   :  { %v7278_v3 = vpop.xlane.xlu1 %7277  ;;  %v16775_v16 = vpop.eup %12538  ;;  %v7335_v37 = vmul.f32 1.442695, %v7310_v60  ;;  %v7296_v18 = vmax.f32 %v7276_v26, 0.0 }
0x13e0   :  { %7353 = vadd.xlane.f32.xlu0 %v16775_v16  ;;  %v16779_v22 = vpop.eup %12540  ;;  %v7297_v36 = vmax.f32 %v7278_v3, 0.0  ;;  %v7337_v35 = vmul.f32 1.442695, %v7311_v10 }
0x13e1   :  { %12548 = vpow2.f32 %v7335_v37  ;;  %v7312_v13 = vsub.f32 %v16736_v39, %v7296_v18  ;;  %v18094_v37 = vld [vmem:[#allocation91_spill] sm:$0xff] }
0x13e2   :  { %12550 = vpow2.f32 %v7333_v48  ;;  %v7313_v54 = vsub.f32 %v16739_v17, %v7297_v36  ;;  %v7280_v20 = vpop.xlane.xlu0 %7279  ;;  %v18099_v48 = vld [vmem:[#allocation63_spill] sm:$0xff] }
0x13e3   :  { %v7282_v5 = vpop.xlane.xlu1 %7281  ;;  %v16781_v24 = vpop.eup %12542  ;;  %12552 = vpow2.f32 %v7337_v35  ;;  %v7298_v23 = vmax.f32 %v7280_v20, 0.0  ;;  %v7339_v17 = vmul.f32 1.442695, %v7312_v13  ;;  %v18106_v35 = vld [vmem:[#allocation52_spill] sm:$0xff] }
0x13e4   :  { %7357 = vadd.xlane.f32.xlu0 %v16779_v22  ;;  %7359 = vadd.xlane.f32.xlu1 %v16781_v24  ;;  %v7299_v44 = vmax.f32 %v7282_v5, 0.0  ;;  %v7341_v25 = vmul.f32 1.442695, %v7313_v54  ;;  %v18095_v5 = vld [vmem:[#allocation19_spill] sm:$0xff] }
0x13e5   :  { %v7314_v42 = vsub.f32 %v16744_v14, %v7298_v23 }
0x13e6   :  { %v7315_v32 = vsub.f32 %v16747_v11, %v7299_v44  ;;  %12554 = vpow2.f32 %v7341_v25  ;;  %v7284_v9 = vpop.xlane.xlu0 %7283 }
0x13e7   :  { %v12003_v29 = vpop.permute.xlu1 %12002  ;;  %v16785_v57 = vpop.eup %12544  ;;  %v7300_v43 = vmax.f32 %v7284_v9, 0.0  ;;  %v7343_v11 = vmul.f32 1.442695, %v7314_v42 }
0x13e8   :  { %v12005_v63 = vunpack.i.h.bf16 %v12003_v29  ;;  %v12004_v46 = vunpack.i.l.bf16 %v12003_v29  ;;  %7363 = vadd.xlane.f32.xlu0 %v16785_v57  ;;  %v16788_v30 = vpop.eup %12546  ;;  %v7345_v27 = vmul.f32 1.442695, %v7315_v32 }
0x13e9   :  { %v7316_v12 = vsub.f32 %v16752_v59, %v7300_v43  ;;  %v18092_v59 = vld [vmem:[#allocation18_spill] sm:$0xff] }
0x13ea   :  { %v11460_v38 = vpack.c.bf16 %v12005_v63, %v12004_v46  ;;  %12556 = vpow2.f32 %v7345_v27  ;;  %v18104_v46 = vld [vmem:[#allocation65_spill] sm:$0xff] }
0x13eb   :  { %v16791_v45 = vpop.eup %12548  ;;  %12558 = vpow2.f32 %v7339_v17  ;;  %v7347_v53 = vmul.f32 1.442695, %v7316_v12 }
0x13ec   :  { %11461 = vmatprep.subr.bf16.mxu0 %v11460_v38  ;;  %7361 = vadd.xlane.f32.xlu0 %v16788_v30  ;;  %v16794_v56 = vpop.eup %12550  ;;  %12560 = vpow2.f32 %v7343_v11 }
0x13ed   :  { %11463 = vmatpush3.bf16.msra.mxu0 %v11460_v38  ;;  %v16805_v31 = vpop.eup %12552  ;;  %12562 = vpow2.f32 %v7347_v53 }
0x13f0   :  { %7367 = vadd.xlane.f32.xlu0 %v16791_v45  ;;  %v16809_v49 = vpop.eup %12554 }
0x13f4   :  { %7365 = vadd.xlane.f32.xlu0 %v16794_v56  ;;  %v16813_v39 = vpop.eup %12556 }
0x13f5   :  { %12012 = vrot.lane.b32.xlu1 %v18090_v19, %s12715_s24  ;;  %v16816_v60 = vpop.eup %12558  ;;  %v18105_v19 = vld [vmem:[#allocation24_spill] sm:$0xff] }
0x13f6   :  { %v16819_v14 = vpop.eup %12560 }
0x13f7   :  { %v16822_v3 = vpop.eup %12562 }
0x140a   :  { %12007 = vrot.lane.b32.xlu0 %v18091_v58, %s12715_s24 }
0x1419   :  { %7369 = vadd.xlane.f32.xlu1 %v16805_v31 }
0x141d   :  { %7373 = vadd.xlane.f32.xlu1 %v16809_v49 }
0x1421   :  { %7377 = vadd.xlane.f32.xlu1 %v16813_v39 }
0x1429   :  { %7371 = vadd.xlane.f32.xlu0 %v16816_v60 }
0x142d   :  { %7375 = vadd.xlane.f32.xlu0 %v16819_v14 }
0x1431   :  { %7379 = vadd.xlane.f32.xlu0 %v16822_v3 }
0x1432   :  { %6886 = vrot.lane.b32.xlu1 %v16659_v51, %s12714_s23  ;;  %v18096_v51 = vld [vmem:[#allocation17_spill] sm:$0xff] }
0x1436   :  { %6120 = vrot.lane.b32.xlu1 %v18092_v59, %s12715_s24 }
0x143a   :  { %6890 = vrot.lane.b32.xlu1 %v16663_v4, %s12714_s23  ;;  %v18097_v4 = vld [vmem:[#allocation16_spill] sm:$0xff] }
0x143e   :  { %6124 = vrot.lane.b32.xlu1 %v18093_v40, %s12715_s24 }
0x1442   :  { %6894 = vrot.lane.b32.xlu1 %v16667_v7, %s12714_s23  ;;  %v18098_v7 = vld [vmem:[#allocation86_spill] sm:$0xff] }
0x1446   :  { %6128 = vrot.lane.b32.xlu1 %v18094_v37, %s12715_s24 }
0x1447   :  { %6114 = vrot.lane.b32.xlu0 %v18095_v5, %s12715_s24 }
0x144a   :  { %6898 = vrot.lane.b32.xlu1 %v16671_v41, %s12714_s23  ;;  %v18100_v41 = vld [vmem:[#allocation90_spill] sm:$0xff] }
0x144b   :  { %6116 = vrot.lane.b32.xlu0 %v18096_v51, %s12715_s24 }
0x144e   :  { %6132 = vrot.lane.b32.xlu1 %v18097_v4, %s12715_s24 }
0x144f   :  { %6884 = vrot.lane.b32.xlu0 %v16661_v62, %s12714_s23  ;;  %v18101_v62 = vld [vmem:[#allocation72_spill] sm:$0xff] }
0x1452   :  { %6902 = vrot.lane.b32.xlu1 %v16675_v55, %s12714_s23  ;;  %v18102_v55 = vld [vmem:[#allocation35_spill] sm:$0xff] }
0x1453   :  { %6118 = vrot.lane.b32.xlu0 %v18098_v7, %s12715_s24 }
0x1456   :  { %6136 = vrot.lane.b32.xlu1 %v18099_v48, %s12715_s24 }
0x1457   :  { %6888 = vrot.lane.b32.xlu0 %v16665_v61, %s12714_s23  ;;  %v18103_v61 = vld [vmem:[#allocation23_spill] sm:$0xff] }
0x145a   :  { %6906 = vrot.lane.b32.xlu1 %v16679_v0, %s12714_s23 }
0x145b   :  { %6122 = vrot.lane.b32.xlu0 %v18100_v41, %s12715_s24 }
0x145e   :  { %6140 = vrot.lane.b32.xlu1 %v18101_v62, %s12715_s24 }
0x145f   :  { %6892 = vrot.lane.b32.xlu0 %v16669_v47, %s12714_s23 }
0x1462   :  { %6910 = vrot.lane.b32.xlu1 %v16683_v1, %s12714_s23 }
0x1463   :  { %6126 = vrot.lane.b32.xlu0 %v18102_v55, %s12715_s24 }
0x1465   :  { %v7350_v29 = vpop.xlane.xlu0 %7349 }
0x1466   :  { %vm7381_vm1 = vcmp.gt.f32.partialorder %v7350_v29, 0.0  ;;  %6144 = vrot.lane.b32.xlu1 %v18103_v61, %s12715_s24 }
0x1467   :  { %v7397_v0 = vsel %vm7381_vm1, %v7350_v29, 1.0  ;;  %6896 = vrot.lane.b32.xlu0 %v16673_v6, %s12714_s23  ;;  %v7352_v6 = vpop.xlane.xlu1 %7351 }
0x1468   :  { %12564 = vrcp.f32 %v7397_v0  ;;  %vm7382_vm5 = vcmp.gt.f32.partialorder %v7352_v6, 0.0 }
0x1469   :  { %v7356_v63 = vpop.xlane.xlu0 %7355  ;;  %v7398_v44 = vsel %vm7382_vm5, %v7352_v6, 1.0 }
0x146a   :  { %vm7384_vm8 = vcmp.gt.f32.partialorder %v7356_v63, 0.0  ;;  %12566 = vrcp.f32 %v7398_v44 }
0x146b   :  { %6130 = vrot.lane.b32.xlu0 %v18104_v46, %s12715_s24  ;;  %v7400_v25 = vsel %vm7384_vm8, %v7356_v63, 1.0 }
0x146d   :  { %v7354_v47 = vpop.xlane.xlu0 %7353 }
0x146e   :  { %vm7383_vm7 = vcmp.gt.f32.partialorder %v7354_v47, 0.0 }
0x146f   :  { %6900 = vrot.lane.b32.xlu0 %v16677_v28, %s12714_s23 }
0x1471   :  { %v7358_v1 = vpop.xlane.xlu0 %7357  ;;  %v7360_v54 = vpop.xlane.xlu1 %7359 }
0x1472   :  { %v12565_v38 = vpop.eup %12564  ;;  %vm7385_vm10 = vcmp.gt.f32.partialorder %v7358_v1, 0.0  ;;  %vm7386_vm11 = vcmp.gt.f32.partialorder %v7360_v54, 0.0 }
0x1473   :  { %6134 = vrot.lane.b32.xlu0 %v18105_v19, %s12715_s24  ;;  %v7429_v52 = vmul.f32 %v12565_v38, %v16765_v50  ;;  %v7399_v50 = vsel %vm7383_vm7, %v7354_v47, 1.0  ;;  %v7401_v32 = vsel %vm7385_vm10, %v7358_v1, 1.0  ;;  %v7402_v23 = vsel %vm7386_vm11, %v7360_v54, 1.0 }
0x1474   :  { %12568 = vrcp.f32 %v7399_v50  ;;  %v12567_v11 = vpop.eup %12566 }
0x1475   :  { %10624 = vmatprep.mubr.f32.mxu0 %v7429_v52  ;;  %v7364_v10 = vpop.xlane.xlu0 %7363  ;;  %v12013_v26 = vpop.permute.xlu1 %12012  ;;  %12570 = vrcp.f32 %v7400_v25  ;;  %v7430_v59 = vmul.f32 %v12567_v11, %v16763_v34 }
0x1476   :  { %v12015_v20 = vunpack.i.h.bf16 %v12013_v26  ;;  %v12014_v27 = vunpack.i.l.bf16 %v12013_v26  ;;  %12572 = vrcp.f32 %v7401_v32  ;;  %vm7388_vm14 = vcmp.gt.f32.partialorder %v7364_v10, 0.0 }
0x1477   :  { %6904 = vrot.lane.b32.xlu0 %v16681_v21, %s12714_s23  ;;  %v18107_v21 = vld [vmem:[#allocation84_spill] sm:$0xff]  ;;  %12574 = vrcp.f32 %v7402_v23  ;;  %v7404_v43 = vsel %vm7388_vm14, %v7364_v10, 1.0 }
0x1478   :  { %v11468_v42 = vpack.c.bf16 %v12015_v20, %v12014_v27 }
0x1479   :  { %v7362_v36 = vpop.xlane.xlu0 %7361 }
0x147a   :  { %vm7387_vm13 = vcmp.gt.f32.partialorder %v7362_v36, 0.0 }
0x147b   :  { %6138 = vrot.lane.b32.xlu0 %v18106_v35, %s12715_s24  ;;  %v7403_v17 = vsel %vm7387_vm13, %v7362_v36, 1.0 }
0x147c   :  { %12576 = vrcp.f32 %v7403_v17 }
0x147d   :  { %v7368_v28 = vpop.xlane.xlu0 %7367  ;;  %12578 = vrcp.f32 %v7404_v43 }
0x147e   :  { %vm7390_vm2 = vcmp.gt.f32.partialorder %v7368_v28, 0.0  ;;  %v12569_v53 = vpop.eup %12568 }
0x147f   :  { %6908 = vrot.lane.b32.xlu0 %v16685_v33, %s12714_s23  ;;  %v12571_v40 = vpop.eup %12570  ;;  %v7431_v37 = vmul.f32 %v12569_v53, %v16775_v16 }
0x1480   :  { %v12573_v5 = vpop.eup %12572  ;;  %v7432_v51 = vmul.f32 %v12571_v40, %v16771_v8 }
0x1481   :  { %v7366_v58 = vpop.xlane.xlu0 %7365  ;;  %v12575_v4 = vpop.eup %12574  ;;  %v7433_v7 = vmul.f32 %v12573_v5, %v16779_v22 }
0x1482   :  { %vm7389_vm15 = vcmp.gt.f32.partialorder %v7366_v58, 0.0  ;;  %v7434_v41 = vmul.f32 %v12575_v4, %v16781_v24 }
0x1483   :  { %6142 = vrot.lane.b32.xlu0 %v18107_v21, %s12715_s24  ;;  %v7405_v12 = vsel %vm7389_vm15, %v7366_v58, 1.0 }
0x1484   :  { %12580 = vrcp.f32 %v7405_v12 }
0x1485   :  { %v12008_v18 = vpop.permute.xlu0 %12007 }
0x1486   :  { %v12010_v13 = vunpack.i.h.bf16 %v12008_v18  ;;  %v12009_v33 = vunpack.i.l.bf16 %v12008_v18  ;;  %v12577_v48 = vpop.eup %12576 }
0x1487   :  { %6912 = vrot.lane.b32.xlu0 %v16689_v2, %s12714_s23  ;;  %v7406_v2 = vsel %vm7390_vm2, %v7368_v28, 1.0  ;;  %v12579_v62 = vpop.eup %12578  ;;  %v7435_v34 = vmul.f32 %v12577_v48, %v16788_v30 }
0x1488   :  { %v11464_v9 = vpack.c.bf16 %v12010_v13, %v12009_v33  ;;  %12582 = vrcp.f32 %v7406_v2  ;;  %v7436_v16 = vmul.f32 %v12579_v62, %v16785_v57 }
0x148a   :  { %11465 = vmatprep.subr.bf16.mxu0 %v11464_v9 }
0x148b   :  { %11467 = vmatpush3.bf16.msra.mxu0 %v11464_v9 }
0x148c   :  { %11469 = vmatprep.subr.bf16.mxu0 %v11468_v42 }
0x148e   :  { %v12581_v55 = vpop.eup %12580 }
0x148f   :  { %11471 = vmatpush3.bf16.msra.mxu0 %v11468_v42  ;;  %v7437_v61 = vmul.f32 %v12581_v55, %v16794_v56 }
0x1492   :  { %10625 = vmatmul.mubr.f32.vlgmr.msra.gmra.mrb[192].mxu0 %v7430_v59  ;;  %v12583_v29 = vpop.eup %12582 }
0x1493   :  { %10627 = vmatprep.mubr.f32.mxu0 %v7431_v37  ;;  %v7438_v8 = vmul.f32 %v12583_v29, %v16791_v45 }
0x1496   :  { %10628 = vmatmul.mubr.f32.gmra.mrb[194].mxu0 %v7432_v51 }
0x1497   :  { %10630 = vmatprep.mubr.f32.mxu0 %v7433_v7 }
0x149a   :  { %10631 = vmatmul.mubr.f32.gmra.mrb[196].mxu0 %v7434_v41 }
0x149b   :  { %10633 = vmatprep.mubr.f32.mxu0 %v7435_v34 }
0x149e   :  { %10634 = vmatmul.mubr.f32.gmra.mrb[198].mxu0 %v7436_v16 }
0x149f   :  { %10636 = vmatprep.mubr.f32.mxu0 %v7437_v61 }
0x14a2   :  { %10637 = vmatmul.mubr.f32.gmra.mrb[200].mxu0 %v7438_v8 }
0x14a6   :  { %v7370_v22 = vpop.xlane.xlu1 %7369 }
0x14a7   :  { %vm7391_vm3 = vcmp.gt.f32.partialorder %v7370_v22, 0.0 }
0x14a8   :  { %v7407_v0 = vsel %vm7391_vm3, %v7370_v22, 1.0 }
0x14a9   :  { %12584 = vrcp.f32 %v7407_v0 }
0x14aa   :  { %v7374_v24 = vpop.xlane.xlu1 %7373 }
0x14ab   :  { %vm7393_vm4 = vcmp.gt.f32.partialorder %v7374_v24, 0.0 }
0x14ac   :  { %v7409_v57 = vsel %vm7393_vm4, %v7374_v24, 1.0 }
0x14ad   :  { %12586 = vrcp.f32 %v7409_v57 }
0x14ae   :  { %v7378_v63 = vpop.xlane.xlu1 %7377 }
0x14af   :  { %vm7395_vm1 = vcmp.gt.f32.partialorder %v7378_v63, 0.0 }
0x14b0   :  { %v7411_v38 = vsel %vm7395_vm1, %v7378_v63, 1.0 }
0x14b2   :  { %v6887_v30 = vpop.permute.xlu1 %6886 }
0x14b3   :  { %v12585_v46 = vpop.eup %12584 }
0x14b4   :  { %v7439_v47 = vmul.f32 %v12585_v46, %v16805_v31 }
0x14b6   :  { %v7372_v1 = vpop.xlane.xlu0 %7371  ;;  %v6121_v56 = vpop.permute.xlu1 %6120  ;;  %10639 = vmatprep.mubr.f32.mxu0 %v7439_v47 }
0x14b7   :  { %vm7392_vm5 = vcmp.gt.f32.partialorder %v7372_v1, 0.0  ;;  %6165 = vst.msk [vmem:[#allocation2 + $0x18] sm:$0xff] %vm2071_vm6, %v6121_v56  ;;  %v12587_v35 = vpop.eup %12586 }
0x14b8   :  { %v7408_v45 = vsel %vm7392_vm5, %v7372_v1, 1.0  ;;  %v7441_v58 = vmul.f32 %v12587_v35, %v16809_v49  ;;  %v18110_v35 = vld [vmem:[#allocation25_spill] sm:$0xff] }
0x14b9   :  { %12588 = vrcp.f32 %v7408_v45 }
0x14ba   :  { %v7376_v19 = vpop.xlane.xlu0 %7375  ;;  %v6891_v52 = vpop.permute.xlu1 %6890  ;;  %12590 = vrcp.f32 %v7411_v38  ;;  %v18108_v38 = vld [vmem:[#allocation12_spill] sm:$0xff] }
0x14bb   :  { %vm7394_vm7 = vcmp.gt.f32.partialorder %v7376_v19, 0.0  ;;  %6935 = vst.msk [vmem:[#allocation2 + $0x18] sm:$0xff] %vm2842_vm9, %v6891_v52 }
0x14bc   :  { %v7410_v10 = vsel %vm7394_vm7, %v7376_v19, 1.0  ;;  %v18109_v19 = vld [vmem:[#allocation80_spill] sm:$0xff] }
0x14bd   :  { %12592 = vrcp.f32 %v7410_v10  ;;  %v16955_v52 = vadd.f32 %v18109_v19, %v18108_v38  ;;  %v16967_v10 = vld [vmem:[%s17509_s8 + $0x1] ss:$0 sm:$0xff] }
0x14be   :  { %v7380_v31 = vpop.xlane.xlu0 %7379  ;;  %v6125_v6 = vpop.permute.xlu1 %6124 }
0x14bf   :  { %vm7396_vm8 = vcmp.gt.f32.partialorder %v7380_v31, 0.0  ;;  %6167 = vst.msk [vmem:[#allocation2 + $0x28] sm:$0xff] %vm2071_vm6, %v6125_v6 }
0x14c0   :  { %v7412_v36 = vsel %vm7396_vm8, %v7380_v31, 1.0 }
0x14c1   :  { %12594 = vrcp.f32 %v7412_v36 }
0x14c2   :  { %v6115_v54 = vpop.permute.xlu0 %6114  ;;  %v6895_v28 = vpop.permute.xlu1 %6894 }
0x14c3   :  { %v12589_v44 = vpop.eup %12588  ;;  %6162 = vst.msk [vmem:[#allocation2] sm:$0xff] %vm2071_vm6, %v6115_v54  ;;  %v16973_v54 = vadd.f32 %v18110_v35, %v18108_v38 }
0x14c4   :  { %6937 = vst.msk [vmem:[#allocation2 + $0x28] sm:$0xff] %vm2842_vm9, %v6895_v28  ;;  %v7440_v50 = vmul.f32 %v12589_v44, %v16816_v60  ;;  %v12591_v26 = vpop.eup %12590  ;;  %v7767_v28 = vmul.f32 %v16967_v10, %v16955_v52 }
0x14c5   :  { %v7443_v18 = vmul.f32 %v12591_v26, %v16813_v39 }
0x14c6   :  { %v6117_v21 = vpop.permute.xlu0 %6116  ;;  %v6129_v25 = vpop.permute.xlu1 %6128  ;;  %10640 = vmatmul.mubr.f32.gmra.mrb[202].mxu0 %v7440_v50 }
0x14c7   :  { %v12593_v32 = vpop.eup %12592  ;;  %6163 = vst.msk [vmem:[#allocation2 + $0x8] sm:$0xff] %vm2071_vm6, %v6117_v21  ;;  %6169 = vst.msk [vmem:[#allocation2 + $0x38] sm:$0xff] %vm2071_vm6, %v6129_v25  ;;  %10642 = vmatprep.mubr.f32.mxu0 %v7441_v58  ;;  %v7766_v25 = vmul.f32 %v16967_v10, %v16973_v54 }
0x14c8   :  { %6933 = vst.msk [vmem:[#allocation2 + $0x8] sm:$0xff] %vm2842_vm9, %v6887_v30  ;;  %v7442_v20 = vmul.f32 %v12593_v32, %v16819_v14  ;;  %v18111_v32 = vld [vmem:[#allocation59_spill] sm:$0xff] }
0x14ca   :  { %v6885_v27 = vpop.permute.xlu0 %6884  ;;  %v6899_v60 = vpop.permute.xlu1 %6898  ;;  %10643 = vmatmul.mubr.f32.gmra.mrb[204].mxu0 %v7442_v20  ;;  %v16987_v20 = vadd.f32 %v18111_v32, %v18108_v38 }
0x14cb   :  { %v12595_v49 = vpop.eup %12594  ;;  %6932 = vst.msk [vmem:[#allocation2] sm:$0xff] %vm2842_vm9, %v6885_v27  ;;  %6939 = vst.msk [vmem:[#allocation2 + $0x38] sm:$0xff] %vm2842_vm9, %v6899_v60  ;;  %10645 = vmatprep.mubr.f32.mxu0 %v7443_v18 }
0x14cc   :  { %v7444_v13 = vmul.f32 %v12595_v49, %v16822_v3 }
0x14ce   :  { %v6119_v33 = vpop.permute.xlu0 %6118  ;;  %v6133_v23 = vpop.permute.xlu1 %6132  ;;  %10646 = vmatmul.mubr.f32.gmra.mrb[206].mxu0 %v7444_v13 }
0x14cf   :  { %6164 = vst.msk [vmem:[#allocation2 + $0x10] sm:$0xff] %vm2071_vm6, %v6119_v33  ;;  %6171 = vst.msk [vmem:[#allocation2 + $0x48] sm:$0xff] %vm2071_vm6, %v6133_v23  ;;  %v7768_v23 = vmul.f32 %v16967_v10, %v16987_v20 }
0x14d2   :  { %v6889_v14 = vpop.permute.xlu0 %6888  ;;  %v6903_v39 = vpop.permute.xlu1 %6902 }
0x14d3   :  { %6934 = vst.msk [vmem:[#allocation2 + $0x10] sm:$0xff] %vm2842_vm9, %v6889_v14  ;;  %6941 = vst.msk [vmem:[#allocation2 + $0x48] sm:$0xff] %vm2842_vm9, %v6903_v39  ;;  %v18112_v14 = vld [vmem:[#allocation67_spill] sm:$0xff] }
0x14d4   :  { %v17001_v39 = vadd.f32 %v18112_v14, %v18108_v38 }
0x14d6   :  { %v6123_v9 = vpop.permute.xlu0 %6122  ;;  %v6137_v17 = vpop.permute.xlu1 %6136 }
0x14d7   :  { %6166 = vst.msk [vmem:[#allocation2 + $0x20] sm:$0xff] %vm2071_vm6, %v6123_v9  ;;  %6173 = vst.msk [vmem:[#allocation2 + $0x58] sm:$0xff] %vm2071_vm6, %v6137_v17  ;;  %v18113_v9 = vld [vmem:[#allocation83_spill] sm:$0xff] }
0x14d8   :  { %v17005_v17 = vadd.f32 %v18113_v9, %v18108_v38  ;;  %v18121_v9 = vld [vmem:[#allocation8_spill] sm:$0xff] }
0x14da   :  { %v6893_v3 = vpop.permute.xlu0 %6892  ;;  %v6907_v42 = vpop.permute.xlu1 %6906 }
0x14db   :  { %6936 = vst.msk [vmem:[#allocation2 + $0x20] sm:$0xff] %vm2842_vm9, %v6893_v3  ;;  %6943 = vst.msk [vmem:[#allocation2 + $0x58] sm:$0xff] %vm2842_vm9, %v6907_v42 }
0x14de   :  { %v6127_v43 = vpop.permute.xlu0 %6126  ;;  %v6141_v11 = vpop.permute.xlu1 %6140 }
0x14df   :  { %6168 = vst.msk [vmem:[#allocation2 + $0x30] sm:$0xff] %vm2071_vm6, %v6127_v43  ;;  %6175 = vst.msk [vmem:[#allocation2 + $0x68] sm:$0xff] %vm2071_vm6, %v6141_v11  ;;  %v18114_v11 = vld [vmem:[#allocation82_spill] sm:$0xff] }
0x14e2   :  { %v6897_v12 = vpop.permute.xlu0 %6896  ;;  %v6911_v53 = vpop.permute.xlu1 %6910 }
0x14e3   :  { %6938 = vst.msk [vmem:[#allocation2 + $0x30] sm:$0xff] %vm2842_vm9, %v6897_v12  ;;  %6945 = vst.msk [vmem:[#allocation2 + $0x68] sm:$0xff] %vm2842_vm9, %v6911_v53  ;;  %v17015_v12 = vadd.f32 %v18114_v11, %v18108_v38 }
0x14e6   :  { %v6131_v2 = vpop.permute.xlu0 %6130  ;;  %v6145_v59 = vpop.permute.xlu1 %6144 }
0x14e7   :  { %6170 = vst.msk [vmem:[#allocation2 + $0x40] sm:$0xff] %vm2071_vm6, %v6131_v2  ;;  %6177 = vst.msk [vmem:[#allocation2 + $0x78] sm:$0xff] %vm2071_vm6, %v6145_v59 }
0x14ea   :  { %v6901_v40 = vpop.permute.xlu0 %6900 }
0x14eb   :  { %6940 = vst.msk [vmem:[#allocation2 + $0x40] sm:$0xff] %vm2842_vm9, %v6901_v40  ;;  %v7769_v40 = vmul.f32 %v16967_v10, %v17001_v39 }
0x14ee   :  { %v6135_v37 = vpop.permute.xlu0 %6134 }
0x14ef   :  { %6172 = vst.msk [vmem:[#allocation2 + $0x50] sm:$0xff] %vm2071_vm6, %v6135_v37  ;;  %v7770_v37 = vmul.f32 %v16967_v10, %v17005_v17 }
0x14f2   :  { %v6905_v5 = vpop.permute.xlu0 %6904 }
0x14f3   :  { %6942 = vst.msk [vmem:[#allocation2 + $0x50] sm:$0xff] %vm2842_vm9, %v6905_v5  ;;  %v18115_v5 = vld [vmem:[#allocation27_spill] sm:$0xff] }
0x14f6   :  { %v6139_v51 = vpop.permute.xlu0 %6138 }
0x14f7   :  { %6174 = vst.msk [vmem:[#allocation2 + $0x60] sm:$0xff] %vm2071_vm6, %v6139_v51  ;;  %v17027_v51 = vadd.f32 %v18115_v5, %v18108_v38 }
0x14fa   :  { %v6909_v4 = vpop.permute.xlu0 %6908 }
0x14fb   :  { %6944 = vst.msk [vmem:[#allocation2 + $0x60] sm:$0xff] %vm2842_vm9, %v6909_v4 }
0x14fe   :  { %v6143_v7 = vpop.permute.xlu0 %6142 }
0x14ff   :  { %6176 = vst.msk [vmem:[#allocation2 + $0x70] sm:$0xff] %vm2071_vm6, %v6143_v7 }
0x1502   :  { %v6913_v48 = vpop.permute.xlu0 %6912 }
0x1503   :  { %6946 = vst.msk [vmem:[#allocation2 + $0x70] sm:$0xff] %vm2842_vm9, %v6913_v48 }
0x1565   :  { %v10626_v41 = vpop.f32.mrb[192].mxu0 }
0x1566   :  { %7656 = vrot.lane.b32.xlu0 %v10626_v41, %s12713_s22  ;;  %v7559_v62 = vpop.f32.mrb[193].mxu0 }
0x1569   :  { %v10629_v34 = vpop.f32.mrb[194].mxu0 }
0x156a   :  { %7654 = vrot.lane.b32.xlu0 %v7559_v62, %s12713_s22  ;;  %7660 = vrot.lane.b32.xlu1 %v10629_v34, %s12713_s22  ;;  %v7569_v55 = vpop.f32.mrb[195].mxu0  ;;  %v7771_v62 = vmul.f32 %v16967_v10, %v17015_v12  ;;  %v18116_v34 = vld [vmem:[#allocation34_spill] sm:$0xff] }
0x156d   :  { %v10632_v16 = vpop.f32.mrb[196].mxu0 }
0x156e   :  { %7658 = vrot.lane.b32.xlu0 %v7569_v55, %s12713_s22  ;;  %7664 = vrot.lane.b32.xlu1 %v10632_v16, %s12713_s22  ;;  %v7579_v29 = vpop.f32.mrb[197].mxu0  ;;  %v17038_v55 = vadd.f32 %v18116_v34, %v18108_v38 }
0x1571   :  { %v10635_v61 = vpop.f32.mrb[198].mxu0 }
0x1572   :  { %7662 = vrot.lane.b32.xlu0 %v7579_v29, %s12713_s22  ;;  %7668 = vrot.lane.b32.xlu1 %v10635_v61, %s12713_s22  ;;  %v7589_v8 = vpop.f32.mrb[199].mxu0  ;;  %v7772_v61 = vmul.f32 %v16967_v10, %v17027_v51 }
0x1575   :  { %v10638_v22 = vpop.f32.mrb[200].mxu0 }
0x1576   :  { %7666 = vrot.lane.b32.xlu0 %v7589_v8, %s12713_s22  ;;  %7672 = vrot.lane.b32.xlu1 %v10638_v22, %s12713_s22  ;;  %v7599_v0 = vpop.f32.mrb[201].mxu0  ;;  %v18117_v8 = vld [vmem:[#allocation45_spill] sm:$0xff] }
0x1577   :  { %v17048_v22 = vadd.f32 %v18117_v8, %v18108_v38 }
0x157a   :  { %7670 = vrot.lane.b32.xlu0 %v7599_v0, %s12713_s22 }
0x1599   :  { %v10641_v24 = vpop.f32.mrb[202].mxu0 }
0x159a   :  { %7676 = vrot.lane.b32.xlu1 %v10641_v24, %s12713_s22  ;;  %v7609_v63 = vpop.f32.mrb[203].mxu0 }
0x159b   :  { %7674 = vrot.lane.b32.xlu0 %v7609_v63, %s12713_s22 }
0x159d   :  { %v10644_v30 = vpop.f32.mrb[204].mxu0 }
0x159e   :  { %7680 = vrot.lane.b32.xlu1 %v10644_v30, %s12713_s22  ;;  %v7619_v46 = vpop.f32.mrb[205].mxu0 }
0x159f   :  { %7678 = vrot.lane.b32.xlu0 %v7619_v46, %s12713_s22  ;;  %v7773_v46 = vmul.f32 %v16967_v10, %v17038_v55 }
0x15a1   :  { %v10647_v47 = vpop.f32.mrb[206].mxu0 }
0x15a2   :  { %6914 = vrot.lane.b32.xlu1 %v16687_v15, %s12714_s23  ;;  %v7629_v57 = vpop.f32.mrb[207].mxu0  ;;  %v16962_v15 = vld [vmem:[%s17510_s7 + $0x1] ss:$0 sm:$0xff] }
0x15a3   :  { %7682 = vrot.lane.b32.xlu0 %v7629_v57, %s12713_s22 }
0x15a7   :  { %7684 = vrot.lane.b32.xlu0 %v10647_v47, %s12713_s22 }
0x15d8   :  { %v7657_v1 = vpop.permute.xlu0 %7656 }
0x15d9   :  { %7703 = vst.msk [vmem:[#allocation2 + $0x8] sm:$0xff] %vm3613_vm12, %v7657_v1  ;;  %v7774_v1 = vmul.f32 %v16967_v10, %v17048_v22 }
0x15dc   :  { %v7655_v56 = vpop.permute.xlu0 %7654  ;;  %v7661_v45 = vpop.permute.xlu1 %7660 }
0x15dd   :  { %7702 = vst.msk [vmem:[#allocation2] sm:$0xff] %vm3613_vm12, %v7655_v56  ;;  %7705 = vst.msk [vmem:[#allocation2 + $0x18] sm:$0xff] %vm3613_vm12, %v7661_v45  ;;  %v18118_v56 = vld [vmem:[#allocation51_spill] sm:$0xff] }
0x15de   :  { %v17064_v45 = vadd.f32 %v18118_v56, %v18108_v38 }
0x15e0   :  { %v7659_v31 = vpop.permute.xlu0 %7658  ;;  %v7665_v6 = vpop.permute.xlu1 %7664  ;;  %v16969_v36 = vld [vmem:[#allocation2 + $0x8] sm:$0xff] }
0x15e1   :  { %7704 = vst.msk [vmem:[#allocation2 + $0x10] sm:$0xff] %vm3613_vm12, %v7659_v31  ;;  %7707 = vst.msk [vmem:[#allocation2 + $0x28] sm:$0xff] %vm3613_vm12, %v7665_v6  ;;  %v7743_v44 = vmul.f32 %v16962_v15, %v16969_v36 }
0x15e3   :  { %v7783_v50 = vadd.f32 %v7767_v28, %v7743_v44  ;;  %v7775_v28 = vmul.f32 %v16967_v10, %v17064_v45 }
0x15e4   :  { %v7663_v58 = vpop.permute.xlu0 %7662  ;;  %v7669_v26 = vpop.permute.xlu1 %7668  ;;  %v16981_v21 = vld [vmem:[#allocation2] sm:$0xff]  ;;  %v16995_v33 = vld [vmem:[#allocation2 + $0x18] sm:$0xff] }
0x15e5   :  { %7706 = vst.msk [vmem:[#allocation2 + $0x20] sm:$0xff] %vm3613_vm12, %v7663_v58  ;;  %7709 = vst.msk [vmem:[#allocation2 + $0x38] sm:$0xff] %vm3613_vm12, %v7669_v26  ;;  %7800 = vadd.xlane.f32.xlu0 %v7783_v50  ;;  %v7742_v18 = vmul.f32 %v16962_v15, %v16981_v21  ;;  %v7745_v43 = vmul.f32 %v16962_v15, %v16995_v33 }
0x15e7   :  { %v7782_v27 = vadd.f32 %v7766_v25, %v7742_v18  ;;  %v7785_v48 = vadd.f32 %v7769_v40, %v7745_v43  ;;  %v18119_v25 = vld [vmem:[#allocation3_spill] sm:$0xff]  ;;  %v18122_v40 = vld [vmem:[#allocation6_spill] sm:$0xff] }
0x15e8   :  { %v7667_v60 = vpop.permute.xlu0 %7666  ;;  %v7673_v49 = vpop.permute.xlu1 %7672  ;;  %v16993_v13 = vld [vmem:[#allocation2 + $0x10] sm:$0xff]  ;;  %v17019_v59 = vld [vmem:[#allocation2 + $0x28] sm:$0xff]  ;;  %v17076_v32 = vadd.f32 %v18119_v25, %v18108_v38 }
0x15e9   :  { %7708 = vst.msk [vmem:[#allocation2 + $0x30] sm:$0xff] %vm3613_vm12, %v7667_v60  ;;  %7711 = vst.msk [vmem:[#allocation2 + $0x48] sm:$0xff] %vm3613_vm12, %v7673_v49  ;;  %7798 = vadd.xlane.f32.xlu1 %v7782_v27  ;;  %v7744_v3 = vmul.f32 %v16962_v15, %v16993_v13  ;;  %v7747_v41 = vmul.f32 %v16962_v15, %v17019_v59  ;;  %v18120_v27 = vld [vmem:[#allocation64_spill] sm:$0xff] }
0x15ea   :  { %v17081_v60 = vadd.f32 %v18120_v27, %v18108_v38  ;;  %v7777_v14 = vmul.f32 %v16967_v10, %v17076_v32 }
0x15eb   :  { %v7784_v42 = vadd.f32 %v7768_v23, %v7744_v3  ;;  %v7787_v63 = vadd.f32 %v7771_v62, %v7747_v41  ;;  %v17090_v3 = vadd.f32 %v18121_v9, %v18108_v38 }
0x15ec   :  { %v7671_v53 = vpop.permute.xlu0 %7670  ;;  %v17017_v2 = vld [vmem:[#allocation2 + $0x20] sm:$0xff]  ;;  %v17042_v29 = vld [vmem:[#allocation2 + $0x38] sm:$0xff] }
0x15ed   :  { %7710 = vst.msk [vmem:[#allocation2 + $0x40] sm:$0xff] %vm3613_vm12, %v7671_v53  ;;  %7802 = vadd.xlane.f32.xlu0 %v7784_v42  ;;  %v7746_v4 = vmul.f32 %v16962_v15, %v17017_v2  ;;  %v7749_v30 = vmul.f32 %v16962_v15, %v17042_v29  ;;  %v7776_v53 = vmul.f32 %v16967_v10, %v17081_v60 }
0x15ee   :  { %v7779_v41 = vmul.f32 %v16967_v10, %v17090_v3 }
0x15ef   :  { %v7786_v7 = vadd.f32 %v7770_v37, %v7746_v4  ;;  %v7789_v6 = vadd.f32 %v7773_v46, %v7749_v30  ;;  %v17101_v37 = vadd.f32 %v18122_v40, %v18108_v38 }
0x15f0   :  { %v17040_v16 = vld [vmem:[#allocation2 + $0x30] sm:$0xff]  ;;  %v17058_v57 = vld [vmem:[#allocation2 + $0x48] sm:$0xff] }
0x15f1   :  { %7806 = vadd.xlane.f32.xlu1 %v7786_v7  ;;  %7804 = vadd.xlane.f32.xlu0 %v7785_v48  ;;  %v7748_v0 = vmul.f32 %v16962_v15, %v17040_v16  ;;  %v7751_v35 = vmul.f32 %v16962_v15, %v17058_v57  ;;  %v7778_v8 = vmul.f32 %v16967_v10, %v17101_v37 }
0x15f3   :  { %v7788_v24 = vadd.f32 %v7772_v61, %v7748_v0  ;;  %v7791_v44 = vadd.f32 %v7775_v28, %v7751_v35  ;;  %v18123_v0 = vld [vmem:[#allocation11_spill] sm:$0xff] }
0x15f4   :  { %v17056_v47 = vld [vmem:[#allocation2 + $0x40] sm:$0xff] }
0x15f5   :  { %7810 = vadd.xlane.f32.xlu1 %v7788_v24  ;;  %7808 = vadd.xlane.f32.xlu0 %v7787_v63  ;;  %v7750_v19 = vmul.f32 %v16962_v15, %v17056_v47  ;;  %v17118_v24 = vadd.f32 %v18123_v0, %v18108_v38 }
0x15f7   :  { %v7790_v31 = vadd.f32 %v7774_v1, %v7750_v19  ;;  %v7780_v56 = vmul.f32 %v16967_v10, %v17118_v24 }
0x15f9   :  { %7814 = vadd.xlane.f32.xlu1 %v7790_v31  ;;  %7812 = vadd.xlane.f32.xlu0 %v7789_v6  ;;  %v18124_v6 = vld [vmem:[#allocation14_spill] sm:$0xff] }
0x15fa   :  { %v7781_v35 = vmul.f32 %v16967_v10, %v18124_v6 }
0x15fd   :  { %7816 = vadd.xlane.f32.xlu0 %v7791_v44 }
0x160c   :  { %v7677_v50 = vpop.permute.xlu1 %7676 }
0x160d   :  { %7713 = vst.msk [vmem:[#allocation2 + $0x58] sm:$0xff] %vm3613_vm12, %v7677_v50  ;;  %v7675_v58 = vpop.permute.xlu0 %7674 }
0x160e   :  { %7712 = vst.msk [vmem:[#allocation2 + $0x50] sm:$0xff] %vm3613_vm12, %v7675_v58 }
0x1610   :  { %v7681_v26 = vpop.permute.xlu1 %7680 }
0x1611   :  { %7715 = vst.msk [vmem:[#allocation2 + $0x68] sm:$0xff] %vm3613_vm12, %v7681_v26  ;;  %v7679_v18 = vpop.permute.xlu0 %7678 }
0x1612   :  { %7714 = vst.msk [vmem:[#allocation2 + $0x60] sm:$0xff] %vm3613_vm12, %v7679_v18 }
0x1614   :  { %v6915_v49 = vpop.permute.xlu1 %6914  ;;  %v17084_v23 = vld [vmem:[#allocation2 + $0x58] sm:$0xff] }
0x1615   :  { %6947 = vst.msk [vmem:[#allocation2 + $0x78] sm:$0xff] %vm2842_vm9, %v6915_v49  ;;  %v7683_v42 = vpop.permute.xlu0 %7682  ;;  %v7753_v43 = vmul.f32 %v16962_v15, %v17084_v23  ;;  %v17095_v11 = vld [vmem:[#allocation2 + $0x50] sm:$0xff] }
0x1616   :  { %7716 = vst.msk [vmem:[#allocation2 + $0x70] sm:$0xff] %vm3613_vm12, %v7683_v42  ;;  %v7752_v5 = vmul.f32 %v16962_v15, %v17095_v11 }
0x1617   :  { %v7793_v4 = vadd.f32 %v7777_v14, %v7753_v43 }
0x1618   :  { %v7792_v7 = vadd.f32 %v7776_v53, %v7752_v5  ;;  %v17106_v48 = vld [vmem:[#allocation2 + $0x68] sm:$0xff] }
0x1619   :  { %7820 = vadd.xlane.f32.xlu0 %v7793_v4  ;;  %v7685_v62 = vpop.permute.xlu0 %7684  ;;  %v7755_v34 = vmul.f32 %v16962_v15, %v17106_v48  ;;  %v17112_v61 = vld [vmem:[#allocation2 + $0x60] sm:$0xff] }
0x161a   :  { %7717 = vst.msk [vmem:[#allocation2 + $0x78] sm:$0xff] %vm3613_vm12, %v7685_v62  ;;  %7818 = vadd.xlane.f32.xlu1 %v7792_v7  ;;  %v7754_v63 = vmul.f32 %v16962_v15, %v17112_v61 }
0x161b   :  { %v7795_v30 = vadd.f32 %v7779_v41, %v7755_v34 }
0x161c   :  { %v7794_v46 = vadd.f32 %v7778_v8, %v7754_v63 }
0x161d   :  { %7824 = vadd.xlane.f32.xlu0 %v7795_v30  ;;  %v17123_v1 = vld [vmem:[#allocation2 + $0x70] sm:$0xff] }
0x161e   :  { %7822 = vadd.xlane.f32.xlu1 %v7794_v46  ;;  %v7756_v19 = vmul.f32 %v16962_v15, %v17123_v1 }
0x1620   :  { %v7796_v38 = vadd.f32 %v7780_v56, %v7756_v19 }
0x1621   :  { %v17129_v31 = vld [vmem:[#allocation2 + $0x78] sm:$0xff] }
0x1622   :  { %7826 = vadd.xlane.f32.xlu1 %v7796_v38  ;;  %v7757_v28 = vmul.f32 %v16962_v15, %v17129_v31 }
0x1624   :  { %v7797_v44 = vadd.f32 %v7781_v35, %v7757_v28 }
0x1626   :  { %7828 = vadd.xlane.f32.xlu0 %v7797_v44 }
0x1672   :  { %v7801_v50 = vpop.xlane.xlu0 %7800 }
0x1673   :  { %v8958_v25 = vmul.f32 -1.442695, %v7801_v50 }
0x1676   :  { %v7799_v58 = vpop.xlane.xlu1 %7798 }
0x1677   :  { %v8957_v26 = vmul.f32 -1.442695, %v7799_v58 }
0x1679   :  { %12596 = vpow2.f32 %v8957_v26 }
0x167a   :  { %v7803_v18 = vpop.xlane.xlu0 %7802  ;;  %12598 = vpow2.f32 %v8958_v25 }
0x167b   :  { %v8959_v27 = vmul.f32 -1.442695, %v7803_v18 }
0x167d   :  { %12600 = vpow2.f32 %v8959_v27 }
0x167e   :  { %v7805_v49 = vpop.xlane.xlu0 %7804  ;;  %v7807_v14 = vpop.xlane.xlu1 %7806 }
0x167f   :  { %v8960_v9 = vmul.f32 -1.442695, %v7805_v49  ;;  %v8961_v42 = vmul.f32 -1.442695, %v7807_v14 }
0x1681   :  { %12602 = vpow2.f32 %v8960_v9 }
0x1682   :  { %v7809_v10 = vpop.xlane.xlu0 %7808  ;;  %12604 = vpow2.f32 %v8961_v42  ;;  %v7811_v40 = vpop.xlane.xlu1 %7810 }
0x1683   :  { %v8962_v43 = vmul.f32 -1.442695, %v7809_v10  ;;  %v12597_v53 = vpop.eup %12596  ;;  %v8963_v62 = vmul.f32 -1.442695, %v7811_v40 }
0x1684   :  { %v12599_v15 = vpop.eup %12598  ;;  %v7878_v4 = vadd.f32 1.0, %v12597_v53 }
0x1685   :  { %12606 = vpow2.f32 %v8962_v43  ;;  %v7879_v7 = vadd.f32 1.0, %v12599_v15 }
0x1686   :  { %v7813_v41 = vpop.xlane.xlu0 %7812  ;;  %12608 = vrcp.f32 %v7878_v4  ;;  %v7815_v30 = vpop.xlane.xlu1 %7814 }
0x1687   :  { %v12601_v5 = vpop.eup %12600  ;;  %v8964_v0 = vmul.f32 -1.442695, %v7813_v41  ;;  %12610 = vrcp.f32 %v7879_v7  ;;  %v8965_v19 = vmul.f32 -1.442695, %v7815_v30 }
0x1688   :  { %v7880_v34 = vadd.f32 1.0, %v12601_v5  ;;  %12612 = vpow2.f32 %v8963_v62 }
0x168a   :  { %12614 = vrcp.f32 %v7880_v34  ;;  %v7817_v56 = vpop.xlane.xlu0 %7816 }
0x168b   :  { %v12603_v8 = vpop.eup %12602  ;;  %12616 = vpow2.f32 %v8964_v0  ;;  %v8966_v28 = vmul.f32 -1.442695, %v7817_v56  ;;  %v18125_v56 = vld [vmem:[#allocation68_spill] sm:$0xff] }
0x168c   :  { %v7881_v63 = vadd.f32 1.0, %v12603_v8  ;;  %v12605_v46 = vpop.eup %12604 }
0x168d   :  { %v7882_v35 = vadd.f32 1.0, %v12605_v46 }
0x168e   :  { %12618 = vrcp.f32 %v7881_v63 }
0x168f   :  { %v12607_v38 = vpop.eup %12606  ;;  %12620 = vpow2.f32 %v8965_v19 }
0x1690   :  { %v7883_v44 = vadd.f32 1.0, %v12607_v38  ;;  %v12609_v50 = vpop.eup %12608  ;;  %12622 = vrcp.f32 %v7882_v35 }
0x1691   :  { %v12611_v58 = vpop.eup %12610  ;;  %12624 = vpow2.f32 %v8966_v28  ;;  %v7942_v18 = vsub.f32 1.0, %v12609_v50  ;;  %v7926_v5 = vmul.f32 %v12609_v50, %v16973_v54 }
0x1692   :  { %v12613_v26 = vpop.eup %12612  ;;  %12626 = vrcp.f32 %v7883_v44  ;;  %v7943_v14 = vsub.f32 1.0, %v12611_v58  ;;  %v7927_v62 = vmul.f32 %v12611_v58, %v16955_v52 }
0x1693   :  { %v7884_v9 = vadd.f32 1.0, %v12613_v26  ;;  %v7958_v10 = vmul.f32 %v7942_v18, %v16981_v21  ;;  %v18127_v26 = vld [vmem:[#allocation74_spill] sm:$0xff] }
0x1694   :  { %v12615_v25 = vpop.eup %12614  ;;  %v7959_v40 = vmul.f32 %v7943_v14, %v16969_v36  ;;  %v18128_v14 = vld [vmem:[#allocation41_spill] sm:$0xff] }
0x1695   :  { %v12617_v27 = vpop.eup %12616  ;;  %v7944_v42 = vsub.f32 1.0, %v12615_v25  ;;  %12628 = vrcp.f32 %v7884_v9  ;;  %v17140_v34 = vadd.f32 %v7958_v10, %v7926_v5  ;;  %v7928_v8 = vmul.f32 %v12615_v25, %v16987_v20 }
0x1696   :  { %v7885_v43 = vadd.f32 1.0, %v12617_v27  ;;  %v17144_v30 = vadd.f32 %v7959_v40, %v7927_v62 }
0x1697   :  { %v7960_v7 = vmul.f32 %v7944_v42, %v16993_v13  ;;  %v7990_v52 = vmul.f32 %v17140_v34, %v18125_v56 }
0x1698   :  { %v12619_v49 = vpop.eup %12618  ;;  %12630 = vrcp.f32 %v7885_v43 }
0x1699   :  { %v7945_v53 = vsub.f32 1.0, %v12619_v49  ;;  %v12621_v15 = vpop.eup %12620  ;;  %v17146_v54 = vadd.f32 %v7960_v7, %v7928_v8  ;;  %v7929_v46 = vmul.f32 %v12619_v49, %v17001_v39  ;;  %v8030_v18 = vmul.f32 %v7990_v52, %v7990_v52 }
0x169a   :  { %v12623_v4 = vpop.eup %12622  ;;  %v7886_v0 = vadd.f32 1.0, %v12621_v15 }
0x169b   :  { %v12625_v41 = vpop.eup %12624  ;;  %v7961_v21 = vmul.f32 %v7945_v53, %v16995_v33  ;;  %v7946_v36 = vsub.f32 1.0, %v12623_v4  ;;  %v18126_v33 = vld [vmem:[#allocation76_spill] sm:$0xff]  ;;  %v7992_v39 = vmul.f32 %v17146_v54, %v18127_v26  ;;  %v7930_v27 = vmul.f32 %v12623_v4, %v17005_v17 }
0x169c   :  { %v12627_v63 = vpop.eup %12626  ;;  %v7887_v13 = vadd.f32 1.0, %v12625_v41  ;;  %12632 = vrcp.f32 %v7886_v0  ;;  %v7991_v28 = vmul.f32 %v17144_v30, %v18126_v33  ;;  %v18130_v33 = vld [vmem:[#allocation66_spill] sm:$0xff] }
0x169d   :  { %v17151_v38 = vadd.f32 %v7961_v21, %v7929_v46  ;;  %v7947_v35 = vsub.f32 1.0, %v12627_v63  ;;  %v7962_v44 = vmul.f32 %v7946_v36, %v17017_v2  ;;  %v8032_v7 = vmul.f32 %v7992_v39, %v7992_v39  ;;  %v18129_v36 = vld [vmem:[#allocation60_spill] sm:$0xff] }
0x169e   :  { %12634 = vrcp.f32 %v7887_v13  ;;  %v8031_v53 = vmul.f32 %v7991_v28, %v7991_v28  ;;  %v8006_v15 = vadd.f32 %v7991_v28, %v7990_v52  ;;  %v7931_v17 = vmul.f32 %v12627_v63, %v17015_v12 }
0x169f   :  { %v12629_v25 = vpop.eup %12628  ;;  %v7993_v9 = vmul.f32 %v17151_v38, %v18128_v14  ;;  %v7963_v42 = vmul.f32 %v7947_v35, %v17019_v59  ;;  %v17162_v40 = vadd.f32 %v7962_v44, %v7930_v27 }
0x16a0   :  { %v7948_v41 = vsub.f32 1.0, %v12629_v25  ;;  %v8046_v4 = vadd.f32 %v8031_v53, %v8030_v18  ;;  %v8007_v62 = vadd.f32 %v8006_v15, %v7992_v39 }
0x16a1   :  { %v8033_v8 = vmul.f32 %v7993_v9, %v7993_v9  ;;  %v17165_v21 = vadd.f32 %v7963_v42, %v7931_v17  ;;  %v7994_v46 = vmul.f32 %v17162_v40, %v18129_v36 }
0x16a2   :  { %v12631_v43 = vpop.eup %12630  ;;  %v8047_v52 = vadd.f32 %v8046_v4, %v8032_v7  ;;  %v7964_v35 = vmul.f32 %v7948_v41, %v17040_v16  ;;  %v18131_v7 = vld [vmem:[#allocation20_spill] sm:$0xff] }
0x16a3   :  { %v7949_v59 = vsub.f32 1.0, %v12631_v43  ;;  %v7995_v28 = vmul.f32 %v17165_v21, %v18130_v33  ;;  %v8034_v26 = vmul.f32 %v7994_v46, %v7994_v46  ;;  %v7933_v16 = vmul.f32 %v12631_v43, %v17038_v55 }
0x16a4   :  { %v8048_v63 = vadd.f32 %v8047_v52, %v8033_v8  ;;  %v18132_v8 = vld [vmem:[#allocation69_spill] sm:$0xff] }
0x16a5   :  { %v7965_v44 = vmul.f32 %v7949_v59, %v17042_v29 }
0x16a6   :  { %v7821_v19 = vpop.xlane.xlu0 %7820  ;;  %v12633_v56 = vpop.eup %12632 }
0x16a7   :  { %v7819_v20 = vpop.xlane.xlu1 %7818  ;;  %v8968_v50 = vmul.f32 -1.442695, %v7821_v19  ;;  %v8008_v19 = vadd.f32 %v8007_v62, %v7993_v9  ;;  %v7950_v39 = vsub.f32 1.0, %v12633_v56  ;;  %v17177_v53 = vadd.f32 %v7965_v44, %v7933_v16 }
0x16a8   :  { %v8967_v58 = vmul.f32 -1.442695, %v7819_v20  ;;  %v12635_v12 = vpop.eup %12634  ;;  %v7932_v20 = vmul.f32 %v12629_v25, %v17027_v51  ;;  %v8049_v25 = vadd.f32 %v8048_v63, %v8034_v26  ;;  %v7934_v43 = vmul.f32 %v12633_v56, %v17048_v22  ;;  %v18133_v56 = vld [vmem:[#allocation85_spill] sm:$0xff] }
0x16a9   :  { %12636 = vpow2.f32 %v8968_v50  ;;  %v8009_v14 = vadd.f32 %v8008_v19, %v7994_v46  ;;  %v7951_v42 = vsub.f32 1.0, %v12635_v12  ;;  %v7966_v15 = vmul.f32 %v7950_v39, %v17056_v47 }
0x16aa   :  { %v7825_v49 = vpop.xlane.xlu0 %7824  ;;  %12638 = vpow2.f32 %v8967_v58  ;;  %v7997_v59 = vmul.f32 %v17177_v53, %v18132_v8  ;;  %v7935_v47 = vmul.f32 %v12635_v12, %v17064_v45 }
0x16ab   :  { %v8970_v10 = vmul.f32 -1.442695, %v7825_v49  ;;  %v7823_v2 = vpop.xlane.xlu1 %7822  ;;  %v17174_v49 = vadd.f32 %v7964_v35, %v7932_v20  ;;  %v8010_v17 = vadd.f32 %v8009_v14, %v7995_v28  ;;  %v7967_v4 = vmul.f32 %v7951_v42, %v17058_v57 }
0x16ac   :  { %v8969_v5 = vmul.f32 -1.442695, %v7823_v2  ;;  %v8035_v2 = vmul.f32 %v7995_v28, %v7995_v28  ;;  %v17186_v36 = vadd.f32 %v7966_v15, %v7934_v43  ;;  %v8037_v35 = vmul.f32 %v7997_v59, %v7997_v59  ;;  %v18136_v43 = vld [vmem:[#allocation71_spill] sm:$0xff] }
0x16ad   :  { %12640 = vpow2.f32 %v8970_v10  ;;  %v7996_v41 = vmul.f32 %v17174_v49, %v18131_v7  ;;  %v17189_v19 = vadd.f32 %v7967_v4, %v7935_v47  ;;  %v18137_v47 = vld [vmem:[#allocation26_spill] sm:$0xff] }
0x16ae   :  { %12642 = vpow2.f32 %v8969_v5  ;;  %v8050_v62 = vadd.f32 %v8049_v25, %v8035_v2  ;;  %v7998_v63 = vmul.f32 %v17186_v36, %v18133_v56 }
0x16af   :  { %v7827_v0 = vpop.xlane.xlu1 %7826  ;;  %v8036_v46 = vmul.f32 %v7996_v41, %v7996_v41  ;;  %v8011_v52 = vadd.f32 %v8010_v17, %v7996_v41 }
0x16b0   :  { %v8971_v13 = vmul.f32 -1.442695, %v7827_v0  ;;  %v8038_v14 = vmul.f32 %v7998_v63, %v7998_v63 }
0x16b1   :  { %v8051_v22 = vadd.f32 %v8050_v62, %v8036_v46  ;;  %v8012_v28 = vadd.f32 %v8011_v52, %v7997_v59  ;;  %v18138_v52 = vld [vmem:[#allocation73_spill] sm:$0xff] }
0x16b2   :  { %12644 = vpow2.f32 %v8971_v13 }
0x16b3   :  { %v7829_v50 = vpop.xlane.xlu0 %7828  ;;  %v12637_v58 = vpop.eup %12636  ;;  %v8052_v26 = vadd.f32 %v8051_v22, %v8037_v35 }
0x16b4   :  { %v8972_v18 = vmul.f32 -1.442695, %v7829_v50  ;;  %v12639_v27 = vpop.eup %12638  ;;  %v7889_v9 = vadd.f32 1.0, %v12637_v58  ;;  %v18134_v58 = vld [vmem:[#allocation70_spill] sm:$0xff] }
0x16b5   :  { %v7888_v10 = vadd.f32 1.0, %v12639_v27  ;;  %v7999_v45 = vmul.f32 %v17189_v19, %v18134_v58  ;;  %v8053_v7 = vadd.f32 %v8052_v26, %v8038_v14  ;;  %v18140_v14 = vld [vmem:[#allocation75_spill] sm:$0xff] }
0x16b6   :  { %12646 = vpow2.f32 %v8972_v18 }
0x16b7   :  { %v12641_v51 = vpop.eup %12640  ;;  %12648 = vrcp.f32 %v7889_v9 }
0x16b8   :  { %v12643_v29 = vpop.eup %12642  ;;  %12650 = vrcp.f32 %v7888_v10  ;;  %v7891_v5 = vadd.f32 1.0, %v12641_v51  ;;  %v8013_v51 = vadd.f32 %v8012_v28, %v7998_v63 }
0x16b9   :  { %v7890_v55 = vadd.f32 1.0, %v12643_v29  ;;  %v8039_v29 = vmul.f32 %v7999_v45, %v7999_v45 }
0x16ba   :  { %12652 = vrcp.f32 %v7891_v5  ;;  %v8014_v62 = vadd.f32 %v8013_v51, %v7999_v45 }
0x16bb   :  { %12654 = vrcp.f32 %v7890_v55 }
0x16bc   :  { %v12645_v0 = vpop.eup %12644 }
0x16bd   :  { %v7892_v13 = vadd.f32 1.0, %v12645_v0  ;;  %v8054_v0 = vadd.f32 %v8053_v7, %v8039_v29  ;;  %v8979_v29 = vld [vmem:[%s17511_s11 + $0x90] sm:$0xff] }
0x16bf   :  { %12656 = vrcp.f32 %v7892_v13 }
0x16c0   :  { %v12647_v57 = vpop.eup %12646 }
0x16c1   :  { %v12649_v20 = vpop.eup %12648  ;;  %v7893_v33 = vadd.f32 1.0, %v12647_v57 }
0x16c2   :  { %v12651_v44 = vpop.eup %12650  ;;  %v7953_v50 = vsub.f32 1.0, %v12649_v20  ;;  %v7937_v18 = vmul.f32 %v12649_v20, %v17076_v32 }
0x16c3   :  { %v7952_v12 = vsub.f32 1.0, %v12651_v44  ;;  %12658 = vrcp.f32 %v7893_v33  ;;  %v7936_v9 = vmul.f32 %v12651_v44, %v17081_v60 }
0x16c4   :  { %v12653_v39 = vpop.eup %12652  ;;  %v7969_v27 = vmul.f32 %v7953_v50, %v17084_v23  ;;  %v18139_v50 = vld [vmem:[#allocation31_spill] sm:$0xff] }
0x16c5   :  { %v12655_v16 = vpop.eup %12654  ;;  %v7968_v42 = vmul.f32 %v7952_v12, %v17095_v11  ;;  %v7955_v10 = vsub.f32 1.0, %v12653_v39  ;;  %v7939_v5 = vmul.f32 %v12653_v39, %v17090_v3  ;;  %v18135_v11 = vld [vmem:[#allocation54_spill] sm:$0xff] }
0x16c6   :  { %v7954_v25 = vsub.f32 1.0, %v12655_v16  ;;  %v17199_v2 = vadd.f32 %v7969_v27, %v7937_v18  ;;  %v7938_v23 = vmul.f32 %v12655_v16, %v17101_v37 }
0x16c7   :  { %v17201_v15 = vadd.f32 %v7968_v42, %v7936_v9  ;;  %v7971_v32 = vmul.f32 %v7955_v10, %v17106_v48 }
0x16c8   :  { %v7970_v41 = vmul.f32 %v7954_v25, %v17112_v61  ;;  %v8001_v4 = vmul.f32 %v17199_v2, %v18136_v43  ;;  %v8978_v25 = vld [vmem:[%s17511_s11 + $0x88] sm:$0xff] }
0x16c9   :  { %v12657_v60 = vpop.eup %12656  ;;  %v17207_v17 = vadd.f32 %v7971_v32, %v7939_v5  ;;  %v8000_v55 = vmul.f32 %v17201_v15, %v18135_v11  ;;  %v8980_v32 = vld [vmem:[%s17511_s11 + $0x98] sm:$0xff] }
0x16ca   :  { %v7956_v8 = vsub.f32 1.0, %v12657_v60  ;;  %v17213_v59 = vadd.f32 %v7970_v41, %v7938_v23  ;;  %v7940_v37 = vmul.f32 %v12657_v60, %v17118_v24  ;;  %v8041_v57 = vmul.f32 %v8001_v4, %v8001_v4  ;;  %v8981_v23 = vld [vmem:[%s17511_s11 + $0xa0] sm:$0xff]  ;;  %v8982_v41 = vld [vmem:[%s17511_s11 + $0xa8] sm:$0xff] }
0x16cb   :  { %v8015_v3 = vadd.f32 %v8014_v62, %v8000_v55  ;;  %v8040_v48 = vmul.f32 %v8000_v55, %v8000_v55  ;;  %v8003_v35 = vmul.f32 %v17207_v17, %v18138_v52  ;;  %v11476_v7 = vpack.c.bf16 %v8980_v32, %v8979_v29  ;;  %v8984_v52 = vld [vmem:[%s17511_s11 + $0xb8] sm:$0xff] }
0x16cc   :  { %v7972_v61 = vmul.f32 %v7956_v8, %v17123_v1  ;;  %v8002_v46 = vmul.f32 %v17213_v59, %v18137_v47  ;;  %v11480_v60 = vpack.c.bf16 %v8982_v41, %v8981_v23 }
0x16cd   :  { %v12659_v13 = vpop.eup %12658  ;;  %v8016_v22 = vadd.f32 %v8015_v3, %v8001_v4  ;;  %v8055_v56 = vadd.f32 %v8054_v0, %v8040_v48  ;;  %v8043_v12 = vmul.f32 %v8003_v35, %v8003_v35 }
0x16ce   :  { %v7957_v63 = vsub.f32 1.0, %v12659_v13  ;;  %v17221_v20 = vadd.f32 %v7972_v61, %v7940_v37  ;;  %v8042_v33 = vmul.f32 %v8002_v46, %v8002_v46  ;;  %v7941_v24 = vmul.f32 %v12659_v13, %v18124_v6  ;;  %v8983_v13 = vld [vmem:[%s17511_s11 + $0xb0] sm:$0xff] }
0x16cf   :  { %v8017_v28 = vadd.f32 %v8016_v22, %v8002_v46  ;;  %v8056_v44 = vadd.f32 %v8055_v56, %v8041_v57  ;;  %v11484_v57 = vpack.c.bf16 %v8984_v52, %v8983_v13  ;;  %v8986_v56 = vld [vmem:[%s17511_s11 + $0xc8] sm:$0xff] }
0x16d0   :  { %v7973_v1 = vmul.f32 %v7957_v63, %v17129_v31  ;;  %v8004_v58 = vmul.f32 %v17221_v20, %v18139_v50  ;;  %v8977_v31 = vld [vmem:[%s17511_s11 + $0x80] sm:$0xff] }
0x16d1   :  { %v8018_v45 = vadd.f32 %v8017_v28, %v8003_v35  ;;  %v8057_v26 = vadd.f32 %v8056_v44, %v8042_v33  ;;  %v11472_v5 = vpack.c.bf16 %v8978_v25, %v8977_v31  ;;  %v8985_v35 = vld [vmem:[%s17511_s11 + $0xc0] sm:$0xff]  ;;  %v8987_v33 = vld [vmem:[%s17511_s11 + $0xd0] sm:$0xff]  ;;  %v8988_v28 = vld [vmem:[%s17511_s11 + $0xd8] sm:$0xff] }
0x16d2   :  { %v17227_v39 = vadd.f32 %v7973_v1, %v7941_v24  ;;  %v8044_v18 = vmul.f32 %v8004_v58, %v8004_v58  ;;  %v11488_v63 = vpack.c.bf16 %v8986_v56, %v8985_v35  ;;  %v11492_v44 = vpack.c.bf16 %v8988_v28, %v8987_v33  ;;  %v8989_v24 = vld [vmem:[%s17511_s11 + $0xe0] sm:$0xff]  ;;  %v8990_v1 = vld [vmem:[%s17511_s11 + $0xe8] sm:$0xff] }
0x16d3   :  { %v8058_v27 = vadd.f32 %v8057_v26, %v8043_v12  ;;  %v8019_v9 = vadd.f32 %v8018_v45, %v8004_v58  ;;  %11473 = vmatprep.subr.bf16.mxu0 %v11472_v5  ;;  %v11496_v50 = vpack.c.bf16 %v8990_v1, %v8989_v24  ;;  %v8991_v58 = vld [vmem:[%s17511_s11 + $0xf0] sm:$0xff]  ;;  %v8992_v45 = vld [vmem:[%s17511_s11 + $0xf8] sm:$0xff]  ;;  %v8370_v26 = vld [vmem:[%s17515_s13] sm:$0xff] }
0x16d4   :  { %v8005_v16 = vmul.f32 %v17227_v39, %v18140_v14  ;;  %11475 = vmatpush3.bf16.msra.mxu0 %v11472_v5  ;;  %v11500_v12 = vpack.c.bf16 %v8992_v45, %v8991_v58 }
0x16d5   :  { %v8059_v51 = vadd.f32 %v8058_v27, %v8044_v18  ;;  %11477 = vmatprep.subr.bf16.mxu0 %v11476_v7  ;;  %v8371_v18 = vld [vmem:[%s17515_s13 + $0x8] sm:$0xff]  ;;  %v8372_v27 = vld [vmem:[%s17515_s13 + $0x10] sm:$0xff] }
0x16d6   :  { %v8020_v42 = vadd.f32 %v8019_v9, %v8005_v16  ;;  %v8045_v10 = vmul.f32 %v8005_v16, %v8005_v16  ;;  %v17288_v14 = vpack.c.bf16 %v8371_v18, %v8370_v26  ;;  %v8373_v16 = vld [vmem:[%s17515_s13 + $0x18] sm:$0xff] }
0x16d7   :  { %v17294_v9 = vpack.c.bf16 %v8373_v16, %v8372_v27 }
0x16d8   :  { %8021 = vadd.xlane.f32.xlu1 %v8020_v42  ;;  %v8060_v6 = vadd.f32 %v8059_v51, %v8045_v10  ;;  %11479 = vmatpush3.bf16.msra.mxu0 %v11476_v7 }
0x16d9   :  { %11481 = vmatprep.subr.bf16.mxu0 %v11480_v60  ;;  %11512 = vmatprep.subr.bf16.mxu1 %v17288_v14 }
0x16da   :  { %8061 = vadd.xlane.f32.xlu0 %v8060_v6  ;;  %11514 = vmatpush3.bf16.msra.mxu1 %v17288_v14 }
0x16db   :  { %11513 = vmatprep.subr.bf16.mxu1 %v17294_v9 }
0x16dc   :  { %11483 = vmatpush3.bf16.msra.mxu0 %v11480_v60  ;;  %v17314_v60 = vld [vmem:[%s17512_s9 + $0x1] ss:$0 sm:$0xff] }
0x16dd   :  { %11485 = vmatprep.subr.bf16.mxu0 %v11484_v57 }
0x16de   :  { %11515 = vmatpush3.bf16.msra.mxu1 %v17294_v9 }
0x16e0   :  { %11487 = vmatpush3.bf16.msra.mxu0 %v11484_v57 }
0x16e1   :  { %11489 = vmatprep.subr.bf16.mxu0 %v11488_v63 }
0x16e4   :  { %11491 = vmatpush3.bf16.msra.mxu0 %v11488_v63 }
0x16e5   :  { %11493 = vmatprep.subr.bf16.mxu0 %v11492_v44 }
0x16e8   :  { %11495 = vmatpush3.bf16.msra.mxu0 %v11492_v44 }
0x16e9   :  { %11497 = vmatprep.subr.bf16.mxu0 %v11496_v50 }
0x16ec   :  { %11499 = vmatpush3.bf16.msra.mxu0 %v11496_v50 }
0x16ed   :  { %11501 = vmatprep.subr.bf16.mxu0 %v11500_v12 }
0x16f0   :  { %11503 = vmatpush3.bf16.msra.mxu0 %v11500_v12 }
0x16f1   :  { %11505 = vmatprep.subr.bf16.mxu0 %v17288_v14 }
0x1765   :  { %v8022_v11 = vpop.xlane.xlu1 %8021 }
0x1766   :  { %v8023_v55 = vrot.slane %v8022_v11, 4 }
0x1767   :  { %v8062_v43 = vpop.xlane.xlu0 %8061 }
0x1768   :  { %v8024_v4 = vadd.f32 %v8023_v55, %v8022_v11  ;;  %v8063_v62 = vrot.slane %v8062_v43, 4 }
0x176a   :  { %v8025_v8 = vrot.slane %v8024_v4, 2  ;;  %v8064_v3 = vadd.f32 %v8063_v62, %v8062_v43 }
0x176c   :  { %v8026_v48 = vadd.f32 %v8025_v8, %v8024_v4  ;;  %v8065_v0 = vrot.slane %v8064_v3, 2 }
0x176e   :  { %v8066_v37 = vadd.f32 %v8065_v0, %v8064_v3  ;;  %v8027_v61 = vrot.slane %v8026_v48, 1 }
0x1770   :  { %v8028_v47 = vadd.f32 %v8027_v61, %v8026_v48  ;;  %v8067_v46 = vrot.slane %v8066_v37, 1 }
0x1772   :  { %11522 = vpush %v8028_v47  ;;  %v8068_v22 = vadd.f32 %v8067_v46, %v8066_v37 }
0x1774   :  { %11524 = vpush %v8068_v22 }
0x17a3   :  { %s11523_s30 = spop %11522 }
0x17a4   :  { %s8070_s16 = smul.f32 0.00048828125, %s11523_s30 }
0x17a5   :  { %s11525_s17 = spop %11524 }
0x17a6   :  { %s8072_s1 = smul.f32 %s8070_s16, %s8070_s16  ;;  %v17301_v5 = vstv %s8070_s16 }
0x17a7   :  { %s8071_s23 = smul.f32 0.00048828125, %s11525_s17  ;;  %v8085_v32 = vsub.f32 %v17140_v34, %v17301_v5  ;;  %v8086_v7 = vsub.f32 %v17144_v30, %v17301_v5  ;;  %v8087_v23 = vsub.f32 %v17146_v54, %v17301_v5  ;;  %v8088_v11 = vsub.f32 %v17151_v38, %v17301_v5  ;;  %v17326_v54 = vld [vmem:[%s17513_s10 + $0x1] ss:$0 sm:$0xff] }
0x17a8   :  { %v8089_v30 = vsub.f32 %v17162_v40, %v17301_v5  ;;  %v8090_v48 = vsub.f32 %v17165_v21, %v17301_v5  ;;  %v8091_v37 = vsub.f32 %v17174_v49, %v17301_v5  ;;  %v8092_v21 = vsub.f32 %v17177_v53, %v17301_v5 }
0x17a9   :  { %s8073_s24 = ssub.f32 %s8071_s23, %s8072_s1  ;;  %v8093_v35 = vsub.f32 %v17186_v36, %v17301_v5  ;;  %v8094_v53 = vsub.f32 %v17189_v19, %v17301_v5  ;;  %v8095_v36 = vsub.f32 %v17201_v15, %v17301_v5  ;;  %v8096_v19 = vsub.f32 %v17199_v2, %v17301_v5 }
0x17aa   :  { %v8097_v15 = vsub.f32 %v17213_v59, %v17301_v5  ;;  %v8098_v2 = vsub.f32 %v17207_v17, %v17301_v5  ;;  %v8099_v59 = vsub.f32 %v17221_v20, %v17301_v5  ;;  %v8100_v17 = vsub.f32 %v17227_v39, %v17301_v5  ;;  %v17401_v5 = vld [vmem:[%s17514_s12 + $0x1] ss:$0 sm:$0xff] }
0x17ab   :  { %s8074_s13 = smax.f32 %s12717_s25, %s8073_s24 }
0x17ac   :  { %v8075_v42 = vstv %s8074_s13 }
0x17ad   :  { %12660 = vrsqrt.f32 %v8075_v42  ;;  %vm8078_vm6 = vcmp.eq.f32.partialorder %v8075_v42, inf  ;;  %v8081_v6 = vand.u32 2147483648, %v8075_v42  ;;  %vm8080_vm9 = vcmp.eq.f32.partialorder %v8075_v42, 0.0 }
0x17b7   :  { %v12661_v10 = vpop.eup %12660 }
0x17b8   :  { %v8077_v51 = vmul.f32 %v12661_v10, %v8075_v42 }
0x17ba   :  { %v8079_v31 = vsel %vm8078_vm6, %v8075_v42, %v8077_v51 }
0x17bb   :  { %v8082_v25 = vsel %vm8080_vm9, %v8081_v6, %v8079_v31 }
0x17bc   :  { %11526 = vpush %v8082_v25 }
0x17ed   :  { %s11527_s22 = spop %11526 }
0x17ee   :  { %s8101_s7 = sadd.f32 1e-05, %s11527_s22 }
0x17f0   :  { %v8102_v29 = vstv %s8101_s7 }
0x17f1   :  { %12662 = vrcp.f32 %v8102_v29 }
0x17fb   :  { %v17309_v41 = vpop.eup %12662 }
0x17fc   :  { %v8104_v55 = vmul.f32 %v17309_v41, %v8085_v32  ;;  %v8105_v34 = vmul.f32 %v17309_v41, %v8086_v7  ;;  %v8106_v43 = vmul.f32 %v17309_v41, %v8087_v23  ;;  %v8107_v4 = vmul.f32 %v17309_v41, %v8088_v11 }
0x17fd   :  { %v8108_v3 = vmul.f32 %v17309_v41, %v8089_v30  ;;  %v8109_v47 = vmul.f32 %v17309_v41, %v8090_v48  ;;  %v8110_v52 = vmul.f32 %v17309_v41, %v8091_v37  ;;  %v8111_v57 = vmul.f32 %v17309_v41, %v8092_v21  ;;  %v18141_v30 = vld [vmem:[#allocation77_spill] sm:$0xff] }
0x17fe   :  { %v8128_v62 = vmul.f32 %v17314_v60, %v8104_v55  ;;  %v8129_v38 = vmul.f32 %v17314_v60, %v8105_v34  ;;  %v8130_v8 = vmul.f32 %v17314_v60, %v8106_v43  ;;  %v8131_v61 = vmul.f32 %v17314_v60, %v8107_v4  ;;  %v18142_v4 = vld [vmem:[#allocation36_spill] sm:$0xff] }
0x17ff   :  { %v8132_v13 = vmul.f32 %v17314_v60, %v8108_v3  ;;  %v8133_v22 = vmul.f32 %v17314_v60, %v8109_v47  ;;  %v8134_v63 = vmul.f32 %v17314_v60, %v8110_v52  ;;  %v8112_v33 = vmul.f32 %v17309_v41, %v8093_v35 }
0x1800   :  { %v8152_v40 = vadd.f32 %v17326_v54, %v8128_v62  ;;  %v8153_v0 = vadd.f32 %v17326_v54, %v8129_v38  ;;  %v8154_v46 = vadd.f32 %v17326_v54, %v8130_v8  ;;  %v8155_v49 = vadd.f32 %v17326_v54, %v8131_v61  ;;  %v18144_v61 = vld [vmem:[#allocation42_spill] sm:$0xff] }
0x1801   :  { %v8156_v56 = vadd.f32 %v17326_v54, %v8132_v13  ;;  %v8157_v28 = vadd.f32 %v17326_v54, %v8133_v22  ;;  %v8135_v44 = vmul.f32 %v17314_v60, %v8111_v57  ;;  %v8113_v24 = vmul.f32 %v17309_v41, %v8094_v53  ;;  %v18145_v22 = vld [vmem:[#allocation55_spill] sm:$0xff] }
0x1802   :  { %10680 = vmatprep.mubr.f32.mxu0 %v8152_v40  ;;  %v8158_v1 = vadd.f32 %v17326_v54, %v8134_v63  ;;  %v8136_v50 = vmul.f32 %v17314_v60, %v8112_v33  ;;  %v8114_v58 = vmul.f32 %v17309_v41, %v8095_v36  ;;  %v8115_v26 = vmul.f32 %v17309_v41, %v8096_v19 }
0x1803   :  { %10681 = vmatmul.mubr.f32.vlgmr.msra.gmra.mrb[208].mxu0 %v8153_v0  ;;  %v8159_v45 = vadd.f32 %v17326_v54, %v8135_v44  ;;  %v8137_v12 = vmul.f32 %v17314_v60, %v8113_v24  ;;  %v8117_v42 = vmul.f32 %v17309_v41, %v8098_v2  ;;  %v8118_v6 = vmul.f32 %v17309_v41, %v8099_v59  ;;  %v18143_v0 = vld [vmem:[#allocation78_spill] sm:$0xff] }
0x1804   :  { %10683 = vmatprep.mubr.f32.mxu0 %v8154_v46  ;;  %11507 = vmatpush3.bf16.msra.mxu0 %v17288_v14  ;;  %v8160_v18 = vadd.f32 %v17326_v54, %v8136_v50  ;;  %v8138_v27 = vmul.f32 %v17314_v60, %v8114_v58  ;;  %v8116_v14 = vmul.f32 %v17309_v41, %v8097_v15  ;;  %v18148_v58 = vld [vmem:[#allocation61_spill] sm:$0xff]  ;;  %v18150_v59 = vld [vmem:[#allocation22_spill] sm:$0xff] }
0x1805   :  { %11509 = vmatprep.subr.bf16.mxu0 %v17294_v9  ;;  %v8161_v16 = vadd.f32 %v17326_v54, %v8137_v12  ;;  %v8141_v20 = vmul.f32 %v17314_v60, %v8117_v42  ;;  %v8119_v25 = vmul.f32 %v17309_v41, %v8100_v17  ;;  %v8142_v32 = vmul.f32 %v17314_v60, %v8118_v6 }
0x1806   :  { %v8162_v10 = vadd.f32 %v17326_v54, %v8138_v27  ;;  %v8140_v51 = vmul.f32 %v17314_v60, %v8116_v14  ;;  %v18149_v14 = vld [vmem:[#allocation40_spill] sm:$0xff] }
0x1807   :  { %10684 = vmatmul.mubr.f32.gmra.mrb[210].mxu0 %v8155_v49  ;;  %v8165_v7 = vadd.f32 %v17326_v54, %v8141_v20  ;;  %v8143_v23 = vmul.f32 %v17314_v60, %v8119_v25  ;;  %v8166_v11 = vadd.f32 %v17326_v54, %v8142_v32  ;;  %v18152_v25 = vld [vmem:[#allocation28_spill] sm:$0xff] }
0x1808   :  { %10686 = vmatprep.mubr.f32.mxu0 %v8156_v56  ;;  %11511 = vmatpush3.bf16.msra.mxu0 %v17294_v9  ;;  %v8139_v9 = vmul.f32 %v17314_v60, %v8115_v26  ;;  %v8164_v29 = vadd.f32 %v17326_v54, %v8140_v51  ;;  %v18146_v56 = vld [vmem:[#allocation48_spill] sm:$0xff] }
0x1809   :  { %v8167_v39 = vadd.f32 %v17326_v54, %v8143_v23 }
0x180a   :  { %v8163_v31 = vadd.f32 %v17326_v54, %v8139_v9 }
0x180b   :  { %10687 = vmatmul.mubr.f32.gmra.mrb[212].mxu0 %v8157_v28 }
0x180c   :  { %10689 = vmatprep.mubr.f32.mxu0 %v8158_v1  ;;  %v18147_v1 = vld [vmem:[#allocation30_spill] sm:$0xff] }
0x180f   :  { %10690 = vmatmul.mubr.f32.gmra.mrb[214].mxu0 %v8159_v45 }
0x1810   :  { %10692 = vmatprep.mubr.f32.mxu0 %v8160_v18 }
0x1813   :  { %10693 = vmatmul.mubr.f32.gmra.mrb[216].mxu0 %v8161_v16 }
0x1814   :  { %10695 = vmatprep.mubr.f32.mxu0 %v8162_v10 }
0x1817   :  { %10696 = vmatmul.mubr.f32.gmra.mrb[218].mxu0 %v8163_v31  ;;  %v18151_v31 = vld [vmem:[#allocation33_spill] sm:$0xff] }
0x1818   :  { %10698 = vmatprep.mubr.f32.mxu0 %v8164_v29 }
0x181b   :  { %10699 = vmatmul.mubr.f32.gmra.mrb[220].mxu0 %v8165_v7 }
0x181c   :  { %10701 = vmatprep.mubr.f32.mxu0 %v8166_v11 }
0x181f   :  { %10702 = vmatmul.mubr.f32.gmra.mrb[222].mxu0 %v8167_v39 }
0x18d6   :  { %v10682_v41 = vpop.f32.mrb[208].mxu0 }
0x18d7   :  { %v8265_v55 = vadd.f32 %v10682_v41, %v17401_v5  ;;  %v8259_v34 = vpop.f32.mrb[209].mxu0 }
0x18d8   :  { %v8260_v43 = vadd.f32 %v17401_v5, %v8259_v34 }
0x18d9   :  { %v8339_v60 = vadd.f32 %v8265_v55, %v18141_v30  ;;  %v18153_v55 = vld [vmem:[#allocation44_spill] sm:$0xff] }
0x18da   :  { %v8338_v62 = vadd.f32 %v8260_v43, %v18142_v4  ;;  %v10685_v38 = vpop.f32.mrb[210].mxu0  ;;  %v18154_v43 = vld [vmem:[#allocation38_spill] sm:$0xff] }
0x18db   :  { %v8275_v8 = vadd.f32 %v10685_v38, %v17401_v5  ;;  %v8269_v54 = vpop.f32.mrb[211].mxu0  ;;  %v8355_v40 = vmax.f32 %v8339_v60, 0.0 }
0x18dc   :  { %v8354_v3 = vmax.f32 %v8338_v62, 0.0  ;;  %v8270_v48 = vadd.f32 %v17401_v5, %v8269_v54 }
0x18dd   :  { %v8341_v37 = vadd.f32 %v8275_v8, %v18143_v0 }
0x18de   :  { %v8340_v47 = vadd.f32 %v8270_v48, %v18144_v61  ;;  %v10688_v46 = vpop.f32.mrb[212].mxu0  ;;  %10712 = vmatprep.mubr.msk.f32.mxu0 %vm304_vm0, %v8354_v3  ;;  %v18155_v3 = vld [vmem:[#allocation57_spill] sm:$0xff] }
0x18df   :  { %v8285_v13 = vadd.f32 %v10688_v46, %v17401_v5  ;;  %v8279_v52 = vpop.f32.mrb[213].mxu0  ;;  %10713 = vmatmul.mubr.msk.f32.vlgmr.msra.gmra.mrb[224].mxu0 %vm304_vm0, %v8355_v40  ;;  %v8357_v49 = vmax.f32 %v8341_v37, 0.0  ;;  %v18156_v40 = vld [vmem:[#allocation50_spill] sm:$0xff] }
0x18e0   :  { %v8356_v21 = vmax.f32 %v8340_v47, 0.0  ;;  %v8280_v35 = vadd.f32 %v17401_v5, %v8279_v52  ;;  %v8995_v47 = vld [vmem:[%s17516_s14] ss:$0 sm:$0xff] }
0x18e1   :  { %v8343_v57 = vadd.f32 %v8285_v13, %v18145_v22 }
0x18e2   :  { %v8342_v63 = vadd.f32 %v8280_v35, %v18146_v56  ;;  %v10691_v33 = vpop.f32.mrb[214].mxu0  ;;  %10715 = vmatprep.mubr.msk.f32.mxu1 %vm304_vm0, %v8356_v21 }
0x18e3   :  { %v8295_v53 = vadd.f32 %v10691_v33, %v17401_v5  ;;  %v8289_v36 = vpop.f32.mrb[215].mxu0  ;;  %10716 = vmatmul.mubr.msk.f32.vlgmr.msra.gmra.mrb[208].mxu1 %vm304_vm0, %v8357_v49  ;;  %v8359_v24 = vmax.f32 %v8343_v57, 0.0 }
0x18e4   :  { %v8358_v28 = vmax.f32 %v8342_v63, 0.0  ;;  %v8290_v44 = vadd.f32 %v17401_v5, %v8289_v36 }
0x18e5   :  { %v8345_v50 = vadd.f32 %v8295_v53, %v18147_v1 }
0x18e6   :  { %v8344_v19 = vadd.f32 %v8290_v44, %v18148_v58  ;;  %v10694_v15 = vpop.f32.mrb[216].mxu0  ;;  %10718 = vmatprep.mubr.msk.f32.mxu1 %vm304_vm0, %v8358_v28 }
0x18e7   :  { %v8305_v45 = vadd.f32 %v10694_v15, %v17401_v5  ;;  %v8299_v12 = vpop.f32.mrb[217].mxu0  ;;  %10719 = vmatmul.mubr.msk.f32.gmra.mrb[210].mxu1 %vm304_vm0, %v8359_v24  ;;  %v8361_v27 = vmax.f32 %v8345_v50, 0.0 }
0x18e8   :  { %v8360_v26 = vmax.f32 %v8344_v19, 0.0  ;;  %v8300_v18 = vadd.f32 %v17401_v5, %v8299_v12 }
0x18e9   :  { %v8347_v2 = vadd.f32 %v8305_v45, %v18149_v14 }
0x18ea   :  { %v8346_v16 = vadd.f32 %v8300_v18, %v18150_v59  ;;  %v10697_v9 = vpop.f32.mrb[218].mxu0  ;;  %10721 = vmatprep.mubr.msk.f32.mxu1 %vm304_vm0, %v8360_v26 }
0x18eb   :  { %v8315_v42 = vadd.f32 %v10697_v9, %v17401_v5  ;;  %v8309_v10 = vpop.f32.mrb[219].mxu0  ;;  %10722 = vmatmul.mubr.msk.f32.gmra.mrb[212].mxu1 %vm304_vm0, %v8361_v27  ;;  %v8363_v17 = vmax.f32 %v8347_v2, 0.0 }
0x18ec   :  { %v8362_v51 = vmax.f32 %v8346_v16, 0.0  ;;  %v8310_v6 = vadd.f32 %v17401_v5, %v8309_v10 }
0x18ed   :  { %v8349_v20 = vadd.f32 %v8315_v42, %v18151_v31 }
0x18ee   :  { %v8348_v29 = vadd.f32 %v8310_v6, %v18152_v25  ;;  %v10700_v32 = vpop.f32.mrb[220].mxu0  ;;  %10724 = vmatprep.mubr.msk.f32.mxu1 %vm304_vm0, %v8362_v51 }
0x18ef   :  { %v8325_v7 = vadd.f32 %v10700_v32, %v17401_v5  ;;  %v8319_v23 = vpop.f32.mrb[221].mxu0  ;;  %10725 = vmatmul.mubr.msk.f32.gmra.mrb[214].mxu1 %vm304_vm0, %v8363_v17  ;;  %v8365_v41 = vmax.f32 %v8349_v20, 0.0 }
0x18f0   :  { %v8364_v11 = vmax.f32 %v8348_v29, 0.0  ;;  %v8320_v39 = vadd.f32 %v17401_v5, %v8319_v23 }
0x18f1   :  { %v8351_v34 = vadd.f32 %v8325_v7, %v18153_v55 }
0x18f2   :  { %v8350_v30 = vadd.f32 %v8320_v39, %v18154_v43  ;;  %v10703_v60 = vpop.f32.mrb[222].mxu0  ;;  %10727 = vmatprep.mubr.msk.f32.mxu1 %vm304_vm0, %v8364_v11 }
0x18f3   :  { %v8335_v4 = vadd.f32 %v10703_v60, %v17401_v5  ;;  %v8329_v62 = vpop.f32.mrb[223].mxu0  ;;  %10728 = vmatmul.mubr.msk.f32.gmra.mrb[216].mxu1 %vm304_vm0, %v8365_v41  ;;  %v8367_v54 = vmax.f32 %v8351_v34, 0.0 }
0x18f4   :  { %v8366_v38 = vmax.f32 %v8350_v30, 0.0  ;;  %v8330_v8 = vadd.f32 %v17401_v5, %v8329_v62 }
0x18f5   :  { %v8353_v48 = vadd.f32 %v8335_v4, %v18155_v3 }
0x18f6   :  { %v8352_v0 = vadd.f32 %v8330_v8, %v18156_v40  ;;  %10730 = vmatprep.mubr.msk.f32.mxu1 %vm304_vm0, %v8366_v38 }
0x18f7   :  { %10731 = vmatmul.mubr.msk.f32.gmra.mrb[218].mxu1 %vm304_vm0, %v8367_v54  ;;  %v8369_v61 = vmax.f32 %v8353_v48, 0.0 }
0x18f8   :  { %v8368_v37 = vmax.f32 %v8352_v0, 0.0 }
0x18fa   :  { %10733 = vmatprep.mubr.msk.f32.mxu1 %vm304_vm0, %v8368_v37 }
0x18fb   :  { %10734 = vmatmul.mubr.msk.f32.gmra.mrb[220].mxu1 %vm304_vm0, %v8369_v61 }
0x19b2   :  { %v10714_v5 = vpop.f32.mrb[224].mxu0 }
0x19b3   :  { %v8501_v46 = vadd.f32 %v10714_v5, %v8995_v47  ;;  %v8495_v13 = vpop.f32.mrb[225].mxu0 }
0x19b4   :  { %v8496_v52 = vadd.f32 %v8995_v47, %v8495_v13 }
0x19b5   :  { %8575 = vst [vmem:[%s17517_s15 + $0x8] sm:$0xff] %v8501_v46 }
0x19b6   :  { %8574 = vst [vmem:[%s17517_s15] sm:$0xff] %v8496_v52  ;;  %v10717_v21 = vpop.f32.mrb[208].mxu1 }
0x19b7   :  { %v8511_v35 = vadd.f32 %v10717_v21, %v8995_v47  ;;  %v8505_v49 = vpop.f32.mrb[209].mxu1 }
0x19b8   :  { %v8506_v22 = vadd.f32 %v8995_v47, %v8505_v49 }
0x19b9   :  { %8577 = vst [vmem:[%s17517_s15 + $0x18] sm:$0xff] %v8511_v35 }
0x19ba   :  { %8576 = vst [vmem:[%s17517_s15 + $0x10] sm:$0xff] %v8506_v22  ;;  %v10720_v57 = vpop.f32.mrb[210].mxu1 }
0x19bb   :  { %v8521_v56 = vadd.f32 %v10720_v57, %v8995_v47  ;;  %v8515_v63 = vpop.f32.mrb[211].mxu1 }
0x19bc   :  { %v8516_v33 = vadd.f32 %v8995_v47, %v8515_v63 }
0x19bd   :  { %8579 = vst [vmem:[%s17517_s15 + $0x28] sm:$0xff] %v8521_v56 }
0x19be   :  { %8578 = vst [vmem:[%s17517_s15 + $0x20] sm:$0xff] %v8516_v33  ;;  %v10723_v53 = vpop.f32.mrb[212].mxu1 }
0x19bf   :  { %v8531_v36 = vadd.f32 %v10723_v53, %v8995_v47  ;;  %v8525_v28 = vpop.f32.mrb[213].mxu1 }
0x19c0   :  { %v8526_v44 = vadd.f32 %v8995_v47, %v8525_v28 }
0x19c1   :  { %8581 = vst [vmem:[%s17517_s15 + $0x38] sm:$0xff] %v8531_v36 }
0x19c2   :  { %8580 = vst [vmem:[%s17517_s15 + $0x30] sm:$0xff] %v8526_v44  ;;  %v10726_v24 = vpop.f32.mrb[214].mxu1 }
0x19c3   :  { %v8541_v1 = vadd.f32 %v10726_v24, %v8995_v47  ;;  %v8535_v50 = vpop.f32.mrb[215].mxu1 }
0x19c4   :  { %v8536_v58 = vadd.f32 %v8995_v47, %v8535_v50 }
0x19c5   :  { %8583 = vst [vmem:[%s17517_s15 + $0x48] sm:$0xff] %v8541_v1 }
0x19c6   :  { %8582 = vst [vmem:[%s17517_s15 + $0x40] sm:$0xff] %v8536_v58  ;;  %v10729_v19 = vpop.f32.mrb[216].mxu1 }
0x19c7   :  { %v8551_v15 = vadd.f32 %v10729_v19, %v8995_v47  ;;  %v8545_v45 = vpop.f32.mrb[217].mxu1 }
0x19c8   :  { %v8546_v12 = vadd.f32 %v8995_v47, %v8545_v45 }
0x19c9   :  { %8585 = vst [vmem:[%s17517_s15 + $0x58] sm:$0xff] %v8551_v15 }
0x19ca   :  { %8584 = vst [vmem:[%s17517_s15 + $0x50] sm:$0xff] %v8546_v12  ;;  %v10732_v26 = vpop.f32.mrb[218].mxu1 }
0x19cb   :  { %v8561_v18 = vadd.f32 %v10732_v26, %v8995_v47  ;;  %v8555_v27 = vpop.f32.mrb[219].mxu1 }
0x19cc   :  { %v8556_v14 = vadd.f32 %v8995_v47, %v8555_v27 }
0x19cd   :  { %8587 = vst [vmem:[%s17517_s15 + $0x68] sm:$0xff] %v8561_v18 }
0x19ce   :  { %8586 = vst [vmem:[%s17517_s15 + $0x60] sm:$0xff] %v8556_v14  ;;  %v10735_v2 = vpop.f32.mrb[220].mxu1 }
0x19cf   :  { %v8571_v59 = vadd.f32 %v10735_v2, %v8995_v47  ;;  %v8565_v16 = vpop.f32.mrb[221].mxu1 }
0x19d0   :  { %v8566_v9 = vadd.f32 %v8995_v47, %v8565_v16 }
0x19d1   :  { %8589 = vst [vmem:[%s17517_s15 + $0x78] sm:$0xff] %v8571_v59 }
0x19d2   :  { %8588 = vst [vmem:[%s17517_s15 + $0x70] sm:$0xff] %v8566_v9 }

</bundles_post_ra>
